<compile_context>
chip_gen: v5e
topology: v5e:2x2
jax: 0.10.0
libtpu: 0.0.40
codegen_flags: <defaults>
</compile_context>

<pallas_src>
import numpy as np
import jax
import jax.numpy as jnp
from jax.experimental import pallas as pl
from jax.experimental.pallas import tpu as pltpu

LEAKY_SLOPE = 0.2
BN_EPS = 1e-5
CP = 128                       # hidden channels padded to one lane width (num_hiddens <= 128)
LEAD1, LEAD2, LEAD3 = 32, 16, 8  # leading zero rows per resolution level (lead_l = 2*lead_{l+1})


def _leaky(y):
    return jnp.where(y >= 0, y, LEAKY_SLOPE * y)


def _round_up(x, m):
    return (x + m - 1) // m * m


# ----------------------------------------------------------------------------
# Mega-kernel: whole ConvNormRelu stack for one batch block, VMEM resident
# ----------------------------------------------------------------------------
def _make_encoder_kernel(B, T1, L, CIP):
    T2, T3 = T1 // 2, T1 // 4
    S1, S2, S3 = T1 + LEAD1, T2 + LEAD2, T3 + LEAD3     # per-sample strides (S_in = 2*S_out)
    M1 = (B - 1) * S1 + T1                               # slab rows covering all B samples
    M2 = (B - 1) * S2 + T2
    M3 = (B - 1) * S3 + T3
    ROWS = LEAD1 + B * S1                                 # ping-pong buffer rows

    def kernel(h_ref, wp_ref, bp_ref, we_ref, be_ref, wd_ref, bd_ref,
               o_ref, buf_a, buf_b, tmp):
        bufs = (buf_a, buf_b)

        # Leading halo rows of both ping-pong buffers: zero once per grid step.
        zlead = jnp.zeros((LEAD1, CP), jnp.bfloat16)
        buf_a[pl.ds(0, LEAD1), :] = zlead
        buf_b[pl.ds(0, LEAD1), :] = zlead

        def store_slab(dst, lead, stride, t_len, m, y):
            # one aligned store of the whole batched slab ...
            dst[pl.ds(lead, m), :] = y.astype(jnp.bfloat16)
            # ... then re-zero the gap rows so they keep acting as conv zero-padding
            gap = stride - t_len
            zgap = jnp.zeros((gap, CP), jnp.bfloat16)
            for b in range(B):
                dst[pl.ds(lead + b * stride + t_len, gap), :] = zgap

        # ---- project: Conv1d(768->H, k=3, s=1, p=1) + BN + LeakyReLU (batched slab) ----
        acc = jnp.dot(h_ref[pl.ds(LEAD1 - 1, M1), :], wp_ref[0],
                      preferred_element_type=jnp.float32)
        for j in (1, 2):
            acc = acc + jnp.dot(h_ref[pl.ds(LEAD1 - 1 + j, M1), :], wp_ref[j],
                                preferred_element_type=jnp.float32)
        store_slab(buf_a, LEAD1, S1, T1, M1, _leaky(acc + bp_ref[...]))
        cur = 0

        def enc_layer(idx, lead, stride, t_len, m, cur):
            # k=3, s=1, identity residual; per-tap MXU accumulation over the slab
            src, dst = bufs[cur], bufs[1 - cur]
            acc = jnp.dot(src[pl.ds(lead - 1, m), :], we_ref[idx, 0],
                          preferred_element_type=jnp.float32)
            for j in (1, 2):
                acc = acc + jnp.dot(src[pl.ds(lead - 1 + j, m), :], we_ref[idx, j],
                                    preferred_element_type=jnp.float32)
            res = src[pl.ds(lead, m), :].astype(jnp.float32)
            store_slab(dst, lead, stride, t_len, m, _leaky(acc + be_ref[idx] + res))
            return 1 - cur

        def down_layer(idx, lead_in, lead_out, s_out, t_out, m_in, m_out, cur):
            # k=4, s=2, residual projection folded into the weights.  Evaluate the conv
            # at stride 1 over the slab (stride-1 bf16 taps), stage in f32 scratch, then
            # subsample with a single strided f32 read.
            src, dst = bufs[cur], bufs[1 - cur]
            acc = jnp.dot(src[pl.ds(lead_in - 1, m_in), :], wd_ref[idx, 0],
                          preferred_element_type=jnp.float32)
            for j in (1, 2, 3):
                acc = acc + jnp.dot(src[pl.ds(lead_in - 1 + j, m_in), :], wd_ref[idx, j],
                                    preferred_element_type=jnp.float32)
            tmp[pl.ds(0, m_in), :] = acc
            z = tmp[pl.ds(0, m_out, stride=2), :]      # rows 0,2,4,... are the stride-2 outputs
            store_slab(dst, lead_out, s_out, t_out, m_out, _leaky(z + bd_ref[idx]))
            return 1 - cur

        for l in range(L):
            cur = enc_layer(l, LEAD1, S1, T1, M1, cur)
        cur = down_layer(0, LEAD1, LEAD2, S2, T2, M1, M2, cur)
        for l in range(L):
            cur = enc_layer(L + l, LEAD2, S2, T2, M2, cur)
        cur = down_layer(1, LEAD2, LEAD3, S3, T3, M2, M3, cur)
        for l in range(L):
            cur = enc_layer(2 * L + l, LEAD3, S3, T3, M3, cur)

        # unpack the per-sample level-3 activations into the lane-dense output block
        src = bufs[cur]
        for b in range(B):
            o_ref[b] = src[pl.ds(LEAD3 + b * S3, T3), :].astype(jnp.float32)

    return kernel, ROWS, M1


# ----------------------------------------------------------------------------
# Host-side weight folding (Conv + BN(eval) [+ residual proj] -> per-tap matmul)
# ----------------------------------------------------------------------------
def _fold_block(blk, k, c_in_pad, c_out_pad):
    w, b = blk["conv"]["w"], blk["conv"]["b"]                  # (Cout, Cin, k), (Cout,)
    c_out, c_in, _ = w.shape
    scale = blk["bn"]["gamma"] / jnp.sqrt(blk["bn"]["var"] + BN_EPS)
    wf = jnp.transpose(w, (2, 1, 0)) * scale[None, None, :]    # (k, Cin, Cout)
    bias = blk["bn"]["beta"] + scale * (b - blk["bn"]["mean"])
    if "res" in blk:                                           # fuse parallel residual conv
        wf = wf + jnp.transpose(blk["res"]["w"], (2, 1, 0))
        bias = bias + blk["res"]["b"]
    wf = jnp.pad(wf, ((0, 0), (0, c_in_pad - c_in), (0, c_out_pad - c_out)))
    bias = jnp.pad(bias, (0, c_out_pad - c_out))
    return wf, bias.reshape(1, c_out_pad)                      # (k, Cin_p, Cout_p), (1, Cout_p)


def _choose_batch_block(N, T1):
    b = max(1, min(8, 512 // max(T1, 1), N))   # target ~512 slab rows at level 1
    if N >= 4:                                  # keep >=2 grid steps so v7x megacore has work
        b = min(b, max(1, N // 2))
    return b


def wav2vec_encoder_forward(h_ncw, params):
    """h_ncw: (N, 768, T) = wav2vec2 last_hidden_state.transpose(1,2) -> (N, H, T//4)."""
    N, C_in, T = h_ncw.shape
    assert T % 4 == 0, "time length must be divisible by 4 (two stride-2 downsamples)"
    L = len(params["enc1"])
    num_hiddens = params["project"]["conv"]["w"].shape[0]
    assert num_hiddens <= CP
    CIP = _round_up(C_in, 128)

    B_BLK = _choose_batch_block(N, T)
    Npad = _round_up(N, B_BLK)
    G = Npad // B_BLK
    T3 = T // 4
    S1 = T + LEAD1

    kernel, ROWS, M1 = _make_encoder_kernel(B_BLK, T, L, CIP)

    # --- pack the input into the kernel's "long sequence with zero gaps" layout ---
    h = jnp.transpose(h_ncw, (0, 2, 1))                                   # (N, T, C)
    h = jnp.pad(h, ((0, Npad - N), (0, S1 - T), (0, CIP - C_in)))         # zero gaps = conv pad
    h = h.reshape(G, B_BLK * S1, CIP)
    h = jnp.pad(h, ((0, 0), (LEAD1, 0), (0, 0))).astype(jnp.bfloat16)     # (G, ROWS, CIP)

    # --- fold BN(eval) (+ residual-projection conv) into per-tap weights/bias ---
    wp, bp = _fold_block(params["project"], 3, CIP, CP)
    wp = wp.astype(jnp.bfloat16)

    enc_blocks = list(params["enc1"]) + list(params["enc2"]) + list(params["enc3"])
    if enc_blocks:
        we_l, be_l = zip(*[_fold_block(b, 3, CP, CP) for b in enc_blocks])
        we = jnp.stack(we_l).astype(jnp.bfloat16)
        be = jnp.stack(be_l)
    else:  # num_residual_layers == 0 (unused dummies)
        we = jnp.zeros((1, 3, CP, CP), jnp.bfloat16)
        be = jnp.zeros((1, 1, CP), jnp.float32)

    wd_l, bd_l = zip(*[_fold_block(params[n], 4, CP, CP) for n in ("down1", "down2")])
    wd = jnp.stack(wd_l).astype(jnp.bfloat16)
    bd = jnp.stack(bd_l)
    NE = we.shape[0]

    # --- explicit VMEM budget (keeps the same kernel inside v7x's 64 MiB) ---
    est = (2 * ROWS * CIP * 2 +                               # double-buffered packed input
           2 * B_BLK * T3 * CP * 4 +                          # double-buffered output block
           2 * 2 * (3 * CIP + NE * 3 * CP + 8 * CP) * CP +    # weight stacks (bf16)
           2 * ROWS * CP * 2 + M1 * CP * 4 +                  # ping-pong + down staging scratch
           8 * M1 * CP * 4)                                   # headroom for compiler temps
    vmem_limit = int(min(max(est * 3 // 2, 32 * 1024 * 1024), 64 * 1024 * 1024))

    out = pl.pallas_call(
        kernel,
        out_shape=jax.ShapeDtypeStruct((Npad, T3, CP), jnp.float32),
        grid_spec=pltpu.PrefetchScalarGridSpec(
            num_scalar_prefetch=0,
            grid=(G,),
            in_specs=[
                pl.BlockSpec((None, ROWS, CIP), lambda g: (g, 0, 0)),     # packed input
                pl.BlockSpec((3, CIP, CP), lambda g: (0, 0, 0)),          # project W (per tap)
                pl.BlockSpec((1, CP), lambda g: (0, 0)),                  # project bias
                pl.BlockSpec((NE, 3, CP, CP), lambda g: (0, 0, 0, 0)),    # enc W (per tap)
                pl.BlockSpec((NE, 1, CP), lambda g: (0, 0, 0)),           # enc biases
                pl.BlockSpec((2, 4, CP, CP), lambda g: (0, 0, 0, 0)),     # down W (per tap)
                pl.BlockSpec((2, 1, CP), lambda g: (0, 0, 0)),            # down biases
            ],
            out_specs=pl.BlockSpec((B_BLK, T3, CP), lambda g: (g, 0, 0)),
            scratch_shapes=[pltpu.VMEM((ROWS, CP), jnp.bfloat16),
                            pltpu.VMEM((ROWS, CP), jnp.bfloat16),
                            pltpu.VMEM((M1, CP), jnp.float32)],
        ),
        compiler_params=pltpu.CompilerParams(
            dimension_semantics=("parallel",),
            vmem_limit_bytes=vmem_limit),
    )(h, wp, bp, we, be, wd, bd)

    return jnp.transpose(out[:N, :, :num_hiddens], (0, 2, 1))


encoder_forward = jax.jit(wav2vec_encoder_forward)


# ----------------------------------------------------------------------------
# Deterministic parameter init (shapes follow the assumed PyTorch module)
# ----------------------------------------------------------------------------
def _conv_params(key, c_in, c_out, k):
    k1, k2 = jax.random.split(key)
    w = jax.random.normal(k1, (c_out, c_in, k), jnp.float32) / np.sqrt(c_in * k)
    b = 0.1 * jax.random.normal(k2, (c_out,), jnp.float32)
    return {"w": w, "b": b}


def _bn_params(key, c):
    k1, k2, k3, k4 = jax.random.split(key, 4)
    return {"gamma": 1.0 + 0.1 * jax.random.normal(k1, (c,), jnp.float32),
            "beta": 0.1 * jax.random.normal(k2, (c,), jnp.float32),
            "mean": 0.1 * jax.random.normal(k3, (c,), jnp.float32),
            "var": 1.0 + 0.5 * jax.random.uniform(k4, (c,), jnp.float32)}


def init_wav2vec_encoder_params(key, in_dim, num_hiddens, num_res_layers):
    keys = iter(jax.random.split(key, 64))

    def cnr(cin, cout, k, res_proj=False):
        d = {"conv": _conv_params(next(keys), cin, cout, k),
             "bn": _bn_params(next(keys), cout)}
        if res_proj:
            d["res"] = _conv_params(next(keys), cin, cout, k)
        return d

    H = num_hiddens
    return {
        "project": cnr(in_dim, H, 3),
        "enc1": [cnr(H, H, 3) for _ in range(num_res_layers)],
        "down1": cnr(H, H, 4, res_proj=True),
        "enc2": [cnr(H, H, 3) for _ in range(num_res_layers)],
        "down2": cnr(H, H, 4, res_proj=True),
        "enc3": [cnr(H, H, 3) for _ in range(num_res_layers)],
    }


# ----------------------------------------------------------------------------
# Pure-JAX f32 reference for verification
# ----------------------------------------------------------------------------
def _conv1d_ref(x, w, b, stride, pad):
    y = jax.lax.conv_general_dilated(x, w, (stride,), [(pad, pad)],
                                     dimension_numbers=("NCH", "OIH", "NCH"))
    return y + b[None, :, None]


def _bn_ref(x, bn):
    s = bn["gamma"] / jnp.sqrt(bn["var"] + BN_EPS)
    return s[None, :, None] * (x - bn["mean"][None, :, None]) + bn["beta"][None, :, None]


def _cnr_ref(x, p, k, stride, residual=False):
    out = _bn_ref(_conv1d_ref(x, p["conv"]["w"], p["conv"]["b"], stride, 1), p["bn"])
    if residual and "res" in p:
        out = out + _conv1d_ref(x, p["res"]["w"], p["res"]["b"], stride, 1)
    elif residual:
        out = out + x
    return jnp.where(out >= 0, out, LEAKY_SLOPE * out)


def wav2vec_encoder_ref(h, params):
    x = _cnr_ref(h, params["project"], 3, 1)
    for blk in params["enc1"]:
        x = _cnr_ref(x, blk, 3, 1, residual=True)
    x = _cnr_ref(x, params["down1"], 4, 2, residual=True)
    for blk in params["enc2"]:
        x = _cnr_ref(x, blk, 3, 1, residual=True)
    x = _cnr_ref(x, params["down2"], 4, 2, residual=True)
    for blk in params["enc3"]:
        x = _cnr_ref(x, blk, 3, 1, residual=True)
    return x


if __name__ == "__main__":
    key = jax.random.PRNGKey(0)
    kp, kx = jax.random.split(key)

    N, C_in, T = 2, 768, 64            # wav2vec2-base hidden size is 768
    num_hiddens, num_res_layers = 64, 2

    params = init_wav2vec_encoder_params(kp, C_in, num_hiddens, num_res_layers)
    # Stand-in for audio_encoder(x).last_hidden_state.transpose(1, 2)  (pretrained
    # wav2vec2 is not translated -- see TODO at top).
    h = jax.random.normal(kx, (N, C_in, T), jnp.float32)

    out = jax.block_until_ready(encoder_forward(h, params))
    ref = jax.block_until_ready(wav2vec_encoder_ref(h, params))

    assert out.shape == (N, num_hiddens, T // 4), out.shape
    err = float(jnp.max(jnp.abs(out - ref)))
    scl = float(jnp.max(jnp.abs(ref))) + 1e-6
    if err > 5e-2 * scl:
        raise AssertionError(f"kernel/reference mismatch: max|err|={err}, ref scale={scl}")
    print("KERNEL_OK")
</pallas_src>

<mosaic_0001>
module attributes {stable_mosaic.version = 11 : i64} {
  func.func @kernel(%arg0: i32, %arg1: memref<1x224x768xbf16, #tpu.memory_space<vmem>>, %arg2: memref<3x768x128xbf16, #tpu.memory_space<vmem>>, %arg3: memref<1x128xf32, #tpu.memory_space<vmem>>, %arg4: memref<6x3x128x128xbf16, #tpu.memory_space<vmem>>, %arg5: memref<6x1x128xf32, #tpu.memory_space<vmem>>, %arg6: memref<2x4x128x128xbf16, #tpu.memory_space<vmem>>, %arg7: memref<2x1x128xf32, #tpu.memory_space<vmem>>, %arg8: memref<2x16x128xf32, #tpu.memory_space<vmem>>, %arg9: memref<224x128xbf16, #tpu.memory_space<vmem>>, %arg10: memref<224x128xbf16, #tpu.memory_space<vmem>>, %arg11: memref<160x128xf32, #tpu.memory_space<vmem>>) attributes {dimension_semantics = [#tpu.dimension_semantics<parallel>], iteration_bounds = array<i64: 1>, scalar_prefetch = 0 : i64, scratch_operands = 3 : i64, tpu.core_type = #tpu.core_type<tc>, window_params = [{transform_indices = @transform_0, window_bounds = array<i64: 1, 224, 768>}, {pipeline_mode = #tpu.pipeline_mode<synchronous>, transform_indices = @transform_1, window_bounds = array<i64: 3, 768, 128>}, {pipeline_mode = #tpu.pipeline_mode<synchronous>, transform_indices = @transform_2, window_bounds = array<i64: 1, 128>}, {pipeline_mode = #tpu.pipeline_mode<synchronous>, transform_indices = @transform_3, window_bounds = array<i64: 6, 3, 128, 128>}, {pipeline_mode = #tpu.pipeline_mode<synchronous>, transform_indices = @transform_4, window_bounds = array<i64: 6, 1, 128>}, {pipeline_mode = #tpu.pipeline_mode<synchronous>, transform_indices = @transform_5, window_bounds = array<i64: 2, 4, 128, 128>}, {pipeline_mode = #tpu.pipeline_mode<synchronous>, transform_indices = @transform_6, window_bounds = array<i64: 2, 1, 128>}, {transform_indices = @transform_7, window_bounds = array<i64: 2, 16, 128>}]} {
    %cst = arith.constant 0.000000e+00 : bf16
    %0 = vector.broadcast %cst : bf16 to vector<32x128xbf16>
    %c0 = arith.constant 0 : index
    %c0_0 = arith.constant 0 : index
    %1 = vector.load %arg9[%c0, %c0_0] : memref<224x128xbf16, #tpu.memory_space<vmem>>, vector<32x128xbf16>
    tpu.vector_store %arg9[%c0, %c0_0], %0 {strides = array<i32>} : memref<224x128xbf16, #tpu.memory_space<vmem>>, vector<32x128xbf16>,
    %c0_1 = arith.constant 0 : index
    %c0_2 = arith.constant 0 : index
    %2 = vector.load %arg10[%c0_1, %c0_2] : memref<224x128xbf16, #tpu.memory_space<vmem>>, vector<32x128xbf16>
    tpu.vector_store %arg10[%c0_1, %c0_2], %0 {strides = array<i32>} : memref<224x128xbf16, #tpu.memory_space<vmem>>, vector<32x128xbf16>,
    %c0_3 = arith.constant 0 : index
    %c31 = arith.constant 31 : index
    %c0_4 = arith.constant 0 : index
    %3 = vector.load %arg1[%c0_3, %c31, %c0_4] : memref<1x224x768xbf16, #tpu.memory_space<vmem>>, vector<1x160x768xbf16>
    %4 = vector.shape_cast %3 : vector<1x160x768xbf16> to vector<160x768xbf16>
    %c0_5 = arith.constant 0 : index
    %c0_6 = arith.constant 0 : index
    %c0_7 = arith.constant 0 : index
    %5 = vector.load %arg2[%c0_5, %c0_6, %c0_7] : memref<3x768x128xbf16, #tpu.memory_space<vmem>>, vector<1x768x128xbf16>
    %6 = vector.shape_cast %5 : vector<1x768x128xbf16> to vector<768x128xbf16>
    %cst_8 = arith.constant dense<0.000000e+00> : vector<160x128xf32>
    %7 = tpu.matmul %4, %6, %cst_8 {dimension_numbers = #tpu.dot_dimension_numbers<[1], [0], [0], [1], [0, 0, 1, 1], [], []>} : vector<160x768xbf16>, vector<768x128xbf16>, vector<160x128xf32> -> vector<160x128xf32>
    %c0_9 = arith.constant 0 : index
    %c32 = arith.constant 32 : index
    %c0_10 = arith.constant 0 : index
    %8 = vector.load %arg1[%c0_9, %c32, %c0_10] : memref<1x224x768xbf16, #tpu.memory_space<vmem>>, vector<1x160x768xbf16>
    %9 = vector.shape_cast %8 : vector<1x160x768xbf16> to vector<160x768xbf16>
    %c1 = arith.constant 1 : index
    %c0_11 = arith.constant 0 : index
    %c0_12 = arith.constant 0 : index
    %10 = vector.load %arg2[%c1, %c0_11, %c0_12] : memref<3x768x128xbf16, #tpu.memory_space<vmem>>, vector<1x768x128xbf16>
    %11 = vector.shape_cast %10 : vector<1x768x128xbf16> to vector<768x128xbf16>
    %cst_13 = arith.constant dense<0.000000e+00> : vector<160x128xf32>
    %12 = tpu.matmul %9, %11, %cst_13 {dimension_numbers = #tpu.dot_dimension_numbers<[1], [0], [0], [1], [0, 0, 1, 1], [], []>} : vector<160x768xbf16>, vector<768x128xbf16>, vector<160x128xf32> -> vector<160x128xf32>
    %13 = arith.addf %7, %12 : vector<160x128xf32>
    %c0_14 = arith.constant 0 : index
    %c33 = arith.constant 33 : index
    %c0_15 = arith.constant 0 : index
    %14 = vector.load %arg1[%c0_14, %c33, %c0_15] : memref<1x224x768xbf16, #tpu.memory_space<vmem>>, vector<1x160x768xbf16>
    %15 = vector.shape_cast %14 : vector<1x160x768xbf16> to vector<160x768xbf16>
    %c2 = arith.constant 2 : index
    %c0_16 = arith.constant 0 : index
    %c0_17 = arith.constant 0 : index
    %16 = vector.load %arg2[%c2, %c0_16, %c0_17] : memref<3x768x128xbf16, #tpu.memory_space<vmem>>, vector<1x768x128xbf16>
    %17 = vector.shape_cast %16 : vector<1x768x128xbf16> to vector<768x128xbf16>
    %cst_18 = arith.constant dense<0.000000e+00> : vector<160x128xf32>
    %18 = tpu.matmul %15, %17, %cst_18 {dimension_numbers = #tpu.dot_dimension_numbers<[1], [0], [0], [1], [0, 0, 1, 1], [], []>} : vector<160x768xbf16>, vector<768x128xbf16>, vector<160x128xf32> -> vector<160x128xf32>
    %19 = arith.addf %13, %18 : vector<160x128xf32>
    %c0_19 = arith.constant 0 : index
    %c0_20 = arith.constant 0 : index
    %20 = vector.load %arg3[%c0_19, %c0_20] : memref<1x128xf32, #tpu.memory_space<vmem>>, vector<1x128xf32>
    %21 = vector.broadcast %20 : vector<1x128xf32> to vector<160x128xf32>
    %22 = arith.addf %19, %21 : vector<160x128xf32>
    %cst_21 = arith.constant 0.000000e+00 : f32
    %23 = vector.broadcast %cst_21 : f32 to vector<160x128xf32>
    %24 = arith.cmpf oge, %22, %23 : vector<160x128xf32>
    %cst_22 = arith.constant 2.000000e-01 : f32
    %25 = vector.broadcast %cst_22 : f32 to vector<160x128xf32>
    %26 = arith.mulf %25, %22 : vector<160x128xf32>
    %27 = arith.select %24, %22, %26 : vector<160x128xi1>, vector<160x128xf32>
    %28 = arith.truncf %27 : vector<160x128xf32> to vector<160x128xbf16>
    %c32_23 = arith.constant 32 : index
    %c0_24 = arith.constant 0 : index
    %29 = vector.load %arg9[%c32_23, %c0_24] : memref<224x128xbf16, #tpu.memory_space<vmem>>, vector<160x128xbf16>
    tpu.vector_store %arg9[%c32_23, %c0_24], %28 {strides = array<i32>} : memref<224x128xbf16, #tpu.memory_space<vmem>>, vector<160x128xbf16>,
    %cst_25 = arith.constant 0.000000e+00 : bf16
    %30 = vector.broadcast %cst_25 : bf16 to vector<32x128xbf16>
    %c96 = arith.constant 96 : index
    %c0_26 = arith.constant 0 : index
    %31 = vector.load %arg9[%c96, %c0_26] : memref<224x128xbf16, #tpu.memory_space<vmem>>, vector<32x128xbf16>
    tpu.vector_store %arg9[%c96, %c0_26], %30 {strides = array<i32>} : memref<224x128xbf16, #tpu.memory_space<vmem>>, vector<32x128xbf16>,
    %c192 = arith.constant 192 : index
    %c0_27 = arith.constant 0 : index
    %32 = vector.load %arg9[%c192, %c0_27] : memref<224x128xbf16, #tpu.memory_space<vmem>>, vector<32x128xbf16>
    tpu.vector_store %arg9[%c192, %c0_27], %30 {strides = array<i32>} : memref<224x128xbf16, #tpu.memory_space<vmem>>, vector<32x128xbf16>,
    %c31_28 = arith.constant 31 : index
    %c0_29 = arith.constant 0 : index
    %33 = vector.load %arg9[%c31_28, %c0_29] : memref<224x128xbf16, #tpu.memory_space<vmem>>, vector<160x128xbf16>
    %c0_30 = arith.constant 0 : index
    %c0_31 = arith.constant 0 : index
    %c0_32 = arith.constant 0 : index
    %c0_33 = arith.constant 0 : index
    %34 = vector.load %arg4[%c0_30, %c0_31, %c0_32, %c0_33] : memref<6x3x128x128xbf16, #tpu.memory_space<vmem>>, vector<1x1x128x128xbf16>
    %35 = vector.shape_cast %34 : vector<1x1x128x128xbf16> to vector<128x128xbf16>
    %cst_34 = arith.constant dense<0.000000e+00> : vector<160x128xf32>
    %36 = tpu.matmul %33, %35, %cst_34 {dimension_numbers = #tpu.dot_dimension_numbers<[1], [0], [0], [1], [0, 0, 1, 1], [], []>} : vector<160x128xbf16>, vector<128x128xbf16>, vector<160x128xf32> -> vector<160x128xf32>
    %c32_35 = arith.constant 32 : index
    %c0_36 = arith.constant 0 : index
    %37 = vector.load %arg9[%c32_35, %c0_36] : memref<224x128xbf16, #tpu.memory_space<vmem>>, vector<160x128xbf16>
    %c0_37 = arith.constant 0 : index
    %c1_38 = arith.constant 1 : index
    %c0_39 = arith.constant 0 : index
    %c0_40 = arith.constant 0 : index
    %38 = vector.load %arg4[%c0_37, %c1_38, %c0_39, %c0_40] : memref<6x3x128x128xbf16, #tpu.memory_space<vmem>>, vector<1x1x128x128xbf16>
    %39 = vector.shape_cast %38 : vector<1x1x128x128xbf16> to vector<128x128xbf16>
    %cst_41 = arith.constant dense<0.000000e+00> : vector<160x128xf32>
    %40 = tpu.matmul %37, %39, %cst_41 {dimension_numbers = #tpu.dot_dimension_numbers<[1], [0], [0], [1], [0, 0, 1, 1], [], []>} : vector<160x128xbf16>, vector<128x128xbf16>, vector<160x128xf32> -> vector<160x128xf32>
    %41 = arith.addf %36, %40 : vector<160x128xf32>
    %c33_42 = arith.constant 33 : index
    %c0_43 = arith.constant 0 : index
    %42 = vector.load %arg9[%c33_42, %c0_43] : memref<224x128xbf16, #tpu.memory_space<vmem>>, vector<160x128xbf16>
    %c0_44 = arith.constant 0 : index
    %c2_45 = arith.constant 2 : index
    %c0_46 = arith.constant 0 : index
    %c0_47 = arith.constant 0 : index
    %43 = vector.load %arg4[%c0_44, %c2_45, %c0_46, %c0_47] : memref<6x3x128x128xbf16, #tpu.memory_space<vmem>>, vector<1x1x128x128xbf16>
    %44 = vector.shape_cast %43 : vector<1x1x128x128xbf16> to vector<128x128xbf16>
    %cst_48 = arith.constant dense<0.000000e+00> : vector<160x128xf32>
    %45 = tpu.matmul %42, %44, %cst_48 {dimension_numbers = #tpu.dot_dimension_numbers<[1], [0], [0], [1], [0, 0, 1, 1], [], []>} : vector<160x128xbf16>, vector<128x128xbf16>, vector<160x128xf32> -> vector<160x128xf32>
    %46 = arith.addf %41, %45 : vector<160x128xf32>
    %c32_49 = arith.constant 32 : index
    %c0_50 = arith.constant 0 : index
    %47 = vector.load %arg9[%c32_49, %c0_50] : memref<224x128xbf16, #tpu.memory_space<vmem>>, vector<160x128xbf16>
    %48 = arith.extf %47 : vector<160x128xbf16> to vector<160x128xf32>
    %c0_51 = arith.constant 0 : index
    %c0_52 = arith.constant 0 : index
    %c0_53 = arith.constant 0 : index
    %49 = vector.load %arg5[%c0_51, %c0_52, %c0_53] : memref<6x1x128xf32, #tpu.memory_space<vmem>>, vector<1x1x128xf32>
    %50 = vector.shape_cast %49 : vector<1x1x128xf32> to vector<1x128xf32>
    %51 = vector.broadcast %50 : vector<1x128xf32> to vector<160x128xf32>
    %52 = arith.addf %46, %51 : vector<160x128xf32>
    %53 = arith.addf %52, %48 : vector<160x128xf32>
    %cst_54 = arith.constant 0.000000e+00 : f32
    %54 = vector.broadcast %cst_54 : f32 to vector<160x128xf32>
    %55 = arith.cmpf oge, %53, %54 : vector<160x128xf32>
    %cst_55 = arith.constant 2.000000e-01 : f32
    %56 = vector.broadcast %cst_55 : f32 to vector<160x128xf32>
    %57 = arith.mulf %56, %53 : vector<160x128xf32>
    %58 = arith.select %55, %53, %57 : vector<160x128xi1>, vector<160x128xf32>
    %59 = arith.truncf %58 : vector<160x128xf32> to vector<160x128xbf16>
    %c32_56 = arith.constant 32 : index
    %c0_57 = arith.constant 0 : index
    %60 = vector.load %arg10[%c32_56, %c0_57] : memref<224x128xbf16, #tpu.memory_space<vmem>>, vector<160x128xbf16>
    tpu.vector_store %arg10[%c32_56, %c0_57], %59 {strides = array<i32>} : memref<224x128xbf16, #tpu.memory_space<vmem>>, vector<160x128xbf16>,
    %cst_58 = arith.constant 0.000000e+00 : bf16
    %61 = vector.broadcast %cst_58 : bf16 to vector<32x128xbf16>
    %c96_59 = arith.constant 96 : index
    %c0_60 = arith.constant 0 : index
    %62 = vector.load %arg10[%c96_59, %c0_60] : memref<224x128xbf16, #tpu.memory_space<vmem>>, vector<32x128xbf16>
    tpu.vector_store %arg10[%c96_59, %c0_60], %61 {strides = array<i32>} : memref<224x128xbf16, #tpu.memory_space<vmem>>, vector<32x128xbf16>,
    %c192_61 = arith.constant 192 : index
    %c0_62 = arith.constant 0 : index
    %63 = vector.load %arg10[%c192_61, %c0_62] : memref<224x128xbf16, #tpu.memory_space<vmem>>, vector<32x128xbf16>
    tpu.vector_store %arg10[%c192_61, %c0_62], %61 {strides = array<i32>} : memref<224x128xbf16, #tpu.memory_space<vmem>>, vector<32x128xbf16>,
    %c31_63 = arith.constant 31 : index
    %c0_64 = arith.constant 0 : index
    %64 = vector.load %arg10[%c31_63, %c0_64] : memref<224x128xbf16, #tpu.memory_space<vmem>>, vector<160x128xbf16>
    %c1_65 = arith.constant 1 : index
    %c0_66 = arith.constant 0 : index
    %c0_67 = arith.constant 0 : index
    %c0_68 = arith.constant 0 : index
    %65 = vector.load %arg4[%c1_65, %c0_66, %c0_67, %c0_68] : memref<6x3x128x128xbf16, #tpu.memory_space<vmem>>, vector<1x1x128x128xbf16>
    %66 = vector.shape_cast %65 : vector<1x1x128x128xbf16> to vector<128x128xbf16>
    %cst_69 = arith.constant dense<0.000000e+00> : vector<160x128xf32>
    %67 = tpu.matmul %64, %66, %cst_69 {dimension_numbers = #tpu.dot_dimension_numbers<[1], [0], [0], [1], [0, 0, 1, 1], [], []>} : vector<160x128xbf16>, vector<128x128xbf16>, vector<160x128xf32> -> vector<160x128xf32>
    %c32_70 = arith.constant 32 : index
    %c0_71 = arith.constant 0 : index
    %68 = vector.load %arg10[%c32_70, %c0_71] : memref<224x128xbf16, #tpu.memory_space<vmem>>, vector<160x128xbf16>
    %c1_72 = arith.constant 1 : index
    %c1_73 = arith.constant 1 : index
    %c0_74 = arith.constant 0 : index
    %c0_75 = arith.constant 0 : index
    %69 = vector.load %arg4[%c1_72, %c1_73, %c0_74, %c0_75] : memref<6x3x128x128xbf16, #tpu.memory_space<vmem>>, vector<1x1x128x128xbf16>
    %70 = vector.shape_cast %69 : vector<1x1x128x128xbf16> to vector<128x128xbf16>
    %cst_76 = arith.constant dense<0.000000e+00> : vector<160x128xf32>
    %71 = tpu.matmul %68, %70, %cst_76 {dimension_numbers = #tpu.dot_dimension_numbers<[1], [0], [0], [1], [0, 0, 1, 1], [], []>} : vector<160x128xbf16>, vector<128x128xbf16>, vector<160x128xf32> -> vector<160x128xf32>
    %72 = arith.addf %67, %71 : vector<160x128xf32>
    %c33_77 = arith.constant 33 : index
    %c0_78 = arith.constant 0 : index
    %73 = vector.load %arg10[%c33_77, %c0_78] : memref<224x128xbf16, #tpu.memory_space<vmem>>, vector<160x128xbf16>
    %c1_79 = arith.constant 1 : index
    %c2_80 = arith.constant 2 : index
    %c0_81 = arith.constant 0 : index
    %c0_82 = arith.constant 0 : index
    %74 = vector.load %arg4[%c1_79, %c2_80, %c0_81, %c0_82] : memref<6x3x128x128xbf16, #tpu.memory_space<vmem>>, vector<1x1x128x128xbf16>
    %75 = vector.shape_cast %74 : vector<1x1x128x128xbf16> to vector<128x128xbf16>
    %cst_83 = arith.constant dense<0.000000e+00> : vector<160x128xf32>
    %76 = tpu.matmul %73, %75, %cst_83 {dimension_numbers = #tpu.dot_dimension_numbers<[1], [0], [0], [1], [0, 0, 1, 1], [], []>} : vector<160x128xbf16>, vector<128x128xbf16>, vector<160x128xf32> -> vector<160x128xf32>
    %77 = arith.addf %72, %76 : vector<160x128xf32>
    %c32_84 = arith.constant 32 : index
    %c0_85 = arith.constant 0 : index
    %78 = vector.load %arg10[%c32_84, %c0_85] : memref<224x128xbf16, #tpu.memory_space<vmem>>, vector<160x128xbf16>
    %79 = arith.extf %78 : vector<160x128xbf16> to vector<160x128xf32>
    %c1_86 = arith.constant 1 : index
    %c0_87 = arith.constant 0 : index
    %c0_88 = arith.constant 0 : index
    %80 = vector.load %arg5[%c1_86, %c0_87, %c0_88] : memref<6x1x128xf32, #tpu.memory_space<vmem>>, vector<1x1x128xf32>
    %81 = vector.shape_cast %80 : vector<1x1x128xf32> to vector<1x128xf32>
    %82 = vector.broadcast %81 : vector<1x128xf32> to vector<160x128xf32>
    %83 = arith.addf %77, %82 : vector<160x128xf32>
    %84 = arith.addf %83, %79 : vector<160x128xf32>
    %cst_89 = arith.constant 0.000000e+00 : f32
    %85 = vector.broadcast %cst_89 : f32 to vector<160x128xf32>
    %86 = arith.cmpf oge, %84, %85 : vector<160x128xf32>
    %cst_90 = arith.constant 2.000000e-01 : f32
    %87 = vector.broadcast %cst_90 : f32 to vector<160x128xf32>
    %88 = arith.mulf %87, %84 : vector<160x128xf32>
    %89 = arith.select %86, %84, %88 : vector<160x128xi1>, vector<160x128xf32>
    %90 = arith.truncf %89 : vector<160x128xf32> to vector<160x128xbf16>
    %c32_91 = arith.constant 32 : index
    %c0_92 = arith.constant 0 : index
    %91 = vector.load %arg9[%c32_91, %c0_92] : memref<224x128xbf16, #tpu.memory_space<vmem>>, vector<160x128xbf16>
    tpu.vector_store %arg9[%c32_91, %c0_92], %90 {strides = array<i32>} : memref<224x128xbf16, #tpu.memory_space<vmem>>, vector<160x128xbf16>,
    %cst_93 = arith.constant 0.000000e+00 : bf16
    %92 = vector.broadcast %cst_93 : bf16 to vector<32x128xbf16>
    %c96_94 = arith.constant 96 : index
    %c0_95 = arith.constant 0 : index
    %93 = vector.load %arg9[%c96_94, %c0_95] : memref<224x128xbf16, #tpu.memory_space<vmem>>, vector<32x128xbf16>
    tpu.vector_store %arg9[%c96_94, %c0_95], %92 {strides = array<i32>} : memref<224x128xbf16, #tpu.memory_space<vmem>>, vector<32x128xbf16>,
    %c192_96 = arith.constant 192 : index
    %c0_97 = arith.constant 0 : index
    %94 = vector.load %arg9[%c192_96, %c0_97] : memref<224x128xbf16, #tpu.memory_space<vmem>>, vector<32x128xbf16>
    tpu.vector_store %arg9[%c192_96, %c0_97], %92 {strides = array<i32>} : memref<224x128xbf16, #tpu.memory_space<vmem>>, vector<32x128xbf16>,
    %c31_98 = arith.constant 31 : index
    %c0_99 = arith.constant 0 : index
    %95 = vector.load %arg9[%c31_98, %c0_99] : memref<224x128xbf16, #tpu.memory_space<vmem>>, vector<160x128xbf16>
    %c0_100 = arith.constant 0 : index
    %c0_101 = arith.constant 0 : index
    %c0_102 = arith.constant 0 : index
    %c0_103 = arith.constant 0 : index
    %96 = vector.load %arg6[%c0_100, %c0_101, %c0_102, %c0_103] : memref<2x4x128x128xbf16, #tpu.memory_space<vmem>>, vector<1x1x128x128xbf16>
    %97 = vector.shape_cast %96 : vector<1x1x128x128xbf16> to vector<128x128xbf16>
    %cst_104 = arith.constant dense<0.000000e+00> : vector<160x128xf32>
    %98 = tpu.matmul %95, %97, %cst_104 {dimension_numbers = #tpu.dot_dimension_numbers<[1], [0], [0], [1], [0, 0, 1, 1], [], []>} : vector<160x128xbf16>, vector<128x128xbf16>, vector<160x128xf32> -> vector<160x128xf32>
    %c32_105 = arith.constant 32 : index
    %c0_106 = arith.constant 0 : index
    %99 = vector.load %arg9[%c32_105, %c0_106] : memref<224x128xbf16, #tpu.memory_space<vmem>>, vector<160x128xbf16>
    %c0_107 = arith.constant 0 : index
    %c1_108 = arith.constant 1 : index
    %c0_109 = arith.constant 0 : index
    %c0_110 = arith.constant 0 : index
    %100 = vector.load %arg6[%c0_107, %c1_108, %c0_109, %c0_110] : memref<2x4x128x128xbf16, #tpu.memory_space<vmem>>, vector<1x1x128x128xbf16>
    %101 = vector.shape_cast %100 : vector<1x1x128x128xbf16> to vector<128x128xbf16>
    %cst_111 = arith.constant dense<0.000000e+00> : vector<160x128xf32>
    %102 = tpu.matmul %99, %101, %cst_111 {dimension_numbers = #tpu.dot_dimension_numbers<[1], [0], [0], [1], [0, 0, 1, 1], [], []>} : vector<160x128xbf16>, vector<128x128xbf16>, vector<160x128xf32> -> vector<160x128xf32>
    %103 = arith.addf %98, %102 : vector<160x128xf32>
    %c33_112 = arith.constant 33 : index
    %c0_113 = arith.constant 0 : index
    %104 = vector.load %arg9[%c33_112, %c0_113] : memref<224x128xbf16, #tpu.memory_space<vmem>>, vector<160x128xbf16>
    %c0_114 = arith.constant 0 : index
    %c2_115 = arith.constant 2 : index
    %c0_116 = arith.constant 0 : index
    %c0_117 = arith.constant 0 : index
    %105 = vector.load %arg6[%c0_114, %c2_115, %c0_116, %c0_117] : memref<2x4x128x128xbf16, #tpu.memory_space<vmem>>, vector<1x1x128x128xbf16>
    %106 = vector.shape_cast %105 : vector<1x1x128x128xbf16> to vector<128x128xbf16>
    %cst_118 = arith.constant dense<0.000000e+00> : vector<160x128xf32>
    %107 = tpu.matmul %104, %106, %cst_118 {dimension_numbers = #tpu.dot_dimension_numbers<[1], [0], [0], [1], [0, 0, 1, 1], [], []>} : vector<160x128xbf16>, vector<128x128xbf16>, vector<160x128xf32> -> vector<160x128xf32>
    %108 = arith.addf %103, %107 : vector<160x128xf32>
    %c34 = arith.constant 34 : index
    %c0_119 = arith.constant 0 : index
    %109 = vector.load %arg9[%c34, %c0_119] : memref<224x128xbf16, #tpu.memory_space<vmem>>, vector<160x128xbf16>
    %c0_120 = arith.constant 0 : index
    %c3 = arith.constant 3 : index
    %c0_121 = arith.constant 0 : index
    %c0_122 = arith.constant 0 : index
    %110 = vector.load %arg6[%c0_120, %c3, %c0_121, %c0_122] : memref<2x4x128x128xbf16, #tpu.memory_space<vmem>>, vector<1x1x128x128xbf16>
    %111 = vector.shape_cast %110 : vector<1x1x128x128xbf16> to vector<128x128xbf16>
    %cst_123 = arith.constant dense<0.000000e+00> : vector<160x128xf32>
    %112 = tpu.matmul %109, %111, %cst_123 {dimension_numbers = #tpu.dot_dimension_numbers<[1], [0], [0], [1], [0, 0, 1, 1], [], []>} : vector<160x128xbf16>, vector<128x128xbf16>, vector<160x128xf32> -> vector<160x128xf32>
    %113 = arith.addf %108, %112 : vector<160x128xf32>
    %c0_124 = arith.constant 0 : index
    %c0_125 = arith.constant 0 : index
    %114 = vector.load %arg11[%c0_124, %c0_125] : memref<160x128xf32, #tpu.memory_space<vmem>>, vector<160x128xf32>
    tpu.vector_store %arg11[%c0_124, %c0_125], %113 {strides = array<i32>} : memref<160x128xf32, #tpu.memory_space<vmem>>, vector<160x128xf32>,
    %c0_126 = arith.constant 0 : index
    %c0_127 = arith.constant 0 : index
    %115 = tpu.strided_load %arg11[%c0_126, %c0_127] {strides = array<i32: 2, 1>} : memref<160x128xf32, #tpu.memory_space<vmem>>, vector<80x128xf32>
    %c0_128 = arith.constant 0 : index
    %c0_129 = arith.constant 0 : index
    %c0_130 = arith.constant 0 : index
    %116 = vector.load %arg7[%c0_128, %c0_129, %c0_130] : memref<2x1x128xf32, #tpu.memory_space<vmem>>, vector<1x1x128xf32>
    %117 = vector.shape_cast %116 : vector<1x1x128xf32> to vector<1x128xf32>
    %118 = vector.broadcast %117 : vector<1x128xf32> to vector<80x128xf32>
    %119 = arith.addf %115, %118 : vector<80x128xf32>
    %cst_131 = arith.constant 0.000000e+00 : f32
    %120 = vector.broadcast %cst_131 : f32 to vector<80x128xf32>
    %121 = arith.cmpf oge, %119, %120 : vector<80x128xf32>
    %cst_132 = arith.constant 2.000000e-01 : f32
    %122 = vector.broadcast %cst_132 : f32 to vector<80x128xf32>
    %123 = arith.mulf %122, %119 : vector<80x128xf32>
    %124 = arith.select %121, %119, %123 : vector<80x128xi1>, vector<80x128xf32>
    %125 = arith.truncf %124 : vector<80x128xf32> to vector<80x128xbf16>
    %c16 = arith.constant 16 : index
    %c0_133 = arith.constant 0 : index
    %126 = vector.load %arg10[%c16, %c0_133] : memref<224x128xbf16, #tpu.memory_space<vmem>>, vector<80x128xbf16>
    tpu.vector_store %arg10[%c16, %c0_133], %125 {strides = array<i32>} : memref<224x128xbf16, #tpu.memory_space<vmem>>, vector<80x128xbf16>,
    %cst_134 = arith.constant 0.000000e+00 : bf16
    %127 = vector.broadcast %cst_134 : bf16 to vector<16x128xbf16>
    %c48 = arith.constant 48 : index
    %c0_135 = arith.constant 0 : index
    %128 = vector.load %arg10[%c48, %c0_135] : memref<224x128xbf16, #tpu.memory_space<vmem>>, vector<16x128xbf16>
    tpu.vector_store %arg10[%c48, %c0_135], %127 {strides = array<i32>} : memref<224x128xbf16, #tpu.memory_space<vmem>>, vector<16x128xbf16>,
    %c96_136 = arith.constant 96 : index
    %c0_137 = arith.constant 0 : index
    %129 = vector.load %arg10[%c96_136, %c0_137] : memref<224x128xbf16, #tpu.memory_space<vmem>>, vector<16x128xbf16>
    tpu.vector_store %arg10[%c96_136, %c0_137], %127 {strides = array<i32>} : memref<224x128xbf16, #tpu.memory_space<vmem>>, vector<16x128xbf16>,
    %c15 = arith.constant 15 : index
    %c0_138 = arith.constant 0 : index
    %130 = vector.load %arg10[%c15, %c0_138] : memref<224x128xbf16, #tpu.memory_space<vmem>>, vector<80x128xbf16>
    %c2_139 = arith.constant 2 : index
    %c0_140 = arith.constant 0 : index
    %c0_141 = arith.constant 0 : index
    %c0_142 = arith.constant 0 : index
    %131 = vector.load %arg4[%c2_139, %c0_140, %c0_141, %c0_142] : memref<6x3x128x128xbf16, #tpu.memory_space<vmem>>, vector<1x1x128x128xbf16>
    %132 = vector.shape_cast %131 : vector<1x1x128x128xbf16> to vector<128x128xbf16>
    %cst_143 = arith.constant dense<0.000000e+00> : vector<80x128xf32>
    %133 = tpu.matmul %130, %132, %cst_143 {dimension_numbers = #tpu.dot_dimension_numbers<[1], [0], [0], [1], [0, 0, 1, 1], [], []>} : vector<80x128xbf16>, vector<128x128xbf16>, vector<80x128xf32> -> vector<80x128xf32>
    %c16_144 = arith.constant 16 : index
    %c0_145 = arith.constant 0 : index
    %134 = vector.load %arg10[%c16_144, %c0_145] : memref<224x128xbf16, #tpu.memory_space<vmem>>, vector<80x128xbf16>
    %c2_146 = arith.constant 2 : index
    %c1_147 = arith.constant 1 : index
    %c0_148 = arith.constant 0 : index
    %c0_149 = arith.constant 0 : index
    %135 = vector.load %arg4[%c2_146, %c1_147, %c0_148, %c0_149] : memref<6x3x128x128xbf16, #tpu.memory_space<vmem>>, vector<1x1x128x128xbf16>
    %136 = vector.shape_cast %135 : vector<1x1x128x128xbf16> to vector<128x128xbf16>
    %cst_150 = arith.constant dense<0.000000e+00> : vector<80x128xf32>
    %137 = tpu.matmul %134, %136, %cst_150 {dimension_numbers = #tpu.dot_dimension_numbers<[1], [0], [0], [1], [0, 0, 1, 1], [], []>} : vector<80x128xbf16>, vector<128x128xbf16>, vector<80x128xf32> -> vector<80x128xf32>
    %138 = arith.addf %133, %137 : vector<80x128xf32>
    %c17 = arith.constant 17 : index
    %c0_151 = arith.constant 0 : index
    %139 = vector.load %arg10[%c17, %c0_151] : memref<224x128xbf16, #tpu.memory_space<vmem>>, vector<80x128xbf16>
    %c2_152 = arith.constant 2 : index
    %c2_153 = arith.constant 2 : index
    %c0_154 = arith.constant 0 : index
    %c0_155 = arith.constant 0 : index
    %140 = vector.load %arg4[%c2_152, %c2_153, %c0_154, %c0_155] : memref<6x3x128x128xbf16, #tpu.memory_space<vmem>>, vector<1x1x128x128xbf16>
    %141 = vector.shape_cast %140 : vector<1x1x128x128xbf16> to vector<128x128xbf16>
    %cst_156 = arith.constant dense<0.000000e+00> : vector<80x128xf32>
    %142 = tpu.matmul %139, %141, %cst_156 {dimension_numbers = #tpu.dot_dimension_numbers<[1], [0], [0], [1], [0, 0, 1, 1], [], []>} : vector<80x128xbf16>, vector<128x128xbf16>, vector<80x128xf32> -> vector<80x128xf32>
    %143 = arith.addf %138, %142 : vector<80x128xf32>
    %c16_157 = arith.constant 16 : index
    %c0_158 = arith.constant 0 : index
    %144 = vector.load %arg10[%c16_157, %c0_158] : memref<224x128xbf16, #tpu.memory_space<vmem>>, vector<80x128xbf16>
    %145 = arith.extf %144 : vector<80x128xbf16> to vector<80x128xf32>
    %c2_159 = arith.constant 2 : index
    %c0_160 = arith.constant 0 : index
    %c0_161 = arith.constant 0 : index
    %146 = vector.load %arg5[%c2_159, %c0_160, %c0_161] : memref<6x1x128xf32, #tpu.memory_space<vmem>>, vector<1x1x128xf32>
    %147 = vector.shape_cast %146 : vector<1x1x128xf32> to vector<1x128xf32>
    %148 = vector.broadcast %147 : vector<1x128xf32> to vector<80x128xf32>
    %149 = arith.addf %143, %148 : vector<80x128xf32>
    %150 = arith.addf %149, %145 : vector<80x128xf32>
    %cst_162 = arith.constant 0.000000e+00 : f32
    %151 = vector.broadcast %cst_162 : f32 to vector<80x128xf32>
    %152 = arith.cmpf oge, %150, %151 : vector<80x128xf32>
    %cst_163 = arith.constant 2.000000e-01 : f32
    %153 = vector.broadcast %cst_163 : f32 to vector<80x128xf32>
    %154 = arith.mulf %153, %150 : vector<80x128xf32>
    %155 = arith.select %152, %150, %154 : vector<80x128xi1>, vector<80x128xf32>
    %156 = arith.truncf %155 : vector<80x128xf32> to vector<80x128xbf16>
    %c16_164 = arith.constant 16 : index
    %c0_165 = arith.constant 0 : index
    %157 = vector.load %arg9[%c16_164, %c0_165] : memref<224x128xbf16, #tpu.memory_space<vmem>>, vector<80x128xbf16>
    tpu.vector_store %arg9[%c16_164, %c0_165], %156 {strides = array<i32>} : memref<224x128xbf16, #tpu.memory_space<vmem>>, vector<80x128xbf16>,
    %cst_166 = arith.constant 0.000000e+00 : bf16
    %158 = vector.broadcast %cst_166 : bf16 to vector<16x128xbf16>
    %c48_167 = arith.constant 48 : index
    %c0_168 = arith.constant 0 : index
    %159 = vector.load %arg9[%c48_167, %c0_168] : memref<224x128xbf16, #tpu.memory_space<vmem>>, vector<16x128xbf16>
    tpu.vector_store %arg9[%c48_167, %c0_168], %158 {strides = array<i32>} : memref<224x128xbf16, #tpu.memory_space<vmem>>, vector<16x128xbf16>,
    %c96_169 = arith.constant 96 : index
    %c0_170 = arith.constant 0 : index
    %160 = vector.load %arg9[%c96_169, %c0_170] : memref<224x128xbf16, #tpu.memory_space<vmem>>, vector<16x128xbf16>
    tpu.vector_store %arg9[%c96_169, %c0_170], %158 {strides = array<i32>} : memref<224x128xbf16, #tpu.memory_space<vmem>>, vector<16x128xbf16>,
    %c15_171 = arith.constant 15 : index
    %c0_172 = arith.constant 0 : index
    %161 = vector.load %arg9[%c15_171, %c0_172] : memref<224x128xbf16, #tpu.memory_space<vmem>>, vector<80x128xbf16>
    %c3_173 = arith.constant 3 : index
    %c0_174 = arith.constant 0 : index
    %c0_175 = arith.constant 0 : index
    %c0_176 = arith.constant 0 : index
    %162 = vector.load %arg4[%c3_173, %c0_174, %c0_175, %c0_176] : memref<6x3x128x128xbf16, #tpu.memory_space<vmem>>, vector<1x1x128x128xbf16>
    %163 = vector.shape_cast %162 : vector<1x1x128x128xbf16> to vector<128x128xbf16>
    %cst_177 = arith.constant dense<0.000000e+00> : vector<80x128xf32>
    %164 = tpu.matmul %161, %163, %cst_177 {dimension_numbers = #tpu.dot_dimension_numbers<[1], [0], [0], [1], [0, 0, 1, 1], [], []>} : vector<80x128xbf16>, vector<128x128xbf16>, vector<80x128xf32> -> vector<80x128xf32>
    %c16_178 = arith.constant 16 : index
    %c0_179 = arith.constant 0 : index
    %165 = vector.load %arg9[%c16_178, %c0_179] : memref<224x128xbf16, #tpu.memory_space<vmem>>, vector<80x128xbf16>
    %c3_180 = arith.constant 3 : index
    %c1_181 = arith.constant 1 : index
    %c0_182 = arith.constant 0 : index
    %c0_183 = arith.constant 0 : index
    %166 = vector.load %arg4[%c3_180, %c1_181, %c0_182, %c0_183] : memref<6x3x128x128xbf16, #tpu.memory_space<vmem>>, vector<1x1x128x128xbf16>
    %167 = vector.shape_cast %166 : vector<1x1x128x128xbf16> to vector<128x128xbf16>
    %cst_184 = arith.constant dense<0.000000e+00> : vector<80x128xf32>
    %168 = tpu.matmul %165, %167, %cst_184 {dimension_numbers = #tpu.dot_dimension_numbers<[1], [0], [0], [1], [0, 0, 1, 1], [], []>} : vector<80x128xbf16>, vector<128x128xbf16>, vector<80x128xf32> -> vector<80x128xf32>
    %169 = arith.addf %164, %168 : vector<80x128xf32>
    %c17_185 = arith.constant 17 : index
    %c0_186 = arith.constant 0 : index
    %170 = vector.load %arg9[%c17_185, %c0_186] : memref<224x128xbf16, #tpu.memory_space<vmem>>, vector<80x128xbf16>
    %c3_187 = arith.constant 3 : index
    %c2_188 = arith.constant 2 : index
    %c0_189 = arith.constant 0 : index
    %c0_190 = arith.constant 0 : index
    %171 = vector.load %arg4[%c3_187, %c2_188, %c0_189, %c0_190] : memref<6x3x128x128xbf16, #tpu.memory_space<vmem>>, vector<1x1x128x128xbf16>
    %172 = vector.shape_cast %171 : vector<1x1x128x128xbf16> to vector<128x128xbf16>
    %cst_191 = arith.constant dense<0.000000e+00> : vector<80x128xf32>
    %173 = tpu.matmul %170, %172, %cst_191 {dimension_numbers = #tpu.dot_dimension_numbers<[1], [0], [0], [1], [0, 0, 1, 1], [], []>} : vector<80x128xbf16>, vector<128x128xbf16>, vector<80x128xf32> -> vector<80x128xf32>
    %174 = arith.addf %169, %173 : vector<80x128xf32>
    %c16_192 = arith.constant 16 : index
    %c0_193 = arith.constant 0 : index
    %175 = vector.load %arg9[%c16_192, %c0_193] : memref<224x128xbf16, #tpu.memory_space<vmem>>, vector<80x128xbf16>
    %176 = arith.extf %175 : vector<80x128xbf16> to vector<80x128xf32>
    %c3_194 = arith.constant 3 : index
    %c0_195 = arith.constant 0 : index
    %c0_196 = arith.constant 0 : index
    %177 = vector.load %arg5[%c3_194, %c0_195, %c0_196] : memref<6x1x128xf32, #tpu.memory_space<vmem>>, vector<1x1x128xf32>
    %178 = vector.shape_cast %177 : vector<1x1x128xf32> to vector<1x128xf32>
    %179 = vector.broadcast %178 : vector<1x128xf32> to vector<80x128xf32>
    %180 = arith.addf %174, %179 : vector<80x128xf32>
    %181 = arith.addf %180, %176 : vector<80x128xf32>
    %cst_197 = arith.constant 0.000000e+00 : f32
    %182 = vector.broadcast %cst_197 : f32 to vector<80x128xf32>
    %183 = arith.cmpf oge, %181, %182 : vector<80x128xf32>
    %cst_198 = arith.constant 2.000000e-01 : f32
    %184 = vector.broadcast %cst_198 : f32 to vector<80x128xf32>
    %185 = arith.mulf %184, %181 : vector<80x128xf32>
    %186 = arith.select %183, %181, %185 : vector<80x128xi1>, vector<80x128xf32>
    %187 = arith.truncf %186 : vector<80x128xf32> to vector<80x128xbf16>
    %c16_199 = arith.constant 16 : index
    %c0_200 = arith.constant 0 : index
    %188 = vector.load %arg10[%c16_199, %c0_200] : memref<224x128xbf16, #tpu.memory_space<vmem>>, vector<80x128xbf16>
    tpu.vector_store %arg10[%c16_199, %c0_200], %187 {strides = array<i32>} : memref<224x128xbf16, #tpu.memory_space<vmem>>, vector<80x128xbf16>,
    %cst_201 = arith.constant 0.000000e+00 : bf16
    %189 = vector.broadcast %cst_201 : bf16 to vector<16x128xbf16>
    %c48_202 = arith.constant 48 : index
    %c0_203 = arith.constant 0 : index
    %190 = vector.load %arg10[%c48_202, %c0_203] : memref<224x128xbf16, #tpu.memory_space<vmem>>, vector<16x128xbf16>
    tpu.vector_store %arg10[%c48_202, %c0_203], %189 {strides = array<i32>} : memref<224x128xbf16, #tpu.memory_space<vmem>>, vector<16x128xbf16>,
    %c96_204 = arith.constant 96 : index
    %c0_205 = arith.constant 0 : index
    %191 = vector.load %arg10[%c96_204, %c0_205] : memref<224x128xbf16, #tpu.memory_space<vmem>>, vector<16x128xbf16>
    tpu.vector_store %arg10[%c96_204, %c0_205], %189 {strides = array<i32>} : memref<224x128xbf16, #tpu.memory_space<vmem>>, vector<16x128xbf16>,
    %c15_206 = arith.constant 15 : index
    %c0_207 = arith.constant 0 : index
    %192 = vector.load %arg10[%c15_206, %c0_207] : memref<224x128xbf16, #tpu.memory_space<vmem>>, vector<80x128xbf16>
    %c1_208 = arith.constant 1 : index
    %c0_209 = arith.constant 0 : index
    %c0_210 = arith.constant 0 : index
    %c0_211 = arith.constant 0 : index
    %193 = vector.load %arg6[%c1_208, %c0_209, %c0_210, %c0_211] : memref<2x4x128x128xbf16, #tpu.memory_space<vmem>>, vector<1x1x128x128xbf16>
    %194 = vector.shape_cast %193 : vector<1x1x128x128xbf16> to vector<128x128xbf16>
    %cst_212 = arith.constant dense<0.000000e+00> : vector<80x128xf32>
    %195 = tpu.matmul %192, %194, %cst_212 {dimension_numbers = #tpu.dot_dimension_numbers<[1], [0], [0], [1], [0, 0, 1, 1], [], []>} : vector<80x128xbf16>, vector<128x128xbf16>, vector<80x128xf32> -> vector<80x128xf32>
    %c16_213 = arith.constant 16 : index
    %c0_214 = arith.constant 0 : index
    %196 = vector.load %arg10[%c16_213, %c0_214] : memref<224x128xbf16, #tpu.memory_space<vmem>>, vector<80x128xbf16>
    %c1_215 = arith.constant 1 : index
    %c1_216 = arith.constant 1 : index
    %c0_217 = arith.constant 0 : index
    %c0_218 = arith.constant 0 : index
    %197 = vector.load %arg6[%c1_215, %c1_216, %c0_217, %c0_218] : memref<2x4x128x128xbf16, #tpu.memory_space<vmem>>, vector<1x1x128x128xbf16>
    %198 = vector.shape_cast %197 : vector<1x1x128x128xbf16> to vector<128x128xbf16>
    %cst_219 = arith.constant dense<0.000000e+00> : vector<80x128xf32>
    %199 = tpu.matmul %196, %198, %cst_219 {dimension_numbers = #tpu.dot_dimension_numbers<[1], [0], [0], [1], [0, 0, 1, 1], [], []>} : vector<80x128xbf16>, vector<128x128xbf16>, vector<80x128xf32> -> vector<80x128xf32>
    %200 = arith.addf %195, %199 : vector<80x128xf32>
    %c17_220 = arith.constant 17 : index
    %c0_221 = arith.constant 0 : index
    %201 = vector.load %arg10[%c17_220, %c0_221] : memref<224x128xbf16, #tpu.memory_space<vmem>>, vector<80x128xbf16>
    %c1_222 = arith.constant 1 : index
    %c2_223 = arith.constant 2 : index
    %c0_224 = arith.constant 0 : index
    %c0_225 = arith.constant 0 : index
    %202 = vector.load %arg6[%c1_222, %c2_223, %c0_224, %c0_225] : memref<2x4x128x128xbf16, #tpu.memory_space<vmem>>, vector<1x1x128x128xbf16>
    %203 = vector.shape_cast %202 : vector<1x1x128x128xbf16> to vector<128x128xbf16>
    %cst_226 = arith.constant dense<0.000000e+00> : vector<80x128xf32>
    %204 = tpu.matmul %201, %203, %cst_226 {dimension_numbers = #tpu.dot_dimension_numbers<[1], [0], [0], [1], [0, 0, 1, 1], [], []>} : vector<80x128xbf16>, vector<128x128xbf16>, vector<80x128xf32> -> vector<80x128xf32>
    %205 = arith.addf %200, %204 : vector<80x128xf32>
    %c18 = arith.constant 18 : index
    %c0_227 = arith.constant 0 : index
    %206 = vector.load %arg10[%c18, %c0_227] : memref<224x128xbf16, #tpu.memory_space<vmem>>, vector<80x128xbf16>
    %c1_228 = arith.constant 1 : index
    %c3_229 = arith.constant 3 : index
    %c0_230 = arith.constant 0 : index
    %c0_231 = arith.constant 0 : index
    %207 = vector.load %arg6[%c1_228, %c3_229, %c0_230, %c0_231] : memref<2x4x128x128xbf16, #tpu.memory_space<vmem>>, vector<1x1x128x128xbf16>
    %208 = vector.shape_cast %207 : vector<1x1x128x128xbf16> to vector<128x128xbf16>
    %cst_232 = arith.constant dense<0.000000e+00> : vector<80x128xf32>
    %209 = tpu.matmul %206, %208, %cst_232 {dimension_numbers = #tpu.dot_dimension_numbers<[1], [0], [0], [1], [0, 0, 1, 1], [], []>} : vector<80x128xbf16>, vector<128x128xbf16>, vector<80x128xf32> -> vector<80x128xf32>
    %210 = arith.addf %205, %209 : vector<80x128xf32>
    %c0_233 = arith.constant 0 : index
    %c0_234 = arith.constant 0 : index
    %211 = vector.load %arg11[%c0_233, %c0_234] : memref<160x128xf32, #tpu.memory_space<vmem>>, vector<80x128xf32>
    tpu.vector_store %arg11[%c0_233, %c0_234], %210 {strides = array<i32>} : memref<160x128xf32, #tpu.memory_space<vmem>>, vector<80x128xf32>,
    %c0_235 = arith.constant 0 : index
    %c0_236 = arith.constant 0 : index
    %212 = tpu.strided_load %arg11[%c0_235, %c0_236] {strides = array<i32: 2, 1>} : memref<160x128xf32, #tpu.memory_space<vmem>>, vector<40x128xf32>
    %c1_237 = arith.constant 1 : index
    %c0_238 = arith.constant 0 : index
    %c0_239 = arith.constant 0 : index
    %213 = vector.load %arg7[%c1_237, %c0_238, %c0_239] : memref<2x1x128xf32, #tpu.memory_space<vmem>>, vector<1x1x128xf32>
    %214 = vector.shape_cast %213 : vector<1x1x128xf32> to vector<1x128xf32>
    %215 = vector.broadcast %214 : vector<1x128xf32> to vector<40x128xf32>
    %216 = arith.addf %212, %215 : vector<40x128xf32>
    %cst_240 = arith.constant 0.000000e+00 : f32
    %217 = vector.broadcast %cst_240 : f32 to vector<40x128xf32>
    %218 = arith.cmpf oge, %216, %217 : vector<40x128xf32>
    %cst_241 = arith.constant 2.000000e-01 : f32
    %219 = vector.broadcast %cst_241 : f32 to vector<40x128xf32>
    %220 = arith.mulf %219, %216 : vector<40x128xf32>
    %221 = arith.select %218, %216, %220 : vector<40x128xi1>, vector<40x128xf32>
    %222 = arith.truncf %221 : vector<40x128xf32> to vector<40x128xbf16>
    %c8 = arith.constant 8 : index
    %c0_242 = arith.constant 0 : index
    %223 = vector.load %arg9[%c8, %c0_242] : memref<224x128xbf16, #tpu.memory_space<vmem>>, vector<40x128xbf16>
    tpu.vector_store %arg9[%c8, %c0_242], %222 {strides = array<i32>} : memref<224x128xbf16, #tpu.memory_space<vmem>>, vector<40x128xbf16>,
    %cst_243 = arith.constant 0.000000e+00 : bf16
    %224 = vector.broadcast %cst_243 : bf16 to vector<8x128xbf16>
    %c24 = arith.constant 24 : index
    %c0_244 = arith.constant 0 : index
    %225 = vector.load %arg9[%c24, %c0_244] : memref<224x128xbf16, #tpu.memory_space<vmem>>, vector<8x128xbf16>
    tpu.vector_store %arg9[%c24, %c0_244], %224 {strides = array<i32>} : memref<224x128xbf16, #tpu.memory_space<vmem>>, vector<8x128xbf16>,
    %c48_245 = arith.constant 48 : index
    %c0_246 = arith.constant 0 : index
    %226 = vector.load %arg9[%c48_245, %c0_246] : memref<224x128xbf16, #tpu.memory_space<vmem>>, vector<8x128xbf16>
    tpu.vector_store %arg9[%c48_245, %c0_246], %224 {strides = array<i32>} : memref<224x128xbf16, #tpu.memory_space<vmem>>, vector<8x128xbf16>,
    %c7 = arith.constant 7 : index
    %c0_247 = arith.constant 0 : index
    %227 = vector.load %arg9[%c7, %c0_247] : memref<224x128xbf16, #tpu.memory_space<vmem>>, vector<40x128xbf16>
    %c4 = arith.constant 4 : index
    %c0_248 = arith.constant 0 : index
    %c0_249 = arith.constant 0 : index
    %c0_250 = arith.constant 0 : index
    %228 = vector.load %arg4[%c4, %c0_248, %c0_249, %c0_250] : memref<6x3x128x128xbf16, #tpu.memory_space<vmem>>, vector<1x1x128x128xbf16>
    %229 = vector.shape_cast %228 : vector<1x1x128x128xbf16> to vector<128x128xbf16>
    %cst_251 = arith.constant dense<0.000000e+00> : vector<40x128xf32>
    %230 = tpu.matmul %227, %229, %cst_251 {dimension_numbers = #tpu.dot_dimension_numbers<[1], [0], [0], [1], [0, 0, 1, 1], [], []>} : vector<40x128xbf16>, vector<128x128xbf16>, vector<40x128xf32> -> vector<40x128xf32>
    %c8_252 = arith.constant 8 : index
    %c0_253 = arith.constant 0 : index
    %231 = vector.load %arg9[%c8_252, %c0_253] : memref<224x128xbf16, #tpu.memory_space<vmem>>, vector<40x128xbf16>
    %c4_254 = arith.constant 4 : index
    %c1_255 = arith.constant 1 : index
    %c0_256 = arith.constant 0 : index
    %c0_257 = arith.constant 0 : index
    %232 = vector.load %arg4[%c4_254, %c1_255, %c0_256, %c0_257] : memref<6x3x128x128xbf16, #tpu.memory_space<vmem>>, vector<1x1x128x128xbf16>
    %233 = vector.shape_cast %232 : vector<1x1x128x128xbf16> to vector<128x128xbf16>
    %cst_258 = arith.constant dense<0.000000e+00> : vector<40x128xf32>
    %234 = tpu.matmul %231, %233, %cst_258 {dimension_numbers = #tpu.dot_dimension_numbers<[1], [0], [0], [1], [0, 0, 1, 1], [], []>} : vector<40x128xbf16>, vector<128x128xbf16>, vector<40x128xf32> -> vector<40x128xf32>
    %235 = arith.addf %230, %234 : vector<40x128xf32>
    %c9 = arith.constant 9 : index
    %c0_259 = arith.constant 0 : index
    %236 = vector.load %arg9[%c9, %c0_259] : memref<224x128xbf16, #tpu.memory_space<vmem>>, vector<40x128xbf16>
    %c4_260 = arith.constant 4 : index
    %c2_261 = arith.constant 2 : index
    %c0_262 = arith.constant 0 : index
    %c0_263 = arith.constant 0 : index
    %237 = vector.load %arg4[%c4_260, %c2_261, %c0_262, %c0_263] : memref<6x3x128x128xbf16, #tpu.memory_space<vmem>>, vector<1x1x128x128xbf16>
    %238 = vector.shape_cast %237 : vector<1x1x128x128xbf16> to vector<128x128xbf16>
    %cst_264 = arith.constant dense<0.000000e+00> : vector<40x128xf32>
    %239 = tpu.matmul %236, %238, %cst_264 {dimension_numbers = #tpu.dot_dimension_numbers<[1], [0], [0], [1], [0, 0, 1, 1], [], []>} : vector<40x128xbf16>, vector<128x128xbf16>, vector<40x128xf32> -> vector<40x128xf32>
    %240 = arith.addf %235, %239 : vector<40x128xf32>
    %c8_265 = arith.constant 8 : index
    %c0_266 = arith.constant 0 : index
    %241 = vector.load %arg9[%c8_265, %c0_266] : memref<224x128xbf16, #tpu.memory_space<vmem>>, vector<40x128xbf16>
    %242 = arith.extf %241 : vector<40x128xbf16> to vector<40x128xf32>
    %c4_267 = arith.constant 4 : index
    %c0_268 = arith.constant 0 : index
    %c0_269 = arith.constant 0 : index
    %243 = vector.load %arg5[%c4_267, %c0_268, %c0_269] : memref<6x1x128xf32, #tpu.memory_space<vmem>>, vector<1x1x128xf32>
    %244 = vector.shape_cast %243 : vector<1x1x128xf32> to vector<1x128xf32>
    %245 = vector.broadcast %244 : vector<1x128xf32> to vector<40x128xf32>
    %246 = arith.addf %240, %245 : vector<40x128xf32>
    %247 = arith.addf %246, %242 : vector<40x128xf32>
    %cst_270 = arith.constant 0.000000e+00 : f32
    %248 = vector.broadcast %cst_270 : f32 to vector<40x128xf32>
    %249 = arith.cmpf oge, %247, %248 : vector<40x128xf32>
    %cst_271 = arith.constant 2.000000e-01 : f32
    %250 = vector.broadcast %cst_271 : f32 to vector<40x128xf32>
    %251 = arith.mulf %250, %247 : vector<40x128xf32>
    %252 = arith.select %249, %247, %251 : vector<40x128xi1>, vector<40x128xf32>
    %253 = arith.truncf %252 : vector<40x128xf32> to vector<40x128xbf16>
    %c8_272 = arith.constant 8 : index
    %c0_273 = arith.constant 0 : index
    %254 = vector.load %arg10[%c8_272, %c0_273] : memref<224x128xbf16, #tpu.memory_space<vmem>>, vector<40x128xbf16>
    tpu.vector_store %arg10[%c8_272, %c0_273], %253 {strides = array<i32>} : memref<224x128xbf16, #tpu.memory_space<vmem>>, vector<40x128xbf16>,
    %cst_274 = arith.constant 0.000000e+00 : bf16
    %255 = vector.broadcast %cst_274 : bf16 to vector<8x128xbf16>
    %c24_275 = arith.constant 24 : index
    %c0_276 = arith.constant 0 : index
    %256 = vector.load %arg10[%c24_275, %c0_276] : memref<224x128xbf16, #tpu.memory_space<vmem>>, vector<8x128xbf16>
    tpu.vector_store %arg10[%c24_275, %c0_276], %255 {strides = array<i32>} : memref<224x128xbf16, #tpu.memory_space<vmem>>, vector<8x128xbf16>,
    %c48_277 = arith.constant 48 : index
    %c0_278 = arith.constant 0 : index
    %257 = vector.load %arg10[%c48_277, %c0_278] : memref<224x128xbf16, #tpu.memory_space<vmem>>, vector<8x128xbf16>
    tpu.vector_store %arg10[%c48_277, %c0_278], %255 {strides = array<i32>} : memref<224x128xbf16, #tpu.memory_space<vmem>>, vector<8x128xbf16>,
    %c7_279 = arith.constant 7 : index
    %c0_280 = arith.constant 0 : index
    %258 = vector.load %arg10[%c7_279, %c0_280] : memref<224x128xbf16, #tpu.memory_space<vmem>>, vector<40x128xbf16>
    %c5 = arith.constant 5 : index
    %c0_281 = arith.constant 0 : index
    %c0_282 = arith.constant 0 : index
    %c0_283 = arith.constant 0 : index
    %259 = vector.load %arg4[%c5, %c0_281, %c0_282, %c0_283] : memref<6x3x128x128xbf16, #tpu.memory_space<vmem>>, vector<1x1x128x128xbf16>
    %260 = vector.shape_cast %259 : vector<1x1x128x128xbf16> to vector<128x128xbf16>
    %cst_284 = arith.constant dense<0.000000e+00> : vector<40x128xf32>
    %261 = tpu.matmul %258, %260, %cst_284 {dimension_numbers = #tpu.dot_dimension_numbers<[1], [0], [0], [1], [0, 0, 1, 1], [], []>} : vector<40x128xbf16>, vector<128x128xbf16>, vector<40x128xf32> -> vector<40x128xf32>
    %c8_285 = arith.constant 8 : index
    %c0_286 = arith.constant 0 : index
    %262 = vector.load %arg10[%c8_285, %c0_286] : memref<224x128xbf16, #tpu.memory_space<vmem>>, vector<40x128xbf16>
    %c5_287 = arith.constant 5 : index
    %c1_288 = arith.constant 1 : index
    %c0_289 = arith.constant 0 : index
    %c0_290 = arith.constant 0 : index
    %263 = vector.load %arg4[%c5_287, %c1_288, %c0_289, %c0_290] : memref<6x3x128x128xbf16, #tpu.memory_space<vmem>>, vector<1x1x128x128xbf16>
    %264 = vector.shape_cast %263 : vector<1x1x128x128xbf16> to vector<128x128xbf16>
    %cst_291 = arith.constant dense<0.000000e+00> : vector<40x128xf32>
    %265 = tpu.matmul %262, %264, %cst_291 {dimension_numbers = #tpu.dot_dimension_numbers<[1], [0], [0], [1], [0, 0, 1, 1], [], []>} : vector<40x128xbf16>, vector<128x128xbf16>, vector<40x128xf32> -> vector<40x128xf32>
    %266 = arith.addf %261, %265 : vector<40x128xf32>
    %c9_292 = arith.constant 9 : index
    %c0_293 = arith.constant 0 : index
    %267 = vector.load %arg10[%c9_292, %c0_293] : memref<224x128xbf16, #tpu.memory_space<vmem>>, vector<40x128xbf16>
    %c5_294 = arith.constant 5 : index
    %c2_295 = arith.constant 2 : index
    %c0_296 = arith.constant 0 : index
    %c0_297 = arith.constant 0 : index
    %268 = vector.load %arg4[%c5_294, %c2_295, %c0_296, %c0_297] : memref<6x3x128x128xbf16, #tpu.memory_space<vmem>>, vector<1x1x128x128xbf16>
    %269 = vector.shape_cast %268 : vector<1x1x128x128xbf16> to vector<128x128xbf16>
    %cst_298 = arith.constant dense<0.000000e+00> : vector<40x128xf32>
    %270 = tpu.matmul %267, %269, %cst_298 {dimension_numbers = #tpu.dot_dimension_numbers<[1], [0], [0], [1], [0, 0, 1, 1], [], []>} : vector<40x128xbf16>, vector<128x128xbf16>, vector<40x128xf32> -> vector<40x128xf32>
    %271 = arith.addf %266, %270 : vector<40x128xf32>
    %c8_299 = arith.constant 8 : index
    %c0_300 = arith.constant 0 : index
    %272 = vector.load %arg10[%c8_299, %c0_300] : memref<224x128xbf16, #tpu.memory_space<vmem>>, vector<40x128xbf16>
    %273 = arith.extf %272 : vector<40x128xbf16> to vector<40x128xf32>
    %c5_301 = arith.constant 5 : index
    %c0_302 = arith.constant 0 : index
    %c0_303 = arith.constant 0 : index
    %274 = vector.load %arg5[%c5_301, %c0_302, %c0_303] : memref<6x1x128xf32, #tpu.memory_space<vmem>>, vector<1x1x128xf32>
    %275 = vector.shape_cast %274 : vector<1x1x128xf32> to vector<1x128xf32>
    %276 = vector.broadcast %275 : vector<1x128xf32> to vector<40x128xf32>
    %277 = arith.addf %271, %276 : vector<40x128xf32>
    %278 = arith.addf %277, %273 : vector<40x128xf32>
    %cst_304 = arith.constant 0.000000e+00 : f32
    %279 = vector.broadcast %cst_304 : f32 to vector<40x128xf32>
    %280 = arith.cmpf oge, %278, %279 : vector<40x128xf32>
    %cst_305 = arith.constant 2.000000e-01 : f32
    %281 = vector.broadcast %cst_305 : f32 to vector<40x128xf32>
    %282 = arith.mulf %281, %278 : vector<40x128xf32>
    %283 = arith.select %280, %278, %282 : vector<40x128xi1>, vector<40x128xf32>
    %284 = arith.truncf %283 : vector<40x128xf32> to vector<40x128xbf16>
    %c8_306 = arith.constant 8 : index
    %c0_307 = arith.constant 0 : index
    %285 = vector.load %arg9[%c8_306, %c0_307] : memref<224x128xbf16, #tpu.memory_space<vmem>>, vector<40x128xbf16>
    tpu.vector_store %arg9[%c8_306, %c0_307], %284 {strides = array<i32>} : memref<224x128xbf16, #tpu.memory_space<vmem>>, vector<40x128xbf16>,
    %cst_308 = arith.constant 0.000000e+00 : bf16
    %286 = vector.broadcast %cst_308 : bf16 to vector<8x128xbf16>
    %c24_309 = arith.constant 24 : index
    %c0_310 = arith.constant 0 : index
    %287 = vector.load %arg9[%c24_309, %c0_310] : memref<224x128xbf16, #tpu.memory_space<vmem>>, vector<8x128xbf16>
    tpu.vector_store %arg9[%c24_309, %c0_310], %286 {strides = array<i32>} : memref<224x128xbf16, #tpu.memory_space<vmem>>, vector<8x128xbf16>,
    %c48_311 = arith.constant 48 : index
    %c0_312 = arith.constant 0 : index
    %288 = vector.load %arg9[%c48_311, %c0_312] : memref<224x128xbf16, #tpu.memory_space<vmem>>, vector<8x128xbf16>
    tpu.vector_store %arg9[%c48_311, %c0_312], %286 {strides = array<i32>} : memref<224x128xbf16, #tpu.memory_space<vmem>>, vector<8x128xbf16>,
    %c8_313 = arith.constant 8 : index
    %c0_314 = arith.constant 0 : index
    %289 = vector.load %arg9[%c8_313, %c0_314] : memref<224x128xbf16, #tpu.memory_space<vmem>>, vector<16x128xbf16>
    %290 = arith.extf %289 : vector<16x128xbf16> to vector<16x128xf32>
    %c0_315 = arith.constant 0 : index
    %c0_316 = arith.constant 0 : index
    %c0_317 = arith.constant 0 : index
    %291 = vector.load %arg8[%c0_315, %c0_316, %c0_317] : memref<2x16x128xf32, #tpu.memory_space<vmem>>, vector<1x16x128xf32>
    %292 = vector.shape_cast %291 : vector<1x16x128xf32> to vector<16x128xf32>
    %293 = vector.shape_cast %290 : vector<16x128xf32> to vector<1x16x128xf32>
    tpu.vector_store %arg8[%c0_315, %c0_316, %c0_317], %293 {strides = array<i32>} : memref<2x16x128xf32, #tpu.memory_space<vmem>>, vector<1x16x128xf32>,
    %c32_318 = arith.constant 32 : index
    %c0_319 = arith.constant 0 : index
    %294 = vector.load %arg9[%c32_318, %c0_319] : memref<224x128xbf16, #tpu.memory_space<vmem>>, vector<16x128xbf16>
    %295 = arith.extf %294 : vector<16x128xbf16> to vector<16x128xf32>
    %c1_320 = arith.constant 1 : index
    %c0_321 = arith.constant 0 : index
    %c0_322 = arith.constant 0 : index
    %296 = vector.load %arg8[%c1_320, %c0_321, %c0_322] : memref<2x16x128xf32, #tpu.memory_space<vmem>>, vector<1x16x128xf32>
    %297 = vector.shape_cast %296 : vector<1x16x128xf32> to vector<16x128xf32>
    %298 = vector.shape_cast %295 : vector<16x128xf32> to vector<1x16x128xf32>
    tpu.vector_store %arg8[%c1_320, %c0_321, %c0_322], %298 {strides = array<i32>} : memref<2x16x128xf32, #tpu.memory_space<vmem>>, vector<1x16x128xf32>,
    return
  }
  func.func @transform_0(%arg0: i32) -> (i32, i32, i32) {
    %c0_i32 = arith.constant 0 : i32
    %c0_i32_0 = arith.constant 0 : i32
    %c0_i32_1 = arith.constant 0 : i32
    return %arg0, %c0_i32, %c0_i32_0 : i32, i32, i32
  }
  func.func @transform_1(%arg0: i32) -> (i32, i32, i32) {
    %c0_i32 = arith.constant 0 : i32
    %c0_i32_0 = arith.constant 0 : i32
    %c0_i32_1 = arith.constant 0 : i32
    %c0_i32_2 = arith.constant 0 : i32
    return %c0_i32, %c0_i32_0, %c0_i32_1 : i32, i32, i32
  }
  func.func @transform_2(%arg0: i32) -> (i32, i32) {
    %c0_i32 = arith.constant 0 : i32
    %c0_i32_0 = arith.constant 0 : i32
    %c0_i32_1 = arith.constant 0 : i32
    return %c0_i32, %c0_i32_0 : i32, i32
  }
  func.func @transform_3(%arg0: i32) -> (i32, i32, i32, i32) {
    %c0_i32 = arith.constant 0 : i32
    %c0_i32_0 = arith.constant 0 : i32
    %c0_i32_1 = arith.constant 0 : i32
    %c0_i32_2 = arith.constant 0 : i32
    %c0_i32_3 = arith.constant 0 : i32
    return %c0_i32, %c0_i32_0, %c0_i32_1, %c0_i32_2 : i32, i32, i32, i32
  }
  func.func @transform_4(%arg0: i32) -> (i32, i32, i32) {
    %c0_i32 = arith.constant 0 : i32
    %c0_i32_0 = arith.constant 0 : i32
    %c0_i32_1 = arith.constant 0 : i32
    %c0_i32_2 = arith.constant 0 : i32
    return %c0_i32, %c0_i32_0, %c0_i32_1 : i32, i32, i32
  }
  func.func @transform_5(%arg0: i32) -> (i32, i32, i32, i32) {
    %c0_i32 = arith.constant 0 : i32
    %c0_i32_0 = arith.constant 0 : i32
    %c0_i32_1 = arith.constant 0 : i32
    %c0_i32_2 = arith.constant 0 : i32
    %c0_i32_3 = arith.constant 0 : i32
    return %c0_i32, %c0_i32_0, %c0_i32_1, %c0_i32_2 : i32, i32, i32, i32
  }
  func.func @transform_6(%arg0: i32) -> (i32, i32, i32) {
    %c0_i32 = arith.constant 0 : i32
    %c0_i32_0 = arith.constant 0 : i32
    %c0_i32_1 = arith.constant 0 : i32
    %c0_i32_2 = arith.constant 0 : i32
    return %c0_i32, %c0_i32_0, %c0_i32_1 : i32, i32, i32
  }
  func.func @transform_7(%arg0: i32) -> (i32, i32, i32) {
    %c0_i32 = arith.constant 0 : i32
    %c0_i32_0 = arith.constant 0 : i32
    %c0_i32_1 = arith.constant 0 : i32
    return %arg0, %c0_i32, %c0_i32_0 : i32, i32, i32
  }
}

</mosaic_0001>

<bundles_post_ra>
// kernel: wav2vec_encoder_forward.1
= control target key start
LH: loop header
LB: loop body
LE: loop exit
PB: predicated region body
PF: predicated region fallthrough
CT: control target
= control target key end

     0   :  { %vm1308_vm0 = vsmask.f32 4352  ;;  %vm3014_vm1 = vsmask.f32 7424  ;;  %s17289_s1 = inlined_call_operand.vmem [shape: bf16[3,768,128], index: 1, kind: input, shape index: {}]   ;;  %s17290_s0 = inlined_call_operand.vmem [shape: bf16[1,224,768], index: 0, kind: input, shape index: {}]   ;;  %s17291_s3 = inlined_call_operand.vmem [shape: bf16[6,3,128,128], index: 3, kind: input, shape index: {}]   ;;  %s17292_s2 = inlined_call_operand.vmem [shape: f32[1,128], index: 2, kind: input, shape index: {}]   ;;  %s17293_s4 = inlined_call_operand.vmem [shape: f32[6,1,128], index: 4, kind: input, shape index: {}]   ;;  %s17294_s5 = inlined_call_operand.vmem [shape: bf16[2,4,128,128], index: 5, kind: input, shape index: {}]   ;;  %s17295_s6 = inlined_call_operand.vmem [shape: f32[2,1,128], index: 6, kind: input, shape index: {}]   ;;  %s17296_s7 = inlined_call_operand.vmem [shape: f32[2,16,128], index: 7, kind: output, shape index: {}]  }
   0x1   :  { %v12496_v0 = vld [vmem:[%s17289_s1 + $0x1b8] sm:$0xff]  ;;  %v12495_v4 = vld [vmem:[%s17289_s1 + $0x1b0] sm:$0xff]  ;;  %v12494_v8 = vld [vmem:[%s17289_s1 + $0x1a8] sm:$0xff] }
   0x2   :  { %v12504_v1 = vld [vmem:[%s17289_s1 + $0x1f8] sm:$0xff]  ;;  %879 = vmatpush.bf16.msra.mxu0 %v12496_v0  ;;  %v12503_v5 = vld [vmem:[%s17289_s1 + $0x1f0] sm:$0xff]  ;;  %v12502_v9 = vld [vmem:[%s17289_s1 + $0x1e8] sm:$0xff] }
   0x3   :  { %v12512_v2 = vld [vmem:[%s17289_s1 + $0x238] sm:$0xff]  ;;  %938 = vmatpush.bf16.msra.mxu1 %v12504_v1  ;;  %v12511_v6 = vld [vmem:[%s17289_s1 + $0x230] sm:$0xff]  ;;  %v12510_v10 = vld [vmem:[%s17289_s1 + $0x228] sm:$0xff] }
   0x4   :  { %v12520_v3 = vld [vmem:[%s17289_s1 + $0x278] sm:$0xff]  ;;  %997 = vmatpush.bf16.msra.mxu2 %v12512_v2  ;;  %v12519_v7 = vld [vmem:[%s17289_s1 + $0x270] sm:$0xff]  ;;  %v12518_v11 = vld [vmem:[%s17289_s1 + $0x268] sm:$0xff] }
   0x5   :  { %1056 = vmatpush.bf16.msra.mxu3 %v12520_v3  ;;  %v12493_v12 = vld [vmem:[%s17289_s1 + $0x1a0] sm:$0xff]  ;;  %v12492_v16 = vld [vmem:[%s17289_s1 + $0x198] sm:$0xff]  ;;  %v13541_v21 = vld [vmem:[%s17290_s0 + $0x90] sm:$0xff] }
   0x6   :  { %880 = vmatpush.bf16.msra.mxu0 %v12495_v4  ;;  %v12501_v13 = vld [vmem:[%s17289_s1 + $0x1e0] sm:$0xff]  ;;  %v12500_v17 = vld [vmem:[%s17289_s1 + $0x1d8] sm:$0xff]  ;;  %v12491_v22 = vld [vmem:[%s17289_s1 + $0x190] sm:$0xff]  ;;  %v363_v26 = vunpack.c.l.b16 %v13541_v21  ;;  %v364_v33 = vunpack.c.h.b16 %v13541_v21 }
   0x7   :  { %939 = vmatpush.bf16.msra.mxu1 %v12503_v5  ;;  %v12509_v14 = vld [vmem:[%s17289_s1 + $0x220] sm:$0xff]  ;;  %v12508_v18 = vld [vmem:[%s17289_s1 + $0x218] sm:$0xff]  ;;  %v12499_v23 = vld [vmem:[%s17289_s1 + $0x1d0] sm:$0xff] }
   0x8   :  { %998 = vmatpush.bf16.msra.mxu2 %v12511_v6  ;;  %v12517_v15 = vld [vmem:[%s17289_s1 + $0x260] sm:$0xff]  ;;  %v12516_v19 = vld [vmem:[%s17289_s1 + $0x258] sm:$0xff]  ;;  %v12507_v28 = vld [vmem:[%s17289_s1 + $0x210] sm:$0xff] }
   0x9   :  { %1057 = vmatpush.bf16.msra.mxu3 %v12519_v7  ;;  %v41_v20 = vld [vmem:[%s17290_s0 + $0x78] sm:$0xff]  ;;  %v42_v25 = vld [vmem:[%s17290_s0 + $0x80] sm:$0xff]  ;;  %v12515_v29 = vld [vmem:[%s17289_s1 + $0x250] sm:$0xff] }
   0xa   :  { %881 = vmatpush.bf16.msra.mxu0 %v12494_v8  ;;  %v357_v24 = vunpack.c.l.b16 %v41_v20  ;;  %v13556_v27 = vld [vmem:[%s17290_s0 + $0x98] sm:$0xff]  ;;  %v358_v31 = vunpack.c.h.b16 %v41_v20  ;;  %v359_v32 = vunpack.c.l.b16 %v42_v25  ;;  %v12490_v35 = vld [vmem:[%s17289_s1 + $0x188] sm:$0xff]  ;;  %v13579_v37 = vld [vmem:[%s17290_s0 + $0x60] sm:$0xff]  ;;  %v360_v43 = vunpack.c.h.b16 %v42_v25 }
   0xb   :  { %940 = vmatpush.bf16.msra.mxu1 %v12502_v9  ;;  %v365_v34 = vunpack.c.l.b16 %v13556_v27  ;;  %v12498_v36 = vld [vmem:[%s17289_s1 + $0x1c8] sm:$0xff]  ;;  %v366_v44 = vunpack.c.h.b16 %v13556_v27  ;;  %v351_v45 = vunpack.c.l.b16 %v13579_v37  ;;  %v352_v46 = vunpack.c.h.b16 %v13579_v37  ;;  %v12489_v47 = vld [vmem:[%s17289_s1 + $0x180] sm:$0xff]  ;;  %v12528_v54 = vld [vmem:[%s17289_s1 + $0x2b8] sm:$0xff] }
   0xc   :  { %999 = vmatpush.bf16.msra.mxu2 %v12510_v10  ;;  %v13566_v30 = vpack.c.b16 %v363_v26, %v357_v24  ;;  %v12506_v38 = vld [vmem:[%s17289_s1 + $0x208] sm:$0xff]  ;;  %v13594_v41 = vpack.c.b16 %v364_v33, %v358_v31  ;;  %v12497_v48 = vld [vmem:[%s17289_s1 + $0x1c0] sm:$0xff]  ;;  %v12536_v55 = vld [vmem:[%s17289_s1 + $0x2f8] sm:$0xff] }
   0xd   :  { %1058 = vmatpush.bf16.msra.mxu3 %v12518_v11  ;;  %v12514_v39 = vld [vmem:[%s17289_s1 + $0x248] sm:$0xff]  ;;  %v13598_v42 = vpack.c.b16 %v365_v34, %v359_v32  ;;  %v13611_v51 = vpack.c.b16 %v366_v44, %v360_v43  ;;  %v12505_v52 = vld [vmem:[%s17289_s1 + $0x200] sm:$0xff]  ;;  %v471_v58 = vpack.c.b16 %v357_v24, %v351_v45  ;;  %v472_v59 = vpack.c.b16 %v358_v31, %v352_v46  ;;  %v48_v60 = vld [vmem:[%s17290_s0 + $0xb0] sm:$0xff] }
   0xe   :  { %882 = vmatpush.bf16.msra.mxu0 %v12493_v12  ;;  %v13590_v40 = vld [vmem:[%s17290_s0 + $0x68] sm:$0xff]  ;;  %v12513_v53 = vld [vmem:[%s17289_s1 + $0x240] sm:$0xff]  ;;  %v371_v4 = vunpack.c.l.b16 %v48_v60  ;;  %v12527_v5 = vld [vmem:[%s17289_s1 + $0x2b0] sm:$0xff]  ;;  %v372_v8 = vunpack.c.h.b16 %v48_v60 }
   0xf   :  { %941 = vmatpush.bf16.msra.mxu1 %v12501_v13  ;;  %v17298_v49 = vunpack.c.l.b16 %v13590_v40  ;;  %v17297_v50 = vunpack.c.h.b16 %v13590_v40  ;;  %v47_v56 = vld [vmem:[%s17290_s0 + $0xa8] sm:$0xff]  ;;  %v13631_v57 = vld [vmem:[%s17290_s0 + $0xc0] sm:$0xff]  ;;  %v12535_v6 = vld [vmem:[%s17289_s1 + $0x2f0] sm:$0xff] }
  0x10   :  { %1000 = vmatpush.bf16.msra.mxu2 %v12509_v14  ;;  %v13643_v61 = vld [vmem:[%s17290_s0 + $0xc8] sm:$0xff]  ;;  %v369_v0 = vunpack.c.l.b16 %v47_v56  ;;  %v370_v1 = vunpack.c.h.b16 %v47_v56  ;;  %v375_v2 = vunpack.c.l.b16 %v13631_v57  ;;  %v376_v3 = vunpack.c.h.b16 %v13631_v57  ;;  %v54_v20 = vld [vmem:[%s17290_s0 + $0xe0] sm:$0xff]  ;;  %v12451_v37 = vld [vmem:[%s17289_s1 + $0x50] sm:$0xff] }
  0x11   :  { %1059 = vmatpush.bf16.msra.mxu3 %v12517_v15  ;;  %v473_v62 = vpack.c.b16 %v359_v32, %v17298_v49  ;;  %v474_v63 = vpack.c.b16 %v360_v43, %v17297_v50  ;;  %v377_v7 = vunpack.c.l.b16 %v13643_v61  ;;  %v378_v11 = vunpack.c.h.b16 %v13643_v61  ;;  %v12526_v14 = vld [vmem:[%s17289_s1 + $0x2a8] sm:$0xff] }
  0x12   :  { %883 = vmatpush.bf16.msra.mxu0 %v12492_v16  ;;  %v13658_v9 = vpack.c.b16 %v375_v2, %v369_v0  ;;  %v13660_v10 = vpack.c.b16 %v376_v3, %v370_v1  ;;  %v12534_v15 = vld [vmem:[%s17289_s1 + $0x2e8] sm:$0xff]  ;;  %v53_v16 = vld [vmem:[%s17290_s0 + $0xd8] sm:$0xff]  ;;  %v480_v24 = vpack.c.b16 %v372_v8, %v366_v44  ;;  %v384_v32 = vunpack.c.h.b16 %v54_v20  ;;  %v62_v44 = vld [vmem:[%s17290_s0 + $0x120] sm:$0xff] }
  0x13   :  { %942 = vmatpush.bf16.msra.mxu1 %v12500_v17  ;;  %v13663_v12 = vpack.c.b16 %v377_v7, %v371_v4  ;;  %v13665_v13 = vpack.c.b16 %v378_v11, %v372_v8  ;;  %v56_v17 = vld [vmem:[%s17290_s0 + $0xf0] sm:$0xff]  ;;  %v381_v25 = vunpack.c.l.b16 %v53_v16  ;;  %v59_v43 = vld [vmem:[%s17290_s0 + $0x108] sm:$0xff]  ;;  %v66_v8 = vld [vmem:[%s17290_s0 + $0x140] sm:$0xff] }
  0x14   :  { %1001 = vmatpush.bf16.msra.mxu2 %v12508_v18  ;;  %v477_v18 = vpack.c.b16 %v369_v0, %v363_v26  ;;  %v388_v31 = vunpack.c.h.b16 %v56_v17  ;;  %v383_v26 = vunpack.c.l.b16 %v54_v20  ;;  %v393_v56 = vunpack.c.l.b16 %v59_v43 }
  0x15   :  { %1060 = vmatpush.bf16.msra.mxu3 %v12516_v19  ;;  %v478_v19 = vpack.c.b16 %v370_v1, %v364_v33  ;;  %v394_v57 = vunpack.c.h.b16 %v59_v43  ;;  %v407_v20 = vunpack.c.l.b16 %v66_v8  ;;  %v72_v43 = vld [vmem:[%s17290_s0 + $0x170] sm:$0xff] }
  0x16   :  { %884 = vmatpush.bf16.msra.mxu0 %v12491_v22  ;;  %v57_v22 = vld [vmem:[%s17290_s0 + $0xf8] sm:$0xff] }
  0x17   :  { %943 = vmatpush.bf16.msra.mxu1 %v12499_v23  ;;  %v479_v23 = vpack.c.b16 %v371_v4, %v365_v34  ;;  %v389_v21 = vunpack.c.l.b16 %v57_v22  ;;  %v390_v33 = vunpack.c.h.b16 %v57_v22  ;;  %v12525_v34 = vld [vmem:[%s17289_s1 + $0x2a0] sm:$0xff]  ;;  %v65_v4 = vld [vmem:[%s17290_s0 + $0x138] sm:$0xff]  ;;  %v408_v22 = vunpack.c.h.b16 %v66_v8 }
  0x18   :  { %1002 = vmatpush.bf16.msra.mxu2 %v12507_v28  ;;  %v382_v28 = vunpack.c.h.b16 %v53_v16  ;;  %v405_v16 = vunpack.c.l.b16 %v65_v4 }
  0x19   :  { %1061 = vmatpush.bf16.msra.mxu3 %v12515_v29  ;;  %v387_v29 = vunpack.c.l.b16 %v56_v17  ;;  %v13697_v27 = vpack.c.b16 %v390_v33, %v384_v32  ;;  %v406_v17 = vunpack.c.h.b16 %v65_v4 }
  0x1a   :  { %885 = vmatpush.bf16.msra.mxu0 %v12490_v35 }
  0x1b   :  { %944 = vmatpush.bf16.msra.mxu1 %v12498_v36  ;;  %v13691_v35 = vpack.c.b16 %v387_v29, %v381_v25  ;;  %v13693_v36 = vpack.c.b16 %v388_v31, %v382_v28 }
  0x1c   :  { %1003 = vmatpush.bf16.msra.mxu2 %v12506_v38  ;;  %v13695_v38 = vpack.c.b16 %v389_v21, %v383_v26 }
  0x1d   :  { %1062 = vmatpush.bf16.msra.mxu3 %v12514_v39  ;;  %v12533_v39 = vld [vmem:[%s17289_s1 + $0x2e0] sm:$0xff] }
  0x1e   :  { %886 = vmatpush.bf16.msra.mxu0 %v12489_v47  ;;  %v483_v47 = vpack.c.b16 %v381_v25, %v375_v2 }
  0x1f   :  { %945 = vmatpush.bf16.msra.mxu1 %v12497_v48  ;;  %v484_v48 = vpack.c.b16 %v382_v28, %v376_v3 }
  0x20   :  { %1004 = vmatpush.bf16.msra.mxu2 %v12505_v52  ;;  %v60_v52 = vld [vmem:[%s17290_s0 + $0x110] sm:$0xff] }
  0x21   :  { %1063 = vmatpush.bf16.msra.mxu3 %v12513_v53  ;;  %887 = vmatmul.bf16.vlgmr.msra.gmra.mxu0 %v471_v58  ;;  %v63_v53 = vld [vmem:[%s17290_s0 + $0x128] sm:$0xff]  ;;  %v399_v58 = vunpack.c.l.b16 %v62_v44  ;;  %v395_v60 = vunpack.c.l.b16 %v60_v52  ;;  %v396_v61 = vunpack.c.h.b16 %v60_v52 }
  0x22   :  { %1115 = vmatpush.bf16.msrb.mxu0 %v12528_v54  ;;  %946 = vmatmul.bf16.vlgmr.msra.gmra.mxu1 %v472_v59  ;;  %v485_v54 = vpack.c.b16 %v383_v26, %v377_v7  ;;  %v400_v59 = vunpack.c.h.b16 %v62_v44  ;;  %v490_v7 = vpack.c.b16 %v394_v57, %v388_v31  ;;  %v12524_v31 = vld [vmem:[%s17289_s1 + $0x298] sm:$0xff]  ;;  %v75_v44 = vld [vmem:[%s17290_s0 + $0x188] sm:$0xff] }
  0x23   :  { %1174 = vmatpush.bf16.msrb.mxu1 %v12536_v55  ;;  %1005 = vmatmul.bf16.vlgmr.msra.gmra.mxu2 %v473_v62  ;;  %v486_v55 = vpack.c.b16 %v384_v32, %v378_v11  ;;  %v401_v62 = vunpack.c.l.b16 %v63_v53  ;;  %v13717_v0 = vpack.c.b16 %v399_v58, %v393_v56  ;;  %v69_v11 = vld [vmem:[%s17290_s0 + $0x158] sm:$0xff] }
  0x24   :  { %1064 = vmatmul.bf16.vlgmr.msra.gmra.mxu3 %v474_v63  ;;  %v402_v63 = vunpack.c.h.b16 %v63_v53  ;;  %v13719_v1 = vpack.c.b16 %v400_v59, %v394_v57  ;;  %v12532_v32 = vld [vmem:[%s17289_s1 + $0x2d8] sm:$0xff]  ;;  %v420_v57 = vunpack.c.h.b16 %v72_v43 }
  0x25   :  { %v13721_v2 = vpack.c.b16 %v401_v62, %v395_v60 }
  0x26   :  { %1116 = vmatpush.bf16.msrb.mxu0 %v12527_v5  ;;  %v13723_v3 = vpack.c.b16 %v402_v63, %v396_v61  ;;  %v68_v5 = vld [vmem:[%s17290_s0 + $0x150] sm:$0xff] }
  0x27   :  { %1175 = vmatpush.bf16.msrb.mxu1 %v12535_v6  ;;  %v489_v6 = vpack.c.b16 %v393_v56, %v387_v29  ;;  %v419_v56 = vunpack.c.l.b16 %v72_v43  ;;  %v12522_v43 = vld [vmem:[%s17289_s1 + $0x288] sm:$0xff] }
  0x2a   :  { %1117 = vmatpush.bf16.msrb.mxu0 %v12526_v14  ;;  %v491_v14 = vpack.c.b16 %v395_v60, %v389_v21  ;;  %v71_v21 = vld [vmem:[%s17290_s0 + $0x168] sm:$0xff]  ;;  %v425_v60 = vunpack.c.l.b16 %v75_v44 }
  0x2b   :  { %1176 = vmatpush.bf16.msrb.mxu1 %v12534_v15  ;;  %v492_v15 = vpack.c.b16 %v396_v61, %v390_v33  ;;  %v74_v33 = vld [vmem:[%s17290_s0 + $0x180] sm:$0xff]  ;;  %v417_v52 = vunpack.c.l.b16 %v71_v21  ;;  %v418_v53 = vunpack.c.h.b16 %v71_v21  ;;  %v426_v61 = vunpack.c.h.b16 %v75_v44  ;;  %v12530_v44 = vld [vmem:[%s17289_s1 + $0x2c8] sm:$0xff] }
  0x2c   :  { %v13767_v4 = vpack.c.b16 %v425_v60, %v419_v56 }
  0x2e   :  { %1118 = vmatpush.bf16.msrb.mxu0 %v12525_v34  ;;  %v495_v34 = vpack.c.b16 %v405_v16, %v399_v58  ;;  %17350 = vst [vmem:[#allocation7_spill] sm:$0xff] %v13767_v4 }
  0x2f   :  { %1177 = vmatpush.bf16.msrb.mxu1 %v12533_v39  ;;  %v496_v39 = vpack.c.b16 %v406_v17, %v400_v59 }
  0x31   :  { %892 = vmatmul.bf16.gmra.mxu0 %v477_v18  ;;  %v411_v18 = vunpack.c.l.b16 %v68_v5 }
  0x32   :  { %951 = vmatmul.bf16.gmra.mxu1 %v478_v19  ;;  %v412_v19 = vunpack.c.h.b16 %v68_v5  ;;  %1119 = vmatpush.bf16.msrb.mxu0 %v12524_v31  ;;  %v12531_v5 = vld [vmem:[%s17289_s1 + $0x2d0] sm:$0xff] }
  0x33   :  { %1010 = vmatmul.bf16.gmra.mxu2 %v479_v23  ;;  %v413_v23 = vunpack.c.l.b16 %v69_v11  ;;  %v13737_v25 = vpack.c.b16 %v411_v18, %v405_v16  ;;  %1178 = vmatpush.bf16.msrb.mxu1 %v12532_v32  ;;  %v501_v8 = vpack.c.b16 %v417_v52, %v411_v18 }
  0x34   :  { %1069 = vmatmul.bf16.gmra.mxu3 %v480_v24  ;;  %v414_v24 = vunpack.c.h.b16 %v69_v11  ;;  %v13739_v28 = vpack.c.b16 %v412_v19, %v406_v17  ;;  %v502_v11 = vpack.c.b16 %v418_v53, %v412_v19 }
  0x35   :  { %v13741_v29 = vpack.c.b16 %v413_v23, %v407_v20  ;;  %v503_v16 = vpack.c.b16 %v419_v56, %v413_v23  ;;  %v13820_v56 = vld [vmem:[%s17290_s0 + $0x1e0] sm:$0xff] }
  0x36   :  { %v13746_v26 = vpack.c.b16 %v414_v24, %v408_v22  ;;  %v504_v17 = vpack.c.b16 %v420_v57, %v414_v24 }
  0x37   :  { %17348 = vst [vmem:[#allocation5_spill] sm:$0xff] %v13741_v29  ;;  %1179 = vmatpush.bf16.msrb.mxu1 %v12531_v5 }
  0x38   :  { %17349 = vst [vmem:[#allocation6_spill] sm:$0xff] %v13746_v26 }
  0x3b   :  { %1180 = vmatpush.bf16.msrb.mxu1 %v12530_v44  ;;  %v35_v44 = vld [vmem:[%s17290_s0 + $0x48] sm:$0x88] }
  0x3c   :  { %v1237_v50 = vunpack.c.h.b16 %v35_v44 }
  0x41   :  { %897 = vmatmul.bf16.gmra.mxu0 %v483_v47  ;;  %v497_v47 = vpack.c.b16 %v407_v20, %v401_v62  ;;  %v13769_v62 = vpack.c.b16 %v426_v61, %v420_v57  ;;  %v13825_v57 = vld [vmem:[%s17290_s0 + $0x1e8] sm:$0xff] }
  0x42   :  { %956 = vmatmul.bf16.gmra.mxu1 %v484_v48  ;;  %v498_v48 = vpack.c.b16 %v408_v22, %v402_v63  ;;  %v12523_v63 = vld [vmem:[%s17289_s1 + $0x290] sm:$0xff] }
  0x43   :  { %1015 = vmatmul.bf16.gmra.mxu2 %v485_v54  ;;  %v423_v54 = vunpack.c.l.b16 %v74_v33  ;;  %17351 = vst [vmem:[#allocation8_spill] sm:$0xff] %v13769_v62  ;;  %1120 = vmatpush.bf16.msrb.mxu0 %v12523_v63 }
  0x44   :  { %1074 = vmatmul.bf16.gmra.mxu3 %v486_v55  ;;  %v424_v55 = vunpack.c.h.b16 %v74_v33 }
  0x45   :  { %v13763_v58 = vpack.c.b16 %v423_v54, %v417_v52 }
  0x46   :  { %v13765_v59 = vpack.c.b16 %v424_v55, %v418_v53  ;;  %v84_v53 = vld [vmem:[%s17290_s0 + $0x1d0] sm:$0xff] }
  0x47   :  { %1121 = vmatpush.bf16.msrb.mxu0 %v12522_v43  ;;  %v12446_v43 = vld [vmem:[%s17289_s1 + $0x28] sm:$0xff] }
  0x51   :  { %902 = vmatmul.bf16.gmra.mxu0 %v489_v6  ;;  %v77_v6 = vld [vmem:[%s17290_s0 + $0x198] sm:$0xff] }
  0x52   :  { %961 = vmatmul.bf16.gmra.mxu1 %v490_v7  ;;  %v13783_v7 = vld [vmem:[%s17290_s0 + $0x1b0] sm:$0xff]  ;;  %v429_v20 = vunpack.c.l.b16 %v77_v6  ;;  %v430_v22 = vunpack.c.h.b16 %v77_v6 }
  0x53   :  { %1020 = vmatmul.bf16.gmra.mxu2 %v491_v14  ;;  %v78_v14 = vld [vmem:[%s17290_s0 + $0x1a0] sm:$0xff]  ;;  %v435_v31 = vunpack.c.l.b16 %v13783_v7  ;;  %v436_v32 = vunpack.c.h.b16 %v13783_v7 }
  0x54   :  { %1079 = vmatmul.bf16.gmra.mxu3 %v492_v15  ;;  %v13791_v15 = vld [vmem:[%s17290_s0 + $0x1b8] sm:$0xff]  ;;  %v431_v21 = vunpack.c.l.b16 %v78_v14  ;;  %v432_v18 = vunpack.c.h.b16 %v78_v14  ;;  %v508_v52 = vpack.c.b16 %v430_v22, %v424_v55  ;;  %v17305_v55 = vunpack.c.h.b16 %v13820_v56 }
  0x55   :  { %v437_v19 = vunpack.c.l.b16 %v13791_v15  ;;  %v438_v33 = vunpack.c.h.b16 %v13791_v15  ;;  %v17304_v14 = vunpack.c.l.b16 %v13825_v57  ;;  %v17302_v15 = vunpack.c.h.b16 %v13825_v57 }
  0x56   :  { %v509_v63 = vpack.c.b16 %v431_v21, %v425_v60  ;;  %v510_v5 = vpack.c.b16 %v432_v18, %v426_v61  ;;  %v12448_v61 = vld [vmem:[%s17289_s1 + $0x38] sm:$0xff] }
  0x57   :  { %v13801_v23 = vpack.c.b16 %v437_v19, %v431_v21  ;;  %v13803_v24 = vpack.c.b16 %v438_v33, %v432_v18  ;;  %2245 = vmatpush.bf16.msrb.mxu2 %v12448_v61  ;;  %v12447_v21 = vld [vmem:[%s17289_s1 + $0x30] sm:$0xff] }
  0x58   :  { %v12455_v18 = vld [vmem:[%s17289_s1 + $0x70] sm:$0xff] }
  0x59   :  { %17352 = vst [vmem:[#allocation9_spill] sm:$0xff] %v13801_v23  ;;  %v13884_v61 = vld [vmem:[%s17290_s0 + $0x210] sm:$0xff] }
  0x5a   :  { %17353 = vst [vmem:[#allocation10_spill] sm:$0xff] %v13803_v24 }
  0x5b   :  { %2246 = vmatpush.bf16.msrb.mxu2 %v12447_v21 }
  0x5f   :  { %2247 = vmatpush.bf16.msrb.mxu2 %v12446_v43  ;;  %v12453_v43 = vld [vmem:[%s17289_s1 + $0x60] sm:$0xff] }
  0x61   :  { %907 = vmatmul.bf16.gmra.mxu0 %v495_v34  ;;  %v13797_v34 = vpack.c.b16 %v435_v31, %v429_v20 }
  0x62   :  { %966 = vmatmul.bf16.gmra.mxu1 %v496_v39  ;;  %v13799_v39 = vpack.c.b16 %v436_v32, %v430_v22  ;;  %v12456_v22 = vld [vmem:[%s17289_s1 + $0x78] sm:$0xff] }
  0x63   :  { %1025 = vmatmul.bf16.gmra.mxu2 %v497_v47  ;;  %v83_v47 = vld [vmem:[%s17290_s0 + $0x1c8] sm:$0xff]  ;;  %2304 = vmatpush.bf16.msrb.mxu3 %v12456_v22  ;;  %v1236_v22 = vunpack.c.l.b16 %v35_v44 }
  0x64   :  { %1084 = vmatmul.bf16.gmra.mxu3 %v498_v48  ;;  %v507_v48 = vpack.c.b16 %v429_v20, %v423_v54  ;;  %v441_v6 = vunpack.c.l.b16 %v83_v47  ;;  %v442_v7 = vunpack.c.h.b16 %v83_v47  ;;  %v447_v54 = vunpack.c.l.b16 %v13820_v56  ;;  %v12454_v47 = vld [vmem:[%s17289_s1 + $0x68] sm:$0xff] }
  0x65   :  { %v1242_v44 = vpack.c.b16 %v351_v45, %v1236_v22  ;;  %v1318_v22 = vshrl.u32 %v13566_v30, 16 }
  0x66   :  { %v13837_v60 = vpack.c.b16 %v17305_v55, %v442_v7 }
  0x67   :  { %2305 = vmatpush.bf16.msrb.mxu3 %v12455_v18  ;;  %v1313_v45 = vshll.u32 %v1242_v44, 16 }
  0x6b   :  { %2306 = vmatpush.bf16.msrb.mxu3 %v12454_v47 }
  0x6f   :  { %2307 = vmatpush.bf16.msrb.mxu3 %v12453_v43  ;;  %v1321_v43 = vshll.u32 %v13566_v30, 16  ;;  %v1338_v30 = vshll.u32 %v13594_v41, 16 }
  0x71   :  { %912 = vmatmul.bf16.gmra.mxu0 %v501_v8  ;;  %v443_v8 = vunpack.c.l.b16 %v84_v53 }
  0x72   :  { %971 = vmatmul.bf16.gmra.mxu1 %v502_v11  ;;  %v444_v11 = vunpack.c.h.b16 %v84_v53  ;;  %v514_v53 = vpack.c.b16 %v442_v7, %v436_v32  ;;  %v13892_v32 = vld [vmem:[%s17290_s0 + $0x218] sm:$0xff] }
  0x73   :  { %1030 = vmatmul.bf16.gmra.mxu2 %v503_v16  ;;  %v13833_v16 = vpack.c.b16 %v447_v54, %v441_v6  ;;  %v515_v21 = vpack.c.b16 %v443_v8, %v437_v19  ;;  %v17301_v19 = vunpack.c.l.b16 %v13884_v61  ;;  %v17299_v47 = vunpack.c.l.b16 %v13892_v32 }
  0x74   :  { %1089 = vmatmul.bf16.gmra.mxu3 %v504_v17  ;;  %v13844_v17 = vpack.c.b16 %v17304_v14, %v443_v8  ;;  %v13848_v20 = vpack.c.b16 %v17302_v15, %v444_v11  ;;  %v516_v18 = vpack.c.b16 %v444_v11, %v438_v33  ;;  %v17300_v33 = vunpack.c.h.b16 %v13884_v61  ;;  %v12529_v11 = vld [vmem:[%s17289_s1 + $0x2c0] sm:$0xff] }
  0x75   :  { %1181 = vmatpush.bf16.msrb.mxu1 %v12529_v11  ;;  %v1323_v15 = vrot.slane %v1321_v43, 4 }
  0x76   :  { %17354 = vst [vmem:[#allocation11_spill] sm:$0xff] %v13844_v17 }
  0x77   :  { %17355 = vst [vmem:[#allocation12_spill] sm:$0xff] %v13848_v20 }
  0x81   :  { %917 = vmatmul.bf16.gmra.mxu0 %v507_v48  ;;  %v13871_v48 = vld [vmem:[%s17290_s0 + $0x1f8] sm:$0xff] }
  0x82   :  { %976 = vmatmul.bf16.gmra.mxu1 %v508_v52  ;;  %v513_v52 = vpack.c.b16 %v441_v6, %v435_v31  ;;  %v12521_v31 = vld [vmem:[%s17289_s1 + $0x280] sm:$0xff]  ;;  %v453_v6 = vunpack.c.l.b16 %v13871_v48  ;;  %v454_v7 = vunpack.c.h.b16 %v13871_v48 }
  0x83   :  { %1035 = vmatmul.bf16.gmra.mxu2 %v509_v63  ;;  %v13876_v63 = vld [vmem:[%s17290_s0 + $0x200] sm:$0xff]  ;;  %1122 = vmatpush.bf16.msrb.mxu0 %v12521_v31  ;;  %v12444_v31 = vld [vmem:[%s17289_s1 + $0x18] sm:$0xff] }
  0x84   :  { %1094 = vmatmul.bf16.gmra.mxu3 %v510_v5  ;;  %v12445_v5 = vld [vmem:[%s17289_s1 + $0x20] sm:$0xff]  ;;  %v455_v8 = vunpack.c.l.b16 %v13876_v63  ;;  %v13908_v48 = vpack.c.b16 %v17301_v19, %v453_v6  ;;  %v1320_v19 = vrot.slane %v1318_v22, 3  ;;  %v519_v55 = vpack.c.b16 %v453_v6, %v447_v54 }
  0x85   :  { %2248 = vmatpush.bf16.msrb.mxu2 %v12445_v5  ;;  %v13912_v5 = vpack.c.b16 %v17300_v33, %v454_v7  ;;  %v1310_v33 = vshrl.u32 %v1242_v44, 16 }
  0x86   :  { %v13919_v49 = vpack.c.b16 %v17299_v47, %v455_v8  ;;  %v17303_v47 = vunpack.c.h.b16 %v13892_v32  ;;  %v13964_v6 = vor.u32 %v1323_v15, %v1320_v19  ;;  %v12472_v15 = vld [vmem:[%s17289_s1 + $0xf8] sm:$0xff] }
  0x87   :  { %v1312_v44 = vrot.slane %v1310_v33, 3  ;;  %2422 = vmatpush.bf16.msra.mxu1 %v12472_v15  ;;  %v14014_v15 = vld [vmem:[%s17290_s0 + $0xa0] sm:$0xff] }
  0x88   :  { %17356 = vst [vmem:[#allocation13_spill] sm:$0xff] %v13919_v49  ;;  %v17316_v20 = vunpack.c.l.b16 %v14014_v15 }
  0x89   :  { %2249 = vmatpush.bf16.msrb.mxu2 %v12444_v31  ;;  %v1335_v31 = vshrl.u32 %v13594_v41, 16  ;;  %v12441_v41 = vld [vmem:[%s17289_s1] sm:$0xff] }
  0x8b   :  { %v1337_v33 = vrot.slane %v1335_v31, 3 }
  0x91   :  { %922 = vmatmul.bf16.gmra.mxu0 %v513_v52  ;;  %v12452_v52 = vld [vmem:[%s17289_s1 + $0x58] sm:$0xff] }
  0x92   :  { %981 = vmatmul.bf16.gmra.mxu1 %v514_v53  ;;  %v1243_v53 = vpack.c.b16 %v352_v46, %v1237_v50  ;;  %2308 = vmatpush.bf16.msrb.mxu3 %v12452_v52  ;;  %v12442_v50 = vld [vmem:[%s17289_s1 + $0x8] sm:$0xff]  ;;  %v1315_v52 = vrot.slane %v1313_v45, 4  ;;  %v1340_v45 = vrot.slane %v1338_v30, 4 }
  0x93   :  { %1040 = vmatmul.bf16.gmra.mxu2 %v515_v21  ;;  %v12443_v21 = vld [vmem:[%s17289_s1 + $0x10] sm:$0xff] }
  0x94   :  { %1099 = vmatmul.bf16.gmra.mxu3 %v516_v18  ;;  %v456_v18 = vunpack.c.h.b16 %v13876_v63  ;;  %2250 = vmatpush.bf16.msrb.mxu2 %v12443_v21  ;;  %v1327_v63 = vshrl.u32 %v1243_v53, 16  ;;  %v1330_v11 = vshll.u32 %v1243_v53, 16  ;;  %v17358_v53 = vunpack.c.h.b16 %v13820_v56  ;;  %v12449_v56 = vld [vmem:[%s17289_s1 + $0x40] sm:$0xff] }
  0x95   :  { %v1316_v54 = vor.u32 %v1315_v52, %v1312_v44 }
  0x96   :  { %v13940_v46 = vpack.c.b16 %v17303_v47, %v456_v18  ;;  %2309 = vmatpush.bf16.msrb.mxu3 %v12451_v37  ;;  %v12450_v47 = vld [vmem:[%s17289_s1 + $0x48] sm:$0xff]  ;;  %v1329_v21 = vrot.slane %v1327_v63, 3  ;;  %v1332_v14 = vrot.slane %v1330_v11, 4  ;;  %v17359_v37 = vunpack.c.l.b16 %v13825_v57 }
  0x98   :  { %17357 = vst [vmem:[#allocation14_spill] sm:$0xff] %v13940_v46  ;;  %2251 = vmatpush.bf16.msrb.mxu2 %v12442_v50  ;;  %v520_v46 = vpack.c.b16 %v454_v7, %v17358_v53  ;;  %v521_v49 = vpack.c.b16 %v455_v8, %v17359_v37  ;;  %v17360_v50 = vunpack.c.h.b16 %v13825_v57  ;;  %v13968_v7 = vsel %vm1308_vm0, %v1316_v54, %v13964_v6  ;;  %v12464_v57 = vld [vmem:[%s17289_s1 + $0xb8] sm:$0xff] }
  0x99   :  { %v1333_v8 = vor.u32 %v1332_v14, %v1329_v21  ;;  %2363 = vmatpush.bf16.msra.mxu0 %v12464_v57  ;;  %v96_v14 = vld [vmem:[%s17290_s0 + $0x230] sm:$0xff]  ;;  %v17363_v37 = vunpack.c.l.b16 %v13884_v61 }
  0x9a   :  { %v522_v63 = vpack.c.b16 %v456_v18, %v17360_v50  ;;  %2310 = vmatpush.bf16.msrb.mxu3 %v12450_v47  ;;  %v1341_v47 = vor.u32 %v1340_v45, %v1337_v33  ;;  %v13993_v33 = vunpack.c.h.b16 %v96_v14  ;;  %v13998_v45 = vld [vmem:[%s17290_s0 + $0x88] sm:$0xff] }
  0x9c   :  { %2252 = vmatpush.bf16.msrb.mxu2 %v12441_v41  ;;  %v13991_v41 = vunpack.c.l.b16 %v96_v14  ;;  %17362 = vst [vmem:[#allocation16_spill] sm:$0xff] %v13993_v33 }
  0x9e   :  { %v888_v22 = vpop.f32.mrf.mxu0  ;;  %2311 = vmatpush.bf16.msrb.mxu3 %v12449_v56  ;;  %17361 = vst [vmem:[#allocation15_spill] sm:$0xff] %v13991_v41  ;;  %v17365_v56 = vunpack.c.l.b16 %v13892_v32 }
  0x9f   :  { %v947_v43 = vpop.f32.mrf.mxu1 }
  0xa0   :  { %v948_v11 = vadd.f32 %v947_v43, %v888_v22  ;;  %v1412_v22 = vshrl.u32 %v13658_v9, 16  ;;  %v1415_v43 = vshll.u32 %v13658_v9, 16  ;;  %v527_v54 = vpack.c.b16 %v13991_v41, %v17365_v56  ;;  %v14019_v9 = vld [vmem:[%s17290_s0 + $0xb8] sm:$0xff] }
  0xa1   :  { %927 = vmatmul.bf16.gmra.mxu0 %v519_v55  ;;  %v13977_v55 = vsel %vm1308_vm0, %v1333_v8, %v1341_v47  ;;  %v362_v56 = vunpack.c.h.b16 %v13998_v45 }
  0xa2   :  { %986 = vmatmul.bf16.gmra.mxu1 %v520_v46 }
  0xa3   :  { %1045 = vmatmul.bf16.gmra.mxu2 %v521_v49  ;;  %v95_v49 = vld [vmem:[%s17290_s0 + $0x228] sm:$0xff] }
  0xa4   :  { %1104 = vmatmul.bf16.gmra.mxu3 %v522_v63  ;;  %v13987_v21 = vunpack.c.l.b16 %v95_v49  ;;  %v13989_v53 = vunpack.c.h.b16 %v95_v49  ;;  %v17364_v63 = vunpack.c.h.b16 %v13884_v61  ;;  %v1417_v61 = vrot.slane %v1415_v43, 4 }
  0xa5   :  { %v1424_v49 = vshll.u32 %v13660_v10, 16 }
  0xa6   :  { %v1006_v19 = vpop.f32.mrf.mxu2  ;;  %v890_v31 = vpop.f32.mrf.mxu0  ;;  %v525_v50 = vpack.c.b16 %v13987_v21, %v17363_v37 }
  0xa7   :  { %v1065_v18 = vpop.f32.mrf.mxu3  ;;  %v1007_v46 = vadd.f32 %v1006_v19, %v948_v11  ;;  %v949_v30 = vpop.f32.mrf.mxu1  ;;  %v526_v11 = vpack.c.b16 %v13989_v53, %v17364_v63  ;;  %v1414_v19 = vrot.slane %v1412_v22, 3  ;;  %v361_v63 = vunpack.c.l.b16 %v13998_v45 }
  0xa8   :  { %v950_v44 = vadd.f32 %v949_v30, %v890_v31  ;;  %v17366_v30 = vunpack.c.h.b16 %v13892_v32  ;;  %v17315_v32 = vunpack.c.l.b16 %v14019_v9 }
  0xa9   :  { %v13985_v52 = vadd.f32 %v1065_v18, %v1007_v46  ;;  %v1421_v18 = vshrl.u32 %v13660_v10, 16  ;;  %v1418_v22 = vor.u32 %v1417_v61, %v1414_v19  ;;  %v14034_v10 = vld [vmem:[%s17290_s0 + $0xd0] sm:$0xff]  ;;  %v14041_v19 = vpack.c.b16 %v17316_v20, %v361_v63 }
  0xaa   :  { %v528_v37 = vpack.c.b16 %v13993_v33, %v17366_v30  ;;  %v17312_v45 = vunpack.c.l.b16 %v14034_v10  ;;  %v17311_v61 = vunpack.c.h.b16 %v14034_v10 }
  0xab   :  { %v1423_v43 = vrot.slane %v1421_v18, 3 }
  0xae   :  { %v1008_v8 = vpop.f32.mrf.mxu2  ;;  %v893_v46 = vpop.f32.mrf.mxu0 }
  0xaf   :  { %v1067_v57 = vpop.f32.mrf.mxu3  ;;  %v1009_v14 = vadd.f32 %v1008_v8, %v950_v44  ;;  %v952_v31 = vpop.f32.mrf.mxu1  ;;  %v17314_v44 = vunpack.c.h.b16 %v14014_v15  ;;  %v1426_v8 = vrot.slane %v1424_v49, 4  ;;  %v14057_v49 = vpack.c.b16 %v17312_v45, %v17315_v32 }
  0xb0   :  { %v953_v41 = vadd.f32 %v952_v31, %v893_v46  ;;  %v1469_v45 = vshll.u32 %v13691_v35, 16 }
  0xb1   :  { %v14029_v17 = vadd.f32 %v1067_v57, %v1009_v14  ;;  %932 = vmatmul.bf16.gmra.mxu0 %v525_v50  ;;  %v17313_v57 = vunpack.c.h.b16 %v14019_v9  ;;  %v14047_v18 = vpack.c.b16 %v17314_v44, %v362_v56  ;;  %v14051_v50 = vsel %vm1308_vm0, %v13964_v6, %v1418_v22 }
  0xb2   :  { %991 = vmatmul.bf16.gmra.mxu1 %v526_v11  ;;  %v1427_v11 = vor.u32 %v1426_v8, %v1423_v43  ;;  %v14071_v43 = vld [vmem:[%s17290_s0 + $0x70] sm:$0xff]  ;;  %v1478_v44 = vshll.u32 %v13693_v36, 16  ;;  %v1471_v24 = vrot.slane %v1469_v45, 4 }
  0xb3   :  { %1050 = vmatmul.bf16.gmra.mxu2 %v527_v54  ;;  %v14063_v54 = vpack.c.b16 %v17311_v61, %v17313_v57  ;;  %v12463_v8 = vld [vmem:[%s17289_s1 + $0xb0] sm:$0xff]  ;;  %v1466_v61 = vshrl.u32 %v13691_v35, 16  ;;  %v17325_v32 = vunpack.c.l.b16 %v14071_v43  ;;  %v17324_v20 = vunpack.c.h.b16 %v14071_v43 }
  0xb4   :  { %1109 = vmatmul.bf16.gmra.mxu3 %v528_v37  ;;  %v14066_v14 = vsel %vm1308_vm0, %v1341_v47, %v1427_v11  ;;  %2364 = vmatpush.bf16.msra.mxu0 %v12463_v8 }
  0xb5   :  { %v1468_v33 = vrot.slane %v1466_v61, 3  ;;  %v476_v8 = vpack.c.b16 %v362_v56, %v17324_v20 }
  0xb6   :  { %v1011_v46 = vpop.f32.mrf.mxu2  ;;  %v895_v30 = vpop.f32.mrf.mxu0 }
  0xb7   :  { %v1070_v31 = vpop.f32.mrf.mxu3  ;;  %v1012_v6 = vadd.f32 %v1011_v46, %v953_v41  ;;  %v954_v37 = vpop.f32.mrf.mxu1  ;;  %v12471_v41 = vld [vmem:[%s17289_s1 + $0xf0] sm:$0xff]  ;;  %v1475_v46 = vshrl.u32 %v13693_v36, 16  ;;  %v1472_v26 = vor.u32 %v1471_v24, %v1468_v33  ;;  %v1523_v33 = vshll.u32 %v13717_v0, 16 }
  0xb8   :  { %v955_v47 = vadd.f32 %v954_v37, %v895_v30  ;;  %2423 = vmatpush.bf16.msra.mxu1 %v12471_v41  ;;  %v1480_v30 = vrot.slane %v1478_v44, 4  ;;  %v475_v37 = vpack.c.b16 %v361_v63, %v17325_v32 }
  0xb9   :  { %v14078_v57 = vadd.f32 %v1070_v31, %v1012_v6  ;;  %v1477_v35 = vrot.slane %v1475_v46, 3  ;;  %v14094_v45 = vsel %vm1308_vm0, %v1418_v22, %v1472_v26 }
  0xbb   :  { %v1481_v44 = vor.u32 %v1480_v30, %v1477_v35  ;;  %v1525_v35 = vrot.slane %v1523_v33, 4 }
  0xbd   :  { %v14099_v63 = vsel %vm1308_vm0, %v1427_v11, %v1481_v44  ;;  %v1529_v11 = vshrl.u32 %v13719_v1, 16 }
  0xbe   :  { %v1013_v31 = vpop.f32.mrf.mxu2  ;;  %v898_v62 = vpop.f32.mrf.mxu0 }
  0xbf   :  { %v1072_v6 = vpop.f32.mrf.mxu3  ;;  %v1014_v23 = vadd.f32 %v1013_v31, %v955_v47  ;;  %v957_v36 = vpop.f32.mrf.mxu1  ;;  %v1531_v30 = vrot.slane %v1529_v11, 3 }
  0xc0   :  { %v958_v4 = vadd.f32 %v957_v36, %v898_v62 }
  0xc1   :  { %v14091_v29 = vadd.f32 %v1072_v6, %v1014_v23  ;;  %1123 = vmatmul.bf16.vlgmr.msrb.gmra.mxu0 %v475_v37  ;;  %v1520_v23 = vshrl.u32 %v13717_v0, 16  ;;  %v55_v0 = vld [vmem:[%s17290_s0 + $0xe8] sm:$0xff]  ;;  %v17367_v37 = vunpack.c.l.b16 %v14014_v15 }
  0xc2   :  { %1182 = vmatmul.bf16.vlgmr.msrb.gmra.mxu1 %v476_v8  ;;  %v17368_v8 = vunpack.c.l.b16 %v14019_v9 }
  0xc3   :  { %2253 = vmatmul.bf16.vlgmr.msrb.gmra.mxu2 %v13968_v7  ;;  %v12462_v7 = vld [vmem:[%s17289_s1 + $0xa8] sm:$0xff]  ;;  %v1522_v46 = vrot.slane %v1520_v23, 3 }
  0xc4   :  { %2312 = vmatmul.bf16.vlgmr.msrb.gmra.mxu3 %v13977_v55  ;;  %v12470_v55 = vld [vmem:[%s17289_s1 + $0xe8] sm:$0xff]  ;;  %2365 = vmatpush.bf16.msra.mxu0 %v12462_v7  ;;  %v481_v36 = vpack.c.b16 %v17368_v8, %v17367_v37  ;;  %v385_v7 = vunpack.c.l.b16 %v55_v0 }
  0xc5   :  { %2424 = vmatpush.bf16.msra.mxu1 %v12470_v55  ;;  %v386_v55 = vunpack.c.h.b16 %v55_v0 }
  0xc6   :  { %v1016_v56 = vpop.f32.mrf.mxu2  ;;  %v900_v62 = vpop.f32.mrf.mxu0 }
  0xc7   :  { %v1075_v61 = vpop.f32.mrf.mxu3  ;;  %v1017_v47 = vadd.f32 %v1016_v56, %v958_v4  ;;  %v959_v24 = vpop.f32.mrf.mxu1  ;;  %v1532_v4 = vshll.u32 %v13719_v1, 16  ;;  %v17369_v56 = vunpack.c.h.b16 %v14014_v15  ;;  %v17370_v1 = vunpack.c.h.b16 %v14019_v9 }
  0xc8   :  { %v960_v41 = vadd.f32 %v959_v24, %v900_v62  ;;  %v1526_v15 = vor.u32 %v1525_v35, %v1522_v46 }
  0xc9   :  { %v14103_v22 = vadd.f32 %v1075_v61, %v1017_v47  ;;  %v482_v61 = vpack.c.b16 %v17370_v1, %v17369_v56  ;;  %v14127_v47 = vld [vmem:[%s17290_s0 + $0x100] sm:$0xff]  ;;  %v1534_v62 = vrot.slane %v1532_v4, 4  ;;  %v1574_v1 = vshrl.u32 %v13737_v25, 16 }
  0xca   :  { %v17327_v20 = vunpack.c.l.b16 %v14127_v47  ;;  %v17326_v37 = vunpack.c.h.b16 %v14127_v47  ;;  %v14144_v4 = vsel %vm1308_vm0, %v1472_v26, %v1526_v15  ;;  %v1586_v26 = vshll.u32 %v13739_v28, 16 }
  0xcb   :  { %v1535_v46 = vor.u32 %v1534_v62, %v1531_v30  ;;  %v1576_v30 = vrot.slane %v1574_v1, 3 }
  0xcc   :  { %v14135_v9 = vpack.c.b16 %v17327_v20, %v385_v7 }
  0xcd   :  { %v14147_v35 = vsel %vm1308_vm0, %v1481_v44, %v1535_v46  ;;  %v61_v44 = vld [vmem:[%s17290_s0 + $0x118] sm:$0xff] }
  0xce   :  { %v1018_v31 = vpop.f32.mrf.mxu2  ;;  %v903_v23 = vpop.f32.mrf.mxu0 }
  0xcf   :  { %v1077_v6 = vpop.f32.mrf.mxu3  ;;  %v1019_v24 = vadd.f32 %v1018_v31, %v960_v41  ;;  %v962_v33 = vpop.f32.mrf.mxu1  ;;  %v14139_v41 = vpack.c.b16 %v17326_v37, %v386_v55  ;;  %v398_v37 = vunpack.c.h.b16 %v61_v44 }
  0xd0   :  { %v963_v11 = vadd.f32 %v962_v33, %v903_v23 }
  0xd1   :  { %v14131_v8 = vadd.f32 %v1077_v6, %v1019_v24  ;;  %1128 = vmatmul.bf16.gmra.mxu0 %v481_v36 }
  0xd2   :  { %1187 = vmatmul.bf16.gmra.mxu1 %v482_v61  ;;  %v1577_v61 = vshll.u32 %v13737_v25, 16  ;;  %v17373_v25 = vunpack.c.h.b16 %v14034_v10 }
  0xd3   :  { %2258 = vmatmul.bf16.gmra.mxu2 %v14051_v50 }
  0xd4   :  { %2317 = vmatmul.bf16.gmra.mxu3 %v14066_v14  ;;  %v1583_v14 = vshrl.u32 %v13739_v28, 16  ;;  %v1579_v62 = vrot.slane %v1577_v61, 4  ;;  %v1588_v28 = vrot.slane %v1586_v26, 4  ;;  %v397_v61 = vunpack.c.l.b16 %v61_v44 }
  0xd6   :  { %v1021_v0 = vpop.f32.mrf.mxu2  ;;  %v905_v36 = vpop.f32.mrf.mxu0  ;;  %v1585_v23 = vrot.slane %v1583_v14, 3  ;;  %v12461_v14 = vld [vmem:[%s17289_s1 + $0xa0] sm:$0xff] }
  0xd7   :  { %v1080_v31 = vpop.f32.mrf.mxu3  ;;  %v1022_v6 = vadd.f32 %v1021_v0, %v963_v11  ;;  %v964_v56 = vpop.f32.mrf.mxu1  ;;  %v17372_v0 = vunpack.c.l.b16 %v14034_v10  ;;  %2366 = vmatpush.bf16.msra.mxu0 %v12461_v14 }
  0xd8   :  { %v965_v24 = vadd.f32 %v964_v56, %v905_v36 }
  0xd9   :  { %v14151_v50 = vadd.f32 %v1080_v31, %v1022_v6  ;;  %v487_v32 = vpack.c.b16 %v385_v7, %v17372_v0  ;;  %v488_v31 = vpack.c.b16 %v386_v55, %v17373_v25  ;;  %v14165_v6 = vld [vmem:[%s17290_s0 + $0x130] sm:$0xff]  ;;  %v1580_v55 = vor.u32 %v1579_v62, %v1576_v30 }
  0xda   :  { %v17329_v7 = vunpack.c.l.b16 %v14165_v6  ;;  %v17328_v10 = vunpack.c.h.b16 %v14165_v6  ;;  %v1589_v62 = vor.u32 %v1588_v28, %v1585_v23 }
  0xdb   :  { %17371 = vst [vmem:[#allocation17_spill] sm:$0xff] %v14151_v50  ;;  %v14188_v30 = vsel %vm1308_vm0, %v1526_v15, %v1580_v55  ;;  %v1640_v15 = vshll.u32 %v13765_v59, 16 }
  0xdc   :  { %v14179_v26 = vpack.c.b16 %v17329_v7, %v397_v61  ;;  %v14183_v44 = vpack.c.b16 %v17328_v10, %v398_v37  ;;  %v17376_v10 = vunpack.c.l.b16 %v14127_v47 }
  0xde   :  { %v1023_v33 = vpop.f32.mrf.mxu2  ;;  %v908_v56 = vpop.f32.mrf.mxu0  ;;  %v493_v7 = vpack.c.b16 %v397_v61, %v17376_v10 }
  0xdf   :  { %v1082_v11 = vpop.f32.mrf.mxu3  ;;  %v1024_v36 = vadd.f32 %v1023_v33, %v965_v24  ;;  %v967_v1 = vpop.f32.mrf.mxu1  ;;  %v12469_v24 = vld [vmem:[%s17289_s1 + $0xe0] sm:$0xff] }
  0xe0   :  { %v968_v20 = vadd.f32 %v967_v1, %v908_v56  ;;  %2425 = vmatpush.bf16.msra.mxu1 %v12469_v24  ;;  %v1628_v56 = vshrl.u32 %v13763_v58, 16  ;;  %v1631_v1 = vshll.u32 %v13763_v58, 16  ;;  %v17377_v58 = vunpack.c.h.b16 %v14127_v47 }
  0xe1   :  { %v14172_v0 = vadd.f32 %v1082_v11, %v1024_v36  ;;  %1133 = vmatmul.bf16.gmra.mxu0 %v487_v32  ;;  %v14191_v32 = vsel %vm1308_vm0, %v1535_v46, %v1589_v62  ;;  %v67_v46 = vld [vmem:[%s17290_s0 + $0x148] sm:$0xff] }
  0xe2   :  { %1192 = vmatmul.bf16.gmra.mxu1 %v488_v31  ;;  %v1630_v23 = vrot.slane %v1628_v56, 3  ;;  %v1633_v28 = vrot.slane %v1631_v1, 4  ;;  %v409_v1 = vunpack.c.l.b16 %v67_v46 }
  0xe3   :  { %17374 = vst [vmem:[#allocation18_spill] sm:$0xff] %v14172_v0  ;;  %2263 = vmatmul.bf16.gmra.mxu2 %v14094_v45 }
  0xe4   :  { %2322 = vmatmul.bf16.gmra.mxu3 %v14099_v63  ;;  %v1637_v63 = vshrl.u32 %v13765_v59, 16  ;;  %v1642_v59 = vrot.slane %v1640_v15, 4  ;;  %v1634_v61 = vor.u32 %v1633_v28, %v1630_v23  ;;  %v12468_v23 = vld [vmem:[%s17289_s1 + $0xd8] sm:$0xff] }
  0xe5   :  { %2426 = vmatpush.bf16.msra.mxu1 %v12468_v23 }
  0xe6   :  { %v1026_v33 = vpop.f32.mrf.mxu2  ;;  %v910_v31 = vpop.f32.mrf.mxu0 }
  0xe7   :  { %v1085_v11 = vpop.f32.mrf.mxu3  ;;  %v1027_v25 = vadd.f32 %v1026_v33, %v968_v20  ;;  %v969_v36 = vpop.f32.mrf.mxu1  ;;  %v1639_v20 = vrot.slane %v1637_v63, 3 }
  0xe8   :  { %v970_v45 = vadd.f32 %v969_v36, %v910_v31 }
  0xe9   :  { %v14195_v14 = vadd.f32 %v1085_v11, %v1027_v25  ;;  %v494_v11 = vpack.c.b16 %v398_v37, %v17377_v58  ;;  %v14209_v25 = vld [vmem:[%s17290_s0 + $0x160] sm:$0xff]  ;;  %v1643_v15 = vor.u32 %v1642_v59, %v1639_v20  ;;  %v1685_v58 = vshll.u32 %v13797_v34, 16 }
  0xea   :  { %v17331_v0 = vunpack.c.l.b16 %v14209_v25  ;;  %v17330_v50 = vunpack.c.h.b16 %v14209_v25  ;;  %v1691_v59 = vshrl.u32 %v13799_v39, 16 }
  0xeb   :  { %17375 = vst [vmem:[#allocation19_spill] sm:$0xff] %v14195_v14  ;;  %v410_v14 = vunpack.c.h.b16 %v67_v46  ;;  %v14235_v28 = vsel %vm1308_vm0, %v1589_v62, %v1643_v15  ;;  %v1687_v62 = vrot.slane %v1685_v58, 4 }
  0xec   :  { %v14217_v47 = vpack.c.b16 %v17331_v0, %v409_v1 }
  0xed   :  { %v14221_v37 = vpack.c.b16 %v17330_v50, %v410_v14 }
  0xee   :  { %v1028_v24 = vpop.f32.mrf.mxu2  ;;  %v913_v36 = vpop.f32.mrf.mxu0 }
  0xef   :  { %v1087_v33 = vpop.f32.mrf.mxu3  ;;  %v1029_v31 = vadd.f32 %v1028_v24, %v970_v45  ;;  %v972_v56 = vpop.f32.mrf.mxu1  ;;  %v14226_v45 = vsel %vm1308_vm0, %v1580_v55, %v1634_v61 }
  0xf0   :  { %v973_v63 = vadd.f32 %v972_v56, %v913_v36  ;;  %v73_v56 = vld [vmem:[%s17290_s0 + $0x178] sm:$0xff] }
  0xf1   :  { %v14213_v10 = vadd.f32 %v1087_v33, %v1029_v31  ;;  %1138 = vmatmul.bf16.gmra.mxu0 %v493_v7  ;;  %v12460_v7 = vld [vmem:[%s17289_s1 + $0x98] sm:$0xff]  ;;  %v1682_v33 = vshrl.u32 %v13797_v34, 16  ;;  %v1694_v31 = vshll.u32 %v13799_v39, 16  ;;  %v17381_v34 = vunpack.c.h.b16 %v14165_v6 }
  0xf2   :  { %1197 = vmatmul.bf16.gmra.mxu1 %v494_v11  ;;  %2367 = vmatpush.bf16.msra.mxu0 %v12460_v7  ;;  %v421_v58 = vunpack.c.l.b16 %v73_v56  ;;  %v422_v0 = vunpack.c.h.b16 %v73_v56 }
  0xf3   :  { %17378 = vst [vmem:[#allocation20_spill] sm:$0xff] %v14213_v10  ;;  %2268 = vmatmul.bf16.gmra.mxu2 %v14144_v4  ;;  %v1684_v36 = vrot.slane %v1682_v33, 3  ;;  %v1696_v39 = vrot.slane %v1694_v31, 4 }
  0xf4   :  { %2327 = vmatmul.bf16.gmra.mxu3 %v14147_v35 }
  0xf6   :  { %v1031_v4 = vpop.f32.mrf.mxu2  ;;  %v915_v24 = vpop.f32.mrf.mxu0 }
  0xf7   :  { %v1090_v46 = vpop.f32.mrf.mxu3  ;;  %v1032_v35 = vadd.f32 %v1031_v4, %v973_v63  ;;  %v974_v55 = vpop.f32.mrf.mxu1  ;;  %v1693_v63 = vrot.slane %v1691_v59, 3  ;;  %v17380_v4 = vunpack.c.l.b16 %v14165_v6 }
  0xf8   :  { %v975_v11 = vadd.f32 %v974_v55, %v915_v24 }
  0xf9   :  { %v14239_v20 = vadd.f32 %v1090_v46, %v1032_v35  ;;  %v499_v50 = vpack.c.b16 %v409_v1, %v17380_v4  ;;  %v500_v46 = vpack.c.b16 %v410_v14, %v17381_v34  ;;  %v14253_v35 = vld [vmem:[%s17290_s0 + $0x190] sm:$0xff]  ;;  %v1688_v1 = vor.u32 %v1687_v62, %v1684_v36 }
  0xfa   :  { %v17332_v10 = vunpack.c.h.b16 %v14253_v35  ;;  %v1697_v31 = vor.u32 %v1696_v39, %v1693_v63  ;;  %v12459_v34 = vld [vmem:[%s17289_s1 + $0x90] sm:$0xff]  ;;  %v1745_v63 = vshrl.u32 %v13837_v60, 16  ;;  %v1748_v39 = vshll.u32 %v13837_v60, 16  ;;  %v14297_v60 = vld [vmem:[%s17290_s0 + $0x1c0] sm:$0xff] }
  0xfb   :  { %17379 = vst [vmem:[#allocation21_spill] sm:$0xff] %v14239_v20  ;;  %v17333_v20 = vunpack.c.l.b16 %v14253_v35  ;;  %2368 = vmatpush.bf16.msra.mxu0 %v12459_v34 }
  0xfc   :  { %v14265_v14 = vpack.c.b16 %v17332_v10, %v422_v0  ;;  %v14273_v36 = vsel %vm1308_vm0, %v1643_v15, %v1697_v31  ;;  %v12467_v15 = vld [vmem:[%s17289_s1 + $0xd0] sm:$0xff]  ;;  %v1750_v34 = vrot.slane %v1748_v39, 4 }
  0xfd   :  { %v14261_v6 = vpack.c.b16 %v17333_v20, %v421_v58  ;;  %2427 = vmatpush.bf16.msra.mxu1 %v12467_v15 }
  0xfe   :  { %v1033_v7 = vpop.f32.mrf.mxu2  ;;  %v918_v55 = vpop.f32.mrf.mxu0 }
  0xff   :  { %v1092_v23 = vpop.f32.mrf.mxu3  ;;  %v1034_v24 = vadd.f32 %v1033_v7, %v975_v11  ;;  %v977_v33 = vpop.f32.mrf.mxu1  ;;  %v14270_v11 = vsel %vm1308_vm0, %v1634_v61, %v1688_v1 }
 0x100   :  { %v978_v59 = vadd.f32 %v977_v33, %v918_v55  ;;  %v79_v33 = vld [vmem:[%s17290_s0 + $0x1a8] sm:$0xff] }
 0x101   :  { %v14257_v4 = vadd.f32 %v1092_v23, %v1034_v24  ;;  %1143 = vmatmul.bf16.gmra.mxu0 %v499_v50  ;;  %v433_v10 = vunpack.c.l.b16 %v79_v33  ;;  %v434_v20 = vunpack.c.h.b16 %v79_v33 }
 0x102   :  { %1202 = vmatmul.bf16.gmra.mxu1 %v500_v46 }
 0x103   :  { %17382 = vst [vmem:[#allocation22_spill] sm:$0xff] %v14257_v4  ;;  %2273 = vmatmul.bf16.gmra.mxu2 %v14188_v30  ;;  %v1736_v30 = vshrl.u32 %v13833_v16, 16  ;;  %v17334_v4 = vunpack.c.h.b16 %v14297_v60 }
 0x104   :  { %2332 = vmatmul.bf16.gmra.mxu3 %v14191_v32  ;;  %v1739_v32 = vshll.u32 %v13833_v16, 16  ;;  %v1747_v16 = vrot.slane %v1745_v63, 3 }
 0x105   :  { %v1738_v24 = vrot.slane %v1736_v30, 3 }
 0x106   :  { %v1036_v50 = vpop.f32.mrf.mxu2  ;;  %v920_v7 = vpop.f32.mrf.mxu0  ;;  %v1741_v55 = vrot.slane %v1739_v32, 4  ;;  %v1751_v39 = vor.u32 %v1750_v34, %v1747_v16  ;;  %v1802_v16 = vshll.u32 %v13912_v5, 16 }
 0x107   :  { %v1095_v62 = vpop.f32.mrf.mxu3  ;;  %v1037_v56 = vadd.f32 %v1036_v50, %v978_v59  ;;  %v979_v23 = vpop.f32.mrf.mxu1 }
 0x108   :  { %v980_v46 = vadd.f32 %v979_v23, %v920_v7  ;;  %v17385_v7 = vunpack.c.h.b16 %v14209_v25 }
 0x109   :  { %v14280_v61 = vadd.f32 %v1095_v62, %v1037_v56  ;;  %v17384_v62 = vunpack.c.l.b16 %v14209_v25  ;;  %v14309_v25 = vpack.c.b16 %v17334_v4, %v434_v20 }
 0x10a   :  { %v506_v23 = vpack.c.b16 %v422_v0, %v17385_v7  ;;  %v1790_v7 = vshrl.u32 %v13908_v48, 16 }
 0x10b   :  { %17383 = vst [vmem:[#allocation23_spill] sm:$0xff] %v14280_v61  ;;  %v505_v56 = vpack.c.b16 %v421_v58, %v17384_v62  ;;  %v17335_v61 = vunpack.c.l.b16 %v14297_v60  ;;  %v1742_v58 = vor.u32 %v1741_v55, %v1738_v24  ;;  %v14317_v24 = vsel %vm1308_vm0, %v1697_v31, %v1751_v39 }
 0x10c   :  { %v1799_v31 = vshrl.u32 %v13912_v5, 16  ;;  %v1792_v34 = vrot.slane %v1790_v7, 3  ;;  %v14343_v5 = vld [vmem:[%s17290_s0 + $0x1f0] sm:$0xff]  ;;  %v1804_v7 = vrot.slane %v1802_v16, 4 }
 0x10d   :  { %v14305_v0 = vpack.c.b16 %v17335_v61, %v433_v10 }
 0x10e   :  { %v1038_v59 = vpop.f32.mrf.mxu2  ;;  %v923_v32 = vpop.f32.mrf.mxu0 }
 0x10f   :  { %v1097_v50 = vpop.f32.mrf.mxu3  ;;  %v1039_v30 = vadd.f32 %v1038_v59, %v980_v46  ;;  %v982_v15 = vpop.f32.mrf.mxu1  ;;  %v14314_v46 = vsel %vm1308_vm0, %v1688_v1, %v1742_v58  ;;  %v12466_v1 = vld [vmem:[%s17289_s1 + $0xc8] sm:$0xff] }
 0x110   :  { %v983_v63 = vadd.f32 %v982_v15, %v923_v32  ;;  %2428 = vmatpush.bf16.msra.mxu1 %v12466_v1  ;;  %v1801_v15 = vrot.slane %v1799_v31, 3 }
 0x111   :  { %v14301_v62 = vadd.f32 %v1097_v50, %v1039_v30  ;;  %1148 = vmatmul.bf16.gmra.mxu0 %v505_v56 }
 0x112   :  { %1207 = vmatmul.bf16.gmra.mxu1 %v506_v23  ;;  %v1793_v23 = vshll.u32 %v13908_v48, 16  ;;  %v14334_v48 = vld [vmem:[%s17290_s0 + $0x1d8] sm:$0xff] }
 0x113   :  { %17386 = vst [vmem:[#allocation24_spill] sm:$0xff] %v14301_v62  ;;  %2278 = vmatmul.bf16.gmra.mxu2 %v14226_v45  ;;  %v445_v4 = vunpack.c.l.b16 %v14334_v48  ;;  %v446_v31 = vunpack.c.h.b16 %v14334_v48  ;;  %v12480_v48 = vld [vmem:[%s17289_s1 + $0x138] sm:$0xff] }
 0x114   :  { %2337 = vmatmul.bf16.gmra.mxu3 %v14235_v28  ;;  %v12458_v28 = vld [vmem:[%s17289_s1 + $0x88] sm:$0xff]  ;;  %v1795_v32 = vrot.slane %v1793_v23, 4  ;;  %2481 = vmatpush.bf16.msra.mxu2 %v12480_v48 }
 0x115   :  { %2369 = vmatpush.bf16.msra.mxu0 %v12458_v28 }
 0x116   :  { %v1041_v55 = vpop.f32.mrf.mxu2  ;;  %v925_v50 = vpop.f32.mrf.mxu0 }
 0x117   :  { %v1100_v33 = vpop.f32.mrf.mxu3  ;;  %v1042_v59 = vadd.f32 %v1041_v55, %v983_v63  ;;  %v984_v56 = vpop.f32.mrf.mxu1 }
 0x118   :  { %v985_v30 = vadd.f32 %v984_v56, %v925_v50  ;;  %v17389_v50 = vunpack.c.h.b16 %v14253_v35 }
 0x119   :  { %v14321_v45 = vadd.f32 %v1100_v33, %v1042_v59  ;;  %v17388_v33 = vunpack.c.l.b16 %v14253_v35  ;;  %v14349_v35 = vor.u32 %v1795_v32, %v1792_v34  ;;  %v36_v34 = vld [vmem:[%s17290_s0 + $0x50] sm:$0x88] }
 0x11a   :  { %v512_v56 = vpack.c.b16 %v434_v20, %v17389_v50 }
 0x11b   :  { %17387 = vst [vmem:[#allocation25_spill] sm:$0xff] %v14321_v45  ;;  %v511_v59 = vpack.c.b16 %v433_v10, %v17388_v33  ;;  %v17337_v45 = vunpack.c.l.b16 %v14343_v5  ;;  %v17336_v10 = vunpack.c.h.b16 %v14343_v5  ;;  %v14371_v32 = vsel %vm1308_vm0, %v1742_v58, %v14349_v35  ;;  %v12488_v33 = vld [vmem:[%s17289_s1 + $0x178] sm:$0xff]  ;;  %v12479_v58 = vld [vmem:[%s17289_s1 + $0x130] sm:$0xff] }
 0x11c   :  { %2540 = vmatpush.bf16.msra.mxu3 %v12488_v33  ;;  %2482 = vmatpush.bf16.msra.mxu2 %v12479_v58  ;;  %v17394_v33 = vunpack.c.l.b16 %v13590_v40  ;;  %v37_v58 = vld [vmem:[%s17290_s0 + $0x58] sm:$0x88] }
 0x11d   :  { %v14359_v16 = vpack.c.b16 %v17336_v10, %v446_v31 }
 0x11e   :  { %v1043_v63 = vpop.f32.mrf.mxu2  ;;  %v928_v28 = vpop.f32.mrf.mxu0 }
 0x11f   :  { %v1102_v55 = vpop.f32.mrf.mxu3  ;;  %v1044_v23 = vadd.f32 %v1043_v63, %v985_v30  ;;  %v987_v1 = vpop.f32.mrf.mxu1  ;;  %v14355_v30 = vpack.c.b16 %v17337_v45, %v445_v4  ;;  %17392 = vst [vmem:[#allocation28_spill] sm:$0xff] %v14359_v16  ;;  %v14373_v63 = vor.u32 %v1804_v7, %v1801_v15  ;;  %v1239_v45 = vunpack.c.h.b16 %v36_v34 }
 0x120   :  { %v988_v61 = vadd.f32 %v987_v1, %v928_v28 }
 0x121   :  { %v14351_v20 = vadd.f32 %v1102_v55, %v1044_v23  ;;  %1153 = vmatmul.bf16.gmra.mxu0 %v511_v59  ;;  %17391 = vst [vmem:[#allocation27_spill] sm:$0xff] %v14355_v30  ;;  %v1302_v55 = vpack.c.b16 %v13987_v21, %v13987_v21  ;;  %v14382_v59 = vsel %vm1308_vm0, %v1751_v39, %v14373_v63  ;;  %v12487_v39 = vld [vmem:[%s17289_s1 + $0x170] sm:$0xff] }
 0x122   :  { %1212 = vmatmul.bf16.gmra.mxu1 %v512_v56  ;;  %v1303_v21 = vpack.c.b16 %v13989_v53, %v13989_v53  ;;  %2541 = vmatpush.bf16.msra.mxu3 %v12487_v39  ;;  %v12478_v53 = vld [vmem:[%s17289_s1 + $0x128] sm:$0xff] }
 0x123   :  { %17390 = vst [vmem:[#allocation26_spill] sm:$0xff] %v14351_v20  ;;  %2283 = vmatmul.bf16.gmra.mxu2 %v14270_v11  ;;  %v1238_v11 = vunpack.c.l.b16 %v36_v34  ;;  %v1844_v23 = vshrl.u32 %v1302_v55, 16  ;;  %v1847_v28 = vshll.u32 %v1302_v55, 16  ;;  %v14408_v34 = vld [vmem:[%s17290_s0 + $0x208] sm:$0xff]  ;;  %v14424_v20 = vld [vmem:[%s17290_s0 + $0x220] sm:$0xff] }
 0x124   :  { %2342 = vmatmul.bf16.gmra.mxu3 %v14273_v36  ;;  %2483 = vmatpush.bf16.msra.mxu2 %v12478_v53 }
 0x125   :  { %v1244_v10 = vpack.c.b16 %v17394_v33, %v1238_v11  ;;  %v1846_v55 = vrot.slane %v1844_v23, 3  ;;  %v17397_v33 = vunpack.c.h.b16 %v14297_v60 }
 0x126   :  { %v1046_v36 = vpop.f32.mrf.mxu2  ;;  %v930_v56 = vpop.f32.mrf.mxu0 }
 0x127   :  { %v1105_v50 = vpop.f32.mrf.mxu3  ;;  %v1047_v15 = vadd.f32 %v1046_v36, %v988_v61  ;;  %v989_v7 = vpop.f32.mrf.mxu1  ;;  %v1853_v61 = vshrl.u32 %v1303_v21, 16  ;;  %v1856_v36 = vshll.u32 %v1303_v21, 16  ;;  %v1344_v11 = vshrl.u32 %v1244_v10, 16 }
 0x128   :  { %v990_v1 = vadd.f32 %v989_v7, %v930_v56  ;;  %v1849_v56 = vrot.slane %v1847_v28, 4  ;;  %v17396_v28 = vunpack.c.l.b16 %v14297_v60  ;;  %v518_v53 = vpack.c.b16 %v446_v31, %v17397_v33 }
 0x129   :  { %v14392_v48 = vadd.f32 %v1105_v50, %v1047_v15  ;;  %v12486_v50 = vld [vmem:[%s17289_s1 + $0x168] sm:$0xff]  ;;  %v17395_v15 = vunpack.c.h.b16 %v13590_v40  ;;  %v1855_v40 = vrot.slane %v1853_v61, 3  ;;  %v17343_v31 = vunpack.c.l.b16 %v14408_v34 }
 0x12a   :  { %v517_v39 = vpack.c.b16 %v445_v4, %v17396_v28  ;;  %2542 = vmatpush.bf16.msra.mxu3 %v12486_v50  ;;  %v12457_v4 = vld [vmem:[%s17289_s1 + $0x80] sm:$0xff]  ;;  %v17341_v28 = vunpack.c.l.b16 %v14424_v20  ;;  %v1850_v61 = vor.u32 %v1849_v56, %v1846_v55 }
 0x12b   :  { %17393 = vst [vmem:[#allocation29_spill] sm:$0xff] %v14392_v48  ;;  %v14412_v21 = vpack.c.b16 %v17395_v15, %v1239_v45  ;;  %v12477_v48 = vld [vmem:[%s17289_s1 + $0x120] sm:$0xff]  ;;  %v1858_v45 = vrot.slane %v1856_v36, 4  ;;  %v1240_v15 = vunpack.c.l.b16 %v37_v58  ;;  %v1347_v36 = vshll.u32 %v1244_v10, 16  ;;  %2370 = vmatpush.bf16.msra.mxu0 %v12457_v4  ;;  %v12476_v10 = vld [vmem:[%s17289_s1 + $0x118] sm:$0xff] }
 0x12c   :  { %2484 = vmatpush.bf16.msra.mxu2 %v12477_v48  ;;  %v12485_v50 = vld [vmem:[%s17289_s1 + $0x160] sm:$0xff]  ;;  %v14460_v55 = vsel %vm1308_vm0, %v14349_v35, %v1850_v61  ;;  %v1352_v35 = vshrl.u32 %v13598_v42, 16  ;;  %v1355_v61 = vshll.u32 %v13598_v42, 16  ;;  %v1389_v42 = vshll.u32 %v14041_v19, 16 }
 0x12d   :  { %v1361_v56 = vshrl.u32 %v14412_v21, 16  ;;  %v1364_v4 = vshll.u32 %v14412_v21, 16  ;;  %v17402_v21 = vunpack.c.h.b16 %v14071_v43 }
 0x12e   :  { %v1048_v7 = vpop.f32.mrf.mxu2  ;;  %v933_v30 = vpop.f32.mrf.mxu0  ;;  %2543 = vmatpush.bf16.msra.mxu3 %v12485_v50  ;;  %v1372_v50 = vshll.u32 %v13611_v51, 16 }
 0x12f   :  { %v1107_v23 = vpop.f32.mrf.mxu3  ;;  %v1049_v16 = vadd.f32 %v1048_v7, %v990_v1  ;;  %v992_v62 = vpop.f32.mrf.mxu1  ;;  %v17342_v1 = vunpack.c.h.b16 %v14408_v34  ;;  %v17340_v7 = vunpack.c.h.b16 %v14424_v20 }
 0x130   :  { %v993_v60 = vadd.f32 %v992_v62, %v933_v30  ;;  %v12465_v62 = vld [vmem:[%s17289_s1 + $0xc0] sm:$0xff]  ;;  %v14445_v30 = vpack.c.b16 %v17341_v28, %v17343_v31  ;;  %2485 = vmatpush.bf16.msra.mxu2 %v12476_v10  ;;  %v1386_v10 = vshrl.u32 %v14041_v19, 16  ;;  %v1363_v28 = vrot.slane %v1361_v56, 3 }
 0x131   :  { %v14434_v33 = vadd.f32 %v1107_v23, %v1049_v16  ;;  %1158 = vmatmul.bf16.gmra.mxu0 %v517_v39  ;;  %v1241_v16 = vunpack.c.h.b16 %v37_v58  ;;  %v14456_v48 = vpack.c.b16 %v17340_v7, %v17342_v1  ;;  %v17401_v23 = vunpack.c.l.b16 %v14071_v43  ;;  %2429 = vmatpush.bf16.msra.mxu1 %v12465_v62 }
 0x132   :  { %1217 = vmatmul.bf16.gmra.mxu1 %v518_v53  ;;  %17399 = vst [vmem:[#allocation31_spill] sm:$0xff] %v14445_v30  ;;  %v14468_v58 = vrot.slane %v1344_v11, 3  ;;  %v14470_v53 = vrot.slane %v1347_v36, 4  ;;  %v12475_v11 = vld [vmem:[%s17289_s1 + $0x110] sm:$0xff]  ;;  %v1403_v43 = vshrl.u32 %v14047_v18, 16  ;;  %v1354_v19 = vrot.slane %v1352_v35, 3 }
 0x133   :  { %17398 = vst [vmem:[#allocation30_spill] sm:$0xff] %v14434_v33  ;;  %2288 = vmatmul.bf16.gmra.mxu2 %v14314_v46  ;;  %v1246_v39 = vpack.c.b16 %v17401_v23, %v1240_v15  ;;  %v1859_v46 = vor.u32 %v1858_v45, %v1855_v40  ;;  %v1369_v15 = vshrl.u32 %v13611_v51, 16  ;;  %v1247_v36 = vpack.c.b16 %v17402_v21, %v1241_v16 }
 0x134   :  { %2347 = vmatmul.bf16.gmra.mxu3 %v14317_v24  ;;  %17400 = vst [vmem:[#allocation32_spill] sm:$0xff] %v14456_v48  ;;  %v12484_v24 = vld [vmem:[%s17289_s1 + $0x158] sm:$0xff]  ;;  %v1406_v16 = vshll.u32 %v14047_v18, 16  ;;  %2486 = vmatpush.bf16.msra.mxu2 %v12475_v11  ;;  %v1374_v56 = vrot.slane %v1372_v50, 4  ;;  %v1391_v48 = vrot.slane %v1389_v42, 4  ;;  %v12482_v18 = vld [vmem:[%s17289_s1 + $0x148] sm:$0xff]  ;;  %v1350_v35 = vor.u32 %v14470_v53, %v14468_v58 }
 0x135   :  { %v14479_v62 = vsel %vm1308_vm0, %v14373_v63, %v1859_v46  ;;  %v1378_v1 = vshrl.u32 %v1246_v39, 16  ;;  %v1381_v31 = vshll.u32 %v1246_v39, 16  ;;  %2544 = vmatpush.bf16.msra.mxu3 %v12484_v24  ;;  %v12483_v63 = vld [vmem:[%s17289_s1 + $0x150] sm:$0xff]  ;;  %v1366_v46 = vrot.slane %v1364_v4, 4 }
 0x136   :  { %v1051_v40 = vpop.f32.mrf.mxu2  ;;  %v935_v7 = vpop.f32.mrf.mxu0  ;;  %v1395_v39 = vshrl.u32 %v1247_v36, 16  ;;  %v1398_v24 = vshll.u32 %v1247_v36, 16  ;;  %v1408_v50 = vrot.slane %v1406_v16, 4 }
 0x137   :  { %v1110_v45 = vpop.f32.mrf.mxu3  ;;  %v1052_v23 = vadd.f32 %v1051_v40, %v993_v60  ;;  %v994_v51 = vpop.f32.mrf.mxu1  ;;  %v1357_v60 = vrot.slane %v1355_v61, 4  ;;  %v1371_v40 = vrot.slane %v1369_v15, 3  ;;  %v1380_v4 = vrot.slane %v1378_v1, 3 }
 0x138   :  { %v995_v33 = vadd.f32 %v994_v51, %v935_v7  ;;  %v12474_v7 = vld [vmem:[%s17289_s1 + $0x108] sm:$0xff]  ;;  %v1388_v51 = vrot.slane %v1386_v10, 3  ;;  %v1383_v30 = vrot.slane %v1381_v31, 4  ;;  %v1367_v61 = vor.u32 %v1366_v46, %v1363_v28  ;;  %v12473_v28 = vld [vmem:[%s17289_s1 + $0x100] sm:$0xff] }
 0x139   :  { %v14493_v21 = vadd.f32 %v1110_v45, %v1052_v23  ;;  %2545 = vmatpush.bf16.msra.mxu3 %v12483_v63  ;;  %v1405_v15 = vrot.slane %v1403_v43, 3  ;;  %2487 = vmatpush.bf16.msra.mxu2 %v12474_v7  ;;  %v14503_v45 = vor.u32 %v1357_v60, %v1354_v19  ;;  %v14505_v11 = vor.u32 %v1374_v56, %v1371_v40 }
 0x13a   :  { %v17403_v31 = vunpack.c.l.b16 %v14343_v5  ;;  %v17404_v1 = vunpack.c.l.b16 %v14408_v34  ;;  %v17405_v23 = vunpack.c.h.b16 %v14343_v5  ;;  %v17406_v63 = vunpack.c.h.b16 %v14408_v34  ;;  %v12481_v5 = vld [vmem:[%s17289_s1 + $0x140] sm:$0xff] }
 0x13b   :  { %v1397_v53 = vrot.slane %v1395_v39, 3  ;;  %v1400_v46 = vrot.slane %v1398_v24, 4  ;;  %v14518_v43 = vor.u32 %v1391_v48, %v1388_v51  ;;  %v1384_v34 = vor.u32 %v1383_v30, %v1380_v4  ;;  %v12604_v48 = vld [vmem:[%s17289_s1 + $0x338] sm:$0xff] }
 0x13c   :  { %v523_v42 = vpack.c.b16 %v17404_v1, %v17403_v31  ;;  %v524_v58 = vpack.c.b16 %v17406_v63, %v17405_v23  ;;  %v14524_v56 = vor.u32 %v1408_v50, %v1405_v15  ;;  %v12612_v51 = vld [vmem:[%s17289_s1 + $0x378] sm:$0xff]  ;;  %3867 = vmatpush.bf16.msrb.mxu0 %v12604_v48  ;;  %v1442_v31 = vshll.u32 %v13665_v13, 16 }
 0x13d   :  { %2546 = vmatpush.bf16.msra.mxu3 %v12482_v18  ;;  %2488 = vmatpush.bf16.msra.mxu2 %v12473_v28  ;;  %v14540_v30 = vsel %vm1308_vm0, %v1384_v34, %v14518_v43  ;;  %v1401_v24 = vor.u32 %v1400_v46, %v1397_v53  ;;  %v1430_v18 = vshrl.u32 %v13663_v12, 16  ;;  %v1448_v1 = vshrl.u32 %v14057_v49, 16 }
 0x13e   :  { %v1053_v36 = vpop.f32.mrf.mxu2  ;;  %v1124_v19 = vpop.f32.mrf.mxu0  ;;  %3926 = vmatpush.bf16.msrb.mxu1 %v12612_v51  ;;  %v17408_v48 = vunpack.c.h.b16 %v14424_v20 }
 0x13f   :  { %v1112_v10 = vpop.f32.mrf.mxu3  ;;  %v1054_v16 = vadd.f32 %v1053_v36, %v995_v33  ;;  %v1183_v60 = vpop.f32.mrf.mxu1  ;;  %v1125_v40 = vadd.f32 %v1124_v19, %v13985_v52  ;;  %v14530_v33 = vsel %vm1308_vm0, %v1350_v35, %v14503_v45  ;;  %v14534_v52 = vsel %vm1308_vm0, %v1367_v61, %v14505_v11 }
 0x140   :  { %v1433_v35 = vshll.u32 %v13663_v12, 16  ;;  %v1439_v61 = vshrl.u32 %v13665_v13, 16  ;;  %v1432_v53 = vrot.slane %v1430_v18, 3  ;;  %v1460_v19 = vshll.u32 %v14063_v54, 16 }
 0x141   :  { %v14526_v7 = vadd.f32 %v1112_v10, %v1054_v16  ;;  %v1184_v39 = vadd.f32 %v1183_v60, %v1125_v40  ;;  %1163 = vmatmul.bf16.gmra.mxu0 %v523_v42  ;;  %2547 = vmatpush.bf16.msra.mxu3 %v12481_v5  ;;  %v97_v10 = vld [vmem:[%s17290_s0 + $0x238] sm:$0xff]  ;;  %v1451_v42 = vshll.u32 %v14057_v49, 16  ;;  %v1457_v16 = vshrl.u32 %v14063_v54, 16 }
 0x142   :  { %1222 = vmatmul.bf16.gmra.mxu1 %v524_v58  ;;  %v14564_v58 = vunpack.c.l.b16 %v97_v10  ;;  %v14566_v28 = vunpack.c.h.b16 %v97_v10  ;;  %v1435_v46 = vrot.slane %v1433_v35, 4  ;;  %v1441_v13 = vrot.slane %v1439_v61, 3 }
 0x143   :  { %2293 = vmatmul.bf16.gmra.mxu2 %v14371_v32  ;;  %v14550_v32 = vsel %vm1308_vm0, %v1401_v24, %v14524_v56  ;;  %v1444_v60 = vrot.slane %v1442_v31, 4  ;;  %v1450_v40 = vrot.slane %v1448_v1, 3  ;;  %v1453_v5 = vrot.slane %v1451_v42, 4 }
 0x144   :  { %2352 = vmatmul.bf16.gmra.mxu3 %v14382_v59  ;;  %v530_v24 = vpack.c.b16 %v14566_v28, %v17408_v48  ;;  %v1459_v51 = vrot.slane %v1457_v16, 3  ;;  %v1436_v61 = vor.u32 %v1435_v46, %v1432_v53  ;;  %v1496_v16 = vshll.u32 %v13697_v27, 16 }
 0x146   :  { %v2254_v59 = vpop.f32.mrf.mxu2  ;;  %v1126_v50 = vpop.f32.mrf.mxu0 }
 0x147   :  { %v2313_v4 = vpop.f32.mrf.mxu3  ;;  %v2255_v15 = vadd.f32 %v2254_v59, %v1184_v39  ;;  %v1185_v36 = vpop.f32.mrf.mxu1  ;;  %v1127_v23 = vadd.f32 %v1126_v50, %v14029_v17  ;;  %v17407_v17 = vunpack.c.l.b16 %v14424_v20  ;;  %v1462_v59 = vrot.slane %v1460_v19, 4 }
 0x148   :  { %v1454_v50 = vor.u32 %v1453_v5, %v1450_v40  ;;  %v14581_v20 = vsel %vm1308_vm0, %v14503_v45, %v1436_v61 }
 0x149   :  { %v14562_v63 = vadd.f32 %v2313_v4, %v2255_v15  ;;  %v1186_v12 = vadd.f32 %v1185_v36, %v1127_v23  ;;  %v529_v39 = vpack.c.b16 %v14564_v58, %v17407_v17  ;;  %v1445_v15 = vor.u32 %v1444_v60, %v1441_v13 }
 0x14a   :  { %v1463_v1 = vor.u32 %v1462_v59, %v1459_v51  ;;  %v1505_v17 = vshll.u32 %v14135_v9, 16  ;;  %v1514_v51 = vshll.u32 %v14139_v41, 16 }
 0x14b   :  { %v14585_v31 = vsel %vm1308_vm0, %v14505_v11, %v1445_v15  ;;  %v1487_v11 = vshll.u32 %v13695_v38, 16 }
 0x14c   :  { %v14595_v42 = vsel %vm1308_vm0, %v14524_v56, %v1463_v1  ;;  %v1507_v48 = vrot.slane %v1505_v17, 4 }
 0x14d   :  { %v1489_v40 = vrot.slane %v1487_v11, 4 }
 0x14e   :  { %v2256_v49 = vpop.f32.mrf.mxu2  ;;  %v1129_v18 = vpop.f32.mrf.mxu0 }
 0x14f   :  { %v2315_v34 = vpop.f32.mrf.mxu3  ;;  %v2257_v4 = vadd.f32 %v2256_v49, %v1186_v12  ;;  %v1188_v35 = vpop.f32.mrf.mxu1  ;;  %v1130_v54 = vadd.f32 %v1129_v18, %v14078_v57  ;;  %v14591_v57 = vsel %vm1308_vm0, %v14518_v43, %v1454_v50  ;;  %v1484_v12 = vshrl.u32 %v13695_v38, 16  ;;  %v12611_v38 = vld [vmem:[%s17289_s1 + $0x370] sm:$0xff] }
 0x150   :  { %v1493_v43 = vshrl.u32 %v13697_v27, 16  ;;  %v1498_v49 = vrot.slane %v1496_v16, 4  ;;  %3927 = vmatpush.bf16.msrb.mxu1 %v12611_v38 }
 0x151   :  { %v14577_v36 = vadd.f32 %v2315_v34, %v2257_v4  ;;  %v1189_v10 = vadd.f32 %v1188_v35, %v1130_v54  ;;  %1168 = vmatmul.bf16.gmra.mxu0 %v529_v39  ;;  %v1486_v60 = vrot.slane %v1484_v12, 3  ;;  %v1502_v34 = vshrl.u32 %v14135_v9, 16 }
 0x152   :  { %1227 = vmatmul.bf16.gmra.mxu1 %v530_v24  ;;  %v1495_v5 = vrot.slane %v1493_v43, 3  ;;  %v1511_v24 = vshrl.u32 %v14139_v41, 16  ;;  %v1516_v9 = vrot.slane %v1514_v51, 4 }
 0x153   :  { %2298 = vmatmul.bf16.gmra.mxu2 %v14460_v55  ;;  %v1490_v54 = vor.u32 %v1489_v40, %v1486_v60 }
 0x154   :  { %2357 = vmatmul.bf16.gmra.mxu3 %v14479_v62  ;;  %v12603_v62 = vld [vmem:[%s17289_s1 + $0x330] sm:$0xff]  ;;  %v1513_v12 = vrot.slane %v1511_v24, 3 }
 0x155   :  { %3868 = vmatpush.bf16.msrb.mxu0 %v12603_v62 }
 0x156   :  { %v2259_v23 = vpop.f32.mrf.mxu2  ;;  %v1131_v46 = vpop.f32.mrf.mxu0 }
 0x157   :  { %v2318_v45 = vpop.f32.mrf.mxu3  ;;  %v2260_v53 = vadd.f32 %v2259_v23, %v1189_v10  ;;  %v1190_v55 = vpop.f32.mrf.mxu1  ;;  %v1132_v56 = vadd.f32 %v1131_v46, %v14091_v29  ;;  %v1504_v29 = vrot.slane %v1502_v34, 3  ;;  %v1499_v10 = vor.u32 %v1498_v49, %v1495_v5 }
 0x158   :  { %v1517_v46 = vor.u32 %v1516_v9, %v1513_v12 }
 0x159   :  { %v14605_v19 = vadd.f32 %v2318_v45, %v2260_v53  ;;  %v1191_v13 = vadd.f32 %v1190_v55, %v1132_v56  ;;  %v1508_v23 = vor.u32 %v1507_v48, %v1504_v29  ;;  %v14620_v53 = vsel %vm1308_vm0, %v1436_v61, %v1490_v54 }
 0x15a   :  { %v14623_v41 = vsel %vm1308_vm0, %v1445_v15, %v1499_v10  ;;  %v14631_v55 = vsel %vm1308_vm0, %v1463_v1, %v1517_v46  ;;  %v1541_v61 = vshll.u32 %v13721_v2, 16  ;;  %v12602_v1 = vld [vmem:[%s17289_s1 + $0x328] sm:$0xff]  ;;  %v1568_v29 = vshll.u32 %v14183_v44, 16 }
 0x15b   :  { %3869 = vmatpush.bf16.msrb.mxu0 %v12602_v1 }
 0x15c   :  { %v1543_v60 = vrot.slane %v1541_v61, 4 }
 0x15e   :  { %v2261_v27 = vpop.f32.mrf.mxu2  ;;  %v1134_v4 = vpop.f32.mrf.mxu0 }
 0x15f   :  { %v2320_v39 = vpop.f32.mrf.mxu3  ;;  %v2262_v59 = vadd.f32 %v2261_v27, %v1191_v13  ;;  %v1193_v18 = vpop.f32.mrf.mxu1  ;;  %v1135_v35 = vadd.f32 %v1134_v4, %v14103_v22  ;;  %v14628_v22 = vsel %vm1308_vm0, %v1454_v50, %v1508_v23 }
 0x161   :  { %v14615_v45 = vadd.f32 %v2320_v39, %v2262_v59  ;;  %v1194_v11 = vadd.f32 %v1193_v18, %v1135_v35  ;;  %2371 = vmatmul.bf16.vlgmr.msra.gmra.mxu0 %v14530_v33  ;;  %v1565_v39 = vshrl.u32 %v14183_v44, 16  ;;  %v17409_v59 = vld [vmem:[#allocation17_spill] sm:$0xff] }
 0x162   :  { %2430 = vmatmul.bf16.vlgmr.msra.gmra.mxu1 %v14534_v52  ;;  %v1538_v52 = vshrl.u32 %v13721_v2, 16  ;;  %v12610_v2 = vld [vmem:[%s17289_s1 + $0x368] sm:$0xff] }
 0x163   :  { %2489 = vmatmul.bf16.vlgmr.msra.gmra.mxu2 %v14540_v30  ;;  %v1547_v30 = vshrl.u32 %v13723_v3, 16  ;;  %3928 = vmatpush.bf16.msrb.mxu1 %v12610_v2 }
 0x164   :  { %2548 = vmatmul.bf16.vlgmr.msra.gmra.mxu3 %v14550_v32  ;;  %v1550_v32 = vshll.u32 %v13723_v3, 16  ;;  %v1540_v38 = vrot.slane %v1538_v52, 3  ;;  %v1556_v3 = vshrl.u32 %v14179_v26, 16 }
 0x165   :  { %v1549_v40 = vrot.slane %v1547_v30, 3 }
 0x166   :  { %v2264_v33 = vpop.f32.mrf.mxu2  ;;  %v1136_v15 = vpop.f32.mrf.mxu0  ;;  %v1552_v5 = vrot.slane %v1550_v32, 4  ;;  %v1558_v17 = vrot.slane %v1556_v3, 3  ;;  %v1544_v18 = vor.u32 %v1543_v60, %v1540_v38  ;;  %v1613_v3 = vshll.u32 %v14217_v47, 16 }
 0x167   :  { %v2323_v62 = vpop.f32.mrf.mxu3  ;;  %v2265_v43 = vadd.f32 %v2264_v33, %v1194_v11  ;;  %v1195_v16 = vpop.f32.mrf.mxu1  ;;  %v1137_v50 = vadd.f32 %v1136_v15, %v14131_v8  ;;  %v1559_v8 = vshll.u32 %v14179_v26, 16  ;;  %v1567_v11 = vrot.slane %v1565_v39, 3 }
 0x168   :  { %v1553_v35 = vor.u32 %v1552_v5, %v1549_v40  ;;  %v1570_v26 = vrot.slane %v1568_v29, 4  ;;  %v1610_v5 = vshrl.u32 %v14217_v47, 16  ;;  %v1622_v39 = vshll.u32 %v14221_v37, 16 }
 0x169   :  { %v14638_v56 = vadd.f32 %v2323_v62, %v2265_v43  ;;  %v1196_v13 = vadd.f32 %v1195_v16, %v1137_v50  ;;  %v1561_v27 = vrot.slane %v1559_v8, 4  ;;  %v14656_v62 = vsel %vm1308_vm0, %v1490_v54, %v1544_v18  ;;  %v17411_v50 = vld [vmem:[#allocation6_spill] sm:$0xff] }
 0x16a   :  { %v14659_v44 = vsel %vm1308_vm0, %v1499_v10, %v1553_v35  ;;  %v1571_v61 = vor.u32 %v1570_v26, %v1567_v11 }
 0x16b   :  { %v1562_v12 = vor.u32 %v1561_v27, %v1558_v17  ;;  %v1615_v17 = vrot.slane %v1613_v3, 4  ;;  %v1619_v27 = vshrl.u32 %v14221_v37, 16  ;;  %v12609_v37 = vld [vmem:[%s17289_s1 + $0x360] sm:$0xff]  ;;  %v1664_v3 = vshrl.u32 %v14261_v6, 16 }
 0x16c   :  { %v14667_v43 = vsel %vm1308_vm0, %v1517_v46, %v1571_v61  ;;  %3929 = vmatpush.bf16.msrb.mxu1 %v12609_v37 }
 0x16d   :  { %v14664_v52 = vsel %vm1308_vm0, %v1508_v23, %v1562_v12 }
 0x16e   :  { %v2266_v49 = vpop.f32.mrf.mxu2  ;;  %v1139_v24 = vpop.f32.mrf.mxu0 }
 0x16f   :  { %v2325_v34 = vpop.f32.mrf.mxu3  ;;  %v2267_v48 = vadd.f32 %v2266_v49, %v1196_v13  ;;  %v1198_v51 = vpop.f32.mrf.mxu1  ;;  %v1140_v4 = vadd.f32 %v1139_v24, %v17409_v59  ;;  %v17412_v13 = vld [vmem:[#allocation18_spill] sm:$0xff]  ;;  %v17413_v59 = vld [vmem:[#allocation19_spill] sm:$0xff] }
 0x171   :  { %v14651_v9 = vadd.f32 %v2325_v34, %v2267_v48  ;;  %v1199_v33 = vadd.f32 %v1198_v51, %v1140_v4  ;;  %2376 = vmatmul.bf16.gmra.mxu0 %v14581_v20  ;;  %v1612_v34 = vrot.slane %v1610_v5, 3  ;;  %v12601_v51 = vld [vmem:[%s17289_s1 + $0x320] sm:$0xff] }
 0x172   :  { %2435 = vmatmul.bf16.gmra.mxu1 %v14585_v31  ;;  %v17410_v31 = vld [vmem:[#allocation5_spill] sm:$0xff]  ;;  %3870 = vmatpush.bf16.msrb.mxu0 %v12601_v51 }
 0x173   :  { %2494 = vmatmul.bf16.gmra.mxu2 %v14591_v57  ;;  %v1592_v16 = vshrl.u32 %v17410_v31, 16  ;;  %v1595_v54 = vshll.u32 %v17410_v31, 16  ;;  %v1601_v57 = vshrl.u32 %v17411_v50, 16  ;;  %v1616_v47 = vor.u32 %v1615_v17, %v1612_v34 }
 0x174   :  { %2553 = vmatmul.bf16.gmra.mxu3 %v14595_v42  ;;  %v1604_v42 = vshll.u32 %v17411_v50, 16  ;;  %v17414_v50 = vld [vmem:[#allocation7_spill] sm:$0xff]  ;;  %v1666_v17 = vrot.slane %v1664_v3, 3 }
 0x175   :  { %v1594_v46 = vrot.slane %v1592_v16, 3  ;;  %v1597_v38 = vrot.slane %v1595_v54, 4  ;;  %v1603_v60 = vrot.slane %v1601_v57, 3  ;;  %v1649_v57 = vshll.u32 %v17414_v50, 16 }
 0x176   :  { %v2269_v20 = vpop.f32.mrf.mxu2  ;;  %v1141_v10 = vpop.f32.mrf.mxu0  ;;  %v1606_v40 = vrot.slane %v1604_v42, 4 }
 0x177   :  { %v2328_v15 = vpop.f32.mrf.mxu3  ;;  %v2270_v30 = vadd.f32 %v2269_v20, %v1199_v33  ;;  %v1200_v32 = vpop.f32.mrf.mxu1  ;;  %v1142_v23 = vadd.f32 %v1141_v10, %v17412_v13  ;;  %v1598_v11 = vor.u32 %v1597_v38, %v1594_v46  ;;  %v1621_v20 = vrot.slane %v1619_v27, 3 }
 0x178   :  { %v1607_v26 = vor.u32 %v1606_v40, %v1603_v60  ;;  %v1651_v60 = vrot.slane %v1649_v57, 4  ;;  %v12600_v57 = vld [vmem:[%s17289_s1 + $0x318] sm:$0xff] }
 0x179   :  { %v14674_v1 = vadd.f32 %v2328_v15, %v2270_v30  ;;  %v1201_v2 = vadd.f32 %v1200_v32, %v1142_v23  ;;  %v1624_v15 = vrot.slane %v1622_v39, 4  ;;  %v14692_v16 = vsel %vm1308_vm0, %v1544_v18, %v1598_v11  ;;  %3871 = vmatpush.bf16.msrb.mxu0 %v12600_v57 }
 0x17a   :  { %v14695_v54 = vsel %vm1308_vm0, %v1553_v35, %v1607_v26  ;;  %v14700_v30 = vsel %vm1308_vm0, %v1562_v12, %v1616_v47  ;;  %v1646_v18 = vshrl.u32 %v17414_v50, 16  ;;  %v17416_v12 = vld [vmem:[#allocation20_spill] sm:$0xff]  ;;  %v1673_v39 = vshrl.u32 %v14265_v14, 16 }
 0x17e   :  { %v2271_v8 = vpop.f32.mrf.mxu2  ;;  %v1144_v48 = vpop.f32.mrf.mxu0 }
 0x17f   :  { %v2330_v49 = vpop.f32.mrf.mxu3  ;;  %v2272_v29 = vadd.f32 %v2271_v8, %v1201_v2  ;;  %v1203_v24 = vpop.f32.mrf.mxu1  ;;  %v1145_v4 = vadd.f32 %v1144_v48, %v17413_v59  ;;  %v1667_v8 = vshll.u32 %v14261_v6, 16  ;;  %v17417_v59 = vld [vmem:[#allocation21_spill] sm:$0xff] }
 0x181   :  { %v14684_v33 = vadd.f32 %v2330_v49, %v2272_v29  ;;  %v1204_v31 = vadd.f32 %v1203_v24, %v1145_v4  ;;  %2381 = vmatmul.bf16.gmra.mxu0 %v14620_v53  ;;  %v1625_v53 = vor.u32 %v1624_v15, %v1621_v20  ;;  %v1669_v27 = vrot.slane %v1667_v8, 4 }
 0x182   :  { %2440 = vmatmul.bf16.gmra.mxu1 %v14623_v41  ;;  %v1676_v29 = vshll.u32 %v14265_v14, 16  ;;  %v1718_v8 = vshrl.u32 %v14305_v0, 16 }
 0x183   :  { %2499 = vmatmul.bf16.gmra.mxu2 %v14628_v22  ;;  %v14703_v41 = vsel %vm1308_vm0, %v1571_v61, %v1625_v53  ;;  %v17415_v22 = vld [vmem:[#allocation8_spill] sm:$0xff]  ;;  %v1648_v61 = vrot.slane %v1646_v18, 3 }
 0x184   :  { %2558 = vmatmul.bf16.gmra.mxu3 %v14631_v55  ;;  %v1655_v23 = vshrl.u32 %v17415_v22, 16  ;;  %v1658_v55 = vshll.u32 %v17415_v22, 16  ;;  %v1678_v6 = vrot.slane %v1676_v29, 4  ;;  %v1727_v29 = vshrl.u32 %v14309_v25, 16 }
 0x185   :  { %v1652_v20 = vor.u32 %v1651_v60, %v1648_v61 }
 0x186   :  { %v2274_v10 = vpop.f32.mrf.mxu2  ;;  %v1146_v42 = vpop.f32.mrf.mxu0  ;;  %v1657_v40 = vrot.slane %v1655_v23, 3  ;;  %v1660_v5 = vrot.slane %v1658_v55, 4  ;;  %v17419_v23 = vld [vmem:[#allocation10_spill] sm:$0xff] }
 0x187   :  { %v2333_v32 = vpop.f32.mrf.mxu3  ;;  %v2275_v35 = vadd.f32 %v2274_v10, %v1204_v31  ;;  %v1205_v13 = vpop.f32.mrf.mxu1  ;;  %v1147_v2 = vadd.f32 %v1146_v42, %v17416_v12  ;;  %v1670_v31 = vor.u32 %v1669_v27, %v1666_v17  ;;  %v1675_v10 = vrot.slane %v1673_v39, 3 }
 0x188   :  { %v1661_v15 = vor.u32 %v1660_v5, %v1657_v40  ;;  %v14722_v50 = vsel %vm1308_vm0, %v1598_v11, %v1652_v20  ;;  %v1709_v55 = vshrl.u32 %v17419_v23, 16  ;;  %v1712_v12 = vshll.u32 %v17419_v23, 16 }
 0x189   :  { %v14710_v46 = vadd.f32 %v2333_v32, %v2275_v35  ;;  %v1206_v38 = vadd.f32 %v1205_v13, %v1147_v2  ;;  %v14730_v18 = vsel %vm1308_vm0, %v1616_v47, %v1670_v31  ;;  %v17420_v2 = vld [vmem:[#allocation22_spill] sm:$0xff]  ;;  %v1720_v27 = vrot.slane %v1718_v8, 3 }
 0x18a   :  { %v14725_v14 = vsel %vm1308_vm0, %v1607_v26, %v1661_v15  ;;  %v1711_v5 = vrot.slane %v1709_v55, 3  ;;  %v1714_v3 = vrot.slane %v1712_v12, 4 }
 0x18e   :  { %v2276_v49 = vpop.f32.mrf.mxu2  ;;  %v1149_v24 = vpop.f32.mrf.mxu0 }
 0x18f   :  { %v2335_v34 = vpop.f32.mrf.mxu3  ;;  %v2277_v48 = vadd.f32 %v2276_v49, %v1206_v38  ;;  %v1208_v51 = vpop.f32.mrf.mxu1  ;;  %v1150_v4 = vadd.f32 %v1149_v24, %v17417_v59  ;;  %v1721_v49 = vshll.u32 %v14305_v0, 16 }
 0x191   :  { %v14717_v37 = vadd.f32 %v2335_v34, %v2277_v48  ;;  %v1209_v32 = vadd.f32 %v1208_v51, %v1150_v4  ;;  %2386 = vmatmul.bf16.gmra.mxu0 %v14656_v62  ;;  %v1679_v62 = vor.u32 %v1678_v6, %v1675_v10  ;;  %v1723_v39 = vrot.slane %v1721_v49, 4  ;;  %v17421_v4 = vld [vmem:[#allocation23_spill] sm:$0xff] }
 0x192   :  { %2445 = vmatmul.bf16.gmra.mxu1 %v14659_v44  ;;  %v12608_v44 = vld [vmem:[%s17289_s1 + $0x358] sm:$0xff]  ;;  %v1730_v48 = vshll.u32 %v14309_v25, 16  ;;  %v17425_v49 = vld [vmem:[#allocation27_spill] sm:$0xff] }
 0x193   :  { %2504 = vmatmul.bf16.gmra.mxu2 %v14664_v52  ;;  %v14739_v11 = vsel %vm1308_vm0, %v1625_v53, %v1679_v62  ;;  %3930 = vmatpush.bf16.msrb.mxu1 %v12608_v44  ;;  %v1724_v57 = vor.u32 %v1723_v39, %v1720_v27 }
 0x194   :  { %2563 = vmatmul.bf16.gmra.mxu3 %v14667_v43  ;;  %v17418_v43 = vld [vmem:[#allocation9_spill] sm:$0xff]  ;;  %v1732_v0 = vrot.slane %v1730_v48, 4 }
 0x195   :  { %v1700_v35 = vshrl.u32 %v17418_v43, 16  ;;  %v1703_v47 = vshll.u32 %v17418_v43, 16 }
 0x196   :  { %v2279_v52 = vpop.f32.mrf.mxu2  ;;  %v1151_v13 = vpop.f32.mrf.mxu0 }
 0x197   :  { %v2338_v26 = vpop.f32.mrf.mxu3  ;;  %v2280_v42 = vadd.f32 %v2279_v52, %v1209_v32  ;;  %v1210_v22 = vpop.f32.mrf.mxu1  ;;  %v1152_v38 = vadd.f32 %v1151_v13, %v17420_v2  ;;  %v1702_v60 = vrot.slane %v1700_v35, 3  ;;  %v1705_v40 = vrot.slane %v1703_v47, 4  ;;  %v17424_v2 = vld [vmem:[#allocation24_spill] sm:$0xff] }
 0x198   :  { %v1715_v32 = vor.u32 %v1714_v3, %v1711_v5  ;;  %v1729_v52 = vrot.slane %v1727_v29, 3  ;;  %v14766_v35 = vsel %vm1308_vm0, %v1670_v31, %v1724_v57 }
 0x199   :  { %v14746_v61 = vadd.f32 %v2338_v26, %v2280_v42  ;;  %v1211_v53 = vadd.f32 %v1210_v22, %v1152_v38  ;;  %v1706_v6 = vor.u32 %v1705_v40, %v1702_v60  ;;  %v12607_v60 = vld [vmem:[%s17289_s1 + $0x350] sm:$0xff] }
 0x19a   :  { %v14761_v25 = vsel %vm1308_vm0, %v1661_v15, %v1715_v32  ;;  %v1733_v47 = vor.u32 %v1732_v0, %v1729_v52  ;;  %3931 = vmatpush.bf16.msrb.mxu1 %v12607_v60  ;;  %v17427_v0 = vld [vmem:[#allocation25_spill] sm:$0xff] }
 0x19b   :  { %v14758_v43 = vsel %vm1308_vm0, %v1652_v20, %v1706_v6 }
 0x19c   :  { %v14769_v42 = vsel %vm1308_vm0, %v1679_v62, %v1733_v47 }
 0x19e   :  { %v2281_v34 = vpop.f32.mrf.mxu2  ;;  %v1154_v51 = vpop.f32.mrf.mxu0 }
 0x19f   :  { %v2340_v17 = vpop.f32.mrf.mxu3  ;;  %v2282_v24 = vadd.f32 %v2281_v34, %v1211_v53  ;;  %v1213_v59 = vpop.f32.mrf.mxu1  ;;  %v1155_v10 = vadd.f32 %v1154_v51, %v17421_v4  ;;  %v1772_v34 = vshrl.u32 %v17425_v49, 16 }
 0x1a1   :  { %v14753_v44 = vadd.f32 %v2340_v17, %v2282_v24  ;;  %v1214_v26 = vadd.f32 %v1213_v59, %v1155_v10  ;;  %2391 = vmatmul.bf16.gmra.mxu0 %v14692_v16  ;;  %v1775_v17 = vshll.u32 %v17425_v49, 16  ;;  %v1774_v29 = vrot.slane %v1772_v34, 3  ;;  %v17426_v24 = vld [vmem:[#allocation28_spill] sm:$0xff]  ;;  %v12606_v49 = vld [vmem:[%s17289_s1 + $0x348] sm:$0xff] }
 0x1a2   :  { %2450 = vmatmul.bf16.gmra.mxu1 %v14695_v54  ;;  %v17422_v54 = vld [vmem:[#allocation11_spill] sm:$0xff]  ;;  %v1781_v51 = vshrl.u32 %v17426_v24, 16  ;;  %v1784_v59 = vshll.u32 %v17426_v24, 16 }
 0x1a3   :  { %2509 = vmatmul.bf16.gmra.mxu2 %v14700_v30  ;;  %v1754_v22 = vshrl.u32 %v17422_v54, 16  ;;  %v1757_v20 = vshll.u32 %v17422_v54, 16  ;;  %v12599_v30 = vld [vmem:[%s17289_s1 + $0x310] sm:$0xff]  ;;  %v1777_v48 = vrot.slane %v1775_v17, 4  ;;  %3932 = vmatpush.bf16.msrb.mxu1 %v12606_v49 }
 0x1a4   :  { %2568 = vmatmul.bf16.gmra.mxu3 %v14703_v41  ;;  %v17423_v41 = vld [vmem:[#allocation12_spill] sm:$0xff]  ;;  %3872 = vmatpush.bf16.msrb.mxu0 %v12599_v30 }
 0x1a5   :  { %v1763_v31 = vshrl.u32 %v17423_v41, 16  ;;  %v1766_v12 = vshll.u32 %v17423_v41, 16  ;;  %v1756_v40 = vrot.slane %v1754_v22, 3  ;;  %v1759_v5 = vrot.slane %v1757_v20, 4 }
 0x1a6   :  { %v2284_v16 = vpop.f32.mrf.mxu2  ;;  %v1156_v15 = vpop.f32.mrf.mxu0  ;;  %v1778_v54 = vor.u32 %v1777_v48, %v1774_v29  ;;  %v1783_v20 = vrot.slane %v1781_v51, 3  ;;  %v17431_v29 = vld [vmem:[#allocation31_spill] sm:$0xff] }
 0x1a7   :  { %v2343_v13 = vpop.f32.mrf.mxu3  ;;  %v2285_v23 = vadd.f32 %v2284_v16, %v1214_v26  ;;  %v1215_v55 = vpop.f32.mrf.mxu1  ;;  %v1157_v62 = vadd.f32 %v1156_v15, %v17424_v2  ;;  %v1765_v3 = vrot.slane %v1763_v31, 3  ;;  %v1768_v8 = vrot.slane %v1766_v12, 4 }
 0x1a8   :  { %v1760_v16 = vor.u32 %v1759_v5, %v1756_v40  ;;  %v14802_v41 = vsel %vm1308_vm0, %v1724_v57, %v1778_v54  ;;  %v17429_v40 = vld [vmem:[#allocation14_spill] sm:$0xff]  ;;  %v1826_v48 = vshrl.u32 %v17431_v29, 16  ;;  %v1829_v24 = vshll.u32 %v17431_v29, 16 }
 0x1a9   :  { %v14779_v38 = vadd.f32 %v2343_v13, %v2285_v23  ;;  %v1216_v53 = vadd.f32 %v1215_v55, %v1157_v62  ;;  %v1769_v13 = vor.u32 %v1768_v8, %v1765_v3  ;;  %v1786_v23 = vrot.slane %v1784_v59, 4  ;;  %v17430_v5 = vld [vmem:[#allocation26_spill] sm:$0xff] }
 0x1aa   :  { %v14794_v55 = vsel %vm1308_vm0, %v1706_v6, %v1760_v16 }
 0x1ab   :  { %v14797_v30 = vsel %vm1308_vm0, %v1715_v32, %v1769_v13  ;;  %v1787_v31 = vor.u32 %v1786_v23, %v1783_v20 }
 0x1ad   :  { %v14805_v12 = vsel %vm1308_vm0, %v1733_v47, %v1787_v31  ;;  %v12598_v47 = vld [vmem:[%s17289_s1 + $0x308] sm:$0xff] }
 0x1ae   :  { %v2286_v27 = vpop.f32.mrf.mxu2  ;;  %v1159_v10 = vpop.f32.mrf.mxu0  ;;  %3873 = vmatpush.bf16.msrb.mxu0 %v12598_v47  ;;  %v12628_v47 = vld [vmem:[%s17289_s1 + $0x3f8] sm:$0xff] }
 0x1af   :  { %v2345_v39 = vpop.f32.mrf.mxu3  ;;  %v2287_v4 = vadd.f32 %v2286_v27, %v1216_v53  ;;  %v1218_v52 = vpop.f32.mrf.mxu1  ;;  %v1160_v26 = vadd.f32 %v1159_v10, %v17427_v0  ;;  %v1831_v10 = vrot.slane %v1829_v24, 4  ;;  %4044 = vmatpush.bf16.msrb.mxu3 %v12628_v47 }
 0x1b1   :  { %v14789_v22 = vadd.f32 %v2345_v39, %v2287_v4  ;;  %v1219_v15 = vadd.f32 %v1218_v52, %v1160_v26  ;;  %2396 = vmatmul.bf16.gmra.mxu0 %v14722_v50  ;;  %v1828_v4 = vrot.slane %v1826_v48, 3  ;;  %v17432_v52 = vld [vmem:[#allocation32_spill] sm:$0xff] }
 0x1b2   :  { %2455 = vmatmul.bf16.gmra.mxu1 %v14725_v14  ;;  %v17428_v14 = vld [vmem:[#allocation13_spill] sm:$0xff]  ;;  %v1835_v0 = vshrl.u32 %v17432_v52, 16  ;;  %v1838_v26 = vshll.u32 %v17432_v52, 16  ;;  %v1307_v52 = vpack.c.b16 %v14566_v28, %v14566_v28 }
 0x1b3   :  { %2514 = vmatmul.bf16.gmra.mxu2 %v14730_v18  ;;  %v1808_v62 = vshrl.u32 %v17428_v14, 16  ;;  %v1811_v6 = vshll.u32 %v17428_v14, 16  ;;  %v1817_v18 = vshrl.u32 %v17429_v40, 16  ;;  %v12617_v28 = vld [vmem:[%s17289_s1 + $0x3a0] sm:$0xff] }
 0x1b4   :  { %2573 = vmatmul.bf16.gmra.mxu3 %v14739_v11  ;;  %v1820_v11 = vshll.u32 %v17429_v40, 16 }
 0x1b5   :  { %v1810_v34 = vrot.slane %v1808_v62, 3  ;;  %v1813_v17 = vrot.slane %v1811_v6, 4  ;;  %v1819_v27 = vrot.slane %v1817_v18, 3  ;;  %v14829_v6 = vor.u32 %v1831_v10, %v1828_v4  ;;  %v12627_v4 = vld [vmem:[%s17289_s1 + $0x3f0] sm:$0xff] }
 0x1b6   :  { %v2289_v50 = vpop.f32.mrf.mxu2  ;;  %v1161_v32 = vpop.f32.mrf.mxu0  ;;  %v1822_v39 = vrot.slane %v1820_v11, 4  ;;  %4045 = vmatpush.bf16.msrb.mxu3 %v12627_v4  ;;  %v12616_v4 = vld [vmem:[%s17289_s1 + $0x398] sm:$0xff] }
 0x1b7   :  { %v2348_v2 = vpop.f32.mrf.mxu3  ;;  %v2290_v53 = vadd.f32 %v2289_v50, %v1219_v15  ;;  %v1220_v60 = vpop.f32.mrf.mxu1  ;;  %v1162_v57 = vadd.f32 %v1161_v32, %v17430_v5  ;;  %v17433_v50 = vld [vmem:[#allocation29_spill] sm:$0xff]  ;;  %v14825_v14 = vor.u32 %v1813_v17, %v1810_v34  ;;  %v1837_v32 = vrot.slane %v1835_v0, 3  ;;  %v12620_v5 = vld [vmem:[%s17289_s1 + $0x3b8] sm:$0xff] }
 0x1b8   :  { %v14827_v62 = vor.u32 %v1822_v39, %v1819_v27  ;;  %3985 = vmatpush.bf16.msrb.mxu2 %v12620_v5 }
 0x1b9   :  { %v14812_v3 = vadd.f32 %v2348_v2, %v2290_v53  ;;  %v1221_v8 = vadd.f32 %v1220_v60, %v1162_v57  ;;  %v1840_v60 = vrot.slane %v1838_v26, 4  ;;  %v14837_v18 = vsel %vm1308_vm0, %v1760_v16, %v14825_v14  ;;  %v17434_v57 = vld [vmem:[#allocation15_spill] sm:$0xff]  ;;  %v17435_v16 = vld [vmem:[#allocation16_spill] sm:$0xff]  ;;  %v12618_v26 = vld [vmem:[%s17289_s1 + $0x3a8] sm:$0xff] }
 0x1ba   :  { %v14841_v11 = vsel %vm1308_vm0, %v1769_v13, %v14827_v62  ;;  %v1305_v13 = vpack.c.b16 %v17435_v16, %v17435_v16  ;;  %v1892_v16 = vshll.u32 %v1307_v52, 16 }
 0x1bc   :  { %v1871_v48 = vshrl.u32 %v1305_v13, 16  ;;  %v1874_v24 = vshll.u32 %v1305_v13, 16 }
 0x1be   :  { %v2291_v51 = vpop.f32.mrf.mxu2  ;;  %v1164_v23 = vpop.f32.mrf.mxu0 }
 0x1bf   :  { %v2350_v59 = vpop.f32.mrf.mxu3  ;;  %v2292_v20 = vadd.f32 %v2291_v51, %v1221_v8  ;;  %v1223_v15 = vpop.f32.mrf.mxu1  ;;  %v1165_v2 = vadd.f32 %v1164_v23, %v17433_v50  ;;  %v1304_v8 = vpack.c.b16 %v17434_v57, %v17434_v57  ;;  %v1306_v51 = vpack.c.b16 %v14564_v58, %v14564_v58  ;;  %v12626_v50 = vld [vmem:[%s17289_s1 + $0x3e8] sm:$0xff] }
 0x1c0   :  { %v1873_v23 = vrot.slane %v1871_v48, 3  ;;  %4046 = vmatpush.bf16.msrb.mxu3 %v12626_v50  ;;  %v12622_v50 = vld [vmem:[%s17289_s1 + $0x3c8] sm:$0xff] }
 0x1c1   :  { %v14831_v53 = vadd.f32 %v2350_v59, %v2292_v20  ;;  %v1224_v40 = vadd.f32 %v1223_v15, %v1165_v2  ;;  %2401 = vmatmul.bf16.gmra.mxu0 %v14758_v43  ;;  %v14852_v43 = vsel %vm1308_vm0, %v1778_v54, %v14829_v6  ;;  %v12619_v54 = vld [vmem:[%s17289_s1 + $0x3b0] sm:$0xff]  ;;  %v1862_v34 = vshrl.u32 %v1304_v8, 16  ;;  %v17436_v59 = vld [vmem:[#allocation30_spill] sm:$0xff] }
 0x1c2   :  { %2460 = vmatmul.bf16.gmra.mxu1 %v14761_v25  ;;  %v14854_v25 = vor.u32 %v1840_v60, %v1837_v32  ;;  %v1865_v17 = vshll.u32 %v1304_v8, 16  ;;  %3986 = vmatpush.bf16.msrb.mxu2 %v12619_v54  ;;  %v1876_v15 = vrot.slane %v1874_v24, 4  ;;  %v1880_v2 = vshrl.u32 %v1306_v51, 16 }
 0x1c3   :  { %2519 = vmatmul.bf16.gmra.mxu2 %v14766_v35  ;;  %v1864_v20 = vrot.slane %v1862_v34, 3  ;;  %v1883_v32 = vshll.u32 %v1306_v51, 16  ;;  %v1889_v8 = vshrl.u32 %v1307_v52, 16  ;;  %v12625_v34 = vld [vmem:[%s17289_s1 + $0x3e0] sm:$0xff]  ;;  %v1894_v24 = vrot.slane %v1892_v16, 4 }
 0x1c4   :  { %2578 = vmatmul.bf16.gmra.mxu3 %v14769_v42  ;;  %v14863_v49 = vsel %vm1308_vm0, %v1787_v31, %v14854_v25  ;;  %v1867_v58 = vrot.slane %v1865_v17, 4  ;;  %v1882_v5 = vrot.slane %v1880_v2, 3 }
 0x1c5   :  { %v1885_v57 = vrot.slane %v1883_v32, 4  ;;  %v1891_v48 = vrot.slane %v1889_v8, 3  ;;  %4047 = vmatpush.bf16.msrb.mxu3 %v12625_v34  ;;  %v12613_v32 = vld [vmem:[%s17289_s1 + $0x380] sm:$0xff] }
 0x1c6   :  { %v2294_v35 = vpop.f32.mrf.mxu2  ;;  %v1166_v39 = vpop.f32.mrf.mxu0  ;;  %3987 = vmatpush.bf16.msrb.mxu2 %v12618_v26  ;;  %v1868_v17 = vor.u32 %v1867_v58, %v1864_v20  ;;  %v12623_v58 = vld [vmem:[%s17289_s1 + $0x3d0] sm:$0xff]  ;;  %v10591_v34 = vld [vmem:[%s17290_s0 + $0x60] sm:$0xf] }
 0x1c7   :  { %v2353_v42 = vpop.f32.mrf.mxu3  ;;  %v2295_v27 = vadd.f32 %v2294_v35, %v1224_v40  ;;  %v1225_v29 = vpop.f32.mrf.mxu1  ;;  %v1167_v31 = vadd.f32 %v1166_v39, %v17436_v59  ;;  %v1886_v39 = vor.u32 %v1885_v57, %v1882_v5  ;;  %v12621_v57 = vld [vmem:[%s17289_s1 + $0x3c0] sm:$0xff] }
 0x1c8   :  { %v14903_v59 = vsel %vm1308_vm0, %v14825_v14, %v1868_v17  ;;  %v12624_v14 = vld [vmem:[%s17289_s1 + $0x3d8] sm:$0xff] }
 0x1c9   :  { %v14874_v10 = vadd.f32 %v2353_v42, %v2295_v27  ;;  %v1226_v0 = vadd.f32 %v1225_v29, %v1167_v31  ;;  %v12597_v42 = vld [vmem:[%s17289_s1 + $0x300] sm:$0xff]  ;;  %v1877_v27 = vor.u32 %v1876_v15, %v1873_v23  ;;  %4048 = vmatpush.bf16.msrb.mxu3 %v12624_v14  ;;  %v12614_v15 = vld [vmem:[%s17289_s1 + $0x388] sm:$0xff]  ;;  %v12540_v17 = vld [vmem:[%s17290_s0 + $0x74] sm:$0xf0] }
 0x1ca   :  { %3988 = vmatpush.bf16.msrb.mxu2 %v12617_v28  ;;  %3874 = vmatpush.bf16.msrb.mxu0 %v12597_v42  ;;  %v10615_v14 = vld [vmem:[%s17290_s0 + $0x90] sm:$0xf] }
 0x1cb   :  { %v14907_v31 = vsel %vm1308_vm0, %v14827_v62, %v1877_v27  ;;  %v12537_v27 = vld [vmem:[%s17290_s0 + $0x64] sm:$0xf] }
 0x1cd   :  { %4049 = vmatpush.bf16.msrb.mxu3 %v12623_v58 }
 0x1ce   :  { %v2296_v60 = vpop.f32.mrf.mxu2  ;;  %v1169_v47 = vpop.f32.mrf.mxu0  ;;  %3989 = vmatpush.bf16.msrb.mxu2 %v12616_v4 }
 0x1cf   :  { %v2355_v40 = vpop.f32.mrf.mxu3  ;;  %v2297_v13 = vadd.f32 %v2296_v60, %v1226_v0  ;;  %v1228_v35 = vpop.f32.mrf.mxu1  ;;  %v1170_v54 = vadd.f32 %v1169_v47, %v14493_v21  ;;  %v12605_v21 = vld [vmem:[%s17289_s1 + $0x340] sm:$0xff] }
 0x1d0   :  { %3933 = vmatpush.bf16.msrb.mxu1 %v12605_v21  ;;  %v10601_v21 = vld [vmem:[%s17290_s0 + $0x80] sm:$0xf0] }
 0x1d1   :  { %v14894_v29 = vadd.f32 %v2355_v40, %v2297_v13  ;;  %v1229_v51 = vadd.f32 %v1228_v35, %v1170_v54  ;;  %2406 = vmatmul.bf16.gmra.mxu0 %v14794_v55  ;;  %v14916_v55 = vsel %vm1308_vm0, %v14829_v6, %v1886_v39  ;;  %4050 = vmatpush.bf16.msrb.mxu3 %v12622_v50  ;;  %v12644_v13 = vld [vmem:[%s17289_s1 + $0x478] sm:$0xff]  ;;  %v12547_v50 = vld [vmem:[%s17290_s0 + $0xac] sm:$0xf0] }
 0x1d2   :  { %2465 = vmatmul.bf16.gmra.mxu1 %v14797_v30  ;;  %v1895_v30 = vor.u32 %v1894_v24, %v1891_v48  ;;  %v10593_v39 = vld [vmem:[%s17290_s0 + $0x78] sm:$0xf0]  ;;  %v12541_v48 = vld [vmem:[%s17290_s0 + $0x7c] sm:$0xf0]  ;;  %v10592_v24 = vor.u32 %v12540_v17, %v10591_v34 }
 0x1d3   :  { %2524 = vmatmul.bf16.gmra.mxu2 %v14802_v41 }
 0x1d4   :  { %2583 = vmatmul.bf16.gmra.mxu3 %v14805_v12  ;;  %v14923_v62 = vsel %vm1308_vm0, %v14854_v25, %v1895_v30  ;;  %v12615_v12 = vld [vmem:[%s17289_s1 + $0x390] sm:$0xff]  ;;  %4162 = vmatpush.bf16.msra.mxu1 %v12644_v13 }
 0x1d5   :  { %3990 = vmatpush.bf16.msrb.mxu2 %v12615_v12  ;;  %4051 = vmatpush.bf16.msrb.mxu3 %v12621_v57 }
 0x1d6   :  { %v2299_v52 = vpop.f32.mrf.mxu2  ;;  %v1171_v0 = vpop.f32.mrf.mxu0 }
 0x1d7   :  { %v2358_v41 = vpop.f32.mrf.mxu3  ;;  %v2300_v6 = vadd.f32 %v2299_v52, %v1229_v51  ;;  %v1230_v26 = vpop.f32.mrf.mxu1  ;;  %v1172_v20 = vadd.f32 %v1171_v0, %v14526_v7  ;;  %v12538_v51 = vld [vmem:[%s17290_s0 + $0x6c] sm:$0xf]  ;;  %v10596_v52 = vor.u32 %v12537_v27, %v10593_v39  ;;  %v12546_v0 = vld [vmem:[%s17290_s0 + $0xa4] sm:$0xf0] }
 0x1d9   :  { %v14932_v23 = vadd.f32 %v2358_v41, %v2300_v6  ;;  %v1231_v25 = vadd.f32 %v1230_v26, %v1172_v20  ;;  %3991 = vmatpush.bf16.msrb.mxu2 %v12614_v15  ;;  %v12543_v26 = vld [vmem:[%s17290_s0 + $0x94] sm:$0xf]  ;;  %v10617_v20 = vld [vmem:[%s17290_s0 + $0xa8] sm:$0xf0]  ;;  %v10623_v15 = vld [vmem:[%s17290_s0 + $0x98] sm:$0xf] }
 0x1da   :  { %v3030_v57 = vshll.u32 %v10596_v52, 16 }
 0x1dd   :  { %3992 = vmatpush.bf16.msrb.mxu2 %v12613_v32  ;;  %v3018_v32 = vshll.u32 %v10592_v24, 16 }
 0x1de   :  { %v2301_v7 = vpop.f32.mrf.mxu2  ;;  %v2372_v40 = vpop.f32.mrf.mxu0 }
 0x1df   :  { %v2360_v2 = vpop.f32.mrf.mxu3  ;;  %v2302_v60 = vadd.f32 %v2301_v7, %v1231_v25  ;;  %v2431_v28 = vpop.f32.mrf.mxu1  ;;  %v2373_v5 = vadd.f32 %v2372_v40, %v14562_v63  ;;  %v12636_v63 = vld [vmem:[%s17289_s1 + $0x438] sm:$0xff]  ;;  %v10604_v7 = vor.u32 %v12538_v51, %v10601_v21 }
 0x1e0   :  { %4103 = vmatpush.bf16.msra.mxu0 %v12636_v63 }
 0x1e1   :  { %v14947_v8 = vadd.f32 %v2360_v2, %v2302_v60  ;;  %v2432_v16 = vadd.f32 %v2431_v28, %v2373_v5  ;;  %2411 = vmatmul.bf16.gmra.mxu0 %v14837_v18  ;;  %v12544_v60 = vld [vmem:[%s17290_s0 + $0x9c] sm:$0xf]  ;;  %v15015_v28 = vor.u32 %v12546_v0, %v10615_v14  ;;  %v15017_v5 = vor.u32 %v12543_v26, %v10617_v20 }
 0x1e2   :  { %2470 = vmatmul.bf16.gmra.mxu1 %v14841_v11 }
 0x1e3   :  { %2529 = vmatmul.bf16.gmra.mxu2 %v14852_v43 }
 0x1e4   :  { %2588 = vmatmul.bf16.gmra.mxu3 %v14863_v49 }
 0x1e6   :  { %v2490_v47 = vpop.f32.mrf.mxu2  ;;  %v2374_v42 = vpop.f32.mrf.mxu0 }
 0x1e7   :  { %v2549_v35 = vpop.f32.mrf.mxu3  ;;  %v2491_v18 = vadd.f32 %v2490_v47, %v2432_v16  ;;  %v2433_v11 = vpop.f32.mrf.mxu1  ;;  %v2375_v43 = vadd.f32 %v2374_v42, %v14577_v36  ;;  %v10599_v36 = vld [vmem:[%s17290_s0 + $0x68] sm:$0xf]  ;;  %v15021_v16 = vor.u32 %v12547_v50, %v10623_v15  ;;  %v3054_v47 = vshll.u32 %v10604_v7, 16 }
 0x1e8   :  { %v10600_v58 = vor.u32 %v12541_v48, %v10599_v36  ;;  %v12635_v36 = vld [vmem:[%s17289_s1 + $0x430] sm:$0xff] }
 0x1e9   :  { %v14960_v54 = vadd.f32 %v2549_v35, %v2491_v18  ;;  %v2434_v49 = vadd.f32 %v2433_v11, %v2375_v43  ;;  %v3016_v35 = vshrl.u32 %v10592_v24, 16  ;;  %v3020_v18 = vrot.slane %v3018_v32, 1  ;;  %4104 = vmatpush.bf16.msra.mxu0 %v12635_v36 }
 0x1ea   :  { %v3042_v63 = vshll.u32 %v10600_v58, 16  ;;  %v3028_v11 = vshrl.u32 %v10596_v52, 16  ;;  %v3032_v43 = vrot.slane %v3030_v57, 1  ;;  %v3047_v39 = vshll.u32 %v15021_v16, 16  ;;  %v12643_v52 = vld [vmem:[%s17289_s1 + $0x470] sm:$0xff] }
 0x1eb   :  { %v3052_v24 = vshrl.u32 %v10604_v7, 16  ;;  %v3056_v51 = vrot.slane %v3054_v47, 1  ;;  %v3021_v14 = vor.u32 %v3020_v18, %v3016_v35  ;;  %4163 = vmatpush.bf16.msra.mxu1 %v12643_v52  ;;  %v12549_v35 = vld [vmem:[%s17290_s0 + $0xc4] sm:$0xf]  ;;  %v10641_v18 = vld [vmem:[%s17290_s0 + $0xd8] sm:$0xf0] }
 0x1ec   :  { %v3044_v27 = vrot.slane %v3042_v63, 1  ;;  %v3049_v26 = vrot.slane %v3047_v39, 1  ;;  %v3087_v39 = vshrl.u32 %v15015_v28, 16 }
 0x1ee   :  { %v2492_v4 = vpop.f32.mrf.mxu2  ;;  %v2377_v12 = vpop.f32.mrf.mxu0 }
 0x1ef   :  { %v2551_v30 = vpop.f32.mrf.mxu3  ;;  %v2493_v41 = vadd.f32 %v2492_v4, %v2434_v49  ;;  %v2436_v6 = vpop.f32.mrf.mxu1  ;;  %v2378_v25 = vadd.f32 %v2377_v12, %v14605_v19  ;;  %v10625_v19 = vld [vmem:[%s17290_s0 + $0xb0] sm:$0xf0]  ;;  %v3035_v49 = vshll.u32 %v15017_v5, 16  ;;  %v3033_v12 = vor.u32 %v3032_v43, %v3028_v11  ;;  %v10649_v11 = vld [vmem:[%s17290_s0 + $0xe0] sm:$0xf0] }
 0x1f0   :  { %v15023_v13 = vor.u32 %v12544_v60, %v10625_v19  ;;  %v10639_v19 = vld [vmem:[%s17290_s0 + $0xc0] sm:$0xf] }
 0x1f1   :  { %v15005_v2 = vadd.f32 %v2551_v30, %v2493_v41  ;;  %v2437_v40 = vadd.f32 %v2436_v6, %v2378_v25  ;;  %2416 = vmatmul.bf16.gmra.mxu0 %v14903_v59  ;;  %v3037_v6 = vrot.slane %v3035_v49, 1 }
 0x1f2   :  { %2475 = vmatmul.bf16.gmra.mxu1 %v14907_v31  ;;  %v3023_v31 = vshll.u32 %v15015_v28, 16  ;;  %v3059_v21 = vshll.u32 %v15023_v13, 16 }
 0x1f3   :  { %2534 = vmatmul.bf16.gmra.mxu2 %v14916_v55  ;;  %v3038_v60 = vsel %vm3014_vm1, %v3033_v12, %v3037_v6 }
 0x1f4   :  { %2593 = vmatmul.bf16.gmra.mxu3 %v14923_v62  ;;  %v3040_v62 = vshrl.u32 %v10600_v58, 16  ;;  %v3025_v41 = vrot.slane %v3023_v31, 1  ;;  %v3061_v20 = vrot.slane %v3059_v21, 1  ;;  %v12550_v31 = vld [vmem:[%s17290_s0 + $0xcc] sm:$0xf]  ;;  %v3095_v21 = vshrl.u32 %v15017_v5, 16 }
 0x1f5   :  { %v12642_v5 = vld [vmem:[%s17289_s1 + $0x468] sm:$0xff] }
 0x1f6   :  { %v2495_v59 = vpop.f32.mrf.mxu2  ;;  %v2379_v55 = vpop.f32.mrf.mxu0  ;;  %v3045_v0 = vor.u32 %v3044_v27, %v3040_v62  ;;  %v3026_v32 = vsel %vm3014_vm1, %v3021_v14, %v3025_v41  ;;  %v3103_v14 = vshrl.u32 %v15021_v16, 16  ;;  %v3089_v16 = vor.u32 %v3087_v39, %v3025_v41  ;;  %4164 = vmatpush.bf16.msra.mxu1 %v12642_v5  ;;  %v10663_v41 = vld [vmem:[%s17290_s0 + $0xf0] sm:$0xf] }
 0x1f7   :  { %v2554_v42 = vpop.f32.mrf.mxu3  ;;  %v2496_v34 = vadd.f32 %v2495_v59, %v2437_v40  ;;  %v2438_v17 = vpop.f32.mrf.mxu1  ;;  %v2380_v48 = vadd.f32 %v2379_v55, %v14615_v45  ;;  %v3057_v45 = vor.u32 %v3056_v51, %v3052_v24  ;;  %v12552_v40 = vld [vmem:[%s17290_s0 + $0xd4] sm:$0xf0]  ;;  %v10647_v59 = vld [vmem:[%s17290_s0 + $0xc8] sm:$0xf] }
 0x1f8   :  { %v3050_v63 = vsel %vm3014_vm1, %v3045_v0, %v3049_v26  ;;  %v15069_v49 = vor.u32 %v12552_v40, %v10639_v19  ;;  %v3111_v0 = vshrl.u32 %v15023_v13, 16 }
 0x1f9   :  { %v15033_v4 = vadd.f32 %v2554_v42, %v2496_v34  ;;  %v2439_v30 = vadd.f32 %v2438_v17, %v2380_v48  ;;  %v3062_v47 = vsel %vm3014_vm1, %v3057_v45, %v3061_v20  ;;  %v15071_v34 = vor.u32 %v12549_v35, %v10641_v18 }
 0x1fa   :  { %v15075_v17 = vor.u32 %v12550_v31, %v10649_v11  ;;  %v3091_v36 = vshll.u32 %v15069_v49, 16  ;;  %v3113_v13 = vor.u32 %v3111_v0, %v3061_v20  ;;  %v10665_v31 = vld [vmem:[%s17290_s0 + $0x108] sm:$0xf0]  ;;  %v10671_v11 = vld [vmem:[%s17290_s0 + $0xf8] sm:$0xf] }
 0x1fc   :  { %v3115_v45 = vshll.u32 %v15075_v17, 16 }
 0x1fe   :  { %v2497_v58 = vpop.f32.mrf.mxu2  ;;  %v2382_v50 = vpop.f32.mrf.mxu0 }
 0x1ff   :  { %v2556_v25 = vpop.f32.mrf.mxu3  ;;  %v2498_v15 = vadd.f32 %v2497_v58, %v2439_v30  ;;  %v2441_v7 = vpop.f32.mrf.mxu1  ;;  %v2383_v57 = vadd.f32 %v2382_v50, %v14638_v56  ;;  %v12553_v56 = vld [vmem:[%s17290_s0 + $0xdc] sm:$0xf0]  ;;  %v3099_v30 = vshll.u32 %v15071_v34, 16 }
 0x200   :  { %v15073_v55 = vor.u32 %v12553_v56, %v10647_v59  ;;  %v12555_v56 = vld [vmem:[%s17290_s0 + $0xf4] sm:$0xf] }
 0x201   :  { %v15058_v42 = vadd.f32 %v2556_v25, %v2498_v15  ;;  %v2442_v43 = vadd.f32 %v2441_v7, %v2383_v57  ;;  %3875 = vmatmul.bf16.vlgmr.msrb.gmra.mxu0 %v3026_v32  ;;  %v12634_v25 = vld [vmem:[%s17289_s1 + $0x428] sm:$0xff]  ;;  %v3093_v15 = vrot.slane %v3091_v36, 1  ;;  %v3101_v50 = vrot.slane %v3099_v30, 1 }
 0x202   :  { %3934 = vmatmul.bf16.vlgmr.msrb.gmra.mxu1 %v3038_v60  ;;  %v3107_v12 = vshll.u32 %v15073_v55, 16  ;;  %v3105_v7 = vor.u32 %v3103_v14, %v3049_v26  ;;  %v3117_v60 = vrot.slane %v3115_v45, 1  ;;  %4105 = vmatpush.bf16.msra.mxu0 %v12634_v25  ;;  %v3135_v14 = vshrl.u32 %v15069_v49, 16 }
 0x203   :  { %3993 = vmatmul.bf16.vlgmr.msrb.gmra.mxu2 %v3050_v63  ;;  %v3094_v35 = vsel %vm3014_vm1, %v3089_v16, %v3093_v15  ;;  %v3151_v5 = vshrl.u32 %v15073_v55, 16 }
 0x204   :  { %4052 = vmatmul.bf16.vlgmr.msrb.gmra.mxu3 %v3062_v47  ;;  %v3109_v32 = vrot.slane %v3107_v12, 1  ;;  %v3118_v59 = vsel %vm3014_vm1, %v3113_v13, %v3117_v60 }
 0x206   :  { %v2500_v62 = vpop.f32.mrf.mxu2  ;;  %v2384_v24 = vpop.f32.mrf.mxu0  ;;  %v3110_v20 = vsel %vm3014_vm1, %v3105_v7, %v3109_v32  ;;  %v3159_v7 = vshrl.u32 %v15075_v17, 16 }
 0x207   :  { %v2559_v27 = vpop.f32.mrf.mxu3  ;;  %v2501_v48 = vadd.f32 %v2500_v62, %v2442_v43  ;;  %v2443_v51 = vpop.f32.mrf.mxu1  ;;  %v2385_v52 = vadd.f32 %v2384_v24, %v14651_v9  ;;  %v3097_v9 = vor.u32 %v3095_v21, %v3037_v6  ;;  %v12558_v6 = vld [vmem:[%s17290_s0 + $0x104] sm:$0xf0]  ;;  %v12556_v62 = vld [vmem:[%s17290_s0 + $0xfc] sm:$0xf] }
 0x208   :  { %v15125_v36 = vor.u32 %v12558_v6, %v10663_v41 }
 0x209   :  { %v15086_v28 = vadd.f32 %v2559_v27, %v2501_v48  ;;  %v2444_v58 = vadd.f32 %v2443_v51, %v2385_v52  ;;  %v3102_v18 = vsel %vm3014_vm1, %v3097_v9, %v3101_v50  ;;  %v10673_v27 = vld [vmem:[%s17290_s0 + $0x110] sm:$0xf0]  ;;  %v15127_v48 = vor.u32 %v12555_v56, %v10665_v31 }
 0x20a   :  { %v15131_v51 = vor.u32 %v12556_v62, %v10673_v27  ;;  %v3139_v52 = vshll.u32 %v15125_v36, 16  ;;  %v10695_v62 = vld [vmem:[%s17290_s0 + $0x128] sm:$0xf] }
 0x20b   :  { %v3147_v25 = vshll.u32 %v15127_v48, 16 }
 0x20c   :  { %v3163_v13 = vshll.u32 %v15131_v51, 16 }
 0x20e   :  { %v2502_v19 = vpop.f32.mrf.mxu2  ;;  %v2387_v63 = vpop.f32.mrf.mxu0  ;;  %v3165_v41 = vrot.slane %v3163_v13, 1 }
 0x20f   :  { %v2561_v40 = vpop.f32.mrf.mxu3  ;;  %v2503_v57 = vadd.f32 %v2502_v19, %v2444_v58  ;;  %v2446_v47 = vpop.f32.mrf.mxu1  ;;  %v2388_v26 = vadd.f32 %v2387_v63, %v14674_v1  ;;  %v12559_v1 = vld [vmem:[%s17290_s0 + $0x10c] sm:$0xf0]  ;;  %v3143_v58 = vshrl.u32 %v15071_v34, 16  ;;  %v3153_v34 = vor.u32 %v3151_v5, %v3109_v32  ;;  %v12633_v32 = vld [vmem:[%s17289_s1 + $0x420] sm:$0xff] }
 0x210   :  { %v15129_v24 = vor.u32 %v12559_v1, %v10671_v11  ;;  %v12561_v11 = vld [vmem:[%s17290_s0 + $0x124] sm:$0xf]  ;;  %v10689_v1 = vld [vmem:[%s17290_s0 + $0x138] sm:$0xf0]  ;;  %4106 = vmatpush.bf16.msra.mxu0 %v12633_v32  ;;  %v3183_v5 = vshrl.u32 %v15125_v36, 16 }
 0x211   :  { %v15114_v43 = vadd.f32 %v2561_v40, %v2503_v57  ;;  %v2447_v39 = vadd.f32 %v2446_v47, %v2388_v26  ;;  %3880 = vmatmul.bf16.gmra.mxu0 %v3094_v35  ;;  %v3137_v40 = vor.u32 %v3135_v14, %v3093_v15  ;;  %v3141_v57 = vrot.slane %v3139_v52, 1  ;;  %v10687_v15 = vld [vmem:[%s17290_s0 + $0x120] sm:$0xf] }
 0x212   :  { %3939 = vmatmul.bf16.gmra.mxu1 %v3102_v18  ;;  %v3155_v9 = vshll.u32 %v15129_v24, 16  ;;  %v3145_v63 = vor.u32 %v3143_v58, %v3101_v50  ;;  %v3149_v47 = vrot.slane %v3147_v25, 1  ;;  %v3161_v18 = vor.u32 %v3159_v7, %v3117_v60  ;;  %v12564_v50 = vld [vmem:[%s17290_s0 + $0x134] sm:$0xf0]  ;;  %v12641_v52 = vld [vmem:[%s17289_s1 + $0x460] sm:$0xff] }
 0x213   :  { %3998 = vmatmul.bf16.gmra.mxu2 %v3110_v20  ;;  %v3142_v17 = vsel %vm3014_vm1, %v3137_v40, %v3141_v57  ;;  %v15178_v14 = vor.u32 %v12564_v50, %v10687_v15  ;;  %4165 = vmatpush.bf16.msra.mxu1 %v12641_v52  ;;  %v10721_v52 = vld [vmem:[%s17290_s0 + $0x170] sm:$0xf0] }
 0x214   :  { %4057 = vmatmul.bf16.gmra.mxu3 %v3118_v59  ;;  %v3157_v35 = vrot.slane %v3155_v9, 1  ;;  %v3150_v59 = vsel %vm3014_vm1, %v3145_v63, %v3149_v47  ;;  %v3166_v31 = vsel %vm3014_vm1, %v3161_v18, %v3165_v41  ;;  %v3199_v63 = vshrl.u32 %v15129_v24, 16 }
 0x216   :  { %v2505_v21 = vpop.f32.mrf.mxu2  ;;  %v2389_v0 = vpop.f32.mrf.mxu0  ;;  %v3158_v56 = vsel %vm3014_vm1, %v3153_v34, %v3157_v35 }
 0x217   :  { %v2564_v30 = vpop.f32.mrf.mxu3  ;;  %v2506_v12 = vadd.f32 %v2505_v21, %v2447_v39  ;;  %v2448_v45 = vpop.f32.mrf.mxu1  ;;  %v2390_v16 = vadd.f32 %v2389_v0, %v14684_v33  ;;  %v12562_v39 = vld [vmem:[%s17290_s0 + $0x12c] sm:$0xf]  ;;  %v10697_v21 = vld [vmem:[%s17290_s0 + $0x140] sm:$0xf0] }
 0x219   :  { %v15142_v49 = vadd.f32 %v2564_v30, %v2506_v12  ;;  %v2449_v19 = vadd.f32 %v2448_v45, %v2390_v16  ;;  %v15183_v12 = vor.u32 %v12561_v11, %v10689_v1  ;;  %v15187_v45 = vor.u32 %v12562_v39, %v10697_v21  ;;  %v10719_v39 = vld [vmem:[%s17290_s0 + $0x158] sm:$0xf] }
 0x21a   :  { %v3187_v16 = vshll.u32 %v15178_v14, 16 }
 0x21b   :  { %v3195_v40 = vshll.u32 %v15183_v12, 16 }
 0x21e   :  { %v2507_v55 = vpop.f32.mrf.mxu2  ;;  %v2392_v26 = vpop.f32.mrf.mxu0 }
 0x21f   :  { %v2566_v6 = vpop.f32.mrf.mxu3  ;;  %v2508_v33 = vadd.f32 %v2507_v55, %v2449_v19  ;;  %v2451_v20 = vpop.f32.mrf.mxu1  ;;  %v2393_v60 = vadd.f32 %v2392_v26, %v14710_v46  ;;  %v12565_v46 = vld [vmem:[%s17290_s0 + $0x13c] sm:$0xf0]  ;;  %v3191_v19 = vshrl.u32 %v15127_v48, 16  ;;  %v3207_v55 = vshrl.u32 %v15131_v51, 16 }
 0x220   :  { %v15185_v0 = vor.u32 %v12565_v46, %v10695_v62  ;;  %v3185_v26 = vor.u32 %v3183_v5, %v3141_v57  ;;  %v3201_v48 = vor.u32 %v3199_v63, %v3157_v35  ;;  %v10711_v57 = vld [vmem:[%s17290_s0 + $0x150] sm:$0xf]  ;;  %v12567_v62 = vld [vmem:[%s17290_s0 + $0x154] sm:$0xf]  ;;  %v10713_v46 = vld [vmem:[%s17290_s0 + $0x168] sm:$0xf0] }
 0x221   :  { %v15167_v27 = vadd.f32 %v2566_v6, %v2508_v33  ;;  %v2452_v30 = vadd.f32 %v2451_v20, %v2393_v60  ;;  %3885 = vmatmul.bf16.gmra.mxu0 %v3142_v17  ;;  %v3211_v6 = vshll.u32 %v15187_v45, 16  ;;  %v3189_v20 = vrot.slane %v3187_v16, 1  ;;  %v12632_v16 = vld [vmem:[%s17289_s1 + $0x418] sm:$0xff] }
 0x222   :  { %3944 = vmatmul.bf16.gmra.mxu1 %v3150_v59  ;;  %v3203_v18 = vshll.u32 %v15185_v0, 16  ;;  %v3193_v17 = vor.u32 %v3191_v19, %v3149_v47  ;;  %v3197_v59 = vrot.slane %v3195_v40, 1  ;;  %v3209_v50 = vor.u32 %v3207_v55, %v3165_v41  ;;  %v12570_v47 = vld [vmem:[%s17290_s0 + $0x164] sm:$0xf0]  ;;  %4107 = vmatpush.bf16.msra.mxu0 %v12632_v16  ;;  %v12574_v16 = vld [vmem:[%s17290_s0 + $0x18c] sm:$0xf] }
 0x223   :  { %4003 = vmatmul.bf16.gmra.mxu2 %v3158_v56  ;;  %v3213_v32 = vrot.slane %v3211_v6, 1  ;;  %v3190_v51 = vsel %vm3014_vm1, %v3185_v26, %v3189_v20  ;;  %v15233_v5 = vor.u32 %v12567_v62, %v10713_v46  ;;  %v3231_v63 = vshrl.u32 %v15178_v14, 16 }
 0x224   :  { %4062 = vmatmul.bf16.gmra.mxu3 %v3166_v31  ;;  %v3205_v15 = vrot.slane %v3203_v18, 1  ;;  %v3198_v11 = vsel %vm3014_vm1, %v3193_v17, %v3197_v59  ;;  %v3247_v17 = vshrl.u32 %v15185_v0, 16 }
 0x225   :  { %v3214_v1 = vsel %vm3014_vm1, %v3209_v50, %v3213_v32  ;;  %v3243_v26 = vshll.u32 %v15233_v5, 16 }
 0x226   :  { %v2510_v58 = vpop.f32.mrf.mxu2  ;;  %v2394_v7 = vpop.f32.mrf.mxu0  ;;  %v3206_v41 = vsel %vm3014_vm1, %v3201_v48, %v3205_v15 }
 0x227   :  { %v2569_v25 = vpop.f32.mrf.mxu3  ;;  %v2511_v9 = vadd.f32 %v2510_v58, %v2452_v30  ;;  %v2453_v13 = vpop.f32.mrf.mxu1  ;;  %v2395_v34 = vadd.f32 %v2394_v7, %v14717_v37  ;;  %v12568_v30 = vld [vmem:[%s17290_s0 + $0x15c] sm:$0xf] }
 0x229   :  { %v15198_v36 = vadd.f32 %v2569_v25, %v2511_v9  ;;  %v2454_v33 = vadd.f32 %v2453_v13, %v2395_v34  ;;  %v15231_v25 = vor.u32 %v12570_v47, %v10711_v57  ;;  %v12640_v9 = vld [vmem:[%s17289_s1 + $0x458] sm:$0xff]  ;;  %v15243_v13 = vor.u32 %v12568_v30, %v10721_v52  ;;  %v10743_v52 = vld [vmem:[%s17290_s0 + $0x188] sm:$0xf] }
 0x22a   :  { %4166 = vmatpush.bf16.msra.mxu1 %v12640_v9  ;;  %v10737_v30 = vld [vmem:[%s17290_s0 + $0x198] sm:$0xf0]  ;;  %v10745_v9 = vld [vmem:[%s17290_s0 + $0x1a0] sm:$0xf0] }
 0x22b   :  { %v3235_v34 = vshll.u32 %v15231_v25, 16 }
 0x22e   :  { %v2512_v24 = vpop.f32.mrf.mxu2  ;;  %v2397_v56 = vpop.f32.mrf.mxu0 }
 0x22f   :  { %v2571_v60 = vpop.f32.mrf.mxu3  ;;  %v2513_v37 = vadd.f32 %v2512_v24, %v2454_v33  ;;  %v2456_v31 = vpop.f32.mrf.mxu1  ;;  %v2398_v35 = vadd.f32 %v2397_v56, %v14746_v61  ;;  %v12571_v61 = vld [vmem:[%s17290_s0 + $0x16c] sm:$0xf0]  ;;  %v3239_v33 = vshrl.u32 %v15183_v12, 16  ;;  %v3255_v24 = vshrl.u32 %v15187_v45, 16 }
 0x230   :  { %v15241_v7 = vor.u32 %v12571_v61, %v10719_v39  ;;  %v3233_v56 = vor.u32 %v3231_v63, %v3189_v20  ;;  %v3249_v12 = vor.u32 %v3247_v17, %v3205_v15  ;;  %v10735_v20 = vld [vmem:[%s17290_s0 + $0x180] sm:$0xf]  ;;  %v12573_v61 = vld [vmem:[%s17290_s0 + $0x184] sm:$0xf] }
 0x231   :  { %v15220_v21 = vadd.f32 %v2571_v60, %v2513_v37  ;;  %v2457_v58 = vadd.f32 %v2456_v31, %v2398_v35  ;;  %3890 = vmatmul.bf16.gmra.mxu0 %v3190_v51  ;;  %v3259_v60 = vshll.u32 %v15243_v13, 16  ;;  %v3237_v31 = vrot.slane %v3235_v34, 1 }
 0x232   :  { %3949 = vmatmul.bf16.gmra.mxu1 %v3198_v11  ;;  %v3251_v50 = vshll.u32 %v15241_v7, 16  ;;  %v3241_v51 = vor.u32 %v3239_v33, %v3197_v59  ;;  %v3245_v11 = vrot.slane %v3243_v26, 1  ;;  %v3257_v47 = vor.u32 %v3255_v24, %v3213_v32  ;;  %v12576_v59 = vld [vmem:[%s17290_s0 + $0x194] sm:$0xf0] }
 0x233   :  { %4008 = vmatmul.bf16.gmra.mxu2 %v3206_v41  ;;  %v3261_v35 = vrot.slane %v3259_v60, 1  ;;  %v3238_v45 = vsel %vm3014_vm1, %v3233_v56, %v3237_v31  ;;  %v15289_v63 = vor.u32 %v12573_v61, %v10737_v30  ;;  %v3279_v33 = vshrl.u32 %v15231_v25, 16  ;;  %v12631_v56 = vld [vmem:[%s17289_s1 + $0x410] sm:$0xff] }
 0x234   :  { %4067 = vmatmul.bf16.gmra.mxu3 %v3214_v1  ;;  %v3253_v57 = vrot.slane %v3251_v50, 1  ;;  %v3246_v46 = vsel %vm3014_vm1, %v3241_v51, %v3245_v11  ;;  %v3287_v24 = vshrl.u32 %v15233_v5, 16  ;;  %v3303_v25 = vshrl.u32 %v15243_v13, 16  ;;  %4108 = vmatpush.bf16.msra.mxu0 %v12631_v56 }
 0x235   :  { %v3262_v39 = vsel %vm3014_vm1, %v3257_v47, %v3261_v35  ;;  %v3291_v60 = vshll.u32 %v15289_v63, 16 }
 0x236   :  { %v2515_v19 = vpop.f32.mrf.mxu2  ;;  %v2399_v55 = vpop.f32.mrf.mxu0  ;;  %v3254_v32 = vsel %vm3014_vm1, %v3249_v12, %v3253_v57 }
 0x237   :  { %v2574_v40 = vpop.f32.mrf.mxu3  ;;  %v2516_v18 = vadd.f32 %v2515_v19, %v2457_v58  ;;  %v2458_v6 = vpop.f32.mrf.mxu1  ;;  %v2400_v48 = vadd.f32 %v2399_v55, %v14753_v44 }
 0x239   :  { %v15254_v14 = vadd.f32 %v2574_v40, %v2516_v18  ;;  %v2459_v37 = vadd.f32 %v2458_v6, %v2400_v48  ;;  %v15287_v40 = vor.u32 %v12576_v59, %v10735_v20  ;;  %v15293_v18 = vor.u32 %v12574_v16, %v10745_v9  ;;  %v10761_v16 = vld [vmem:[%s17290_s0 + $0x1c8] sm:$0xf0]  ;;  %v10767_v9 = vld [vmem:[%s17290_s0 + $0x1b8] sm:$0xf] }
 0x23b   :  { %v3283_v26 = vshll.u32 %v15287_v40, 16  ;;  %v3307_v47 = vshll.u32 %v15293_v18, 16 }
 0x23d   :  { %v3309_v20 = vrot.slane %v3307_v47, 1  ;;  %v3335_v47 = vshrl.u32 %v15289_v63, 16  ;;  %v12638_v63 = vld [vmem:[%s17289_s1 + $0x448] sm:$0xff] }
 0x23e   :  { %v2517_v0 = vpop.f32.mrf.mxu2  ;;  %v2402_v1 = vpop.f32.mrf.mxu0 }
 0x23f   :  { %v2576_v41 = vpop.f32.mrf.mxu3  ;;  %v2518_v44 = vadd.f32 %v2517_v0, %v2459_v37  ;;  %v2461_v62 = vpop.f32.mrf.mxu1  ;;  %v2403_v15 = vadd.f32 %v2402_v1, %v14779_v38  ;;  %v12577_v38 = vld [vmem:[%s17290_s0 + $0x19c] sm:$0xf0]  ;;  %v3295_v37 = vshrl.u32 %v15241_v7, 16  ;;  %v12639_v7 = vld [vmem:[%s17289_s1 + $0x450] sm:$0xff]  ;;  %v3289_v1 = vor.u32 %v3287_v24, %v3245_v11  ;;  %v12582_v11 = vld [vmem:[%s17290_s0 + $0x1c4] sm:$0xf0] }
 0x240   :  { %v15291_v34 = vor.u32 %v12577_v38, %v10743_v52  ;;  %4167 = vmatpush.bf16.msra.mxu1 %v12639_v7  ;;  %v12579_v38 = vld [vmem:[%s17290_s0 + $0x1b4] sm:$0xf] }
 0x241   :  { %v15276_v58 = vadd.f32 %v2576_v41, %v2518_v44  ;;  %v2462_v19 = vadd.f32 %v2461_v62, %v2403_v15  ;;  %3895 = vmatmul.bf16.gmra.mxu0 %v3238_v45  ;;  %v3281_v41 = vor.u32 %v3279_v33, %v3237_v31  ;;  %v3285_v44 = vrot.slane %v3283_v26, 1  ;;  %v10759_v31 = vld [vmem:[%s17290_s0 + $0x1b0] sm:$0xf] }
 0x242   :  { %3954 = vmatmul.bf16.gmra.mxu1 %v3246_v46  ;;  %v3299_v12 = vshll.u32 %v15291_v34, 16  ;;  %v3293_v62 = vrot.slane %v3291_v60, 1  ;;  %v3297_v45 = vor.u32 %v3295_v37, %v3253_v57  ;;  %v3305_v46 = vor.u32 %v3303_v25, %v3261_v35 }
 0x243   :  { %4013 = vmatmul.bf16.gmra.mxu2 %v3254_v32  ;;  %v3286_v61 = vsel %vm3014_vm1, %v3281_v41, %v3285_v44  ;;  %v15343_v26 = vor.u32 %v12582_v11, %v10759_v31  ;;  %v3327_v37 = vshrl.u32 %v15287_v40, 16  ;;  %v3343_v7 = vshrl.u32 %v15291_v34, 16 }
 0x244   :  { %4072 = vmatmul.bf16.gmra.mxu3 %v3262_v39  ;;  %v3294_v30 = vsel %vm3014_vm1, %v3289_v1, %v3293_v62  ;;  %v3310_v52 = vsel %vm3014_vm1, %v3305_v46, %v3309_v20  ;;  %4168 = vmatpush.bf16.msra.mxu1 %v12638_v63 }
 0x245   :  { %v3331_v56 = vshll.u32 %v15343_v26, 16  ;;  %v3329_v34 = vor.u32 %v3327_v37, %v3285_v44  ;;  %v10783_v44 = vld [vmem:[%s17290_s0 + $0x1e0] sm:$0xf] }
 0x246   :  { %v2520_v55 = vpop.f32.mrf.mxu2  ;;  %v2404_v48 = vpop.f32.mrf.mxu0 }
 0x247   :  { %v2579_v6 = vpop.f32.mrf.mxu3  ;;  %v2521_v17 = vadd.f32 %v2520_v55, %v2462_v19  ;;  %v2463_v50 = vpop.f32.mrf.mxu1  ;;  %v2405_v51 = vadd.f32 %v2404_v48, %v14789_v22  ;;  %v3301_v22 = vrot.slane %v3299_v12, 1  ;;  %v12580_v55 = vld [vmem:[%s17290_s0 + $0x1bc] sm:$0xf] }
 0x249   :  { %v15307_v0 = vadd.f32 %v2579_v6, %v2521_v17  ;;  %v2464_v5 = vadd.f32 %v2463_v50, %v2405_v51  ;;  %v3302_v35 = vsel %vm3014_vm1, %v3297_v45, %v3301_v22  ;;  %v10769_v6 = vld [vmem:[%s17290_s0 + $0x1d0] sm:$0xf0]  ;;  %v15345_v17 = vor.u32 %v12579_v38, %v10761_v16 }
 0x24a   :  { %v15349_v50 = vor.u32 %v12580_v55, %v10769_v6  ;;  %v3351_v45 = vshrl.u32 %v15293_v18, 16  ;;  %v10785_v55 = vld [vmem:[%s17290_s0 + $0x1f8] sm:$0xf0]  ;;  %v10791_v6 = vld [vmem:[%s17290_s0 + $0x1e8] sm:$0xf] }
 0x24c   :  { %v3355_v46 = vshll.u32 %v15349_v50, 16  ;;  %v3353_v18 = vor.u32 %v3351_v45, %v3309_v20 }
 0x24e   :  { %v2522_v13 = vpop.f32.mrf.mxu2  ;;  %v2407_v32 = vpop.f32.mrf.mxu0 }
 0x24f   :  { %v2581_v59 = vpop.f32.mrf.mxu3  ;;  %v2523_v15 = vadd.f32 %v2522_v13, %v2464_v5  ;;  %v2466_v39 = vpop.f32.mrf.mxu1  ;;  %v2408_v57 = vadd.f32 %v2407_v32, %v14812_v3  ;;  %v12583_v3 = vld [vmem:[%s17290_s0 + $0x1cc] sm:$0xf0]  ;;  %v3339_v5 = vshll.u32 %v15345_v17, 16 }
 0x250   :  { %v15347_v48 = vor.u32 %v12583_v3, %v10767_v9  ;;  %v12585_v3 = vld [vmem:[%s17290_s0 + $0x1e4] sm:$0xf] }
 0x251   :  { %v15332_v19 = vadd.f32 %v2581_v59, %v2523_v15  ;;  %v2467_v33 = vadd.f32 %v2466_v39, %v2408_v57  ;;  %3900 = vmatmul.bf16.gmra.mxu0 %v3286_v61  ;;  %v12630_v59 = vld [vmem:[%s17289_s1 + $0x408] sm:$0xff]  ;;  %v3333_v15 = vrot.slane %v3331_v56, 1  ;;  %v3341_v32 = vrot.slane %v3339_v5, 1 }
 0x252   :  { %3959 = vmatmul.bf16.gmra.mxu1 %v3294_v30  ;;  %v3347_v1 = vshll.u32 %v15347_v48, 16  ;;  %v3345_v39 = vor.u32 %v3343_v7, %v3301_v22  ;;  %v3357_v30 = vrot.slane %v3355_v46, 1  ;;  %4109 = vmatpush.bf16.msra.mxu0 %v12630_v59  ;;  %v3375_v7 = vshrl.u32 %v15343_v26, 16 }
 0x253   :  { %4018 = vmatmul.bf16.gmra.mxu2 %v3302_v35  ;;  %v3334_v38 = vsel %vm3014_vm1, %v3329_v34, %v3333_v15  ;;  %v3391_v63 = vshrl.u32 %v15347_v48, 16 }
 0x254   :  { %4077 = vmatmul.bf16.gmra.mxu3 %v3310_v52  ;;  %v3349_v61 = vrot.slane %v3347_v1, 1  ;;  %v3358_v9 = vsel %vm3014_vm1, %v3353_v18, %v3357_v30 }
 0x256   :  { %v2525_v24 = vpop.f32.mrf.mxu2  ;;  %v2409_v12 = vpop.f32.mrf.mxu0  ;;  %v3350_v20 = vsel %vm3014_vm1, %v3345_v39, %v3349_v61  ;;  %v3399_v39 = vshrl.u32 %v15349_v50, 16  ;;  %v10807_v50 = vld [vmem:[%s17290_s0 + $0x210] sm:$0xf] }
 0x257   :  { %v2584_v60 = vpop.f32.mrf.mxu3  ;;  %v2526_v51 = vadd.f32 %v2525_v24, %v2467_v33  ;;  %v2468_v25 = vpop.f32.mrf.mxu1  ;;  %v2410_v41 = vadd.f32 %v2409_v12, %v14831_v53  ;;  %v3337_v53 = vor.u32 %v3335_v47, %v3293_v62  ;;  %v12588_v62 = vld [vmem:[%s17290_s0 + $0x1f4] sm:$0xf0]  ;;  %v12586_v24 = vld [vmem:[%s17290_s0 + $0x1ec] sm:$0xf] }
 0x258   :  { %v15399_v56 = vor.u32 %v12588_v62, %v10783_v44 }
 0x259   :  { %v15360_v40 = vadd.f32 %v2584_v60, %v2526_v51  ;;  %v2469_v13 = vadd.f32 %v2468_v25, %v2410_v41  ;;  %v3342_v16 = vsel %vm3014_vm1, %v3337_v53, %v3341_v32  ;;  %v10793_v60 = vld [vmem:[%s17290_s0 + $0x200] sm:$0xf0]  ;;  %v15401_v51 = vor.u32 %v12585_v3, %v10785_v55 }
 0x25a   :  { %v15405_v25 = vor.u32 %v12586_v24, %v10793_v60  ;;  %v3379_v41 = vshll.u32 %v15399_v56, 16  ;;  %v12595_v24 = vld [vmem:[%s17290_s0 + $0x22c] sm:$0xf0]  ;;  %v10817_v60 = vld [vmem:[%s17290_s0 + $0x230] sm:$0xf0] }
 0x25b   :  { %v3387_v59 = vshll.u32 %v15401_v51, 16 }
 0x25c   :  { %v3403_v18 = vshll.u32 %v15405_v25, 16 }
 0x25e   :  { %v2527_v31 = vpop.f32.mrf.mxu2  ;;  %v2412_v35 = vpop.f32.mrf.mxu0  ;;  %v3405_v48 = vrot.slane %v3403_v18, 1 }
 0x25f   :  { %v2586_v11 = vpop.f32.mrf.mxu3  ;;  %v2528_v57 = vadd.f32 %v2527_v31, %v2469_v13  ;;  %v2471_v52 = vpop.f32.mrf.mxu1  ;;  %v2413_v22 = vadd.f32 %v2412_v35, %v14874_v10  ;;  %v12589_v10 = vld [vmem:[%s17290_s0 + $0x1fc] sm:$0xf0]  ;;  %v3383_v13 = vshrl.u32 %v15345_v17, 16  ;;  %v3389_v17 = vrot.slane %v3387_v59, 1 }
 0x260   :  { %v15403_v12 = vor.u32 %v12589_v10, %v10791_v6  ;;  %v10809_v6 = vld [vmem:[%s17290_s0 + $0x228] sm:$0xf0]  ;;  %v10815_v10 = vld [vmem:[%s17290_s0 + $0x218] sm:$0xf] }
 0x261   :  { %v15388_v33 = vadd.f32 %v2586_v11, %v2528_v57  ;;  %v2472_v37 = vadd.f32 %v2471_v52, %v2413_v22  ;;  %3905 = vmatmul.bf16.gmra.mxu0 %v3334_v38  ;;  %v3377_v11 = vor.u32 %v3375_v7, %v3333_v15  ;;  %v3381_v57 = vrot.slane %v3379_v41, 1 }
 0x262   :  { %3964 = vmatmul.bf16.gmra.mxu1 %v3342_v16  ;;  %v3395_v53 = vshll.u32 %v15403_v12, 16  ;;  %v3385_v35 = vor.u32 %v3383_v13, %v3341_v32  ;;  %v3393_v52 = vor.u32 %v3391_v63, %v3349_v61  ;;  %v3401_v16 = vor.u32 %v3399_v39, %v3357_v30  ;;  %v12594_v32 = vld [vmem:[%s17290_s0 + $0x224] sm:$0xf0]  ;;  %v12591_v61 = vld [vmem:[%s17290_s0 + $0x214] sm:$0xf]  ;;  %v12629_v30 = vld [vmem:[%s17289_s1 + $0x400] sm:$0xff] }
 0x263   :  { %4023 = vmatmul.bf16.gmra.mxu2 %v3350_v20  ;;  %v3382_v20 = vsel %vm3014_vm1, %v3377_v11, %v3381_v57  ;;  %4110 = vmatpush.bf16.msra.mxu0 %v12629_v30  ;;  %v15461_v7 = vor.u32 %v12591_v61, %v10809_v6  ;;  %v15463_v41 = vor.u32 %v12595_v24, %v10815_v10  ;;  %v3423_v13 = vshrl.u32 %v15399_v56, 16 }
 0x264   :  { %4082 = vmatmul.bf16.gmra.mxu3 %v3358_v9  ;;  %v3397_v38 = vrot.slane %v3395_v53, 1  ;;  %v3390_v15 = vsel %vm3014_vm1, %v3385_v35, %v3389_v17  ;;  %v3406_v55 = vsel %vm3014_vm1, %v3401_v16, %v3405_v48  ;;  %v3431_v63 = vshrl.u32 %v15401_v51, 16 }
 0x265   :  { %v3435_v18 = vshll.u32 %v15461_v7, 16  ;;  %v3439_v11 = vshrl.u32 %v15403_v12, 16  ;;  %v3443_v35 = vshll.u32 %v15463_v41, 16  ;;  %v3447_v16 = vshrl.u32 %v15405_v25, 16  ;;  %v2660_v25 = vld [vmem:[%s17290_s0 + $0x248] sm:$0x11] }
 0x266   :  { %v2530_v47 = vpop.f32.mrf.mxu2  ;;  %v2414_v45 = vpop.f32.mrf.mxu0  ;;  %v3398_v3 = vsel %vm3014_vm1, %v3393_v52, %v3397_v38  ;;  %v3425_v51 = vor.u32 %v3423_v13, %v3381_v57  ;;  %v2944_v24 = vunpack.c.l.b16 %v2660_v25 }
 0x267   :  { %v2589_v5 = vpop.f32.mrf.mxu3  ;;  %v2531_v1 = vadd.f32 %v2530_v47, %v2472_v37  ;;  %v2473_v46 = vpop.f32.mrf.mxu1  ;;  %v2415_v34 = vadd.f32 %v2414_v45, %v14894_v29  ;;  %v12637_v37 = vld [vmem:[%s17289_s1 + $0x440] sm:$0xff]  ;;  %v3445_v61 = vrot.slane %v3443_v35, 1  ;;  %v3449_v30 = vor.u32 %v3447_v16, %v3405_v48 }
 0x268   :  { %4169 = vmatpush.bf16.msra.mxu1 %v12637_v37 }
 0x269   :  { %v15416_v26 = vadd.f32 %v2589_v5, %v2531_v1  ;;  %v15418_v31 = vadd.f32 %v2473_v46, %v2415_v34  ;;  %v15459_v5 = vor.u32 %v12594_v32, %v10807_v50  ;;  %v3441_v32 = vor.u32 %v3439_v11, %v3397_v38 }
 0x26b   :  { %17437 = vst [vmem:[#allocation17_spill] sm:$0xff] %v15416_v26  ;;  %v3427_v59 = vshll.u32 %v15459_v5, 16 }
 0x26c   :  { %17438 = vst [vmem:[#allocation5_spill] sm:$0xff] %v15418_v31 }
 0x26e   :  { %v15420_v44 = vpop.f32.mrf.mxu2  ;;  %v2417_v62 = vpop.f32.mrf.mxu0 }
 0x26f   :  { %17439 = vst [vmem:[#allocation6_spill] sm:$0xff] %v15420_v44  ;;  %v15422_v29 = vpop.f32.mrf.mxu3  ;;  %v2476_v22 = vpop.f32.mrf.mxu1  ;;  %v2418_v9 = vadd.f32 %v2417_v62, %v14932_v23  ;;  %v12592_v23 = vld [vmem:[%s17290_s0 + $0x21c] sm:$0xf] }
 0x270   :  { %17440 = vst [vmem:[#allocation18_spill] sm:$0xff] %v15422_v29  ;;  %v15465_v1 = vor.u32 %v12592_v23, %v10817_v60  ;;  %v2945_v23 = vunpack.c.h.b16 %v2660_v25 }
 0x271   :  { %v2477_v47 = vadd.f32 %v2476_v22, %v2418_v9  ;;  %3910 = vmatmul.bf16.gmra.mxu0 %v3382_v20  ;;  %v3429_v22 = vrot.slane %v3427_v59, 1  ;;  %v3433_v20 = vor.u32 %v3431_v63, %v3389_v17  ;;  %v3446_v17 = vsel %vm3014_vm1, %v3441_v32, %v3445_v61 }
 0x272   :  { %3969 = vmatmul.bf16.gmra.mxu1 %v3390_v15  ;;  %v3451_v50 = vshll.u32 %v15465_v1, 16  ;;  %v3437_v15 = vrot.slane %v3435_v18, 1  ;;  %v3495_v35 = vshrl.u32 %v15465_v1, 16  ;;  %v12539_v1 = vld [vmem:[%s17290_s0 + $0x74] sm:$0xf] }
 0x273   :  { %4028 = vmatmul.bf16.gmra.mxu2 %v3398_v3  ;;  %v3430_v9 = vsel %vm3014_vm1, %v3425_v51, %v3429_v22 }
 0x274   :  { %4087 = vmatmul.bf16.gmra.mxu3 %v3406_v55  ;;  %v3453_v12 = vrot.slane %v3451_v50, 1  ;;  %v3438_v57 = vsel %vm3014_vm1, %v3433_v20, %v3437_v15 }
 0x276   :  { %v2535_v45 = vpop.f32.mrf.mxu2  ;;  %v2419_v53 = vpop.f32.mrf.mxu0  ;;  %v3454_v10 = vsel %vm3014_vm1, %v3449_v30, %v3453_v12  ;;  %v3497_v30 = vor.u32 %v3495_v35, %v3453_v12  ;;  %v12660_v35 = vld [vmem:[%s17291_s3 + $0x78] sm:$0xff] }
 0x277   :  { %v2594_v46 = vpop.f32.mrf.mxu3  ;;  %v2536_v34 = vadd.f32 %v2535_v45, %v2477_v47  ;;  %v2478_v39 = vpop.f32.mrf.mxu1  ;;  %v2420_v52 = vadd.f32 %v2419_v53, %v14947_v8  ;;  %v2659_v8 = vld [vmem:[%s17290_s0 + $0x240] sm:$0x11]  ;;  %v3010_v47 = vpack.c.b16 %v2944_v24, %v2944_v24  ;;  %v3011_v45 = vpack.c.b16 %v2945_v23, %v2945_v23  ;;  %v10633_v24 = vld [vmem:[%s17290_s0 + $0xb8] sm:$0xf0]  ;;  %4535 = vmatpush.bf16.msra.mxu2 %v12660_v35 }
 0x278   :  { %v2942_v38 = vunpack.c.l.b16 %v2659_v8  ;;  %v2943_v6 = vunpack.c.h.b16 %v2659_v8  ;;  %v12557_v35 = vld [vmem:[%s17290_s0 + $0x104] sm:$0xf] }
 0x279   :  { %v15476_v56 = vadd.f32 %v2594_v46, %v2536_v34  ;;  %v15478_v62 = vadd.f32 %v2478_v39, %v2420_v52  ;;  %v3471_v46 = vshrl.u32 %v15459_v5, 16  ;;  %v3479_v34 = vshrl.u32 %v15461_v7, 16  ;;  %v10607_v5 = vld [vmem:[%s17290_s0 + $0x70] sm:$0xf]  ;;  %v12542_v7 = vld [vmem:[%s17290_s0 + $0x84] sm:$0xf0] }
 0x27a   :  { %v3008_v60 = vpack.c.b16 %v2942_v38, %v2942_v38  ;;  %v3009_v37 = vpack.c.b16 %v2943_v6, %v2943_v6  ;;  %v3487_v39 = vshrl.u32 %v15463_v41, 16  ;;  %v3491_v11 = vshll.u32 %v3010_v47, 16  ;;  %v12548_v6 = vld [vmem:[%s17290_s0 + $0xb4] sm:$0xf0] }
 0x27b   :  { %17441 = vst [vmem:[#allocation19_spill] sm:$0xff] %v15476_v56  ;;  %v3499_v52 = vshll.u32 %v3011_v45, 16  ;;  %v3473_v16 = vor.u32 %v3471_v46, %v3429_v22  ;;  %v3481_v51 = vor.u32 %v3479_v34, %v3437_v15  ;;  %v10609_v22 = vld [vmem:[%s17290_s0 + $0x88] sm:$0xf0]  ;;  %v10608_v15 = vor.u32 %v12542_v7, %v10607_v5  ;;  %v10823_v56 = vld [vmem:[%s17290_s0 + $0x220] sm:$0xf] }
 0x27c   :  { %17442 = vst [vmem:[#allocation7_spill] sm:$0xff] %v15478_v62  ;;  %v3475_v63 = vshll.u32 %v3008_v60, 16  ;;  %v3483_v53 = vshll.u32 %v3009_v37, 16  ;;  %v3489_v32 = vor.u32 %v3487_v39, %v3445_v61  ;;  %v3493_v41 = vrot.slane %v3491_v11, 1  ;;  %v10631_v61 = vld [vmem:[%s17290_s0 + $0xa0] sm:$0xf] }
 0x27d   :  { %v3501_v8 = vrot.slane %v3499_v52, 1  ;;  %v10612_v12 = vor.u32 %v12539_v1, %v10609_v22  ;;  %v3066_v23 = vshll.u32 %v10608_v15, 16  ;;  %v10632_v60 = vor.u32 %v12548_v6, %v10631_v61  ;;  %v12652_v52 = vld [vmem:[%s17291_s3 + $0x38] sm:$0xff]  ;;  %v12554_v1 = vld [vmem:[%s17290_s0 + $0xe4] sm:$0xf0] }
 0x27e   :  { %v3876_v3 = vpop.f32.mrf.mxu0  ;;  %v3477_v50 = vrot.slane %v3475_v63, 1  ;;  %v3485_v20 = vrot.slane %v3483_v53, 1  ;;  %v3064_v45 = vshrl.u32 %v10608_v15, 16  ;;  %4763 = vmatpush.bf16.msra.mxu3 %v12652_v52  ;;  %v12551_v22 = vld [vmem:[%s17290_s0 + $0xd4] sm:$0xf] }
 0x27f   :  { %v3935_v55 = vpop.f32.mrf.mxu1  ;;  %v3502_v38 = vsel %vm3014_vm1, %v3497_v30, %v3501_v8  ;;  %v3078_v47 = vshll.u32 %v10612_v12, 16  ;;  %v3068_v46 = vrot.slane %v3066_v23, 1  ;;  %v3071_v63 = vshll.u32 %v10632_v60, 16  ;;  %v10655_v30 = vld [vmem:[%s17290_s0 + $0xd0] sm:$0xf] }
 0x280   :  { %v15489_v48 = vadd.f32 %v3935_v55, %v3876_v3  ;;  %v3478_v3 = vsel %vm3014_vm1, %v3473_v16, %v3477_v50  ;;  %v3486_v55 = vsel %vm3014_vm1, %v3481_v51, %v3485_v20  ;;  %v3076_v34 = vshrl.u32 %v10612_v12, 16  ;;  %v10657_v15 = vld [vmem:[%s17290_s0 + $0xe8] sm:$0xf0]  ;;  %v10681_v52 = vld [vmem:[%s17290_s0 + $0x118] sm:$0xf0] }
 0x281   :  { %3915 = vmatmul.bf16.gmra.mxu0 %v3430_v9  ;;  %v3080_v53 = vrot.slane %v3078_v47, 1  ;;  %v3069_v16 = vor.u32 %v3068_v46, %v3064_v45  ;;  %v3073_v50 = vrot.slane %v3071_v63, 1  ;;  %v3119_v12 = vshrl.u32 %v10632_v60, 16  ;;  %v12659_v60 = vld [vmem:[%s17291_s3 + $0x70] sm:$0xff] }
 0x282   :  { %3974 = vmatmul.bf16.gmra.mxu1 %v3438_v57  ;;  %4536 = vmatpush.bf16.msra.mxu2 %v12659_v60 }
 0x283   :  { %4033 = vmatmul.bf16.gmra.mxu2 %v3446_v17  ;;  %v3494_v17 = vsel %vm3014_vm1, %v3489_v32, %v3493_v41  ;;  %v3081_v51 = vor.u32 %v3080_v53, %v3076_v34  ;;  %v3074_v32 = vsel %vm3014_vm1, %v3069_v16, %v3073_v50  ;;  %v10679_v34 = vld [vmem:[%s17290_s0 + $0x100] sm:$0xf] }
 0x284   :  { %4092 = vmatmul.bf16.gmra.mxu3 %v3454_v10  ;;  %v12545_v10 = vld [vmem:[%s17290_s0 + $0xa4] sm:$0xf] }
 0x285   :  { %v10636_v37 = vor.u32 %v12545_v10, %v10633_v24  ;;  %v3121_v24 = vor.u32 %v3119_v12, %v3073_v50  ;;  %v10684_v50 = vor.u32 %v12557_v35, %v10681_v52  ;;  %v12676_v52 = vld [vmem:[%s17291_s3 + $0xa8] sm:$0xff] }
 0x286   :  { %v3878_v13 = vpop.f32.mrf.mxu0 }
 0x287   :  { %v3937_v59 = vpop.f32.mrf.mxu1  ;;  %v3083_v39 = vshll.u32 %v10636_v37, 16 }
 0x288   :  { %v15495_v18 = vadd.f32 %v3937_v59, %v3878_v13 }
 0x289   :  { %v3085_v20 = vrot.slane %v3083_v39, 1  ;;  %v12560_v39 = vld [vmem:[%s17290_s0 + $0x114] sm:$0xf0] }
 0x28a   :  { %v10680_v16 = vor.u32 %v12560_v39, %v10679_v34 }
 0x28b   :  { %v3086_v41 = vsel %vm3014_vm1, %v3081_v51, %v3085_v20 }
 0x28c   :  { %v3215_v34 = vshrl.u32 %v10680_v16, 16 }
 0x28e   :  { %v3881_v25 = vpop.f32.mrf.mxu0 }
 0x28f   :  { %v3940_v9 = vpop.f32.mrf.mxu1 }
 0x290   :  { %v15515_v57 = vadd.f32 %v3940_v9, %v3881_v25  ;;  %v12678_v25 = vld [vmem:[%s17291_s3 + $0xb8] sm:$0xff]  ;;  %v10656_v9 = vor.u32 %v12554_v1, %v10655_v30  ;;  %v12677_v30 = vld [vmem:[%s17291_s3 + $0xb0] sm:$0xff] }
 0x291   :  { %3920 = vmatmul.bf16.gmra.mxu0 %v3478_v3  ;;  %v10660_v3 = vor.u32 %v12551_v22, %v10657_v15 }
 0x292   :  { %3979 = vmatmul.bf16.gmra.mxu1 %v3486_v55  ;;  %5055 = vmatpush.bf16.msrb.mxu0 %v12678_v25 }
 0x293   :  { %4038 = vmatmul.bf16.gmra.mxu2 %v3494_v17  ;;  %v3123_v17 = vshll.u32 %v10656_v9, 16  ;;  %v3131_v6 = vshll.u32 %v10660_v3, 16 }
 0x294   :  { %4097 = vmatmul.bf16.gmra.mxu3 %v3502_v38  ;;  %v3127_v38 = vshrl.u32 %v10636_v37, 16  ;;  %v12651_v37 = vld [vmem:[%s17291_s3 + $0x30] sm:$0xff] }
 0x295   :  { %v3125_v23 = vrot.slane %v3123_v17, 1  ;;  %v3133_v45 = vrot.slane %v3131_v6, 1  ;;  %4764 = vmatpush.bf16.msra.mxu3 %v12651_v37  ;;  %v12566_v6 = vld [vmem:[%s17290_s0 + $0x144] sm:$0xf0]  ;;  %v3223_v37 = vshrl.u32 %v10684_v50, 16 }
 0x296   :  { %v3883_v13 = vpop.f32.mrf.mxu0  ;;  %v3129_v47 = vor.u32 %v3127_v38, %v3085_v20  ;;  %5056 = vmatpush.bf16.msrb.mxu0 %v12677_v30 }
 0x297   :  { %v3942_v59 = vpop.f32.mrf.mxu1 }
 0x298   :  { %v15528_v11 = vadd.f32 %v3942_v59, %v3883_v13  ;;  %v3126_v59 = vsel %vm3014_vm1, %v3121_v24, %v3125_v23  ;;  %v3134_v63 = vsel %vm3014_vm1, %v3129_v47, %v3133_v45  ;;  %v12563_v24 = vld [vmem:[%s17290_s0 + $0x134] sm:$0xf]  ;;  %v12658_v47 = vld [vmem:[%s17291_s3 + $0x68] sm:$0xff] }
 0x299   :  { %4537 = vmatpush.bf16.msra.mxu2 %v12658_v47  ;;  %v12657_v47 = vld [vmem:[%s17291_s3 + $0x60] sm:$0xff] }
 0x29a   :  { %5057 = vmatpush.bf16.msrb.mxu0 %v12676_v52 }
 0x29d   :  { %4538 = vmatpush.bf16.msra.mxu2 %v12657_v47  ;;  %v15664_v47 = vpop.f32.mrf.mxu3 }
 0x29e   :  { %v3886_v5 = vpop.f32.mrf.mxu0  ;;  %17444 = vst [vmem:[#allocation20_spill] sm:$0xff] %v15664_v47 }
 0x29f   :  { %v3945_v7 = vpop.f32.mrf.mxu1 }
 0x2a0   :  { %v15541_v8 = vadd.f32 %v3945_v7, %v3886_v5  ;;  %v3167_v5 = vshrl.u32 %v10656_v9, 16  ;;  %v3171_v7 = vshll.u32 %v10680_v16, 16 }
 0x2a1   :  { %4111 = vmatmul.bf16.vlgmr.msra.gmra.mxu0 %v3074_v32  ;;  %v3175_v32 = vshrl.u32 %v10660_v3, 16  ;;  %v10703_v3 = vld [vmem:[%s17290_s0 + $0x130] sm:$0xf] }
 0x2a2   :  { %4170 = vmatmul.bf16.vlgmr.msra.gmra.mxu1 %v3086_v41  ;;  %v3179_v41 = vshll.u32 %v10684_v50, 16  ;;  %v3169_v22 = vor.u32 %v3167_v5, %v3125_v23  ;;  %v3173_v15 = vrot.slane %v3171_v7, 1  ;;  %v10705_v23 = vld [vmem:[%s17290_s0 + $0x148] sm:$0xf0]  ;;  %v10727_v50 = vld [vmem:[%s17290_s0 + $0x160] sm:$0xf] }
 0x2a3   :  { %v3177_v25 = vor.u32 %v3175_v32, %v3133_v45  ;;  %v12650_v45 = vld [vmem:[%s17291_s3 + $0x28] sm:$0xff] }
 0x2a4   :  { %v3174_v17 = vsel %vm3014_vm1, %v3169_v22, %v3173_v15  ;;  %4765 = vmatpush.bf16.msra.mxu3 %v12650_v45  ;;  %v12649_v45 = vld [vmem:[%s17291_s3 + $0x20] sm:$0xff] }
 0x2a6   :  { %v3888_v55 = vpop.f32.mrf.mxu0 }
 0x2a7   :  { %v3947_v61 = vpop.f32.mrf.mxu1 }
 0x2a8   :  { %v15555_v10 = vadd.f32 %v3947_v61, %v3888_v55  ;;  %v3181_v55 = vrot.slane %v3179_v41, 1  ;;  %4766 = vmatpush.bf16.msra.mxu3 %v12649_v45 }
 0x2aa   :  { %v3182_v9 = vsel %vm3014_vm1, %v3177_v25, %v3181_v55  ;;  %v3225_v5 = vor.u32 %v3223_v37, %v3181_v55  ;;  %v12569_v25 = vld [vmem:[%s17290_s0 + $0x164] sm:$0xf]  ;;  %v10729_v55 = vld [vmem:[%s17290_s0 + $0x178] sm:$0xf0] }
 0x2ae   :  { %v3891_v46 = vpop.f32.mrf.mxu0 }
 0x2af   :  { %v3950_v13 = vpop.f32.mrf.mxu1 }
 0x2b0   :  { %v15568_v53 = vadd.f32 %v3950_v13, %v3891_v46  ;;  %v10704_v46 = vor.u32 %v12566_v6, %v10703_v3  ;;  %v10708_v13 = vor.u32 %v12563_v24, %v10705_v23 }
 0x2b1   :  { %4116 = vmatmul.bf16.gmra.mxu0 %v3126_v59 }
 0x2b2   :  { %4175 = vmatmul.bf16.gmra.mxu1 %v3134_v63  ;;  %v3219_v60 = vshll.u32 %v10704_v46, 16  ;;  %v3227_v39 = vshll.u32 %v10708_v13, 16  ;;  %v3263_v3 = vshrl.u32 %v10704_v46, 16  ;;  %v3271_v24 = vshrl.u32 %v10708_v13, 16 }
 0x2b4   :  { %v3229_v7 = vrot.slane %v3227_v39, 1 }
 0x2b6   :  { %v3893_v51 = vpop.f32.mrf.mxu0  ;;  %v3230_v16 = vsel %vm3014_vm1, %v3225_v5, %v3229_v7  ;;  %v12675_v5 = vld [vmem:[%s17291_s3 + $0xa0] sm:$0xff] }
 0x2b7   :  { %v3952_v20 = vpop.f32.mrf.mxu1  ;;  %5058 = vmatpush.bf16.msrb.mxu0 %v12675_v5 }
 0x2b8   :  { %v15582_v1 = vadd.f32 %v3952_v20, %v3893_v51  ;;  %v3217_v51 = vor.u32 %v3215_v34, %v3173_v15  ;;  %v3221_v20 = vrot.slane %v3219_v60, 1  ;;  %v12572_v15 = vld [vmem:[%s17290_s0 + $0x174] sm:$0xf0]  ;;  %v3273_v60 = vor.u32 %v3271_v24, %v3229_v7  ;;  %v12575_v7 = vld [vmem:[%s17290_s0 + $0x194] sm:$0xf] }
 0x2b9   :  { %v12656_v24 = vld [vmem:[%s17291_s3 + $0x58] sm:$0xff] }
 0x2ba   :  { %v3222_v30 = vsel %vm3014_vm1, %v3217_v51, %v3221_v20  ;;  %v10751_v51 = vld [vmem:[%s17290_s0 + $0x190] sm:$0xf]  ;;  %4539 = vmatpush.bf16.msra.mxu2 %v12656_v24 }
 0x2be   :  { %v3896_v61 = vpop.f32.mrf.mxu0 }
 0x2bf   :  { %v3955_v12 = vpop.f32.mrf.mxu1 }
 0x2c0   :  { %v15589_v38 = vadd.f32 %v3955_v12, %v3896_v61  ;;  %v10728_v61 = vor.u32 %v12572_v15, %v10727_v50  ;;  %v10732_v12 = vor.u32 %v12569_v25, %v10729_v55  ;;  %v15654_v50 = vpop.f32.mrf.mxu2 }
 0x2c1   :  { %4121 = vmatmul.bf16.gmra.mxu0 %v3174_v17  ;;  %17443 = vst [vmem:[#allocation8_spill] sm:$0xff] %v15654_v50 }
 0x2c2   :  { %4180 = vmatmul.bf16.gmra.mxu1 %v3182_v9  ;;  %v3267_v6 = vshll.u32 %v10728_v61, 16  ;;  %v3275_v23 = vshll.u32 %v10732_v12, 16  ;;  %v3311_v55 = vshrl.u32 %v10728_v61, 16 }
 0x2c4   :  { %v3269_v34 = vrot.slane %v3267_v6, 1  ;;  %v3277_v37 = vrot.slane %v3275_v23, 1  ;;  %v12648_v23 = vld [vmem:[%s17291_s3 + $0x18] sm:$0xff] }
 0x2c5   :  { %4767 = vmatpush.bf16.msra.mxu3 %v12648_v23 }
 0x2c6   :  { %v3898_v59 = vpop.f32.mrf.mxu0  ;;  %v3278_v52 = vsel %vm3014_vm1, %v3273_v60, %v3277_v37  ;;  %v3313_v45 = vor.u32 %v3311_v55, %v3269_v34 }
 0x2c7   :  { %v3957_v63 = vpop.f32.mrf.mxu1 }
 0x2c8   :  { %v15606_v35 = vadd.f32 %v3957_v63, %v3898_v59  ;;  %v3265_v63 = vor.u32 %v3263_v3, %v3221_v20  ;;  %v12578_v20 = vld [vmem:[%s17290_s0 + $0x1a4] sm:$0xf0] }
 0x2ca   :  { %v3270_v13 = vsel %vm3014_vm1, %v3265_v63, %v3269_v34  ;;  %v12584_v34 = vld [vmem:[%s17290_s0 + $0x1d4] sm:$0xf0] }
 0x2ce   :  { %v3901_v32 = vpop.f32.mrf.mxu0 }
 0x2cf   :  { %v3960_v41 = vpop.f32.mrf.mxu1 }
 0x2d0   :  { %v15616_v22 = vadd.f32 %v3960_v41, %v3901_v32  ;;  %v10753_v41 = vld [vmem:[%s17290_s0 + $0x1a8] sm:$0xf0] }
 0x2d1   :  { %4126 = vmatmul.bf16.gmra.mxu0 %v3222_v30  ;;  %v10752_v30 = vor.u32 %v12578_v20, %v10751_v51  ;;  %v15671_v51 = vpop.f32.mrf.mxu2  ;;  %v10777_v20 = vld [vmem:[%s17290_s0 + $0x1d8] sm:$0xf0] }
 0x2d2   :  { %4185 = vmatmul.bf16.gmra.mxu1 %v3230_v16  ;;  %v10756_v16 = vor.u32 %v12575_v7, %v10753_v41  ;;  %v12674_v7 = vld [vmem:[%s17291_s3 + $0x98] sm:$0xff] }
 0x2d3   :  { %5059 = vmatpush.bf16.msrb.mxu0 %v12674_v7  ;;  %v12590_v7 = vld [vmem:[%s17290_s0 + $0x204] sm:$0xf0] }
 0x2d4   :  { %v3323_v3 = vshll.u32 %v10756_v16, 16  ;;  %v3367_v24 = vshrl.u32 %v10756_v16, 16  ;;  %v12655_v16 = vld [vmem:[%s17291_s3 + $0x50] sm:$0xff] }
 0x2d5   :  { %4540 = vmatpush.bf16.msra.mxu2 %v12655_v16  ;;  %v12673_v16 = vld [vmem:[%s17291_s3 + $0x90] sm:$0xff] }
 0x2d6   :  { %v3903_v17 = vpop.f32.mrf.mxu0 }
 0x2d7   :  { %v3962_v9 = vpop.f32.mrf.mxu1  ;;  %5060 = vmatpush.bf16.msrb.mxu0 %v12673_v16  ;;  %v17346_v16 = vmov 0  }
 0x2d8   :  { %v15633_v59 = vadd.f32 %v3962_v9, %v3903_v17  ;;  %v3315_v17 = vshll.u32 %v10752_v30, 16  ;;  %v3319_v9 = vshrl.u32 %v10732_v12, 16  ;;  %30 = vst [vmem:[#allocation2 + $0xc] sm:$0xf] %v17346_v16 }
 0x2d9   :  { %27 = vst [vmem:[#allocation2] sm:$0xf] %v17346_v16 }
 0x2da   :  { %v3317_v63 = vrot.slane %v3315_v17, 1  ;;  %v3321_v60 = vor.u32 %v3319_v9, %v3277_v37  ;;  %v12581_v37 = vld [vmem:[%s17290_s0 + $0x1c4] sm:$0xf]  ;;  %v3359_v9 = vshrl.u32 %v10752_v30, 16  ;;  %v10799_v30 = vld [vmem:[%s17290_s0 + $0x1f0] sm:$0xf] }
 0x2db   :  { %28 = vst [vmem:[#allocation2 + $0x4] sm:$0xf] %v17346_v16 }
 0x2dc   :  { %29 = vst [vmem:[#allocation2 + $0x8] sm:$0xf] %v17346_v16 }
 0x2dd   :  { %31 = vst [vmem:[#allocation3] sm:$0xf] %v17346_v16 }
 0x2de   :  { %v3906_v46 = vpop.f32.mrf.mxu0  ;;  %32 = vst [vmem:[#allocation3 + $0x4] sm:$0xf] %v17346_v16 }
 0x2df   :  { %v3965_v39 = vpop.f32.mrf.mxu1  ;;  %33 = vst [vmem:[#allocation3 + $0x8] sm:$0xf] %v17346_v16 }
 0x2e0   :  { %v15643_v32 = vadd.f32 %v3965_v39, %v3906_v46  ;;  %v3325_v46 = vrot.slane %v3323_v3, 1  ;;  %v3318_v39 = vsel %vm3014_vm1, %v3313_v45, %v3317_v63  ;;  %34 = vst [vmem:[#allocation3 + $0xc] sm:$0xf] %v17346_v16 }
 0x2e1   :  { %4131 = vmatmul.bf16.gmra.mxu0 %v3270_v13  ;;  %4369 = vst [vmem:[#allocation2 + $0x60] sm:$0xf] %v17346_v16 }
 0x2e2   :  { %4190 = vmatmul.bf16.gmra.mxu1 %v3278_v52  ;;  %v3326_v13 = vsel %vm3014_vm1, %v3321_v60, %v3325_v46  ;;  %v10775_v52 = vld [vmem:[%s17290_s0 + $0x1c0] sm:$0xf]  ;;  %v15691_v60 = vpop.f32.mrf.mxu2  ;;  %v3369_v47 = vor.u32 %v3367_v24, %v3325_v46  ;;  %5302 = vst [vmem:[#allocation3 + $0x60] sm:$0xf] %v17346_v16 }
 0x2e3   :  { %v10776_v41 = vor.u32 %v12584_v34, %v10775_v52 }
 0x2e5   :  { %v3363_v3 = vshll.u32 %v10776_v41, 16 }
 0x2e6   :  { %v3908_v15 = vpop.f32.mrf.mxu0 }
 0x2e7   :  { %v3967_v25 = vpop.f32.mrf.mxu1 }
 0x2e8   :  { %v15656_v6 = vadd.f32 %v3967_v25, %v3908_v15  ;;  %v10780_v15 = vor.u32 %v12581_v37, %v10777_v20  ;;  %v15687_v25 = vpop.f32.mrf.mxu3 }
 0x2ea   :  { %v3371_v23 = vshll.u32 %v10780_v15, 16 }
 0x2ee   :  { %v3911_v61 = vpop.f32.mrf.mxu0 }
 0x2ef   :  { %v3970_v12 = vpop.f32.mrf.mxu1 }
 0x2f0   :  { %v15673_v5 = vadd.f32 %v3970_v12, %v3911_v61  ;;  %v3361_v61 = vor.u32 %v3359_v9, %v3317_v63  ;;  %v3365_v12 = vrot.slane %v3363_v3, 1  ;;  %v12647_v63 = vld [vmem:[%s17291_s3 + $0x10] sm:$0xff]  ;;  %v15717_v3 = vpop.f32.mrf.mxu2 }
 0x2f1   :  { %4136 = vmatmul.bf16.gmra.mxu0 %v3318_v39  ;;  %v3373_v39 = vrot.slane %v3371_v23, 1  ;;  %4768 = vmatpush.bf16.msra.mxu3 %v12647_v63 }
 0x2f2   :  { %4195 = vmatmul.bf16.gmra.mxu1 %v3326_v13  ;;  %v15693_v13 = vpop.f32.mrf.mxu3  ;;  %v3366_v37 = vsel %vm3014_vm1, %v3361_v61, %v3365_v12  ;;  %v3407_v61 = vshrl.u32 %v10776_v41, 16 }
 0x2f3   :  { %v3374_v20 = vsel %vm3014_vm1, %v3369_v47, %v3373_v39  ;;  %v12587_v47 = vld [vmem:[%s17290_s0 + $0x1f4] sm:$0xf] }
 0x2f6   :  { %v3913_v55 = vpop.f32.mrf.mxu0 }
 0x2f7   :  { %v3972_v17 = vpop.f32.mrf.mxu1 }
 0x2f8   :  { %v15689_v45 = vadd.f32 %v3972_v17, %v3913_v55  ;;  %v10801_v55 = vld [vmem:[%s17290_s0 + $0x208] sm:$0xf0]  ;;  %v10800_v17 = vor.u32 %v12590_v7, %v10799_v30  ;;  %v15728_v7 = vpop.f32.mrf.mxu2 }
 0x2f9   :  { %v10804_v9 = vor.u32 %v12587_v47, %v10801_v55 }
 0x2fa   :  { %v15723_v62 = vpop.f32.mrf.mxu3 }
 0x2fb   :  { %v3419_v50 = vshll.u32 %v10804_v9, 16 }
 0x2fd   :  { %v3421_v63 = vrot.slane %v3419_v50, 1  ;;  %v12593_v50 = vld [vmem:[%s17290_s0 + $0x224] sm:$0xf] }
 0x2fe   :  { %v3916_v52 = vpop.f32.mrf.mxu0 }
 0x2ff   :  { %v3975_v34 = vpop.f32.mrf.mxu1 }
 0x300   :  { %v15706_v46 = vadd.f32 %v3975_v34, %v3916_v52  ;;  %v3411_v52 = vshll.u32 %v10800_v17, 16  ;;  %v3415_v34 = vshrl.u32 %v10780_v15, 16 }
 0x301   :  { %4141 = vmatmul.bf16.gmra.mxu0 %v3366_v37  ;;  %v3409_v37 = vor.u32 %v3407_v61, %v3365_v12  ;;  %v12596_v12 = vld [vmem:[%s17290_s0 + $0x234] sm:$0xf0] }
 0x302   :  { %4200 = vmatmul.bf16.gmra.mxu1 %v3374_v20  ;;  %v3413_v20 = vrot.slane %v3411_v52, 1  ;;  %v3417_v30 = vor.u32 %v3415_v34, %v3373_v39  ;;  %v10825_v39 = vld [vmem:[%s17290_s0 + $0x238] sm:$0xf0]  ;;  %v15746_v61 = vpop.f32.mrf.mxu3  ;;  %v15748_v52 = vor.u32 %v12596_v12, %v10823_v56  ;;  %v12654_v56 = vld [vmem:[%s17291_s3 + $0x48] sm:$0xff] }
 0x303   :  { %v15750_v34 = vor.u32 %v12593_v50, %v10825_v39  ;;  %4541 = vmatpush.bf16.msra.mxu2 %v12654_v56 }
 0x304   :  { %v3414_v41 = vsel %vm3014_vm1, %v3409_v37, %v3413_v20  ;;  %v3422_v15 = vsel %vm3014_vm1, %v3417_v30, %v3421_v63 }
 0x305   :  { %v3467_v44 = vshll.u32 %v15750_v34, 16 }
 0x306   :  { %v15719_v24 = vpop.f32.mrf.mxu0 }
 0x307   :  { %v15721_v23 = vpop.f32.mrf.mxu1  ;;  %v3469_v39 = vrot.slane %v3467_v44, 1 }
 0x30e   :  { %v3921_v47 = vpop.f32.mrf.mxu0 }
 0x30f   :  { %v3980_v55 = vpop.f32.mrf.mxu1 }
 0x310   :  { %v15735_v29 = vadd.f32 %v3980_v55, %v3921_v47  ;;  %v3455_v47 = vshrl.u32 %v10800_v17, 16  ;;  %v3459_v55 = vshll.u32 %v15748_v52, 16  ;;  %v3995_v17 = vadd.f32 %v15671_v51, %v15489_v48  ;;  %v2661_v48 = vld [vmem:[%s17290_s0 + $0x250] sm:$0x11]  ;;  %v12653_v51 = vld [vmem:[%s17291_s3 + $0x40] sm:$0xff] }
 0x311   :  { %4146 = vmatmul.bf16.gmra.mxu0 %v3414_v41  ;;  %v15760_v41 = vpop.f32.mrf.mxu2  ;;  %v2947_v56 = vunpack.c.h.b16 %v2661_v48  ;;  %4542 = vmatpush.bf16.msra.mxu2 %v12653_v51 }
 0x312   :  { %17445 = vst [vmem:[#allocation21_spill] sm:$0xff] %v15735_v29  ;;  %4205 = vmatmul.bf16.gmra.mxu1 %v3422_v15  ;;  %v3463_v29 = vshrl.u32 %v10804_v9, 16  ;;  %v12646_v9 = vld [vmem:[%s17291_s3 + $0x8] sm:$0xff]  ;;  %v3457_v15 = vor.u32 %v3455_v47, %v3413_v20  ;;  %v3461_v12 = vrot.slane %v3459_v55, 1  ;;  %v4054_v44 = vadd.f32 %v15687_v25, %v3995_v17 }
 0x313   :  { %4769 = vmatpush.bf16.msra.mxu3 %v12646_v9  ;;  %v2946_v55 = vunpack.c.l.b16 %v2661_v48  ;;  %v3013_v17 = vpack.c.b16 %v2947_v56, %v2947_v56 }
 0x314   :  { %v3465_v50 = vor.u32 %v3463_v29, %v3421_v63  ;;  %v3462_v63 = vsel %vm3014_vm1, %v3457_v15, %v3461_v12 }
 0x315   :  { %v3012_v25 = vpack.c.b16 %v2946_v55, %v2946_v55  ;;  %v12645_v55 = vld [vmem:[%s17291_s3] sm:$0xff] }
 0x316   :  { %v15753_v37 = vpop.f32.mrf.mxu0  ;;  %v3470_v47 = vsel %vm3014_vm1, %v3465_v50, %v3469_v39  ;;  %v12672_v50 = vld [vmem:[%s17291_s3 + $0x88] sm:$0xff] }
 0x317   :  { %17446 = vst [vmem:[#allocation9_spill] sm:$0xff] %v15753_v37  ;;  %v15755_v30 = vpop.f32.mrf.mxu1  ;;  %v3997_v37 = vadd.f32 %v15691_v60, %v15495_v18  ;;  %v15803_v18 = vld [vmem:[%s17292_s2] ss:$0 sm:$0xff]  ;;  %5061 = vmatpush.bf16.msrb.mxu0 %v12672_v50  ;;  %4770 = vmatpush.bf16.msra.mxu3 %v12645_v55 }
 0x318   :  { %17447 = vst [vmem:[#allocation10_spill] sm:$0xff] %v15755_v30  ;;  %v15774_v30 = vpop.f32.mrf.mxu3 }
 0x319   :  { %v15790_v31 = vpop.f32.mrf.mxu2  ;;  %v4056_v48 = vadd.f32 %v15693_v13, %v3997_v37  ;;  %v4000_v13 = vadd.f32 %v15717_v3, %v15515_v57 }
 0x31e   :  { %v4112_v29 = vpop.f32.mrf.mxu0 }
 0x31f   :  { %v4171_v20 = vpop.f32.mrf.mxu1  ;;  %v4113_v9 = vadd.f32 %v4112_v29, %v4054_v44  ;;  %v3503_v29 = vshrl.u32 %v15748_v52, 16 }
 0x320   :  { %v15798_v51 = vpop.f32.mrf.mxu3 }
 0x321   :  { %v4172_v26 = vadd.f32 %v4171_v20, %v4113_v9  ;;  %4151 = vmatmul.bf16.gmra.mxu0 %v3462_v63  ;;  %v3507_v20 = vshll.u32 %v3012_v25, 16  ;;  %v3505_v56 = vor.u32 %v3503_v29, %v3461_v12  ;;  %v15813_v25 = vpop.f32.mrf.mxu2 }
 0x322   :  { %4210 = vmatmul.bf16.gmra.mxu1 %v3470_v47 }
 0x323   :  { %v4221_v15 = vadd.f32 %v4172_v26, %v14960_v54  ;;  %v3511_v54 = vshrl.u32 %v15750_v34, 16  ;;  %v3515_v26 = vshll.u32 %v3013_v17, 16  ;;  %v3509_v9 = vrot.slane %v3507_v20, 1 }
 0x324   :  { %v4059_v17 = vadd.f32 %v15723_v62, %v4000_v13  ;;  %v4002_v62 = vadd.f32 %v15728_v7, %v15528_v11 }
 0x325   :  { %v4245_v37 = vadd.f32 %v15803_v18, %v4221_v15  ;;  %v3513_v16 = vor.u32 %v3511_v54, %v3469_v39  ;;  %v3517_v52 = vrot.slane %v3515_v26, 1  ;;  %v12671_v39 = vld [vmem:[%s17291_s3 + $0x80] sm:$0xff] }
 0x326   :  { %v4114_v60 = vpop.f32.mrf.mxu0  ;;  %5062 = vmatpush.bf16.msrb.mxu0 %v12671_v39 }
 0x327   :  { %v4173_v44 = vpop.f32.mrf.mxu1  ;;  %v4115_v63 = vadd.f32 %v4114_v60, %v4056_v48  ;;  %v4285_v50 = vmul.f32 0.2, %v4245_v37  ;;  %vm4265_vm2 = vcmp.ge.f32.partialorder %v4245_v37, 0.0  ;;  %v3510_v48 = vsel %vm3014_vm1, %v3505_v56, %v3509_v9 }
 0x328   :  { %v3518_v12 = vsel %vm3014_vm1, %v3513_v16, %v3517_v52  ;;  %v4068_v60 = vpop.f32.mrf.mxu3  ;;  %v4005_v9 = vadd.f32 %v15760_v41, %v15541_v8 }
 0x329   :  { %v4174_v47 = vadd.f32 %v4173_v44, %v4115_v63  ;;  %v4305_v29 = vsel %vm4265_vm2, %v4245_v37, %v4285_v50  ;;  %v4061_v63 = vadd.f32 %v15746_v61, %v4002_v62  ;;  %v4011_v13 = vpop.f32.mrf.mxu2 }
 0x32a   :  { %v4064_v61 = vadd.f32 %v15774_v30, %v4005_v9  ;;  %v4373_v30 = vld [vmem:[#allocation2 + $0xc] sm:$0x8] }
 0x32b   :  { %v4222_v34 = vadd.f32 %v4174_v47, %v15005_v2 }
 0x32d   :  { %v4246_v57 = vadd.f32 %v15803_v18, %v4222_v34 }
 0x32e   :  { %v4117_v3 = vpop.f32.mrf.mxu0 }
 0x32f   :  { %v4176_v15 = vpop.f32.mrf.mxu1  ;;  %vm4266_vm3 = vcmp.ge.f32.partialorder %v4246_v57, 0.0  ;;  %v4286_v2 = vmul.f32 0.2, %v4246_v57  ;;  %v4118_v44 = vadd.f32 %v4117_v3, %v4059_v17 }
 0x330   :  { %v15829_v11 = vpop.f32.mrf.mxu3 }
 0x331   :  { %v4306_v20 = vsel %vm4266_vm3, %v4246_v57, %v4286_v2  ;;  %v4177_v54 = vadd.f32 %v4176_v15, %v4118_v44  ;;  %4156 = vmatmul.bf16.gmra.mxu0 %v3510_v48  ;;  %v15835_v41 = vpop.f32.mrf.mxu2 }
 0x332   :  { %4215 = vmatmul.bf16.gmra.mxu1 %v3518_v12  ;;  %v12905_v26 = vpack.c.bf16 %v4306_v20, %v4305_v29 }
 0x333   :  { %v4223_v16 = vadd.f32 %v4177_v54, %v15033_v4 }
 0x334   :  { %13229 = vst [vmem:[#allocation2 + $0x10] sm:$0xff] %v12905_v26  }
 0x335   :  { %v4247_v7 = vadd.f32 %v15803_v18, %v4223_v16  ;;  %v4595_v16 = vunpack.c.l.b16 %v4373_v30 }
 0x336   :  { %v4119_v47 = vpop.f32.mrf.mxu0 }
 0x337   :  { %v4178_v55 = vpop.f32.mrf.mxu1  ;;  %v4120_v56 = vadd.f32 %v4119_v47, %v4061_v63  ;;  %v4287_v57 = vmul.f32 0.2, %v4247_v7  ;;  %vm4267_vm4 = vcmp.ge.f32.partialorder %v4247_v7, 0.0 }
 0x338   :  { %v15839_v54 = vpop.f32.mrf.mxu3 }
 0x339   :  { %v4179_v37 = vadd.f32 %v4178_v55, %v4120_v56  ;;  %v4307_v2 = vsel %vm4267_vm4, %v4247_v7, %v4287_v57  ;;  %v15845_v7 = vpop.f32.mrf.mxu2 }
 0x33b   :  { %v4224_v52 = vadd.f32 %v4179_v37, %v15058_v42  ;;  %v4374_v34 = vld [vmem:[#allocation2 + $0x10] sm:$0xf]  ;;  %v4375_v17 = vld [vmem:[#allocation2 + $0x14] sm:$0xf]  ;;  %v4007_v42 = vadd.f32 %v15790_v31, %v15555_v10  ;;  %v4010_v31 = vadd.f32 %v15813_v25, %v15568_v53 }
 0x33c   :  { %v4447_v4 = vunpack.c.l.b16 %v4374_v34  ;;  %v4448_v50 = vunpack.c.l.b16 %v4375_v17  ;;  %v12661_v20 = vld [vmem:[#allocation2 + $0x10] sm:$0xff] }
 0x33d   :  { %v4248_v3 = vadd.f32 %v15803_v18, %v4224_v52  ;;  %v4066_v63 = vadd.f32 %v15798_v51, %v4007_v42  ;;  %v4916_v56 = vshll.u32 %v12661_v20, 16  ;;  %v4069_v17 = vadd.f32 %v4068_v60, %v4010_v31 }
 0x33e   :  { %v4122_v15 = vpop.f32.mrf.mxu0  ;;  %v4467_v8 = vpack.c.b16 %v4448_v50, %v4447_v4  ;;  %v4596_v9 = vpack.c.b16 %v4447_v4, %v4595_v16 }
 0x33f   :  { %v4181_v48 = vpop.f32.mrf.mxu1  ;;  %vm4268_vm5 = vcmp.ge.f32.partialorder %v4248_v3, 0.0  ;;  %v4288_v12 = vmul.f32 0.2, %v4248_v3  ;;  %v4123_v39 = vadd.f32 %v4122_v15, %v4064_v61  ;;  %v4918_v34 = vrot.slane %v4916_v56, 1 }
 0x340   :  { %4543 = vmatmul.bf16.vlgmr.msra.gmra.mxu2 %v4467_v8  ;;  %v4608_v4 = vshrl.u32 %v4596_v9, 16  ;;  %v4611_v15 = vshll.u32 %v4596_v9, 16  ;;  %v15858_v8 = vpop.f32.mrf.mxu3 }
 0x341   :  { %v4308_v44 = vsel %vm4268_vm5, %v4248_v3, %v4288_v12  ;;  %v4182_v62 = vadd.f32 %v4181_v48, %v4123_v39  ;;  %v4914_v3 = vshrl.u32 %v12661_v20, 16  ;;  %v4012_v48 = vadd.f32 %v4011_v13, %v15582_v1 }
 0x342   :  { %v12910_v29 = vpack.c.bf16 %v4308_v44, %v4307_v2  ;;  %v4613_v16 = vrot.slane %v4611_v15, 4 }
 0x343   :  { %v4225_v26 = vadd.f32 %v4182_v62, %v15086_v28  ;;  %v4919_v62 = vor.u32 %v4918_v34, %v4914_v3 }
 0x344   :  { %13230 = vst [vmem:[#allocation2 + $0x18] sm:$0xff] %v12910_v29  }
 0x345   :  { %v4249_v37 = vadd.f32 %v15803_v18, %v4225_v26  ;;  %v4610_v26 = vrot.slane %v4608_v4, 3 }
 0x346   :  { %v4124_v47 = vpop.f32.mrf.mxu0 }
 0x347   :  { %v4183_v55 = vpop.f32.mrf.mxu1  ;;  %v4125_v10 = vadd.f32 %v4124_v47, %v4066_v63  ;;  %v4289_v60 = vmul.f32 0.2, %v4249_v37  ;;  %vm4269_vm6 = vcmp.ge.f32.partialorder %v4249_v37, 0.0  ;;  %v4614_v34 = vor.u32 %v4613_v16, %v4610_v26 }
 0x348   :  { %v15870_v4 = vpop.f32.mrf.mxu3 }
 0x349   :  { %v4184_v52 = vadd.f32 %v4183_v55, %v4125_v10  ;;  %v4309_v63 = vsel %vm4269_vm6, %v4249_v37, %v4289_v60  ;;  %v4015_v60 = vadd.f32 %v15835_v41, %v15589_v38 }
 0x34b   :  { %v4226_v28 = vadd.f32 %v4184_v52, %v15114_v43  ;;  %v15849_v61 = vld [vmem:[#allocation2 + $0x18] sm:$0xf]  ;;  %v15851_v51 = vld [vmem:[#allocation2 + $0x1c] sm:$0xf] }
 0x34c   :  { %v15853_v57 = vld [vmem:[#allocation2 + $0x18] sm:$0xff]  ;;  %v4449_v53 = vunpack.c.l.b16 %v15849_v61  ;;  %v4450_v25 = vunpack.c.l.b16 %v15851_v51 }
 0x34d   :  { %v4250_v43 = vadd.f32 %v15803_v18, %v4226_v28  ;;  %v4921_v12 = vshll.u32 %v15853_v57, 16  ;;  %v4071_v28 = vadd.f32 %v15829_v11, %v4012_v48  ;;  %v4925_v41 = vshrl.u32 %v15853_v57, 16 }
 0x34e   :  { %v4127_v39 = vpop.f32.mrf.mxu0  ;;  %v4468_v2 = vpack.c.b16 %v4450_v25, %v4449_v53  ;;  %v4597_v44 = vpack.c.b16 %v4449_v53, %v4448_v50  ;;  %v15865_v50 = vpop.f32.mrf.mxu2 }
 0x34f   :  { %v4186_v42 = vpop.f32.mrf.mxu1  ;;  %vm4270_vm7 = vcmp.ge.f32.partialorder %v4250_v43, 0.0  ;;  %v4290_v30 = vmul.f32 0.2, %v4250_v43  ;;  %v4128_v29 = vadd.f32 %v4127_v39, %v4069_v17  ;;  %v4923_v20 = vrot.slane %v4921_v12, 1 }
 0x350   :  { %4548 = vmatmul.bf16.gmra.mxu2 %v4468_v2  ;;  %v4616_v1 = vshrl.u32 %v4597_v44, 16  ;;  %v4619_v13 = vshll.u32 %v4597_v44, 16  ;;  %v4074_v44 = vadd.f32 %v15839_v54, %v4015_v60  ;;  %v12712_v60 = vld [vmem:[%s17291_s3 + $0x178] sm:$0xff] }
 0x351   :  { %v4310_v47 = vsel %vm4270_vm7, %v4250_v43, %v4290_v30  ;;  %v4187_v55 = vadd.f32 %v4186_v42, %v4128_v29  ;;  %v4924_v56 = vsel %vm3014_vm1, %v4919_v62, %v4923_v20  ;;  %5989 = vmatpush.bf16.msrb.mxu3 %v12712_v60 }
 0x352   :  { %v12915_v31 = vpack.c.bf16 %v4310_v47, %v4309_v63  ;;  %v4618_v10 = vrot.slane %v4616_v1, 3  ;;  %v4621_v9 = vrot.slane %v4619_v13, 4  ;;  %5063 = vmatmul.bf16.vlgmr.msrb.gmra.mxu0 %v4924_v56  ;;  %v4927_v63 = vor.u32 %v4925_v41, %v4923_v20 }
 0x353   :  { %v4227_v52 = vadd.f32 %v4187_v55, %v15142_v49  ;;  %v12686_v49 = vld [vmem:[%s17291_s3 + $0xf8] sm:$0xff]  ;;  %v4017_v55 = vadd.f32 %v15845_v7, %v15606_v35 }
 0x354   :  { %13231 = vst [vmem:[#allocation2 + $0x20] sm:$0xff] %v12915_v31   ;;  %v4622_v17 = vor.u32 %v4621_v9, %v4618_v10  ;;  %5697 = vmatpush.bf16.msrb.mxu2 %v12686_v49  ;;  %v15899_v10 = vpop.f32.mrf.mxu3 }
 0x355   :  { %v4251_v43 = vadd.f32 %v15803_v18, %v4227_v52  ;;  %v4076_v35 = vadd.f32 %v15858_v8, %v4017_v55 }
 0x356   :  { %v4129_v3 = vpop.f32.mrf.mxu0  ;;  %v4623_v37 = vsel %vm1308_vm0, %v4614_v34, %v4622_v17  ;;  %v15889_v62 = vpop.f32.mrf.mxu2 }
 0x357   :  { %v4188_v53 = vpop.f32.mrf.mxu1  ;;  %v4130_v15 = vadd.f32 %v4129_v3, %v4071_v28  ;;  %4771 = vmatmul.bf16.vlgmr.msra.gmra.mxu3 %v4623_v37  ;;  %v4291_v30 = vmul.f32 0.2, %v4251_v43  ;;  %vm4271_vm8 = vcmp.ge.f32.partialorder %v4251_v43, 0.0 }
 0x359   :  { %v4189_v12 = vadd.f32 %v4188_v53, %v4130_v15  ;;  %v4311_v9 = vsel %vm4271_vm8, %v4251_v43, %v4291_v30  ;;  %v12694_v43 = vld [vmem:[%s17291_s3 + $0x138] sm:$0xff] }
 0x35a   :  { %5469 = vmatpush.bf16.msrb.mxu1 %v12694_v43 }
 0x35b   :  { %v4228_v11 = vadd.f32 %v4189_v12, %v15167_v27  ;;  %v15879_v48 = vld [vmem:[#allocation2 + $0x20] sm:$0xf]  ;;  %v15881_v39 = vld [vmem:[#allocation2 + $0x24] sm:$0xf] }
 0x35c   :  { %v15883_v42 = vld [vmem:[#allocation2 + $0x20] sm:$0xff]  ;;  %v4451_v2 = vunpack.c.l.b16 %v15879_v48  ;;  %v4452_v38 = vunpack.c.l.b16 %v15881_v39 }
 0x35d   :  { %v4252_v27 = vadd.f32 %v15803_v18, %v4228_v11  ;;  %v4929_v29 = vshll.u32 %v15883_v42, 16 }
 0x35e   :  { %v4132_v1 = vpop.f32.mrf.mxu0  ;;  %v4469_v26 = vpack.c.b16 %v4452_v38, %v4451_v2  ;;  %v4598_v16 = vpack.c.b16 %v4451_v2, %v4450_v25  ;;  %v4024_v12 = vpop.f32.mrf.mxu2 }
 0x35f   :  { %v4191_v13 = vpop.f32.mrf.mxu1  ;;  %vm4272_vm9 = vcmp.ge.f32.partialorder %v4252_v27, 0.0  ;;  %v4292_v57 = vmul.f32 0.2, %v4252_v27  ;;  %v4133_v54 = vadd.f32 %v4132_v1, %v4074_v44  ;;  %v4931_v47 = vrot.slane %v4929_v29, 1 }
 0x360   :  { %4553 = vmatmul.bf16.gmra.mxu2 %v4469_v26  ;;  %v4625_v56 = vshrl.u32 %v4598_v16, 16  ;;  %v4628_v31 = vshll.u32 %v4598_v16, 16  ;;  %v4933_v1 = vshrl.u32 %v15883_v42, 16 }
 0x361   :  { %v4312_v52 = vsel %vm4272_vm9, %v4252_v27, %v4292_v57  ;;  %v4192_v34 = vadd.f32 %v4191_v13, %v4133_v54  ;;  %v4932_v28 = vsel %vm3014_vm1, %v4927_v63, %v4931_v47 }
 0x362   :  { %v12920_v51 = vpack.c.bf16 %v4312_v52, %v4311_v9  ;;  %5068 = vmatmul.bf16.gmra.mxu0 %v4932_v28  ;;  %v4627_v25 = vrot.slane %v4625_v56, 3  ;;  %v4630_v20 = vrot.slane %v4628_v31, 4  ;;  %v4935_v54 = vor.u32 %v4933_v1, %v4931_v47 }
 0x363   :  { %v4229_v3 = vadd.f32 %v4192_v34, %v15198_v36  ;;  %v4020_v36 = vadd.f32 %v15865_v50, %v15616_v22 }
 0x364   :  { %13232 = vst [vmem:[#allocation2 + $0x28] sm:$0xff] %v12920_v51   ;;  %v4631_v53 = vor.u32 %v4630_v20, %v4627_v25 }
 0x365   :  { %v4253_v8 = vadd.f32 %v15803_v18, %v4229_v3  ;;  %v4079_v22 = vadd.f32 %v15870_v4, %v4020_v36  ;;  %v4022_v4 = vadd.f32 %v15889_v62, %v15633_v59  ;;  %v12685_v59 = vld [vmem:[%s17291_s3 + $0xf0] sm:$0xff] }
 0x366   :  { %v4134_v7 = vpop.f32.mrf.mxu0  ;;  %v4632_v15 = vsel %vm1308_vm0, %v4622_v17, %v4631_v53  ;;  %v4083_v17 = vpop.f32.mrf.mxu3  ;;  %v12711_v62 = vld [vmem:[%s17291_s3 + $0x170] sm:$0xff]  ;;  %5698 = vmatpush.bf16.msrb.mxu2 %v12685_v59 }
 0x367   :  { %v4193_v37 = vpop.f32.mrf.mxu1  ;;  %v4135_v49 = vadd.f32 %v4134_v7, %v4076_v35  ;;  %4776 = vmatmul.bf16.gmra.mxu3 %v4632_v15  ;;  %v4293_v50 = vmul.f32 0.2, %v4253_v8  ;;  %vm4273_vm10 = vcmp.ge.f32.partialorder %v4253_v8, 0.0  ;;  %v4026_v52 = vpop.f32.mrf.mxu2  ;;  %v4081_v7 = vadd.f32 %v15899_v10, %v4022_v4  ;;  %v12693_v10 = vld [vmem:[%s17291_s3 + $0x130] sm:$0xff] }
 0x368   :  { %v17448_v15 = vmov 0   ;;  %5990 = vmatpush.bf16.msrb.mxu3 %v12711_v62  ;;  %5470 = vmatpush.bf16.msrb.mxu1 %v12693_v10 }
 0x369   :  { %v4194_v11 = vadd.f32 %v4193_v37, %v4135_v49  ;;  %v4313_v34 = vsel %vm4273_vm10, %v4253_v8, %v4293_v50  ;;  %v4025_v8 = vadd.f32 %v4024_v12, %v15643_v32 }
 0x36b   :  { %v4230_v2 = vadd.f32 %v4194_v11, %v15220_v21  ;;  %v15915_v41 = vld [vmem:[#allocation2 + $0x28] sm:$0xf]  ;;  %v15917_v44 = vld [vmem:[#allocation2 + $0x2c] sm:$0xf] }
 0x36c   :  { %v15919_v30 = vld [vmem:[#allocation2 + $0x28] sm:$0xff]  ;;  %v4453_v27 = vunpack.c.l.b16 %v15915_v41  ;;  %v4454_v29 = vunpack.c.l.b16 %v15917_v44 }
 0x36d   :  { %v4254_v13 = vadd.f32 %v15803_v18, %v4230_v2  ;;  %v4937_v26 = vshll.u32 %v15919_v30, 16  ;;  %v4941_v4 = vshrl.u32 %v15919_v30, 16  ;;  %v12684_v30 = vld [vmem:[%s17291_s3 + $0xe8] sm:$0xff] }
 0x36e   :  { %v4137_v21 = vpop.f32.mrf.mxu0  ;;  %v4470_v63 = vpack.c.b16 %v4454_v29, %v4453_v27  ;;  %v4599_v57 = vpack.c.b16 %v4453_v27, %v4452_v38  ;;  %v4085_v37 = vpop.f32.mrf.mxu3  ;;  %5699 = vmatpush.bf16.msrb.mxu2 %v12684_v30 }
 0x36f   :  { %v4196_v16 = vpop.f32.mrf.mxu1  ;;  %vm4274_vm11 = vcmp.ge.f32.partialorder %v4254_v13, 0.0  ;;  %v4294_v55 = vmul.f32 0.2, %v4254_v13  ;;  %v4138_v42 = vadd.f32 %v4137_v21, %v4079_v22  ;;  %v15931_v56 = vrot.slane %v4937_v26, 1  ;;  %v4029_v2 = vpop.f32.mrf.mxu2 }
 0x370   :  { %4558 = vmatmul.bf16.gmra.mxu2 %v4470_v63  ;;  %v4634_v31 = vshrl.u32 %v4599_v57, 16  ;;  %v4637_v9 = vshll.u32 %v4599_v57, 16  ;;  %v4027_v26 = vadd.f32 %v4026_v52, %v15656_v6 }
 0x371   :  { %v4314_v28 = vsel %vm4274_vm11, %v4254_v13, %v4294_v55  ;;  %v4197_v51 = vadd.f32 %v4196_v16, %v4138_v42  ;;  %v4940_v25 = vsel %vm3014_vm1, %v4935_v54, %v15931_v56 }
 0x372   :  { %v12925_v38 = vpack.c.bf16 %v4314_v28, %v4313_v34  ;;  %5073 = vmatmul.bf16.gmra.mxu0 %v4940_v25  ;;  %v4636_v47 = vrot.slane %v4634_v31, 3  ;;  %v4639_v20 = vrot.slane %v4637_v9, 4 }
 0x373   :  { %v4231_v3 = vadd.f32 %v4197_v51, %v15254_v14  ;;  %v4943_v51 = vor.u32 %v4941_v4, %v15931_v56 }
 0x374   :  { %13233 = vst [vmem:[#allocation2 + $0x30] sm:$0xff] %v12925_v38   ;;  %v15938_v35 = vor.u32 %v4639_v20, %v4636_v47 }
 0x375   :  { %4365 = vst [vmem:[#allocation2 + $0x30] sm:$0xf] %v17448_v15  ;;  %v4255_v36 = vadd.f32 %v15803_v18, %v4231_v3  ;;  %v4086_v3 = vadd.f32 %v4085_v37, %v4027_v26 }
 0x376   :  { %4366 = vst [vmem:[#allocation2 + $0x34] sm:$0xf] %v17448_v15  ;;  %v4139_v60 = vpop.f32.mrf.mxu0  ;;  %v4641_v43 = vsel %vm1308_vm0, %v4631_v53, %v15938_v35  ;;  %v4084_v53 = vadd.f32 %v4083_v17, %v4025_v8  ;;  %v4088_v63 = vpop.f32.mrf.mxu3  ;;  %v12692_v8 = vld [vmem:[%s17291_s3 + $0x128] sm:$0xff] }
 0x377   :  { %v4198_v14 = vpop.f32.mrf.mxu1  ;;  %v4140_v49 = vadd.f32 %v4139_v60, %v4081_v7  ;;  %4781 = vmatmul.bf16.gmra.mxu3 %v4641_v43  ;;  %v4295_v1 = vmul.f32 0.2, %v4255_v36  ;;  %vm4275_vm12 = vcmp.ge.f32.partialorder %v4255_v36, 0.0  ;;  %v4031_v59 = vpop.f32.mrf.mxu2  ;;  %v4030_v43 = vadd.f32 %v4029_v2, %v15673_v5  ;;  %5471 = vmatpush.bf16.msrb.mxu1 %v12692_v8 }
 0x379   :  { %v4199_v11 = vadd.f32 %v4198_v14, %v4140_v49  ;;  %v4315_v55 = vsel %vm4275_vm12, %v4255_v36, %v4295_v1  ;;  %v12710_v36 = vld [vmem:[%s17291_s3 + $0x168] sm:$0xff]  ;;  %v4089_v5 = vadd.f32 %v4088_v63, %v4030_v43 }
 0x37a   :  { %5991 = vmatpush.bf16.msrb.mxu3 %v12710_v36 }
 0x37b   :  { %v4232_v27 = vadd.f32 %v4199_v11, %v15276_v58 }
 0x37c   :  { %v15957_v22 = vld [vmem:[#allocation2 + $0x30] sm:$0xf] }
 0x37d   :  { %v4256_v50 = vadd.f32 %v15803_v18, %v4232_v27  ;;  %v15960_v13 = vld [vmem:[#allocation2 + $0x34] sm:$0xf]  ;;  %v4455_v32 = vunpack.c.l.b16 %v15957_v22 }
 0x37e   :  { %v15963_v12 = vld [vmem:[#allocation2 + $0x30] sm:$0xff]  ;;  %v4142_v21 = vpop.f32.mrf.mxu0  ;;  %v4456_v58 = vunpack.c.l.b16 %v15960_v13  ;;  %v4090_v37 = vpop.f32.mrf.mxu3 }
 0x37f   :  { %v4201_v16 = vpop.f32.mrf.mxu1  ;;  %vm4276_vm13 = vcmp.ge.f32.partialorder %v4256_v50, 0.0  ;;  %v4296_v57 = vmul.f32 0.2, %v4256_v50  ;;  %v4143_v54 = vadd.f32 %v4142_v21, %v4084_v53  ;;  %v4600_v17 = vpack.c.b16 %v4455_v32, %v4454_v29 }
 0x380   :  { %v4471_v42 = vpack.c.b16 %v4456_v58, %v4455_v32  ;;  %v4945_v31 = vshll.u32 %v15963_v12, 16  ;;  %v4949_v27 = vshrl.u32 %v15963_v12, 16  ;;  %v4032_v32 = vadd.f32 %v4031_v59, %v15689_v45 }
 0x381   :  { %v4316_v9 = vsel %vm4276_vm13, %v4256_v50, %v4296_v57  ;;  %v4202_v34 = vadd.f32 %v4201_v16, %v4143_v54  ;;  %v4643_v6 = vshrl.u32 %v4600_v17, 16  ;;  %v4646_v52 = vshll.u32 %v4600_v17, 16  ;;  %v4034_v16 = vpop.f32.mrf.mxu2 }
 0x382   :  { %v12930_v28 = vpack.c.bf16 %v4316_v9, %v4315_v55  ;;  %4563 = vmatmul.bf16.gmra.mxu2 %v4471_v42  ;;  %v4947_v25 = vrot.slane %v4945_v31, 1  ;;  %v4035_v59 = vadd.f32 %v4034_v16, %v15706_v46 }
 0x383   :  { %v4233_v38 = vadd.f32 %v4202_v34, %v15307_v0  ;;  %v4645_v47 = vrot.slane %v4643_v6, 3  ;;  %v4648_v20 = vrot.slane %v4646_v52, 4 }
 0x384   :  { %13234 = vst [vmem:[#allocation2 + $0x38] sm:$0xff] %v12930_v28   ;;  %v4948_v29 = vsel %vm3014_vm1, %v4943_v51, %v4947_v25  ;;  %v4951_v55 = vor.u32 %v4949_v27, %v4947_v25 }
 0x385   :  { %4367 = vst [vmem:[#allocation2 + $0x38] sm:$0xf] %v17448_v15  ;;  %5078 = vmatmul.bf16.gmra.mxu0 %v4948_v29  ;;  %v4649_v62 = vor.u32 %v4648_v20, %v4645_v47  ;;  %v4257_v14 = vadd.f32 %v15803_v18, %v4233_v38 }
 0x386   :  { %4368 = vst [vmem:[#allocation2 + $0x3c] sm:$0xf] %v17448_v15  ;;  %v4144_v56 = vpop.f32.mrf.mxu0  ;;  %v4093_v52 = vpop.f32.mrf.mxu3 }
 0x387   :  { %v4203_v7 = vpop.f32.mrf.mxu1  ;;  %v4145_v0 = vadd.f32 %v4144_v56, %v4086_v3  ;;  %v4650_v60 = vsel %vm1308_vm0, %v15938_v35, %v4649_v62  ;;  %v4297_v35 = vmul.f32 0.2, %v4257_v14  ;;  %vm4277_vm14 = vcmp.ge.f32.partialorder %v4257_v14, 0.0 }
 0x388   :  { %4786 = vmatmul.bf16.gmra.mxu3 %v4650_v60  ;;  %v12709_v60 = vld [vmem:[%s17291_s3 + $0x160] sm:$0xff] }
 0x389   :  { %v4204_v49 = vadd.f32 %v4203_v7, %v4145_v0  ;;  %v4317_v63 = vsel %vm4277_vm14, %v4257_v14, %v4297_v35  ;;  %v4036_v56 = vpop.f32.mrf.mxu2  ;;  %v12683_v0 = vld [vmem:[%s17291_s3 + $0xe0] sm:$0xff]  ;;  %5992 = vmatpush.bf16.msrb.mxu3 %v12709_v60 }
 0x38a   :  { %5700 = vmatpush.bf16.msrb.mxu2 %v12683_v0 }
 0x38b   :  { %v4234_v11 = vadd.f32 %v4204_v49, %v15332_v19  ;;  %v3978_v49 = vadd.f32 %v15721_v23, %v15719_v24 }
 0x38c   :  { %v15990_v10 = vld [vmem:[#allocation2 + $0x38] sm:$0xf] }
 0x38d   :  { %v4258_v2 = vadd.f32 %v15803_v18, %v4234_v11  ;;  %v15994_v1 = vld [vmem:[#allocation2 + $0x3c] sm:$0xf]  ;;  %v4457_v53 = vunpack.c.l.b16 %v15990_v10  ;;  %v4094_v11 = vadd.f32 %v4093_v52, %v4035_v59  ;;  %v17450_v52 = vld [vmem:[#allocation5_spill] sm:$0xff] }
 0x38e   :  { %v12666_v50 = vld [vmem:[#allocation2 + $0x38] sm:$0xff]  ;;  %v4147_v26 = vpop.f32.mrf.mxu0  ;;  %v4458_v21 = vunpack.c.l.b16 %v15994_v1  ;;  %v4095_v35 = vpop.f32.mrf.mxu3 }
 0x38f   :  { %v4206_v19 = vpop.f32.mrf.mxu1  ;;  %vm4278_vm15 = vcmp.ge.f32.partialorder %v4258_v2, 0.0  ;;  %v4298_v57 = vmul.f32 0.2, %v4258_v2  ;;  %v4148_v54 = vadd.f32 %v4147_v26, %v4089_v5  ;;  %v4601_v12 = vpack.c.b16 %v4457_v53, %v4456_v58 }
 0x390   :  { %v4472_v17 = vpack.c.b16 %v4458_v21, %v4457_v53  ;;  %v4953_v42 = vshll.u32 %v12666_v50, 16  ;;  %v4091_v58 = vadd.f32 %v4090_v37, %v4032_v32  ;;  %v4957_v14 = vshrl.u32 %v12666_v50, 16 }
 0x391   :  { %v4318_v4 = vsel %vm4278_vm15, %v4258_v2, %v4298_v57  ;;  %v4207_v31 = vadd.f32 %v4206_v19, %v4148_v54  ;;  %v4652_v9 = vshrl.u32 %v4601_v12, 16  ;;  %v4655_v34 = vshll.u32 %v4601_v12, 16 }
 0x392   :  { %v12935_v6 = vpack.c.bf16 %v4318_v4, %v4317_v63  ;;  %4568 = vmatmul.bf16.gmra.mxu2 %v4472_v17  ;;  %v4955_v45 = vrot.slane %v4953_v42, 1  ;;  %v4037_v54 = vadd.f32 %v4036_v56, %v3978_v49  ;;  %v17452_v56 = vld [vmem:[#allocation18_spill] sm:$0xff] }
 0x393   :  { %v4235_v28 = vadd.f32 %v4207_v31, %v15360_v40  ;;  %v4654_v51 = vrot.slane %v4652_v9, 3  ;;  %v4657_v38 = vrot.slane %v4655_v34, 4  ;;  %v4039_v9 = vpop.f32.mrf.mxu2  ;;  %v17449_v34 = vld [vmem:[#allocation17_spill] sm:$0xff] }
 0x394   :  { %13235 = vst [vmem:[#allocation2 + $0x40] sm:$0xff] %v12935_v6   ;;  %v4956_v47 = vsel %vm3014_vm1, %v4951_v55, %v4955_v45  ;;  %v4959_v26 = vor.u32 %v4957_v14, %v4955_v45  ;;  %v12691_v45 = vld [vmem:[%s17291_s3 + $0x120] sm:$0xff] }
 0x395   :  { %5083 = vmatmul.bf16.gmra.mxu0 %v4956_v47  ;;  %v4658_v20 = vor.u32 %v4657_v38, %v4654_v51  ;;  %v4259_v7 = vadd.f32 %v15803_v18, %v4235_v28  ;;  %v17451_v28 = vld [vmem:[#allocation6_spill] sm:$0xff]  ;;  %v4096_v38 = vadd.f32 %v4095_v35, %v4037_v54  ;;  %v12682_v47 = vld [vmem:[%s17291_s3 + $0xd8] sm:$0xff]  ;;  %5472 = vmatpush.bf16.msrb.mxu1 %v12691_v45 }
 0x396   :  { %v4149_v25 = vpop.f32.mrf.mxu0  ;;  %v2533_v51 = vadd.f32 %v17451_v28, %v17450_v52  ;;  %5701 = vmatpush.bf16.msrb.mxu2 %v12682_v47  ;;  %v4098_v59 = vpop.f32.mrf.mxu3  ;;  %v17455_v35 = vld [vmem:[#allocation10_spill] sm:$0xff] }
 0x397   :  { %v4208_v29 = vpop.f32.mrf.mxu1  ;;  %v4150_v30 = vadd.f32 %v4149_v25, %v4091_v58  ;;  %v4659_v3 = vsel %vm1308_vm0, %v4649_v62, %v4658_v20  ;;  %v4299_v27 = vmul.f32 0.2, %v4259_v7  ;;  %vm4279_vm2 = vcmp.ge.f32.partialorder %v4259_v7, 0.0  ;;  %v12708_v58 = vld [vmem:[%s17291_s3 + $0x158] sm:$0xff] }
 0x398   :  { %4791 = vmatmul.bf16.gmra.mxu3 %v4659_v3 }
 0x399   :  { %v4209_v40 = vadd.f32 %v4208_v29, %v4150_v30  ;;  %v4319_v12 = vsel %vm4279_vm2, %v4259_v7, %v4299_v27  ;;  %5993 = vmatpush.bf16.msrb.mxu3 %v12708_v58  ;;  %v2592_v7 = vadd.f32 %v17452_v56, %v2533_v51 }
 0x39b   :  { %v4236_v43 = vadd.f32 %v4209_v40, %v15388_v33  ;;  %v16011_v37 = vld [vmem:[#allocation2 + $0x40] sm:$0xf]  ;;  %v16013_v62 = vld [vmem:[#allocation2 + $0x44] sm:$0xf] }
 0x39c   :  { %v16015_v46 = vld [vmem:[#allocation2 + $0x40] sm:$0xff]  ;;  %v4459_v36 = vunpack.c.l.b16 %v16011_v37  ;;  %v4460_v8 = vunpack.c.l.b16 %v16013_v62 }
 0x39d   :  { %v4260_v33 = vadd.f32 %v15803_v18, %v4236_v43  ;;  %v4961_v5 = vshll.u32 %v16015_v46, 16  ;;  %v17453_v40 = vld [vmem:[#allocation21_spill] sm:$0xff] }
 0x39e   :  { %v4152_v2 = vpop.f32.mrf.mxu0  ;;  %v4473_v50 = vpack.c.b16 %v4460_v8, %v4459_v36  ;;  %v4602_v32 = vpack.c.b16 %v4459_v36, %v4458_v21  ;;  %v4040_v0 = vadd.f32 %v4039_v9, %v17453_v40  ;;  %v4100_v28 = vpop.f32.mrf.mxu3 }
 0x39f   :  { %v4211_v53 = vpop.f32.mrf.mxu1  ;;  %vm4280_vm3 = vcmp.ge.f32.partialorder %v4260_v33, 0.0  ;;  %v4300_v24 = vmul.f32 0.2, %v4260_v33  ;;  %v4153_v23 = vadd.f32 %v4152_v2, %v4094_v11  ;;  %v4963_v19 = vrot.slane %v4961_v5, 1  ;;  %v12690_v2 = vld [vmem:[%s17291_s3 + $0x118] sm:$0xff] }
 0x3a0   :  { %v4661_v16 = vshrl.u32 %v4602_v32, 16  ;;  %v4664_v57 = vshll.u32 %v4602_v32, 16  ;;  %v4041_v32 = vpop.f32.mrf.mxu2  ;;  %5473 = vmatpush.bf16.msrb.mxu1 %v12690_v2 }
 0x3a1   :  { %v4320_v63 = vsel %vm4280_vm3, %v4260_v33, %v4300_v24  ;;  %v4212_v17 = vadd.f32 %v4211_v53, %v4153_v23  ;;  %v4964_v42 = vsel %vm3014_vm1, %v4959_v26, %v4963_v19  ;;  %v16058_v53 = vld [vmem:[#allocation2 + $0x60] sm:$0x1] }
 0x3a2   :  { %v12940_v55 = vpack.c.bf16 %v4320_v63, %v4319_v12  ;;  %4573 = vmatmul.bf16.gmra.mxu2 %v4473_v50  ;;  %v4663_v4 = vrot.slane %v4661_v16, 3  ;;  %v4666_v31 = vrot.slane %v4664_v57, 4  ;;  %v4099_v50 = vadd.f32 %v4098_v59, %v4040_v0  ;;  %6237 = vst [vmem:[#allocation2 + $0x60] sm:$0xf] %v17448_v15  ;;  %v12681_v0 = vld [vmem:[%s17291_s3 + $0xd0] sm:$0xff] }
 0x3a3   :  { %v4237_v21 = vadd.f32 %v4212_v17, %v17449_v34  ;;  %v4965_v63 = vshrl.u32 %v16015_v46, 16  ;;  %v17456_v46 = vld [vmem:[#allocation19_spill] sm:$0xff]  ;;  %5702 = vmatpush.bf16.msrb.mxu2 %v12681_v0 }
 0x3a4   :  { %13236 = vst [vmem:[#allocation2 + $0x48] sm:$0xff] %v12940_v55   ;;  %v16027_v6 = vor.u32 %v4666_v31, %v4663_v4 }
 0x3a5   :  { %5088 = vmatmul.bf16.gmra.mxu0 %v4964_v42  ;;  %v4261_v60 = vadd.f32 %v15803_v18, %v4237_v21  ;;  %v4967_v4 = vor.u32 %v4965_v63, %v4963_v19 }
 0x3a6   :  { %v4154_v25 = vpop.f32.mrf.mxu0  ;;  %v4668_v30 = vsel %vm1308_vm0, %v4658_v20, %v16027_v6  ;;  %v17454_v20 = vld [vmem:[#allocation9_spill] sm:$0xff] }
 0x3a7   :  { %v4213_v29 = vpop.f32.mrf.mxu1  ;;  %v4155_v3 = vadd.f32 %v4154_v25, %v4096_v38  ;;  %v3983_v27 = vadd.f32 %v17455_v35, %v17454_v20  ;;  %v4301_v26 = vmul.f32 0.2, %v4261_v60  ;;  %vm4281_vm4 = vcmp.ge.f32.partialorder %v4261_v60, 0.0 }
 0x3a8   :  { %4796 = vmatmul.bf16.gmra.mxu3 %v4668_v30  ;;  %v17458_v30 = vld [vmem:[#allocation8_spill] sm:$0xff] }
 0x3a9   :  { %v4214_v14 = vadd.f32 %v4213_v29, %v4155_v3  ;;  %v4042_v34 = vadd.f32 %v4041_v32, %v3983_v27  ;;  %v4321_v21 = vsel %vm4281_vm4, %v4261_v60, %v4301_v26  ;;  %v17457_v29 = vld [vmem:[#allocation7_spill] sm:$0xff]  ;;  %v17459_v60 = vld [vmem:[#allocation20_spill] sm:$0xff] }
 0x3aa   :  { %v2538_v19 = vadd.f32 %v17458_v30, %v17457_v29 }
 0x3ab   :  { %v4238_v43 = vadd.f32 %v4214_v14, %v2592_v7  ;;  %v16045_v49 = vld [vmem:[#allocation2 + $0x48] sm:$0xf]  ;;  %v16047_v36 = vld [vmem:[#allocation2 + $0x4c] sm:$0xf]  ;;  %v4101_v3 = vadd.f32 %v4100_v28, %v4042_v34 }
 0x3ac   :  { %v16049_v11 = vld [vmem:[#allocation2 + $0x48] sm:$0xff]  ;;  %v4461_v33 = vunpack.c.l.b16 %v16045_v49  ;;  %v4462_v5 = vunpack.c.l.b16 %v16047_v36  ;;  %v2597_v14 = vadd.f32 %v17459_v60, %v2538_v19 }
 0x3ad   :  { %v4262_v24 = vadd.f32 %v15803_v18, %v4238_v43  ;;  %v4969_v23 = vshll.u32 %v16049_v11, 16 }
 0x3ae   :  { %v4157_v16 = vpop.f32.mrf.mxu0  ;;  %v4474_v54 = vpack.c.b16 %v4462_v5, %v4461_v33  ;;  %v4603_v12 = vpack.c.b16 %v4461_v33, %v4460_v8 }
 0x3af   :  { %v4216_v57 = vpop.f32.mrf.mxu1  ;;  %vm4282_vm5 = vcmp.ge.f32.partialorder %v4262_v24, 0.0  ;;  %v4302_v17 = vmul.f32 0.2, %v4262_v24  ;;  %v4158_v55 = vadd.f32 %v4157_v16, %v4099_v50  ;;  %v4971_v42 = vrot.slane %v4969_v23, 1 }
 0x3b0   :  { %v4670_v31 = vshrl.u32 %v4603_v12, 16  ;;  %v4673_v9 = vshll.u32 %v4603_v12, 16 }
 0x3b1   :  { %v4322_v45 = vsel %vm4282_vm5, %v4262_v24, %v4302_v17  ;;  %v4217_v52 = vadd.f32 %v4216_v57, %v4158_v55  ;;  %v4972_v38 = vsel %vm3014_vm1, %v4967_v4, %v4971_v42  ;;  %v4973_v57 = vshrl.u32 %v16049_v11, 16  ;;  %v12707_v11 = vld [vmem:[%s17291_s3 + $0x150] sm:$0xff] }
 0x3b2   :  { %v12945_v51 = vpack.c.bf16 %v4322_v45, %v4321_v21  ;;  %4578 = vmatmul.bf16.gmra.mxu2 %v4474_v54  ;;  %v4672_v8 = vrot.slane %v4670_v31, 3  ;;  %v4675_v47 = vrot.slane %v4673_v9, 4  ;;  %5994 = vmatpush.bf16.msrb.mxu3 %v12707_v11  ;;  %v13431_v11 = vld [vmem:[#allocation2 + $0x10] sm:$0xf] }
 0x3b3   :  { %v4239_v58 = vadd.f32 %v4217_v52, %v17456_v46  ;;  %v4975_v63 = vor.u32 %v4973_v57, %v4971_v42 }
 0x3b4   :  { %13237 = vst [vmem:[#allocation2 + $0x50] sm:$0xff] %v12945_v51   ;;  %v4676_v25 = vor.u32 %v4675_v47, %v4672_v8 }
 0x3b5   :  { %5093 = vmatmul.bf16.gmra.mxu0 %v4972_v38  ;;  %v4263_v43 = vadd.f32 %v15803_v18, %v4239_v58 }
 0x3b6   :  { %v4159_v59 = vpop.f32.mrf.mxu0  ;;  %v4677_v56 = vsel %vm1308_vm0, %v16027_v6, %v4676_v25 }
 0x3b7   :  { %v4160_v7 = vadd.f32 %v4159_v59, %v4101_v3  ;;  %v4218_v40 = vpop.f32.mrf.mxu1  ;;  %v4303_v32 = vmul.f32 0.2, %v4263_v43  ;;  %vm4283_vm6 = vcmp.ge.f32.partialorder %v4263_v43, 0.0 }
 0x3b8   :  { %4801 = vmatmul.bf16.gmra.mxu3 %v4677_v56 }
 0x3b9   :  { %v4219_v20 = vadd.f32 %v4218_v40, %v4160_v7  ;;  %v4323_v4 = vsel %vm4283_vm6, %v4263_v43, %v4303_v32 }
 0x3bb   :  { %v4240_v35 = vadd.f32 %v4219_v20, %v2597_v14  ;;  %v16077_v27 = vld [vmem:[#allocation2 + $0x50] sm:$0xf]  ;;  %v16079_v33 = vld [vmem:[#allocation2 + $0x54] sm:$0xf]  ;;  %v4901_v20 = vunpack.c.l.b16 %v16058_v53 }
 0x3bc   :  { %v12669_v2 = vld [vmem:[#allocation2 + $0x50] sm:$0xff]  ;;  %v4463_v6 = vunpack.c.l.b16 %v16077_v27  ;;  %v4464_v50 = vunpack.c.l.b16 %v16079_v33 }
 0x3bd   :  { %v4264_v26 = vadd.f32 %v15803_v18, %v4240_v35  ;;  %v4977_v24 = vshll.u32 %v12669_v2, 16  ;;  %v4981_v19 = vshrl.u32 %v12669_v2, 16  ;;  %v12680_v35 = vld [vmem:[%s17291_s3 + $0xc8] sm:$0xff]  ;;  %v4912_v53 = vpack.c.b16 %v4901_v20, %v4901_v20 }
 0x3be   :  { %v4475_v23 = vpack.c.b16 %v4464_v50, %v4463_v6  ;;  %v4604_v16 = vpack.c.b16 %v4463_v6, %v4462_v5  ;;  %v12689_v5 = vld [vmem:[%s17291_s3 + $0x110] sm:$0xff]  ;;  %v12706_v2 = vld [vmem:[%s17291_s3 + $0x148] sm:$0xff]  ;;  %5703 = vmatpush.bf16.msrb.mxu2 %v12680_v35  ;;  %v12705_v35 = vld [vmem:[%s17291_s3 + $0x140] sm:$0xff] }
 0x3bf   :  { %vm4284_vm7 = vcmp.ge.f32.partialorder %v4264_v26, 0.0  ;;  %v4304_v54 = vmul.f32 0.2, %v4264_v26  ;;  %v4979_v12 = vrot.slane %v4977_v24, 1  ;;  %5474 = vmatpush.bf16.msrb.mxu1 %v12689_v5  ;;  %v12688_v6 = vld [vmem:[%s17291_s3 + $0x108] sm:$0xff]  ;;  %5995 = vmatpush.bf16.msrb.mxu3 %v12706_v2  ;;  %v12687_v24 = vld [vmem:[%s17291_s3 + $0x100] sm:$0xff]  ;;  %v5134_v5 = vunpack.c.l.bf16 %v13431_v11 }
 0x3c0   :  { %v4679_v17 = vshrl.u32 %v4604_v16, 16  ;;  %v4682_v55 = vshll.u32 %v4604_v16, 16 }
 0x3c1   :  { %v4324_v31 = vsel %vm4284_vm7, %v4264_v26, %v4304_v54  ;;  %v4980_v34 = vsel %vm3014_vm1, %v4975_v63, %v4979_v12  ;;  %v4993_v63 = vshll.u32 %v4912_v53, 16 }
 0x3c2   :  { %v12950_v9 = vpack.c.bf16 %v4324_v31, %v4323_v4  ;;  %4583 = vmatmul.bf16.gmra.mxu2 %v4475_v23  ;;  %v4681_v21 = vrot.slane %v4679_v17, 3  ;;  %v4684_v18 = vrot.slane %v4682_v55, 4  ;;  %v16117_v55 = vld [vmem:[%s17293_s4] ss:$0 sm:$0xff] }
 0x3c3   :  { %v4544_v45 = vpop.f32.mrf.mxu2  ;;  %5475 = vmatpush.bf16.msrb.mxu1 %v12688_v6  ;;  %5996 = vmatpush.bf16.msrb.mxu3 %v12705_v35 }
 0x3c4   :  { %13238 = vst [vmem:[#allocation2 + $0x58] sm:$0xff] %v12950_v9   ;;  %v4685_v52 = vor.u32 %v4684_v18, %v4681_v21  ;;  %v4995_v18 = vrot.slane %v4993_v63, 1 }
 0x3c5   :  { %5098 = vmatmul.bf16.gmra.mxu0 %v4980_v34 }
 0x3c6   :  { %v4686_v42 = vsel %vm1308_vm0, %v4676_v25, %v4685_v52  ;;  %v4983_v25 = vor.u32 %v4981_v19, %v4979_v12  ;;  %v13432_v19 = vld [vmem:[#allocation2 + $0x14] sm:$0xf] }
 0x3c7   :  { %5476 = vmatpush.bf16.msrb.mxu1 %v12687_v24  ;;  %v5136_v24 = vunpack.c.l.bf16 %v15849_v61 }
 0x3c8   :  { %4806 = vmatmul.bf16.gmra.mxu3 %v4686_v42 }
 0x3cb   :  { %v4546_v28 = vpop.f32.mrf.mxu2  ;;  %v16093_v51 = vld [vmem:[#allocation2 + $0x58] sm:$0xf]  ;;  %v16095_v38 = vld [vmem:[#allocation2 + $0x5c] sm:$0xf] }
 0x3cc   :  { %v12670_v8 = vld [vmem:[#allocation2 + $0x58] sm:$0xff]  ;;  %v4465_v47 = vunpack.c.l.b16 %v16093_v51  ;;  %v4466_v46 = vunpack.c.l.b16 %v16095_v38 }
 0x3cd   :  { %v4985_v58 = vshll.u32 %v12670_v8, 16  ;;  %v4989_v4 = vshrl.u32 %v12670_v8, 16  ;;  %v12679_v8 = vld [vmem:[%s17291_s3 + $0xc0] sm:$0xff] }
 0x3ce   :  { %v4476_v29 = vpack.c.b16 %v4466_v46, %v4465_v47  ;;  %v4605_v30 = vpack.c.b16 %v4465_v47, %v4464_v50  ;;  %v4606_v32 = vpack.c.b16 %v4466_v46, %v4466_v46  ;;  %5704 = vmatpush.bf16.msrb.mxu2 %v12679_v8 }
 0x3cf   :  { %v5064_v3 = vpop.f32.mrf.mxu0  ;;  %v4987_v59 = vrot.slane %v4985_v58, 1 }
 0x3d0   :  { %v4688_v56 = vshrl.u32 %v4605_v30, 16  ;;  %v4691_v7 = vshll.u32 %v4605_v30, 16  ;;  %v4697_v54 = vshrl.u32 %v4606_v32, 16  ;;  %v4700_v12 = vshll.u32 %v4606_v32, 16 }
 0x3d1   :  { %v4988_v40 = vsel %vm3014_vm1, %v4983_v25, %v4987_v59  ;;  %v4991_v21 = vor.u32 %v4989_v4, %v4987_v59 }
 0x3d2   :  { %4588 = vmatmul.bf16.gmra.mxu2 %v4476_v29  ;;  %v4690_v0 = vrot.slane %v4688_v56, 3  ;;  %v4693_v60 = vrot.slane %v4691_v7, 4  ;;  %v4699_v9 = vrot.slane %v4697_v54, 3  ;;  %v4702_v34 = vrot.slane %v4700_v12, 4  ;;  %v13433_v12 = vld [vmem:[#allocation2 + $0x1c] sm:$0xf] }
 0x3d3   :  { %v4549_v14 = vpop.f32.mrf.mxu2  ;;  %v4996_v58 = vsel %vm3014_vm1, %v4991_v21, %v4995_v18  ;;  %v5137_v63 = vunpack.c.l.bf16 %v13433_v12 }
 0x3d4   :  { %v4694_v43 = vor.u32 %v4693_v60, %v4690_v0  ;;  %v4703_v46 = vor.u32 %v4702_v34, %v4699_v9 }
 0x3d5   :  { %5103 = vmatmul.bf16.gmra.mxu0 %v4988_v40 }
 0x3d6   :  { %v4695_v50 = vsel %vm1308_vm0, %v4685_v52, %v4694_v43  ;;  %v4704_v25 = vsel %vm1308_vm0, %v4694_v43, %v4703_v46 }
 0x3d7   :  { %v5066_v26 = vpop.f32.mrf.mxu0 }
 0x3d8   :  { %4811 = vmatmul.bf16.gmra.mxu3 %v4695_v50 }
 0x3da   :  { %v4772_v23 = vpop.f32.mrf.mxu3 }
 0x3db   :  { %v4773_v16 = vadd.f32 %v4772_v23, %v4544_v45  ;;  %v4551_v57 = vpop.f32.mrf.mxu2 }
 0x3dd   :  { %v5114_v17 = vadd.f32 %v5064_v3, %v4773_v16  ;;  %v5135_v3 = vunpack.c.l.bf16 %v13432_v19 }
 0x3df   :  { %v5069_v31 = vpop.f32.mrf.mxu0  ;;  %v5158_v52 = vadd.f32 %v16117_v55, %v5114_v17 }
 0x3e1   :  { %v5178_v29 = vadd.f32 %v5158_v52, %v5134_v5 }
 0x3e2   :  { %v4774_v45 = vpop.f32.mrf.mxu3 }
 0x3e3   :  { %v4775_v42 = vadd.f32 %v4774_v45, %v4546_v28  ;;  %v4554_v47 = vpop.f32.mrf.mxu2  ;;  %v5218_v28 = vmul.f32 0.2, %v5178_v29  ;;  %vm5198_vm8 = vcmp.ge.f32.partialorder %v5178_v29, 0.0 }
 0x3e5   :  { %v5115_v30 = vadd.f32 %v5066_v26, %v4775_v42  ;;  %5108 = vmatmul.bf16.gmra.mxu0 %v4996_v58  ;;  %v5238_v2 = vsel %vm5198_vm8, %v5178_v29, %v5218_v28  ;;  %v5306_v42 = vld [vmem:[#allocation3 + $0xc] sm:$0x8]  ;;  %v5138_v28 = vunpack.c.l.bf16 %v15879_v48 }
 0x3e6   :  { %v5529_v19 = vunpack.c.l.b16 %v5306_v42 }
 0x3e7   :  { %v5159_v59 = vadd.f32 %v16117_v55, %v5115_v30  ;;  %v5071_v56 = vpop.f32.mrf.mxu0 }
 0x3e8   :  { %4816 = vmatmul.bf16.gmra.mxu3 %v4704_v25 }
 0x3e9   :  { %v5179_v7 = vadd.f32 %v5159_v59, %v5135_v3 }
 0x3ea   :  { %v4777_v40 = vpop.f32.mrf.mxu3 }
 0x3eb   :  { %vm5199_vm9 = vcmp.ge.f32.partialorder %v5179_v7, 0.0  ;;  %v5219_v0 = vmul.f32 0.2, %v5179_v7  ;;  %v4778_v60 = vadd.f32 %v4777_v40, %v4549_v14  ;;  %v4556_v20 = vpop.f32.mrf.mxu2 }
 0x3ed   :  { %v5239_v6 = vsel %vm5199_vm9, %v5179_v7, %v5219_v0  ;;  %v5116_v50 = vadd.f32 %v5069_v31, %v4778_v60 }
 0x3ee   :  { %v12955_v43 = vpack.c.bf16 %v5239_v6, %v5238_v2  ;;  %v5139_v2 = vunpack.c.l.bf16 %v15881_v39 }
 0x3ef   :  { %v5074_v32 = vpop.f32.mrf.mxu0  ;;  %v5160_v26 = vadd.f32 %v16117_v55, %v5116_v50 }
 0x3f0   :  { %13239 = vst [vmem:[#allocation3 + $0x10] sm:$0xff] %v12955_v43  }
 0x3f1   :  { %v5180_v14 = vadd.f32 %v5160_v26, %v5136_v24 }
 0x3f2   :  { %v4779_v53 = vpop.f32.mrf.mxu3 }
 0x3f3   :  { %v4780_v23 = vadd.f32 %v4779_v53, %v4551_v57  ;;  %v16131_v16 = vpop.f32.mrf.mxu2  ;;  %v5220_v18 = vmul.f32 0.2, %v5180_v14  ;;  %vm5200_vm10 = vcmp.ge.f32.partialorder %v5180_v14, 0.0 }
 0x3f5   :  { %v5117_v54 = vadd.f32 %v5071_v56, %v4780_v23  ;;  %v5240_v46 = vsel %vm5200_vm10, %v5180_v14, %v5220_v18 }
 0x3f7   :  { %v5161_v17 = vadd.f32 %v16117_v55, %v5117_v54  ;;  %v16134_v4 = vld [vmem:[#allocation3 + $0x10] sm:$0xf]  ;;  %v16136_v31 = vld [vmem:[#allocation3 + $0x14] sm:$0xf]  ;;  %v5076_v9 = vpop.f32.mrf.mxu0 }
 0x3f8   :  { %v5381_v34 = vunpack.c.l.b16 %v16134_v4  ;;  %v5382_v21 = vunpack.c.l.b16 %v16136_v31  ;;  %v12695_v8 = vld [vmem:[#allocation3 + $0x10] sm:$0xff] }
 0x3f9   :  { %v5181_v61 = vadd.f32 %v5161_v17, %v5137_v63  ;;  %v5850_v56 = vshll.u32 %v12695_v8, 16  ;;  %v5848_v53 = vshrl.u32 %v12695_v8, 16 }
 0x3fa   :  { %v4782_v57 = vpop.f32.mrf.mxu3  ;;  %v5401_v52 = vpack.c.b16 %v5382_v21, %v5381_v34 }
 0x3fb   :  { %vm5201_vm11 = vcmp.ge.f32.partialorder %v5181_v61, 0.0  ;;  %v5221_v45 = vmul.f32 0.2, %v5181_v61  ;;  %v4783_v11 = vadd.f32 %v4782_v57, %v4554_v47  ;;  %v16140_v5 = vpop.f32.mrf.mxu2  ;;  %v5530_v47 = vpack.c.b16 %v5381_v34, %v5529_v19 }
 0x3fc   :  { %5477 = vmatmul.bf16.vlgmr.msrb.gmra.mxu1 %v5401_v52  ;;  %v5852_v35 = vrot.slane %v5850_v56, 1 }
 0x3fd   :  { %v5241_v58 = vsel %vm5201_vm11, %v5181_v61, %v5221_v45  ;;  %v5118_v29 = vadd.f32 %v5074_v32, %v4783_v11  ;;  %v5542_v26 = vshrl.u32 %v5530_v47, 16  ;;  %v5545_v24 = vshll.u32 %v5530_v47, 16 }
 0x3fe   :  { %v12960_v30 = vpack.c.bf16 %v5241_v58, %v5240_v46  ;;  %v5853_v17 = vor.u32 %v5852_v35, %v5848_v53  ;;  %v5140_v47 = vunpack.c.l.bf16 %v15915_v41  ;;  %v12745_v35 = vld [vmem:[%s17294_s5 + $0xb8] sm:$0xff] }
 0x3ff   :  { %v5162_v3 = vadd.f32 %v16117_v55, %v5118_v29  ;;  %v5544_v61 = vrot.slane %v5542_v26, 3  ;;  %v5547_v11 = vrot.slane %v5545_v24, 4  ;;  %6923 = vmatpush.bf16.msra.mxu2 %v12745_v35  ;;  %v12744_v35 = vld [vmem:[%s17294_s5 + $0xb0] sm:$0xff] }
 0x400   :  { %13240 = vst [vmem:[#allocation3 + $0x18] sm:$0xff] %v12960_v30  }
 0x401   :  { %v5182_v40 = vadd.f32 %v5162_v3, %v5138_v28  ;;  %v5548_v3 = vor.u32 %v5547_v11, %v5544_v61 }
 0x402   :  { %v5079_v59 = vpop.f32.mrf.mxu0  ;;  %v4784_v25 = vpop.f32.mrf.mxu3 }
 0x403   :  { %v4785_v7 = vadd.f32 %v4784_v25, %v4556_v20  ;;  %v5222_v23 = vmul.f32 0.2, %v5182_v40  ;;  %vm5202_vm12 = vcmp.ge.f32.partialorder %v5182_v40, 0.0  ;;  %6924 = vmatpush.bf16.msra.mxu2 %v12744_v35 }
 0x405   :  { %v5119_v0 = vadd.f32 %v5076_v9, %v4785_v7  ;;  %v16144_v60 = vpop.f32.mrf.mxu2  ;;  %v5242_v42 = vsel %vm5202_vm12, %v5182_v40, %v5222_v23 }
 0x407   :  { %v5163_v6 = vadd.f32 %v16117_v55, %v5119_v0  ;;  %v16148_v50 = vld [vmem:[#allocation3 + $0x18] sm:$0xf]  ;;  %v16150_v43 = vld [vmem:[#allocation3 + $0x1c] sm:$0xf] }
 0x408   :  { %v16152_v32 = vld [vmem:[#allocation3 + $0x18] sm:$0xff]  ;;  %v5383_v48 = vunpack.c.l.b16 %v16148_v50  ;;  %v5384_v20 = vunpack.c.l.b16 %v16150_v43 }
 0x409   :  { %v5183_v14 = vadd.f32 %v5163_v6, %v5139_v2  ;;  %v5855_v54 = vshll.u32 %v16152_v32, 16  ;;  %v12753_v2 = vld [vmem:[%s17294_s5 + $0xf8] sm:$0xff] }
 0x40a   :  { %v5081_v39 = vpop.f32.mrf.mxu0  ;;  %v5402_v12 = vpack.c.b16 %v5384_v20, %v5383_v48  ;;  %v5531_v63 = vpack.c.b16 %v5383_v48, %v5382_v21  ;;  %v12728_v6 = vld [vmem:[%s17294_s5 + $0x78] sm:$0xff]  ;;  %7103 = vmatpush.bf16.msra.mxu3 %v12753_v2 }
 0x40b   :  { %vm5203_vm13 = vcmp.ge.f32.partialorder %v5183_v14, 0.0  ;;  %v5223_v9 = vmul.f32 0.2, %v5183_v14  ;;  %v4787_v34 = vpop.f32.mrf.mxu3  ;;  %v5857_v18 = vrot.slane %v5855_v54, 1  ;;  %6403 = vmatpush.bf16.msra.mxu0 %v12728_v6 }
 0x40c   :  { %v4788_v57 = vadd.f32 %v4787_v34, %v16131_v16  ;;  %5482 = vmatmul.bf16.gmra.mxu1 %v5402_v12  ;;  %v5550_v52 = vshrl.u32 %v5531_v63, 16  ;;  %v5553_v45 = vshll.u32 %v5531_v63, 16 }
 0x40d   :  { %v5243_v46 = vsel %vm5203_vm13, %v5183_v14, %v5223_v9  ;;  %v5858_v58 = vsel %vm3014_vm1, %v5853_v17, %v5857_v18  ;;  %v16161_v19 = vpop.f32.mrf.mxu2  ;;  %v12720_v14 = vld [vmem:[%s17294_s5 + $0x38] sm:$0xff] }
 0x40e   :  { %v12965_v29 = vpack.c.bf16 %v5243_v46, %v5242_v42  ;;  %v5120_v30 = vadd.f32 %v5079_v59, %v4788_v57  ;;  %v5552_v8 = vrot.slane %v5550_v52, 3  ;;  %v5555_v21 = vrot.slane %v5553_v45, 4  ;;  %5997 = vmatmul.bf16.vlgmr.msrb.gmra.mxu3 %v5858_v58  ;;  %6631 = vmatpush.bf16.msra.mxu1 %v12720_v14 }
 0x410   :  { %13241 = vst [vmem:[#allocation3 + $0x20] sm:$0xff] %v12965_v29   ;;  %v5556_v25 = vor.u32 %v5555_v21, %v5552_v8  ;;  %v5164_v16 = vadd.f32 %v16117_v55, %v5120_v30 }
 0x412   :  { %v5084_v56 = vpop.f32.mrf.mxu0  ;;  %v5557_v28 = vsel %vm1308_vm0, %v5548_v3, %v5556_v25  ;;  %v5184_v59 = vadd.f32 %v5164_v16, %v5140_v47 }
 0x413   :  { %v4789_v7 = vpop.f32.mrf.mxu3  ;;  %5705 = vmatmul.bf16.vlgmr.msrb.gmra.mxu2 %v5557_v28 }
 0x414   :  { %v4790_v40 = vadd.f32 %v4789_v7, %v16140_v5  ;;  %v5141_v5 = vunpack.c.l.bf16 %v15917_v44  ;;  %v5224_v63 = vmul.f32 0.2, %v5184_v59  ;;  %vm5204_vm14 = vcmp.ge.f32.partialorder %v5184_v59, 0.0 }
 0x415   :  { %v4569_v54 = vpop.f32.mrf.mxu2 }
 0x416   :  { %v5121_v0 = vadd.f32 %v5081_v39, %v4790_v40  ;;  %v5859_v39 = vshrl.u32 %v16152_v32, 16  ;;  %v5244_v58 = vsel %vm5204_vm14, %v5184_v59, %v5224_v63 }
 0x417   :  { %v16176_v26 = vld [vmem:[#allocation3 + $0x20] sm:$0xf]  ;;  %v16178_v48 = vld [vmem:[#allocation3 + $0x24] sm:$0xf] }
 0x418   :  { %v16180_v41 = vld [vmem:[#allocation3 + $0x20] sm:$0xff]  ;;  %v5165_v53 = vadd.f32 %v16117_v55, %v5121_v0  ;;  %v5385_v24 = vunpack.c.l.b16 %v16176_v26  ;;  %v5386_v23 = vunpack.c.l.b16 %v16178_v48  ;;  %v5861_v57 = vor.u32 %v5859_v39, %v5857_v18 }
 0x419   :  { %v5863_v12 = vshll.u32 %v16180_v41, 16  ;;  %v5142_v18 = vunpack.c.l.bf16 %v15957_v22  ;;  %v5143_v0 = vunpack.c.l.bf16 %v15960_v13 }
 0x41a   :  { %v5185_v44 = vadd.f32 %v5165_v53, %v5141_v5  ;;  %v5086_v17 = vpop.f32.mrf.mxu0  ;;  %v5403_v9 = vpack.c.b16 %v5386_v23, %v5385_v24  ;;  %v5532_v34 = vpack.c.b16 %v5385_v24, %v5384_v20  ;;  %v5867_v53 = vshrl.u32 %v16180_v41, 16 }
 0x41b   :  { %v4792_v61 = vpop.f32.mrf.mxu3  ;;  %v5865_v52 = vrot.slane %v5863_v12, 1 }
 0x41c   :  { %vm5205_vm15 = vcmp.ge.f32.partialorder %v5185_v44, 0.0  ;;  %v5225_v45 = vmul.f32 0.2, %v5185_v44  ;;  %v4793_v11 = vadd.f32 %v4792_v61, %v16144_v60  ;;  %5487 = vmatmul.bf16.gmra.mxu1 %v5403_v9  ;;  %v5559_v32 = vshrl.u32 %v5532_v34, 16 }
 0x41d   :  { %v5866_v42 = vsel %vm3014_vm1, %v5861_v57, %v5865_v52  ;;  %v5562_v46 = vshll.u32 %v5532_v34, 16  ;;  %v4571_v60 = vpop.f32.mrf.mxu2 }
 0x41e   :  { %v5245_v29 = vsel %vm5205_vm15, %v5185_v44, %v5225_v45  ;;  %v5122_v30 = vadd.f32 %v5084_v56, %v4793_v11  ;;  %6002 = vmatmul.bf16.gmra.mxu3 %v5866_v42  ;;  %v5561_v8 = vrot.slane %v5559_v32, 3 }
 0x41f   :  { %v12970_v20 = vpack.c.bf16 %v5245_v29, %v5244_v58  ;;  %v5564_v21 = vrot.slane %v5562_v46, 4 }
 0x420   :  { %v5166_v16 = vadd.f32 %v16117_v55, %v5122_v30 }
 0x421   :  { %13242 = vst [vmem:[#allocation3 + $0x28] sm:$0xff] %v12970_v20   ;;  %v5565_v3 = vor.u32 %v5564_v21, %v5561_v8  ;;  %v12752_v8 = vld [vmem:[%s17294_s5 + $0xf0] sm:$0xff] }
 0x422   :  { %v5089_v28 = vpop.f32.mrf.mxu0  ;;  %v5186_v59 = vadd.f32 %v5166_v16, %v5142_v18  ;;  %v12727_v20 = vld [vmem:[%s17294_s5 + $0x70] sm:$0xff]  ;;  %7104 = vmatpush.bf16.msra.mxu3 %v12752_v8  ;;  %v5146_v8 = vunpack.c.l.bf16 %v16011_v37 }
 0x423   :  { %v4794_v7 = vpop.f32.mrf.mxu3  ;;  %v5566_v47 = vsel %vm1308_vm0, %v5556_v25, %v5565_v3  ;;  %v12719_v21 = vld [vmem:[%s17294_s5 + $0x30] sm:$0xff]  ;;  %6404 = vmatpush.bf16.msra.mxu0 %v12727_v20 }
 0x424   :  { %v4795_v40 = vadd.f32 %v4794_v7, %v16161_v19  ;;  %5710 = vmatmul.bf16.gmra.mxu2 %v5566_v47  ;;  %v5226_v13 = vmul.f32 0.2, %v5186_v59  ;;  %vm5206_vm2 = vcmp.ge.f32.partialorder %v5186_v59, 0.0  ;;  %6632 = vmatpush.bf16.msra.mxu1 %v12719_v21 }
 0x425   :  { %v4574_v57 = vpop.f32.mrf.mxu2 }
 0x426   :  { %v5123_v56 = vadd.f32 %v5086_v17, %v4795_v40  ;;  %v5869_v17 = vor.u32 %v5867_v53, %v5865_v52  ;;  %v5246_v11 = vsel %vm5206_vm2, %v5186_v59, %v5226_v13  ;;  %v5145_v40 = vunpack.c.l.bf16 %v15994_v1 }
 0x428   :  { %v5167_v22 = vadd.f32 %v16117_v55, %v5123_v56  ;;  %v16204_v2 = vld [vmem:[#allocation3 + $0x28] sm:$0xf]  ;;  %v16206_v6 = vld [vmem:[#allocation3 + $0x2c] sm:$0xf] }
 0x429   :  { %v16208_v5 = vld [vmem:[#allocation3 + $0x28] sm:$0xff]  ;;  %v5387_v19 = vunpack.c.l.b16 %v16204_v2  ;;  %v5388_v25 = vunpack.c.l.b16 %v16206_v6 }
 0x42a   :  { %v5187_v24 = vadd.f32 %v5167_v22, %v5143_v0  ;;  %v5091_v14 = vpop.f32.mrf.mxu0  ;;  %v5871_v39 = vshll.u32 %v16208_v5, 16 }
 0x42b   :  { %v4797_v12 = vpop.f32.mrf.mxu3  ;;  %v5404_v63 = vpack.c.b16 %v5388_v25, %v5387_v19  ;;  %v5533_v44 = vpack.c.b16 %v5387_v19, %v5386_v23  ;;  %v5144_v23 = vunpack.c.l.bf16 %v15990_v10 }
 0x42c   :  { %vm5207_vm3 = vcmp.ge.f32.partialorder %v5187_v24, 0.0  ;;  %v5227_v9 = vmul.f32 0.2, %v5187_v24  ;;  %v4798_v34 = vadd.f32 %v4797_v12, %v4569_v54  ;;  %v5873_v61 = vrot.slane %v5871_v39, 1 }
 0x42d   :  { %5492 = vmatmul.bf16.gmra.mxu1 %v5404_v63  ;;  %v5568_v45 = vshrl.u32 %v5533_v44, 16  ;;  %v5571_v41 = vshll.u32 %v5533_v44, 16  ;;  %v4576_v59 = vpop.f32.mrf.mxu2  ;;  %v5875_v44 = vshrl.u32 %v16208_v5, 16  ;;  %v12743_v5 = vld [vmem:[%s17294_s5 + $0xa8] sm:$0xff] }
 0x42e   :  { %v5247_v32 = vsel %vm5207_vm3, %v5187_v24, %v5227_v9  ;;  %v5124_v42 = vadd.f32 %v5089_v28, %v4798_v34  ;;  %v5874_v46 = vsel %vm3014_vm1, %v5869_v17, %v5873_v61  ;;  %6925 = vmatpush.bf16.msra.mxu2 %v12743_v5 }
 0x42f   :  { %v12975_v58 = vpack.c.bf16 %v5247_v32, %v5246_v11  ;;  %6007 = vmatmul.bf16.gmra.mxu3 %v5874_v46  ;;  %v5570_v29 = vrot.slane %v5568_v45, 3  ;;  %v5573_v30 = vrot.slane %v5571_v41, 4  ;;  %v5877_v32 = vor.u32 %v5875_v44, %v5873_v61  ;;  %v12726_v61 = vld [vmem:[%s17294_s5 + $0x68] sm:$0xff] }
 0x430   :  { %v5168_v52 = vadd.f32 %v16117_v55, %v5124_v42  ;;  %6405 = vmatpush.bf16.msra.mxu0 %v12726_v61 }
 0x431   :  { %13243 = vst [vmem:[#allocation3 + $0x30] sm:$0xff] %v12975_v58   ;;  %v16219_v54 = vor.u32 %v5573_v30, %v5570_v29  ;;  %v12751_v30 = vld [vmem:[%s17294_s5 + $0xe8] sm:$0xff] }
 0x432   :  { %5298 = vst [vmem:[#allocation3 + $0x30] sm:$0xf] %v17448_v15  ;;  %v5094_v18 = vpop.f32.mrf.mxu0  ;;  %v5188_v7 = vadd.f32 %v5168_v52, %v5144_v23  ;;  %v12718_v52 = vld [vmem:[%s17294_s5 + $0x28] sm:$0xff]  ;;  %7105 = vmatpush.bf16.msra.mxu3 %v12751_v30 }
 0x433   :  { %5299 = vst [vmem:[#allocation3 + $0x34] sm:$0xf] %v17448_v15  ;;  %v4799_v10 = vpop.f32.mrf.mxu3  ;;  %v5575_v16 = vsel %vm1308_vm0, %v5565_v3, %v16219_v54  ;;  %6633 = vmatpush.bf16.msra.mxu1 %v12718_v52 }
 0x434   :  { %v4800_v28 = vadd.f32 %v4799_v10, %v4571_v60  ;;  %5715 = vmatmul.bf16.gmra.mxu2 %v5575_v16  ;;  %v5228_v0 = vmul.f32 0.2, %v5188_v7  ;;  %vm5208_vm4 = vcmp.ge.f32.partialorder %v5188_v7, 0.0 }
 0x436   :  { %v5125_v47 = vadd.f32 %v5091_v14, %v4800_v28  ;;  %v5248_v12 = vsel %vm5208_vm4, %v5188_v7, %v5228_v0  ;;  %v5147_v7 = vunpack.c.l.bf16 %v16013_v62  ;;  %vm7023_vm4 = vcmask 1046528  }
 0x438   :  { %v5169_v56 = vadd.f32 %v16117_v55, %v5125_v47 }
 0x439   :  { %v16236_v35 = vld [vmem:[#allocation3 + $0x30] sm:$0xf] }
 0x43a   :  { %v5189_v22 = vadd.f32 %v5169_v56, %v5145_v40  ;;  %v5096_v19 = vpop.f32.mrf.mxu0  ;;  %v16238_v53 = vld [vmem:[#allocation3 + $0x34] sm:$0xf]  ;;  %v5389_v3 = vunpack.c.l.b16 %v16236_v35 }
 0x43b   :  { %v16241_v60 = vld [vmem:[#allocation3 + $0x30] sm:$0xff]  ;;  %v4802_v13 = vpop.f32.mrf.mxu3  ;;  %v5390_v1 = vunpack.c.l.b16 %v16238_v53 }
 0x43c   :  { %7287 = vst [vmem:[#allocation3 + $0x30] sm:$0xf] %v17448_v15  ;;  %vm5209_vm5 = vcmp.ge.f32.partialorder %v5189_v22, 0.0  ;;  %v5229_v24 = vmul.f32 0.2, %v5189_v22  ;;  %v4803_v14 = vadd.f32 %v4802_v13, %v4574_v57  ;;  %v5534_v39 = vpack.c.b16 %v5389_v3, %v5388_v25  ;;  %v4579_v25 = vpop.f32.mrf.mxu2 }
 0x43d   :  { %7288 = vst [vmem:[#allocation3 + $0x34] sm:$0xf] %v17448_v15  ;;  %v5405_v63 = vpack.c.b16 %v5390_v1, %v5389_v3  ;;  %v5879_v17 = vshll.u32 %v16241_v60, 16  ;;  %v5883_v37 = vshrl.u32 %v16241_v60, 16 }
 0x43e   :  { %8470 = vst [vmem:[#allocation3 + $0x34] sm:$0xf] %v17448_v15  ;;  %v5249_v9 = vsel %vm5209_vm5, %v5189_v22, %v5229_v24  ;;  %v5126_v34 = vadd.f32 %v5094_v18, %v4803_v14  ;;  %v5577_v45 = vshrl.u32 %v5534_v39, 16  ;;  %v5580_v41 = vshll.u32 %v5534_v39, 16 }
 0x43f   :  { %v12980_v11 = vpack.c.bf16 %v5249_v9, %v5248_v12  ;;  %5497 = vmatmul.bf16.gmra.mxu1 %v5405_v63  ;;  %v5881_v42 = vrot.slane %v5879_v17, 1 }
 0x440   :  { %v5579_v57 = vrot.slane %v5577_v45, 3  ;;  %v5582_v46 = vrot.slane %v5580_v41, 4  ;;  %v5170_v58 = vadd.f32 %v16117_v55, %v5126_v34 }
 0x441   :  { %13244 = vst [vmem:[#allocation3 + $0x38] sm:$0xff] %v12980_v11   ;;  %v5882_v29 = vsel %vm3014_vm1, %v5877_v32, %v5881_v42  ;;  %v5885_v44 = vor.u32 %v5883_v37, %v5881_v42 }
 0x442   :  { %5300 = vst [vmem:[#allocation3 + $0x38] sm:$0xf] %v17448_v15  ;;  %6012 = vmatmul.bf16.gmra.mxu3 %v5882_v29  ;;  %v5583_v23 = vor.u32 %v5582_v46, %v5579_v57  ;;  %v5099_v20 = vpop.f32.mrf.mxu0  ;;  %v5190_v16 = vadd.f32 %v5170_v58, %v5146_v8  ;;  %v5148_v29 = vunpack.c.l.bf16 %v16045_v49 }
 0x443   :  { %5301 = vst [vmem:[#allocation3 + $0x3c] sm:$0xf] %v17448_v15  ;;  %v4804_v21 = vpop.f32.mrf.mxu3 }
 0x444   :  { %v4805_v18 = vadd.f32 %v4804_v21, %v4576_v59  ;;  %v5584_v10 = vsel %vm1308_vm0, %v16219_v54, %v5583_v23  ;;  %v5230_v40 = vmul.f32 0.2, %v5190_v16  ;;  %vm5210_vm6 = vcmp.ge.f32.partialorder %v5190_v16, 0.0  ;;  %v4581_v3 = vpop.f32.mrf.mxu2  ;;  %v12725_v21 = vld [vmem:[%s17294_s5 + $0x60] sm:$0xff] }
 0x445   :  { %5720 = vmatmul.bf16.gmra.mxu2 %v5584_v10  ;;  %6406 = vmatpush.bf16.msra.mxu0 %v12725_v21 }
 0x446   :  { %v5127_v28 = vadd.f32 %v5096_v19, %v4805_v18  ;;  %v5250_v39 = vsel %vm5210_vm6, %v5190_v16, %v5230_v40  ;;  %v12717_v18 = vld [vmem:[%s17294_s5 + $0x20] sm:$0xff] }
 0x447   :  { %6634 = vmatpush.bf16.msra.mxu1 %v12717_v18 }
 0x448   :  { %v5171_v47 = vadd.f32 %v16117_v55, %v5127_v28 }
 0x449   :  { %v16272_v56 = vld [vmem:[#allocation3 + $0x38] sm:$0xf] }
 0x44a   :  { %v5191_v0 = vadd.f32 %v5171_v47, %v5147_v7  ;;  %v16275_v59 = vld [vmem:[#allocation3 + $0x3c] sm:$0xf]  ;;  %v5391_v54 = vunpack.c.l.b16 %v16272_v56  ;;  %v5101_v12 = vpop.f32.mrf.mxu0 }
 0x44b   :  { %v12700_v22 = vld [vmem:[#allocation3 + $0x38] sm:$0xff]  ;;  %v4807_v13 = vpop.f32.mrf.mxu3  ;;  %v5392_v19 = vunpack.c.l.b16 %v16275_v59 }
 0x44c   :  { %vm5211_vm7 = vcmp.ge.f32.partialorder %v5191_v0, 0.0  ;;  %v5231_v62 = vmul.f32 0.2, %v5191_v0  ;;  %v4808_v24 = vadd.f32 %v4807_v13, %v4579_v25  ;;  %v5535_v14 = vpack.c.b16 %v5391_v54, %v5390_v1  ;;  %v12742_v1 = vld [vmem:[%s17294_s5 + $0xa0] sm:$0xff]  ;;  %v4584_v61 = vpop.f32.mrf.mxu2 }
 0x44d   :  { %v5406_v63 = vpack.c.b16 %v5392_v19, %v5391_v54  ;;  %v5887_v60 = vshll.u32 %v12700_v22, 16  ;;  %6926 = vmatpush.bf16.msra.mxu2 %v12742_v1  ;;  %v5891_v10 = vshrl.u32 %v12700_v22, 16 }
 0x44e   :  { %v5251_v17 = vsel %vm5211_vm7, %v5191_v0, %v5231_v62  ;;  %v5128_v9 = vadd.f32 %v5099_v20, %v4808_v24  ;;  %v5586_v34 = vshrl.u32 %v5535_v14, 16  ;;  %v5589_v45 = vshll.u32 %v5535_v14, 16  ;;  %v12750_v20 = vld [vmem:[%s17294_s5 + $0xe0] sm:$0xff] }
 0x44f   :  { %v12985_v41 = vpack.c.bf16 %v5251_v17, %v5250_v39  ;;  %5502 = vmatmul.bf16.gmra.mxu1 %v5406_v63  ;;  %v5889_v11 = vrot.slane %v5887_v60, 1  ;;  %7106 = vmatpush.bf16.msra.mxu3 %v12750_v20  ;;  %v5151_v20 = vunpack.c.l.bf16 %v16079_v33 }
 0x450   :  { %v5588_v32 = vrot.slane %v5586_v34, 3  ;;  %v5591_v57 = vrot.slane %v5589_v45, 4  ;;  %v5172_v25 = vadd.f32 %v16117_v55, %v5128_v9 }
 0x451   :  { %13245 = vst [vmem:[#allocation3 + $0x40] sm:$0xff] %v12985_v41   ;;  %v5890_v46 = vsel %vm3014_vm1, %v5885_v44, %v5889_v11  ;;  %v5893_v62 = vor.u32 %v5891_v10, %v5889_v11  ;;  %v12741_v11 = vld [vmem:[%s17294_s5 + $0x98] sm:$0xff] }
 0x452   :  { %6017 = vmatmul.bf16.gmra.mxu3 %v5890_v46  ;;  %v5592_v42 = vor.u32 %v5591_v57, %v5588_v32  ;;  %v5192_v52 = vadd.f32 %v5172_v25, %v5148_v29  ;;  %v5104_v49 = vpop.f32.mrf.mxu0  ;;  %v12749_v46 = vld [vmem:[%s17294_s5 + $0xd8] sm:$0xff]  ;;  %6927 = vmatpush.bf16.msra.mxu2 %v12741_v11 }
 0x453   :  { %v4809_v58 = vpop.f32.mrf.mxu3  ;;  %v12724_v25 = vld [vmem:[%s17294_s5 + $0x58] sm:$0xff]  ;;  %7107 = vmatpush.bf16.msra.mxu3 %v12749_v46 }
 0x454   :  { %v4810_v5 = vadd.f32 %v4809_v58, %v4581_v3  ;;  %v5593_v30 = vsel %vm1308_vm0, %v5583_v23, %v5592_v42  ;;  %v5149_v23 = vunpack.c.l.bf16 %v16047_v36  ;;  %v5232_v0 = vmul.f32 0.2, %v5192_v52  ;;  %v4586_v9 = vpop.f32.mrf.mxu2  ;;  %v12716_v58 = vld [vmem:[%s17294_s5 + $0x18] sm:$0xff]  ;;  %6407 = vmatpush.bf16.msra.mxu0 %v12724_v25 }
 0x455   :  { %5725 = vmatmul.bf16.gmra.mxu2 %v5593_v30  ;;  %vm5212_vm8 = vcmp.ge.f32.partialorder %v5192_v52, 0.0  ;;  %v5150_v30 = vunpack.c.l.bf16 %v16077_v27  ;;  %6635 = vmatpush.bf16.msra.mxu1 %v12716_v58 }
 0x456   :  { %v5129_v8 = vadd.f32 %v5101_v12, %v4810_v5  ;;  %v5252_v44 = vsel %vm5212_vm8, %v5192_v52, %v5232_v0 }
 0x458   :  { %v5173_v16 = vadd.f32 %v16117_v55, %v5129_v8  ;;  %v16297_v28 = vld [vmem:[#allocation3 + $0x40] sm:$0xf]  ;;  %v16299_v7 = vld [vmem:[#allocation3 + $0x44] sm:$0xf] }
 0x459   :  { %v16301_v47 = vld [vmem:[#allocation3 + $0x40] sm:$0xff]  ;;  %v5393_v40 = vunpack.c.l.b16 %v16297_v28  ;;  %v5394_v37 = vunpack.c.l.b16 %v16299_v7 }
 0x45a   :  { %v5193_v54 = vadd.f32 %v5173_v16, %v5149_v23  ;;  %v5895_v22 = vshll.u32 %v16301_v47, 16  ;;  %v5106_v57 = vpop.f32.mrf.mxu0 }
 0x45b   :  { %v4812_v36 = vpop.f32.mrf.mxu3  ;;  %v5407_v3 = vpack.c.b16 %v5394_v37, %v5393_v40  ;;  %v5536_v13 = vpack.c.b16 %v5393_v40, %v5392_v19 }
 0x45c   :  { %vm5213_vm9 = vcmp.ge.f32.partialorder %v5193_v54, 0.0  ;;  %v5233_v24 = vmul.f32 0.2, %v5193_v54  ;;  %v4813_v14 = vadd.f32 %v4812_v36, %v4584_v61  ;;  %v5897_v39 = vrot.slane %v5895_v22, 1 }
 0x45d   :  { %v5595_v12 = vshrl.u32 %v5536_v13, 16  ;;  %v5598_v63 = vshll.u32 %v5536_v13, 16 }
 0x45e   :  { %v5253_v60 = vsel %vm5213_vm9, %v5193_v54, %v5233_v24  ;;  %v5130_v17 = vadd.f32 %v5104_v49, %v4813_v14  ;;  %v5898_v45 = vsel %vm3014_vm1, %v5893_v62, %v5897_v39 }
 0x45f   :  { %v12990_v34 = vpack.c.bf16 %v5253_v60, %v5252_v44  ;;  %5507 = vmatmul.bf16.gmra.mxu1 %v5407_v3  ;;  %v5597_v41 = vrot.slane %v5595_v12, 3  ;;  %v5600_v32 = vrot.slane %v5598_v63, 4  ;;  %v5899_v3 = vshrl.u32 %v16301_v47, 16 }
 0x460   :  { %v5174_v1 = vadd.f32 %v16117_v55, %v5130_v17 }
 0x461   :  { %13246 = vst [vmem:[#allocation3 + $0x48] sm:$0xff] %v12990_v34   ;;  %v5601_v19 = vor.u32 %v5600_v32, %v5597_v41  ;;  %v5901_v14 = vor.u32 %v5899_v3, %v5897_v39  ;;  %v12740_v39 = vld [vmem:[%s17294_s5 + $0x90] sm:$0xff] }
 0x462   :  { %6022 = vmatmul.bf16.gmra.mxu3 %v5898_v45  ;;  %v5194_v52 = vadd.f32 %v5174_v1, %v5150_v30  ;;  %v5109_v54 = vpop.f32.mrf.mxu0  ;;  %v12748_v32 = vld [vmem:[%s17294_s5 + $0xd0] sm:$0xff]  ;;  %v5152_v1 = vunpack.c.l.bf16 %v16093_v51  ;;  %6928 = vmatpush.bf16.msra.mxu2 %v12740_v39  ;;  %v5153_v30 = vunpack.c.l.bf16 %v16095_v38 }
 0x463   :  { %v4814_v29 = vpop.f32.mrf.mxu3  ;;  %v5602_v5 = vsel %vm1308_vm0, %v5592_v42, %v5601_v19  ;;  %v4589_v42 = vpop.f32.mrf.mxu2  ;;  %7108 = vmatpush.bf16.msra.mxu3 %v12748_v32 }
 0x464   :  { %v4815_v61 = vadd.f32 %v4814_v29, %v4586_v9  ;;  %v5234_v16 = vmul.f32 0.2, %v5194_v52  ;;  %vm5214_vm10 = vcmp.ge.f32.partialorder %v5194_v52, 0.0 }
 0x465   :  { %5730 = vmatmul.bf16.gmra.mxu2 %v5602_v5 }
 0x466   :  { %v5131_v8 = vadd.f32 %v5106_v57, %v4815_v61  ;;  %v5254_v44 = vsel %vm5214_vm10, %v5194_v52, %v5234_v16 }
 0x468   :  { %v5175_v21 = vadd.f32 %v16117_v55, %v5131_v8  ;;  %v16324_v18 = vld [vmem:[#allocation3 + $0x48] sm:$0xf]  ;;  %v16326_v49 = vld [vmem:[#allocation3 + $0x4c] sm:$0xf] }
 0x469   :  { %v16328_v10 = vld [vmem:[#allocation3 + $0x48] sm:$0xff]  ;;  %v5395_v23 = vunpack.c.l.b16 %v16324_v18  ;;  %v5396_v27 = vunpack.c.l.b16 %v16326_v49 }
 0x46a   :  { %v5195_v40 = vadd.f32 %v5175_v21, %v5151_v20  ;;  %v5903_v0 = vshll.u32 %v16328_v10, 16  ;;  %v5111_v58 = vpop.f32.mrf.mxu0  ;;  %v5907_v38 = vshrl.u32 %v16328_v10, 16  ;;  %v12723_v10 = vld [vmem:[%s17294_s5 + $0x50] sm:$0xff] }
 0x46b   :  { %v4817_v33 = vpop.f32.mrf.mxu3  ;;  %v5408_v22 = vpack.c.b16 %v5396_v27, %v5395_v23  ;;  %v5537_v36 = vpack.c.b16 %v5395_v23, %v5394_v37  ;;  %v4591_v57 = vpop.f32.mrf.mxu2  ;;  %6408 = vmatpush.bf16.msra.mxu0 %v12723_v10 }
 0x46c   :  { %vm5215_vm11 = vcmp.ge.f32.partialorder %v5195_v40, 0.0  ;;  %v5235_v13 = vmul.f32 0.2, %v5195_v40  ;;  %v4818_v62 = vadd.f32 %v4817_v33, %v4589_v42  ;;  %v5905_v24 = vrot.slane %v5903_v0, 1 }
 0x46d   :  { %v5604_v12 = vshrl.u32 %v5537_v36, 16  ;;  %v5607_v63 = vshll.u32 %v5537_v36, 16 }
 0x46e   :  { %v5255_v60 = vsel %vm5215_vm11, %v5195_v40, %v5235_v13  ;;  %v5132_v17 = vadd.f32 %v5109_v54, %v4818_v62  ;;  %v5906_v34 = vsel %vm3014_vm1, %v5901_v14, %v5905_v24  ;;  %v5909_v33 = vor.u32 %v5907_v38, %v5905_v24  ;;  %v12715_v24 = vld [vmem:[%s17294_s5 + $0x10] sm:$0xff] }
 0x46f   :  { %v12995_v9 = vpack.c.bf16 %v5255_v60, %v5254_v44  ;;  %5512 = vmatmul.bf16.gmra.mxu1 %v5408_v22  ;;  %v5606_v45 = vrot.slane %v5604_v12, 3  ;;  %v5609_v41 = vrot.slane %v5607_v63, 4 }
 0x470   :  { %v5176_v47 = vadd.f32 %v16117_v55, %v5132_v17  ;;  %6636 = vmatpush.bf16.msra.mxu1 %v12715_v24  ;;  %v12722_v17 = vld [vmem:[%s17294_s5 + $0x48] sm:$0xff] }
 0x471   :  { %13247 = vst [vmem:[#allocation3 + $0x50] sm:$0xff] %v12995_v9   ;;  %v5610_v37 = vor.u32 %v5609_v41, %v5606_v45  ;;  %6409 = vmatpush.bf16.msra.mxu0 %v12722_v17 }
 0x472   :  { %6027 = vmatmul.bf16.gmra.mxu3 %v5906_v34  ;;  %v5196_v29 = vadd.f32 %v5176_v47, %v5152_v1 }
 0x473   :  { %v4819_v11 = vpop.f32.mrf.mxu3  ;;  %v5611_v46 = vsel %vm1308_vm0, %v5601_v19, %v5610_v37 }
 0x474   :  { %v4820_v25 = vadd.f32 %v4819_v11, %v4591_v57  ;;  %v5236_v42 = vmul.f32 0.2, %v5196_v29  ;;  %vm5216_vm12 = vcmp.ge.f32.partialorder %v5196_v29, 0.0 }
 0x475   :  { %5735 = vmatmul.bf16.gmra.mxu2 %v5611_v46 }
 0x476   :  { %v5133_v5 = vadd.f32 %v5111_v58, %v4820_v25  ;;  %v5256_v3 = vsel %vm5216_vm12, %v5196_v29, %v5236_v42 }
 0x478   :  { %v5177_v61 = vadd.f32 %v16117_v55, %v5133_v5  ;;  %v16346_v52 = vld [vmem:[#allocation3 + $0x50] sm:$0xf]  ;;  %v16348_v8 = vld [vmem:[#allocation3 + $0x54] sm:$0xf]  ;;  %v5776_v5 = vld [vmem:[#allocation3 + $0x60] sm:$0x1] }
 0x479   :  { %v12703_v20 = vld [vmem:[#allocation3 + $0x50] sm:$0xff]  ;;  %v16350_v21 = vpop.f32.mrf.mxu1  ;;  %v5397_v51 = vunpack.c.l.b16 %v16346_v52  ;;  %v5398_v19 = vunpack.c.l.b16 %v16348_v8 }
 0x47a   :  { %v5197_v23 = vadd.f32 %v5177_v61, %v5153_v30  ;;  %v5911_v16 = vshll.u32 %v12703_v20, 16  ;;  %v5915_v46 = vshrl.u32 %v12703_v20, 16  ;;  %v12739_v20 = vld [vmem:[%s17294_s5 + $0x88] sm:$0xff] }
 0x47b   :  { %v5409_v40 = vpack.c.b16 %v5398_v19, %v5397_v51  ;;  %v5538_v0 = vpack.c.b16 %v5397_v51, %v5396_v27  ;;  %6929 = vmatpush.bf16.msra.mxu2 %v12739_v20 }
 0x47c   :  { %vm5217_vm13 = vcmp.ge.f32.partialorder %v5197_v23, 0.0  ;;  %v5237_v55 = vmul.f32 0.2, %v5197_v23  ;;  %v5913_v54 = vrot.slane %v5911_v16, 1 }
 0x47d   :  { %v5613_v22 = vshrl.u32 %v5538_v0, 16  ;;  %v5616_v36 = vshll.u32 %v5538_v0, 16  ;;  %v12714_v0 = vld [vmem:[%s17294_s5 + $0x8] sm:$0xff] }
 0x47e   :  { %v5257_v13 = vsel %vm5217_vm13, %v5197_v23, %v5237_v55  ;;  %v5914_v14 = vsel %vm3014_vm1, %v5909_v33, %v5913_v54  ;;  %v5917_v25 = vor.u32 %v5915_v46, %v5913_v54  ;;  %6637 = vmatpush.bf16.msra.mxu1 %v12714_v0 }
 0x47f   :  { %v13000_v62 = vpack.c.bf16 %v5257_v13, %v5256_v3  ;;  %5517 = vmatmul.bf16.gmra.mxu1 %v5409_v40  ;;  %v5615_v12 = vrot.slane %v5613_v22, 3  ;;  %v5618_v63 = vrot.slane %v5616_v36, 4  ;;  %v5835_v40 = vunpack.c.l.b16 %v5776_v5 }
 0x481   :  { %13248 = vst [vmem:[#allocation3 + $0x58] sm:$0xff] %v13000_v62   ;;  %v16356_v44 = vpop.f32.mrf.mxu1  ;;  %v5619_v27 = vor.u32 %v5618_v63, %v5615_v12  ;;  %v5846_v54 = vpack.c.b16 %v5835_v40, %v5835_v40  ;;  %v16396_v62 = vld [vmem:[%s17293_s4 + $0x1] ss:$0 sm:$0xff] }
 0x482   :  { %6032 = vmatmul.bf16.gmra.mxu3 %v5914_v14 }
 0x483   :  { %v5620_v60 = vsel %vm1308_vm0, %v5610_v37, %v5619_v27  ;;  %v12721_v37 = vld [vmem:[%s17294_s5 + $0x40] sm:$0xff]  ;;  %v5927_v12 = vshll.u32 %v5846_v54, 16 }
 0x484   :  { %6410 = vmatpush.bf16.msra.mxu0 %v12721_v37 }
 0x485   :  { %5740 = vmatmul.bf16.gmra.mxu2 %v5620_v60 }
 0x488   :  { %v16368_v9 = vld [vmem:[#allocation3 + $0x58] sm:$0xf]  ;;  %v16370_v34 = vld [vmem:[#allocation3 + $0x5c] sm:$0xf] }
 0x489   :  { %v12704_v45 = vld [vmem:[#allocation3 + $0x58] sm:$0xff]  ;;  %v16372_v41 = vpop.f32.mrf.mxu1  ;;  %v5399_v47 = vunpack.c.l.b16 %v16368_v9  ;;  %v5400_v39 = vunpack.c.l.b16 %v16370_v34 }
 0x48a   :  { %v5919_v32 = vshll.u32 %v12704_v45, 16 }
 0x48b   :  { %v5410_v57 = vpack.c.b16 %v5400_v39, %v5399_v47  ;;  %v5539_v11 = vpack.c.b16 %v5399_v47, %v5398_v19  ;;  %v12747_v19 = vld [vmem:[%s17294_s5 + $0xc8] sm:$0xff]  ;;  %v5540_v55 = vpack.c.b16 %v5400_v39, %v5400_v39  ;;  %v5929_v47 = vrot.slane %v5927_v12, 1 }
 0x48c   :  { %v5921_v1 = vrot.slane %v5919_v32, 1  ;;  %7109 = vmatpush.bf16.msra.mxu3 %v12747_v19 }
 0x48d   :  { %v5622_v58 = vshrl.u32 %v5539_v11, 16  ;;  %v5625_v29 = vshll.u32 %v5539_v11, 16  ;;  %v5631_v36 = vshrl.u32 %v5540_v55, 16  ;;  %v5634_v3 = vshll.u32 %v5540_v55, 16 }
 0x48e   :  { %v5922_v30 = vsel %vm3014_vm1, %v5917_v25, %v5921_v1 }
 0x48f   :  { %5522 = vmatmul.bf16.gmra.mxu1 %v5410_v57  ;;  %v5624_v61 = vrot.slane %v5622_v58, 3  ;;  %v5627_v51 = vrot.slane %v5625_v29, 4  ;;  %v5633_v10 = vrot.slane %v5631_v36, 3  ;;  %v5636_v24 = vrot.slane %v5634_v3, 4 }
 0x491   :  { %v16380_v42 = vpop.f32.mrf.mxu1  ;;  %v5998_v23 = vpop.f32.mrf.mxu3  ;;  %v5628_v16 = vor.u32 %v5627_v51, %v5624_v61  ;;  %v5637_v32 = vor.u32 %v5636_v24, %v5633_v10 }
 0x492   :  { %6037 = vmatmul.bf16.gmra.mxu3 %v5922_v30 }
 0x493   :  { %v5629_v38 = vsel %vm1308_vm0, %v5619_v27, %v5628_v16  ;;  %v5923_v27 = vshrl.u32 %v12704_v45, 16  ;;  %v12738_v45 = vld [vmem:[%s17294_s5 + $0x80] sm:$0xff]  ;;  %v5638_v5 = vsel %vm1308_vm0, %v5628_v16, %v5637_v32 }
 0x494   :  { %6930 = vmatpush.bf16.msra.mxu2 %v12738_v45 }
 0x495   :  { %5745 = vmatmul.bf16.gmra.mxu2 %v5629_v38  ;;  %v5925_v17 = vor.u32 %v5923_v27, %v5921_v1  ;;  %v12746_v1 = vld [vmem:[%s17294_s5 + $0xc0] sm:$0xff] }
 0x496   :  { %v5706_v33 = vpop.f32.mrf.mxu2  ;;  %7110 = vmatpush.bf16.msra.mxu3 %v12746_v1 }
 0x497   :  { %v5707_v22 = vadd.f32 %v5706_v33, %v16350_v21  ;;  %v6068_v21 = vunpack.c.l.bf16 %v16134_v4  ;;  %v5930_v46 = vsel %vm3014_vm1, %v5925_v17, %v5929_v47  ;;  %v12713_v4 = vld [vmem:[%s17294_s5] sm:$0xff]  ;;  %v6070_v33 = vunpack.c.l.bf16 %v16148_v50 }
 0x498   :  { %6638 = vmatpush.bf16.msra.mxu1 %v12713_v4 }
 0x499   :  { %v6048_v13 = vadd.f32 %v5998_v23, %v5707_v22  ;;  %v6000_v14 = vpop.f32.mrf.mxu3  ;;  %v5488_v63 = vpop.f32.mrf.mxu1 }
 0x49b   :  { %v6093_v60 = vadd.f32 %v16396_v62, %v6048_v13 }
 0x49d   :  { %v6113_v57 = vadd.f32 %v6093_v60, %v6068_v21 }
 0x49e   :  { %v5708_v39 = vpop.f32.mrf.mxu2 }
 0x49f   :  { %v5709_v37 = vadd.f32 %v5708_v39, %v16356_v44  ;;  %v6069_v44 = vunpack.c.l.bf16 %v16136_v31  ;;  %v6153_v30 = vmul.f32 0.2, %v6113_v57  ;;  %vm6133_vm14 = vcmp.ge.f32.partialorder %v6113_v57, 0.0 }
 0x4a1   :  { %v6049_v11 = vadd.f32 %v6000_v14, %v5709_v37  ;;  %v6003_v25 = vpop.f32.mrf.mxu3  ;;  %v5490_v29 = vpop.f32.mrf.mxu1  ;;  %v6173_v20 = vsel %vm6133_vm14, %v6113_v57, %v6153_v30  ;;  %v13271_v37 = vld [vmem:[#allocation2 + $0xc] sm:$0x8] }
 0x4a2   :  { %6042 = vmatmul.bf16.gmra.mxu3 %v5930_v46 }
 0x4a3   :  { %v6094_v58 = vadd.f32 %v16396_v62, %v6049_v11 }
 0x4a5   :  { %v6114_v61 = vadd.f32 %v6094_v58, %v6069_v44  ;;  %5750 = vmatmul.bf16.gmra.mxu2 %v5638_v5 }
 0x4a7   :  { %vm6134_vm15 = vcmp.ge.f32.partialorder %v6114_v61, 0.0  ;;  %v6154_v51 = vmul.f32 0.2, %v6114_v61  ;;  %v5711_v23 = vpop.f32.mrf.mxu2 }
 0x4a8   :  { %v5712_v40 = vadd.f32 %v5711_v23, %v16372_v41  ;;  %v6071_v41 = vunpack.c.l.bf16 %v16150_v43 }
 0x4a9   :  { %v6174_v19 = vsel %vm6134_vm15, %v6114_v61, %v6154_v51  ;;  %v6005_v31 = vpop.f32.mrf.mxu3 }
 0x4aa   :  { %v13005_v0 = vpack.c.bf16 %v6174_v19, %v6173_v20  ;;  %v6050_v38 = vadd.f32 %v6003_v25, %v5712_v40  ;;  %v16416_v55 = vpop.f32.mrf.mxu1  ;;  %v6072_v25 = vunpack.c.l.bf16 %v16176_v26  ;;  %v6073_v40 = vunpack.c.l.bf16 %v16178_v48 }
 0x4ac   :  { %13249 = vst [vmem:[#allocation2 + $0x10] sm:$0xff] %v13005_v0   ;;  %6411 = vmatmul.bf16.vlgmr.msra.gmra.mxu0 %v13005_v0  ;;  %v6095_v16 = vadd.f32 %v16396_v62, %v6050_v38  ;;  %v6784_v57 = vshll.u32 %v13005_v0, 16  ;;  %v6782_v61 = vshrl.u32 %v13005_v0, 16 }
 0x4ae   :  { %v6115_v36 = vadd.f32 %v6095_v16, %v6070_v33  ;;  %v6786_v58 = vrot.slane %v6784_v57, 1 }
 0x4af   :  { %v5713_v54 = vpop.f32.mrf.mxu2 }
 0x4b0   :  { %v5714_v22 = vadd.f32 %v5713_v54, %v16380_v42  ;;  %v6155_v12 = vmul.f32 0.2, %v6115_v36  ;;  %vm6135_vm2 = vcmp.ge.f32.partialorder %v6115_v36, 0.0  ;;  %v6787_v16 = vor.u32 %v6786_v58, %v6782_v61 }
 0x4b2   :  { %v6051_v3 = vadd.f32 %v6005_v31, %v5714_v22  ;;  %v6008_v13 = vpop.f32.mrf.mxu3  ;;  %v16422_v60 = vpop.f32.mrf.mxu1  ;;  %v6175_v47 = vsel %vm6135_vm2, %v6115_v36, %v6155_v12 }
 0x4b3   :  { %v13378_v32 = vld [vmem:[#allocation2 + $0xc] sm:$0xf0]   ;;  %v13319_v11 = vld [vmem:[#allocation2 + $0x10] sm:$0xf0] }
 0x4b4   :  { %v6096_v14 = vadd.f32 %v16396_v62, %v6051_v3  ;;  %v13320_v46 = vld [vmem:[#allocation2 + $0x10] sm:$0xe]  ;;  %v13272_v1 = vor.u32 %v13378_v32, %v13271_v37 }
 0x4b5   :  { %v13321_v44 = vor.u32 %v13320_v46, %v13319_v11  ;;  %v6074_v46 = vunpack.c.l.bf16 %v16204_v2 }
 0x4b6   :  { %v6116_v27 = vadd.f32 %v6096_v14, %v6071_v41  ;;  %v6476_v51 = vshrl.u32 %v13272_v1, 16  ;;  %v6479_v23 = vshll.u32 %v13272_v1, 16 }
 0x4b7   :  { %v5716_v10 = vpop.f32.mrf.mxu2 }
 0x4b8   :  { %vm6136_vm3 = vcmp.ge.f32.partialorder %v6116_v27, 0.0  ;;  %v6156_v24 = vmul.f32 0.2, %v6116_v27  ;;  %v5717_v17 = vadd.f32 %v5716_v10, %v5488_v63  ;;  %v6478_v36 = vrot.slane %v6476_v51, 3 }
 0x4b9   :  { %v6481_v3 = vrot.slane %v6479_v23, 4 }
 0x4ba   :  { %v6176_v50 = vsel %vm6136_vm3, %v6116_v27, %v6156_v24  ;;  %v6052_v39 = vadd.f32 %v6008_v13, %v5717_v17  ;;  %v6010_v21 = vpop.f32.mrf.mxu3 }
 0x4bb   :  { %v13010_v42 = vpack.c.bf16 %v6176_v50, %v6175_v47 }
 0x4bc   :  { %v6097_v43 = vadd.f32 %v16396_v62, %v6052_v39  ;;  %v16426_v5 = vpop.f32.mrf.mxu1 }
 0x4bd   :  { %13250 = vst [vmem:[#allocation2 + $0x18] sm:$0xff] %v13010_v42   ;;  %6416 = vmatmul.bf16.gmra.mxu0 %v13010_v42 }
 0x4be   :  { %v6117_v63 = vadd.f32 %v6097_v43, %v6072_v25 }
 0x4bf   :  { %v5718_v45 = vpop.f32.mrf.mxu2 }
 0x4c0   :  { %v5719_v4 = vadd.f32 %v5718_v45, %v5490_v29  ;;  %v6157_v26 = vmul.f32 0.2, %v6117_v63  ;;  %v7024_v29 = vrot.slane %v13321_v44, 1  ;;  %vm6137_vm5 = vcmp.ge.f32.partialorder %v6117_v63, 0.0 }
 0x4c1   :  { %v6075_v44 = vunpack.c.l.bf16 %v16206_v6 }
 0x4c2   :  { %v6053_v30 = vadd.f32 %v6010_v21, %v5719_v4  ;;  %v6177_v17 = vsel %vm6137_vm5, %v6117_v63, %v6157_v26  ;;  %v6482_v21 = vor.u32 %v6481_v3, %v6478_v36 }
 0x4c4   :  { %v6098_v20 = vadd.f32 %v16396_v62, %v6053_v30  ;;  %v16430_v19 = vld [vmem:[#allocation2 + $0x18] sm:$0xff]  ;;  %v5500_v32 = vpop.f32.mrf.mxu1 }
 0x4c5   :  { %v13380_v31 = vld [vmem:[#allocation2 + $0x14] sm:$0xff]   ;;  %v6013_v38 = vpop.f32.mrf.mxu3  ;;  %v7025_v33 = vrot.slane %v16430_v19, 1  ;;  %v6789_v22 = vshll.u32 %v16430_v19, 16  ;;  %v6793_v61 = vshrl.u32 %v16430_v19, 16 }
 0x4c6   :  { %v6118_v54 = vadd.f32 %v6098_v20, %v6073_v40  ;;  %v6484_v0 = vshrl.u32 %v13380_v31, 16  ;;  %v6487_v48 = vshll.u32 %v13380_v31, 16 }
 0x4c7   :  { %v7026_v14 = vsel %vm7023_vm4, %v7024_v29, %v7025_v33  ;;  %v6791_v12 = vrot.slane %v6789_v22, 1 }
 0x4c8   :  { %vm6138_vm6 = vcmp.ge.f32.partialorder %v6118_v54, 0.0  ;;  %v6158_v13 = vmul.f32 0.2, %v6118_v54  ;;  %v5721_v41 = vpop.f32.mrf.mxu2  ;;  %7111 = vmatmul.bf16.vlgmr.msra.gmra.mxu3 %v7026_v14  ;;  %v6486_v10 = vrot.slane %v6484_v0, 3  ;;  %v6489_v24 = vrot.slane %v6487_v48, 4 }
 0x4c9   :  { %v5722_v27 = vadd.f32 %v5721_v41, %v16416_v55  ;;  %v6792_v50 = vsel %vm3014_vm1, %v6787_v16, %v6791_v12  ;;  %v6795_v26 = vor.u32 %v6793_v61, %v6791_v12 }
 0x4ca   :  { %v6178_v47 = vsel %vm6138_vm6, %v6118_v54, %v6158_v13  ;;  %6931 = vmatmul.bf16.vlgmr.msra.gmra.mxu2 %v6792_v50  ;;  %v6490_v37 = vor.u32 %v6489_v24, %v6486_v10  ;;  %v6077_v50 = vunpack.c.l.bf16 %v16238_v53 }
 0x4cb   :  { %v13015_v39 = vpack.c.bf16 %v6178_v47, %v6177_v17  ;;  %v6054_v42 = vadd.f32 %v6013_v38, %v5722_v27 }
 0x4cc   :  { %v6491_v57 = vsel %vm1308_vm0, %v6482_v21, %v6490_v37  ;;  %v5503_v51 = vpop.f32.mrf.mxu1 }
 0x4cd   :  { %13251 = vst [vmem:[#allocation2 + $0x20] sm:$0xff] %v13015_v39   ;;  %v6015_v43 = vpop.f32.mrf.mxu3  ;;  %6421 = vmatmul.bf16.gmra.mxu0 %v13015_v39  ;;  %6639 = vmatmul.bf16.vlgmr.msra.gmra.mxu1 %v6491_v57  ;;  %v6099_v55 = vadd.f32 %v16396_v62, %v6054_v42 }
 0x4cf   :  { %v6119_v45 = vadd.f32 %v6099_v55, %v6074_v46 }
 0x4d0   :  { %v5723_v11 = vpop.f32.mrf.mxu2 }
 0x4d1   :  { %v5724_v25 = vadd.f32 %v5723_v11, %v16422_v60  ;;  %vm6139_vm7 = vcmp.ge.f32.partialorder %v6119_v45, 0.0  ;;  %v6159_v60 = vmul.f32 0.2, %v6119_v45 }
 0x4d3   :  { %v6055_v1 = vadd.f32 %v6015_v43, %v5724_v25  ;;  %v6179_v3 = vsel %vm6139_vm7, %v6119_v45, %v6159_v60 }
 0x4d4   :  { %v16441_v4 = vld [vmem:[#allocation2 + $0x20] sm:$0xff] }
 0x4d5   :  { %v13382_v63 = vld [vmem:[#allocation2 + $0x1c] sm:$0xff]   ;;  %v6100_v58 = vadd.f32 %v16396_v62, %v6055_v1  ;;  %v6018_v30 = vpop.f32.mrf.mxu3  ;;  %v7027_v23 = vrot.slane %v16441_v4, 1  ;;  %v6797_v40 = vshll.u32 %v16441_v4, 16 }
 0x4d6   :  { %v6493_v2 = vshrl.u32 %v13382_v63, 16  ;;  %v6496_v20 = vshll.u32 %v13382_v63, 16 }
 0x4d7   :  { %v6120_v31 = vadd.f32 %v6100_v58, %v6075_v44  ;;  %v7028_v29 = vsel %vm7023_vm4, %v7025_v33, %v7027_v23  ;;  %v6799_v6 = vrot.slane %v6797_v40, 1  ;;  %v6076_v33 = vunpack.c.l.bf16 %v16236_v35 }
 0x4d8   :  { %v5726_v38 = vpop.f32.mrf.mxu2  ;;  %v6495_v16 = vrot.slane %v6493_v2, 3  ;;  %v6498_v54 = vrot.slane %v6496_v20, 4  ;;  %7116 = vmatmul.bf16.gmra.mxu3 %v7028_v29 }
 0x4d9   :  { %vm6140_vm8 = vcmp.ge.f32.partialorder %v6120_v31, 0.0  ;;  %v6160_v22 = vmul.f32 0.2, %v6120_v31  ;;  %v5727_v19 = vadd.f32 %v5726_v38, %v16426_v5  ;;  %v6800_v0 = vsel %vm3014_vm1, %v6795_v26, %v6799_v6  ;;  %v5505_v5 = vpop.f32.mrf.mxu1 }
 0x4da   :  { %v6499_v36 = vor.u32 %v6498_v54, %v6495_v16  ;;  %6936 = vmatmul.bf16.gmra.mxu2 %v6800_v0  ;;  %v6079_v16 = vunpack.c.l.bf16 %v16275_v59 }
 0x4db   :  { %v6180_v48 = vsel %vm6140_vm8, %v6120_v31, %v6160_v22  ;;  %v6056_v13 = vadd.f32 %v6018_v30, %v5727_v19 }
 0x4dc   :  { %v13020_v41 = vpack.c.bf16 %v6180_v48, %v6179_v3  ;;  %v6500_v14 = vsel %vm1308_vm0, %v6490_v37, %v6499_v36 }
 0x4dd   :  { %v6020_v12 = vpop.f32.mrf.mxu3  ;;  %v6101_v27 = vadd.f32 %v16396_v62, %v6056_v13  ;;  %6644 = vmatmul.bf16.gmra.mxu1 %v6500_v14 }
 0x4de   :  { %13252 = vst [vmem:[#allocation2 + $0x28] sm:$0xff] %v13020_v41   ;;  %6426 = vmatmul.bf16.gmra.mxu0 %v13020_v41 }
 0x4df   :  { %v6121_v17 = vadd.f32 %v6101_v27, %v6076_v33 }
 0x4e0   :  { %v5728_v10 = vpop.f32.mrf.mxu2 }
 0x4e1   :  { %v5729_v24 = vadd.f32 %v5728_v10, %v5500_v32  ;;  %v6161_v43 = vmul.f32 0.2, %v6121_v17  ;;  %vm6141_vm9 = vcmp.ge.f32.partialorder %v6121_v17, 0.0  ;;  %v6801_v32 = vshrl.u32 %v16441_v4, 16  ;;  %v5508_v63 = vpop.f32.mrf.mxu1 }
 0x4e3   :  { %v6057_v47 = vadd.f32 %v6020_v12, %v5729_v24  ;;  %v6803_v44 = vor.u32 %v6801_v32, %v6799_v6  ;;  %v6181_v40 = vsel %vm6141_vm9, %v6121_v17, %v6161_v43 }
 0x4e5   :  { %v6102_v39 = vadd.f32 %v16396_v62, %v6057_v47  ;;  %v6023_v42 = vpop.f32.mrf.mxu3  ;;  %v16456_v21 = vld [vmem:[#allocation2 + $0x28] sm:$0xff] }
 0x4e6   :  { %v13384_v37 = vld [vmem:[#allocation2 + $0x24] sm:$0xff]   ;;  %v7029_v35 = vrot.slane %v16456_v21, 1  ;;  %v6805_v55 = vshll.u32 %v16456_v21, 16 }
 0x4e7   :  { %v6122_v57 = vadd.f32 %v6102_v39, %v6077_v50  ;;  %v6502_v11 = vshrl.u32 %v13384_v37, 16  ;;  %v6505_v25 = vshll.u32 %v13384_v37, 16 }
 0x4e8   :  { %v5731_v46 = vpop.f32.mrf.mxu2  ;;  %v7030_v1 = vsel %vm7023_vm4, %v7027_v23, %v7029_v35  ;;  %v6807_v58 = vrot.slane %v6805_v55, 1  ;;  %v6078_v23 = vunpack.c.l.bf16 %v16272_v56  ;;  %v13383_v56 = vld [vmem:[#allocation2 + $0x2c] sm:$0xf] }
 0x4e9   :  { %vm6142_vm10 = vcmp.ge.f32.partialorder %v6122_v57, 0.0  ;;  %v6162_v53 = vmul.f32 0.2, %v6122_v57  ;;  %v5732_v45 = vadd.f32 %v5731_v46, %v5503_v51  ;;  %7121 = vmatmul.bf16.gmra.mxu3 %v7030_v1  ;;  %v6504_v30 = vrot.slane %v6502_v11, 3  ;;  %v5510_v19 = vpop.f32.mrf.mxu1 }
 0x4ea   :  { %v6507_v61 = vrot.slane %v6505_v25, 4  ;;  %v6808_v4 = vsel %vm3014_vm1, %v6803_v44, %v6807_v58 }
 0x4eb   :  { %v6182_v2 = vsel %vm6142_vm10, %v6122_v57, %v6162_v53  ;;  %v6058_v20 = vadd.f32 %v6023_v42, %v5732_v45  ;;  %6941 = vmatmul.bf16.gmra.mxu2 %v6808_v4 }
 0x4ec   :  { %v13025_v60 = vpack.c.bf16 %v6182_v2, %v6181_v40  ;;  %v6508_v31 = vor.u32 %v6507_v61, %v6504_v30  ;;  %v6081_v2 = vunpack.c.l.bf16 %v16299_v7 }
 0x4ed   :  { %v6025_v26 = vpop.f32.mrf.mxu3  ;;  %v6103_v38 = vadd.f32 %v16396_v62, %v6058_v20 }
 0x4ee   :  { %13253 = vst [vmem:[#allocation2 + $0x30] sm:$0xff] %v13025_v60   ;;  %v6509_v51 = vsel %vm1308_vm0, %v6499_v36, %v6508_v31 }
 0x4ef   :  { %6233 = vst [vmem:[#allocation2 + $0x30] sm:$0xf] %v17448_v15  ;;  %6649 = vmatmul.bf16.gmra.mxu1 %v6509_v51  ;;  %v6123_v54 = vadd.f32 %v6103_v38, %v6078_v23 }
 0x4f0   :  { %6234 = vst [vmem:[#allocation2 + $0x34] sm:$0xf] %v17448_v15  ;;  %v5733_v29 = vpop.f32.mrf.mxu2 }
 0x4f1   :  { %v5734_v6 = vadd.f32 %v5733_v29, %v5505_v5  ;;  %v6163_v13 = vmul.f32 0.2, %v6123_v54  ;;  %vm6143_vm11 = vcmp.ge.f32.partialorder %v6123_v54, 0.0  ;;  %v6809_v5 = vshrl.u32 %v16456_v21, 16  ;;  %v5513_v45 = vpop.f32.mrf.mxu1 }
 0x4f3   :  { %v6059_v22 = vadd.f32 %v6025_v26, %v5734_v6  ;;  %v6811_v50 = vor.u32 %v6809_v5, %v6807_v58  ;;  %v6183_v37 = vsel %vm6143_vm11, %v6123_v54, %v6163_v13 }
 0x4f5   :  { %v6104_v0 = vadd.f32 %v16396_v62, %v6059_v22  ;;  %v6028_v3 = vpop.f32.mrf.mxu3 }
 0x4f6   :  { %v13386_v36 = vld [vmem:[#allocation2 + $0x2c] sm:$0xf0]  }
 0x4f7   :  { %v11484_v48 = vld [vmem:[#allocation2 + $0x30] sm:$0xf]  ;;  %v6124_v41 = vadd.f32 %v6104_v0, %v6079_v16  ;;  %v12732_v12 = vld [vmem:[#allocation2 + $0x30] sm:$0xf0]  ;;  %v13292_v33 = vor.u32 %v13386_v36, %v13383_v56 }
 0x4f8   :  { %v13263_v14 = vld [vmem:[#allocation2 + $0x30] sm:$0xff]   ;;  %v5736_v27 = vpop.f32.mrf.mxu2  ;;  %v16473_v59 = vor.u32 %v12732_v12, %v11484_v48 }
 0x4f9   :  { %6431 = vmatmul.bf16.gmra.mxu0 %v13263_v14  ;;  %7878 = vst [vmem:[#allocation2 + $0x30] sm:$0xf] %v17448_v15  ;;  %vm6144_vm12 = vcmp.ge.f32.partialorder %v6124_v41, 0.0  ;;  %v6164_v10 = vmul.f32 0.2, %v6124_v41  ;;  %v5737_v24 = vadd.f32 %v5736_v27, %v5508_v63  ;;  %v6511_v17 = vshrl.u32 %v13292_v33, 16 }
 0x4fa   :  { %7879 = vst [vmem:[#allocation2 + $0x34] sm:$0xf] %v17448_v15  ;;  %v7031_v47 = vrot.slane %v16473_v59, 1  ;;  %v6813_v39 = vshll.u32 %v16473_v59, 16  ;;  %v6514_v42 = vshll.u32 %v13292_v33, 16  ;;  %v6817_v4 = vshrl.u32 %v16473_v59, 16 }
 0x4fb   :  { %v6184_v43 = vsel %vm6144_vm12, %v6124_v41, %v6164_v10  ;;  %v6060_v57 = vadd.f32 %v6028_v3, %v5737_v24  ;;  %v6513_v55 = vrot.slane %v6511_v17, 3  ;;  %v6082_v17 = vunpack.c.l.bf16 %v16324_v18 }
 0x4fc   :  { %v13030_v11 = vpack.c.bf16 %v6184_v43, %v6183_v37  ;;  %v7032_v46 = vsel %vm7023_vm4, %v7029_v35, %v7031_v47  ;;  %v6815_v32 = vrot.slane %v6813_v39, 1  ;;  %v6516_v25 = vrot.slane %v6514_v42, 4 }
 0x4fd   :  { %v6030_v53 = vpop.f32.mrf.mxu3  ;;  %7126 = vmatmul.bf16.gmra.mxu3 %v7032_v46  ;;  %v6105_v44 = vadd.f32 %v16396_v62, %v6060_v57  ;;  %v6080_v35 = vunpack.c.l.bf16 %v16297_v28  ;;  %v6083_v37 = vunpack.c.l.bf16 %v16326_v49 }
 0x4fe   :  { %13254 = vst [vmem:[#allocation2 + $0x38] sm:$0xff] %v13030_v11   ;;  %v6816_v1 = vsel %vm3014_vm1, %v6811_v50, %v6815_v32  ;;  %v6517_v63 = vor.u32 %v6516_v25, %v6513_v55 }
 0x4ff   :  { %6235 = vst [vmem:[#allocation2 + $0x38] sm:$0xf] %v17448_v15  ;;  %6946 = vmatmul.bf16.gmra.mxu2 %v6816_v1  ;;  %v6125_v61 = vadd.f32 %v6105_v44, %v6080_v35 }
 0x500   :  { %6236 = vst [vmem:[#allocation2 + $0x3c] sm:$0xf] %v17448_v15  ;;  %v5738_v58 = vpop.f32.mrf.mxu2  ;;  %v6518_v21 = vsel %vm1308_vm0, %v6508_v31, %v6517_v63  ;;  %v5515_v31 = vpop.f32.mrf.mxu1 }
 0x501   :  { %v5739_v30 = vadd.f32 %v5738_v58, %v5510_v19  ;;  %6654 = vmatmul.bf16.gmra.mxu1 %v6518_v21  ;;  %v6165_v51 = vmul.f32 0.2, %v6125_v61  ;;  %vm6145_vm13 = vcmp.ge.f32.partialorder %v6125_v61, 0.0  ;;  %v6819_v19 = vor.u32 %v6817_v4, %v6815_v32 }
 0x503   :  { %v6061_v40 = vadd.f32 %v6030_v53, %v5739_v30  ;;  %v6185_v48 = vsel %vm6145_vm13, %v6125_v61, %v6165_v51 }
 0x505   :  { %v6106_v20 = vadd.f32 %v16396_v62, %v6061_v40  ;;  %v6033_v60 = vpop.f32.mrf.mxu3 }
 0x506   :  { %v13388_v26 = vld [vmem:[#allocation2 + $0x34] sm:$0xff]  }
 0x507   :  { %v6126_v23 = vadd.f32 %v6106_v20, %v6081_v2  ;;  %v13264_v38 = vld [vmem:[#allocation2 + $0x38] sm:$0xff]   ;;  %v6520_v6 = vshrl.u32 %v13388_v26, 16  ;;  %v6523_v16 = vshll.u32 %v13388_v26, 16 }
 0x508   :  { %v16491_v29 = vld [vmem:[#allocation2 + $0x38] sm:$0xff]  ;;  %v5741_v28 = vpop.f32.mrf.mxu2  ;;  %v5518_v39 = vpop.f32.mrf.mxu1 }
 0x509   :  { %6436 = vmatmul.bf16.gmra.mxu0 %v13264_v38  ;;  %vm6146_vm14 = vcmp.ge.f32.partialorder %v6126_v23, 0.0  ;;  %v6166_v54 = vmul.f32 0.2, %v6126_v23  ;;  %v5742_v7 = vadd.f32 %v5741_v28, %v5513_v45  ;;  %v7033_v22 = vrot.slane %v16491_v29, 1  ;;  %v12782_v38 = vld [vmem:[%s17291_s3 + $0x238] sm:$0xff] }
 0x50a   :  { %v6821_v0 = vshll.u32 %v16491_v29, 16  ;;  %v6522_v3 = vrot.slane %v6520_v6, 3  ;;  %v6525_v36 = vrot.slane %v6523_v16, 4  ;;  %v6825_v46 = vshrl.u32 %v16491_v29, 16  ;;  %v12761_v28 = vld [vmem:[%s17291_s3 + $0x1b8] sm:$0xff]  ;;  %7747 = vmatpush.bf16.msrb.mxu2 %v12782_v38 }
 0x50b   :  { %v6186_v56 = vsel %vm6146_vm14, %v6126_v23, %v6166_v54  ;;  %v6062_v13 = vadd.f32 %v6033_v60, %v5742_v7  ;;  %v7034_v41 = vsel %vm7023_vm4, %v7031_v47, %v7033_v22  ;;  %v6084_v54 = vunpack.c.l.bf16 %v16346_v52  ;;  %7560 = vmatpush.bf16.msrb.mxu1 %v12761_v28 }
 0x50c   :  { %v13035_v14 = vpack.c.bf16 %v6186_v56, %v6185_v48  ;;  %v6823_v12 = vrot.slane %v6821_v0, 1  ;;  %v6526_v33 = vor.u32 %v6525_v36, %v6522_v3  ;;  %v6085_v0 = vunpack.c.l.bf16 %v16348_v8 }
 0x50d   :  { %v6035_v27 = vpop.f32.mrf.mxu3  ;;  %7131 = vmatmul.bf16.gmra.mxu3 %v7034_v41  ;;  %v6107_v10 = vadd.f32 %v16396_v62, %v6062_v13 }
 0x50e   :  { %13255 = vst [vmem:[#allocation2 + $0x40] sm:$0xff] %v13035_v14   ;;  %v6824_v59 = vsel %vm3014_vm1, %v6819_v19, %v6823_v12  ;;  %v6527_v5 = vsel %vm1308_vm0, %v6517_v63, %v6526_v33  ;;  %v6827_v58 = vor.u32 %v6825_v46, %v6823_v12 }
 0x50f   :  { %6951 = vmatmul.bf16.gmra.mxu2 %v6824_v59  ;;  %v6127_v47 = vadd.f32 %v6107_v10, %v6082_v17 }
 0x510   :  { %v5743_v24 = vpop.f32.mrf.mxu2  ;;  %v5520_v20 = vpop.f32.mrf.mxu1 }
 0x511   :  { %v5744_v50 = vadd.f32 %v5743_v24, %v5515_v31  ;;  %6659 = vmatmul.bf16.gmra.mxu1 %v6527_v5  ;;  %v6167_v32 = vmul.f32 0.2, %v6127_v47  ;;  %vm6147_vm15 = vcmp.ge.f32.partialorder %v6127_v47, 0.0  ;;  %v12769_v31 = vld [vmem:[%s17291_s3 + $0x1f8] sm:$0xff] }
 0x512   :  { %7412 = vmatpush.bf16.msrb.mxu0 %v12769_v31 }
 0x513   :  { %v6063_v42 = vadd.f32 %v6035_v27, %v5744_v50  ;;  %v6187_v61 = vsel %vm6147_vm15, %v6127_v47, %v6167_v32 }
 0x515   :  { %v6108_v43 = vadd.f32 %v16396_v62, %v6063_v42  ;;  %v6038_v57 = vpop.f32.mrf.mxu3  ;;  %v16502_v55 = vld [vmem:[#allocation2 + $0x40] sm:$0xff] }
 0x516   :  { %v13390_v11 = vld [vmem:[#allocation2 + $0x3c] sm:$0xff]   ;;  %v6829_v53 = vshll.u32 %v16502_v55, 16  ;;  %v7035_v1 = vrot.slane %v16502_v55, 1  ;;  %v6833_v10 = vshrl.u32 %v16502_v55, 16 }
 0x517   :  { %v6128_v25 = vadd.f32 %v6108_v43, %v6083_v37  ;;  %v6529_v18 = vshrl.u32 %v13390_v11, 16  ;;  %v6532_v63 = vshll.u32 %v13390_v11, 16 }
 0x518   :  { %v5746_v45 = vpop.f32.mrf.mxu2  ;;  %v6831_v21 = vrot.slane %v6829_v53, 1  ;;  %v7036_v4 = vsel %vm7023_vm4, %v7033_v22, %v7035_v1  ;;  %v5523_v56 = vpop.f32.mrf.mxu1 }
 0x519   :  { %6441 = vmatmul.bf16.gmra.mxu0 %v13035_v14  ;;  %vm6148_vm2 = vcmp.ge.f32.partialorder %v6128_v25, 0.0  ;;  %v6168_v49 = vmul.f32 0.2, %v6128_v25  ;;  %v5747_v44 = vadd.f32 %v5746_v45, %v5518_v39  ;;  %v6531_v35 = vrot.slane %v6529_v18, 3 }
 0x51a   :  { %v6534_v30 = vrot.slane %v6532_v63, 4  ;;  %v6832_v23 = vsel %vm3014_vm1, %v6827_v58, %v6831_v21  ;;  %v6086_v45 = vunpack.c.l.bf16 %v16368_v9  ;;  %v12781_v58 = vld [vmem:[%s17291_s3 + $0x230] sm:$0xff] }
 0x51b   :  { %v6188_v40 = vsel %vm6148_vm2, %v6128_v25, %v6168_v49  ;;  %v6064_v2 = vadd.f32 %v6038_v57, %v5747_v44  ;;  %v6835_v57 = vor.u32 %v6833_v10, %v6831_v21  ;;  %v12768_v21 = vld [vmem:[%s17291_s3 + $0x1f0] sm:$0xff]  ;;  %7748 = vmatpush.bf16.msrb.mxu2 %v12781_v58 }
 0x51c   :  { %v13040_v60 = vpack.c.bf16 %v6188_v40, %v6187_v61  ;;  %v6535_v26 = vor.u32 %v6534_v30, %v6531_v35  ;;  %v12760_v35 = vld [vmem:[%s17291_s3 + $0x1b0] sm:$0xff]  ;;  %v6087_v30 = vunpack.c.l.bf16 %v16370_v34  ;;  %7413 = vmatpush.bf16.msrb.mxu0 %v12768_v21 }
 0x51d   :  { %7136 = vmatmul.bf16.gmra.mxu3 %v7036_v4  ;;  %v6040_v51 = vpop.f32.mrf.mxu3  ;;  %v6109_v29 = vadd.f32 %v16396_v62, %v6064_v2  ;;  %7561 = vmatpush.bf16.msrb.mxu1 %v12760_v35 }
 0x51e   :  { %13256 = vst [vmem:[#allocation2 + $0x48] sm:$0xff] %v13040_v60   ;;  %v6536_v16 = vsel %vm1308_vm0, %v6526_v33, %v6535_v26 }
 0x51f   :  { %6956 = vmatmul.bf16.gmra.mxu2 %v6832_v23  ;;  %v6129_v22 = vadd.f32 %v6109_v29, %v6084_v54 }
 0x520   :  { %v5748_v6 = vpop.f32.mrf.mxu2  ;;  %v5525_v55 = vpop.f32.mrf.mxu1 }
 0x521   :  { %v5749_v7 = vadd.f32 %v5748_v6, %v5520_v20  ;;  %6664 = vmatmul.bf16.gmra.mxu1 %v6536_v16  ;;  %v6169_v13 = vmul.f32 0.2, %v6129_v22  ;;  %vm6149_vm3 = vcmp.ge.f32.partialorder %v6129_v22, 0.0 }
 0x523   :  { %v6065_v19 = vadd.f32 %v6040_v51, %v5749_v7  ;;  %v6189_v39 = vsel %vm6149_vm3, %v6129_v22, %v6169_v13 }
 0x525   :  { %v6110_v3 = vadd.f32 %v16396_v62, %v6065_v19  ;;  %v16523_v36 = vld [vmem:[#allocation2 + $0x48] sm:$0xff]  ;;  %v6043_v52 = vpop.f32.mrf.mxu3 }
 0x526   :  { %v13392_v48 = vld [vmem:[#allocation2 + $0x44] sm:$0xff]   ;;  %v6837_v14 = vshll.u32 %v16523_v36, 16  ;;  %v7037_v27 = vrot.slane %v16523_v36, 1  ;;  %v6841_v34 = vshrl.u32 %v16523_v36, 16 }
 0x527   :  { %v6130_v41 = vadd.f32 %v6110_v3, %v6085_v0  ;;  %v6538_v12 = vshrl.u32 %v13392_v48, 16  ;;  %v6541_v59 = vshll.u32 %v13392_v48, 16 }
 0x528   :  { %v5751_v33 = vpop.f32.mrf.mxu2  ;;  %v6839_v24 = vrot.slane %v6837_v14, 1  ;;  %v7038_v43 = vsel %vm7023_vm4, %v7035_v1, %v7037_v27  ;;  %v12780_v14 = vld [vmem:[%s17291_s3 + $0x228] sm:$0xff] }
 0x529   :  { %6446 = vmatmul.bf16.gmra.mxu0 %v13040_v60  ;;  %vm6150_vm5 = vcmp.ge.f32.partialorder %v6130_v41, 0.0  ;;  %v6170_v8 = vmul.f32 0.2, %v6130_v41  ;;  %v5752_v5 = vadd.f32 %v5751_v33, %v5523_v56  ;;  %v6540_v17 = vrot.slane %v6538_v12, 3  ;;  %v16529_v46 = vpop.f32.mrf.mxu0  ;;  %7749 = vmatpush.bf16.msrb.mxu2 %v12780_v14 }
 0x52a   :  { %v6543_v50 = vrot.slane %v6541_v59, 4  ;;  %v6840_v32 = vsel %vm3014_vm1, %v6835_v57, %v6839_v24  ;;  %v6843_v7 = vor.u32 %v6841_v34, %v6839_v24  ;;  %v12764_v34 = vld [vmem:[%s17291_s3 + $0x1d0] sm:$0xff] }
 0x52b   :  { %v6190_v47 = vsel %vm6150_vm5, %v6130_v41, %v6170_v8  ;;  %v6066_v42 = vadd.f32 %v6043_v52, %v5752_v5 }
 0x52c   :  { %v13045_v37 = vpack.c.bf16 %v6190_v47, %v6189_v39  ;;  %v6544_v11 = vor.u32 %v6543_v50, %v6540_v17  ;;  %v6710_v47 = vld [vmem:[#allocation2 + $0x60] sm:$0x1] }
 0x52d   :  { %7141 = vmatmul.bf16.gmra.mxu3 %v7038_v43  ;;  %v6111_v25 = vadd.f32 %v16396_v62, %v6066_v42  ;;  %v6045_v1 = vpop.f32.mrf.mxu3 }
 0x52e   :  { %13257 = vst [vmem:[#allocation2 + $0x50] sm:$0xff] %v13045_v37   ;;  %v6545_v18 = vsel %vm1308_vm0, %v6535_v26, %v6544_v11 }
 0x52f   :  { %6961 = vmatmul.bf16.gmra.mxu2 %v6840_v32  ;;  %v6131_v49 = vadd.f32 %v6111_v25, %v6086_v45  ;;  %v6769_v25 = vunpack.c.l.b16 %v6710_v47 }
 0x530   :  { %v5753_v53 = vpop.f32.mrf.mxu2 }
 0x531   :  { %v5754_v63 = vadd.f32 %v5753_v53, %v5525_v55  ;;  %6669 = vmatmul.bf16.gmra.mxu1 %v6545_v18  ;;  %v16546_v2 = vpop.f32.mrf.mxu0  ;;  %v6171_v20 = vmul.f32 0.2, %v6131_v49  ;;  %vm6151_vm6 = vcmp.ge.f32.partialorder %v6131_v49, 0.0  ;;  %v12766_v18 = vld [vmem:[%s17291_s3 + $0x1e0] sm:$0xff] }
 0x533   :  { %v6067_v44 = vadd.f32 %v6045_v1, %v5754_v63  ;;  %v6191_v28 = vsel %vm6151_vm6, %v6131_v49, %v6171_v20  ;;  %v6780_v1 = vpack.c.b16 %v6769_v25, %v6769_v25 }
 0x535   :  { %v6112_v9 = vadd.f32 %v16396_v62, %v6067_v44  ;;  %v12736_v61 = vld [vmem:[#allocation2 + $0x50] sm:$0xff]  ;;  %v6861_v35 = vshll.u32 %v6780_v1, 16 }
 0x536   :  { %v13394_v40 = vld [vmem:[#allocation2 + $0x4c] sm:$0xff]   ;;  %v6845_v4 = vshll.u32 %v12736_v61, 16  ;;  %v7039_v51 = vrot.slane %v12736_v61, 1  ;;  %v6849_v59 = vshrl.u32 %v12736_v61, 16  ;;  %v7043_v61 = vrot.slane %v6780_v1, 1  ;;  %v12778_v1 = vld [vmem:[%s17291_s3 + $0x218] sm:$0xff] }
 0x537   :  { %v6132_v60 = vadd.f32 %v6112_v9, %v6087_v30  ;;  %v6547_v26 = vshrl.u32 %v13394_v40, 16  ;;  %v6550_v23 = vshll.u32 %v13394_v40, 16  ;;  %v12765_v9 = vld [vmem:[%s17291_s3 + $0x1d8] sm:$0xff] }
 0x538   :  { %v6847_v62 = vrot.slane %v6845_v4, 1  ;;  %v7040_v54 = vsel %vm7023_vm4, %v7037_v27, %v7039_v51 }
 0x539   :  { %6451 = vmatmul.bf16.gmra.mxu0 %v13045_v37  ;;  %vm6152_vm7 = vcmp.ge.f32.partialorder %v6132_v60, 0.0  ;;  %v6172_v38 = vmul.f32 0.2, %v6132_v60  ;;  %v6549_v29 = vrot.slane %v6547_v26, 3  ;;  %v6552_v31 = vrot.slane %v6550_v23, 4  ;;  %v12779_v23 = vld [vmem:[%s17291_s3 + $0x220] sm:$0xff] }
 0x53a   :  { %v6848_v19 = vsel %vm3014_vm1, %v6843_v7, %v6847_v62  ;;  %v16552_v3 = vpop.f32.mrf.mxu0  ;;  %v6851_v17 = vor.u32 %v6849_v59, %v6847_v62  ;;  %7750 = vmatpush.bf16.msrb.mxu2 %v12779_v23  ;;  %v12756_v23 = vld [vmem:[%s17291_s3 + $0x190] sm:$0xff] }
 0x53b   :  { %v6192_v6 = vsel %vm6152_vm7, %v6132_v60, %v6172_v38  ;;  %v6553_v22 = vor.u32 %v6552_v31, %v6549_v29 }
 0x53c   :  { %v13050_v16 = vpack.c.bf16 %v6192_v6, %v6191_v28 }
 0x53d   :  { %7146 = vmatmul.bf16.gmra.mxu3 %v7040_v54  ;;  %v6554_v0 = vsel %vm1308_vm0, %v6544_v11, %v6553_v22  ;;  %v12767_v11 = vld [vmem:[%s17291_s3 + $0x1e8] sm:$0xff] }
 0x53e   :  { %13258 = vst [vmem:[#allocation2 + $0x58] sm:$0xff] %v13050_v16   ;;  %v13091_v42 = vunpack.c.h.b16 %v13050_v16  ;;  %7414 = vmatpush.bf16.msrb.mxu0 %v12767_v11  ;;  %7751 = vmatpush.bf16.msrb.mxu2 %v12778_v1 }
 0x53f   :  { %6966 = vmatmul.bf16.gmra.mxu2 %v6848_v19 }
 0x540   :  { %v6474_v53 = vpack.c.b16 %v13091_v42, %v13091_v42 }
 0x541   :  { %6674 = vmatmul.bf16.gmra.mxu1 %v6554_v0 }
 0x542   :  { %v16561_v27 = vpop.f32.mrf.mxu0  ;;  %7415 = vmatpush.bf16.msrb.mxu0 %v12766_v18  ;;  %v6565_v44 = vshrl.u32 %v6474_v53, 16  ;;  %v6568_v58 = vshll.u32 %v6474_v53, 16 }
 0x544   :  { %v6567_v60 = vrot.slane %v6565_v44, 3  ;;  %v6570_v4 = vrot.slane %v6568_v58, 4  ;;  %v12757_v44 = vld [vmem:[%s17291_s3 + $0x198] sm:$0xff] }
 0x545   :  { %v16554_v36 = vld [vmem:[#allocation2 + $0x58] sm:$0xff] }
 0x546   :  { %v13395_v48 = vld [vmem:[#allocation2 + $0x54] sm:$0xff]   ;;  %v6853_v56 = vshll.u32 %v16554_v36, 16  ;;  %v7041_v12 = vrot.slane %v16554_v36, 1  ;;  %v6857_v40 = vshrl.u32 %v16554_v36, 16  ;;  %7416 = vmatpush.bf16.msrb.mxu0 %v12765_v9  ;;  %v6571_v54 = vor.u32 %v6570_v4, %v6567_v60  ;;  %v12762_v36 = vld [vmem:[%s17291_s3 + $0x1c0] sm:$0xff] }
 0x547   :  { %v6556_v13 = vshrl.u32 %v13395_v48, 16  ;;  %v6559_v41 = vshll.u32 %v13395_v48, 16 }
 0x548   :  { %v6855_v8 = vrot.slane %v6853_v56, 1  ;;  %v7042_v24 = vsel %vm7023_vm4, %v7039_v51, %v7041_v12  ;;  %v6863_v51 = vrot.slane %v6861_v35, 1  ;;  %v7044_v62 = vsel %vm7023_vm4, %v7041_v12, %v7043_v61 }
 0x549   :  { %6456 = vmatmul.bf16.gmra.mxu0 %v13050_v16  ;;  %v6558_v52 = vrot.slane %v6556_v13, 3  ;;  %v6561_v33 = vrot.slane %v6559_v41, 4 }
 0x54a   :  { %v6640_v5 = vpop.f32.mrf.mxu1  ;;  %v6856_v43 = vsel %vm3014_vm1, %v6851_v17, %v6855_v8  ;;  %v6422_v45 = vpop.f32.mrf.mxu0  ;;  %v6859_v26 = vor.u32 %v6857_v40, %v6855_v8  ;;  %7417 = vmatpush.bf16.msrb.mxu0 %v12764_v34 }
 0x54b   :  { %v7112_v10 = vpop.f32.mrf.mxu3  ;;  %v6562_v50 = vor.u32 %v6561_v33, %v6558_v52  ;;  %v6641_v39 = vadd.f32 %v6640_v5, %v16529_v46  ;;  %v12758_v52 = vld [vmem:[%s17291_s3 + $0x1a0] sm:$0xff] }
 0x54c   :  { %v6864_v6 = vsel %vm3014_vm1, %v6859_v26, %v6863_v51  ;;  %v16604_v33 = vld [vmem:[%s17295_s6] ss:$0 sm:$0xff]  ;;  %v12776_v51 = vld [vmem:[%s17291_s3 + $0x208] sm:$0xff] }
 0x54d   :  { %7151 = vmatmul.bf16.gmra.mxu3 %v7042_v24  ;;  %v6932_v37 = vpop.f32.mrf.mxu2  ;;  %v6563_v32 = vsel %vm1308_vm0, %v6553_v22, %v6562_v50  ;;  %v12763_v22 = vld [vmem:[%s17291_s3 + $0x1c8] sm:$0xff]  ;;  %v6572_v19 = vsel %vm1308_vm0, %v6562_v50, %v6571_v54  ;;  %v12754_v54 = vld [vmem:[%s17291_s3 + $0x180] sm:$0xff] }
 0x54e   :  { %v6982_v57 = vadd.f32 %v6932_v37, %v6641_v39  ;;  %7418 = vmatpush.bf16.msrb.mxu0 %v12763_v22 }
 0x54f   :  { %6971 = vmatmul.bf16.gmra.mxu2 %v6856_v43 }
 0x550   :  { %v7162_v55 = vadd.f32 %v7112_v10, %v6982_v57 }
 0x551   :  { %6679 = vmatmul.bf16.gmra.mxu1 %v6563_v32 }
 0x552   :  { %7182 = vst [vmem:[#allocation4] sm:$0xff] %v7162_v55  ;;  %v6642_v46 = vpop.f32.mrf.mxu1  ;;  %v6424_v28 = vpop.f32.mrf.mxu0  ;;  %7419 = vmatpush.bf16.msrb.mxu0 %v12762_v36 }
 0x553   :  { %v7114_v63 = vpop.f32.mrf.mxu3  ;;  %v6643_v49 = vadd.f32 %v6642_v46, %v16546_v2  ;;  %v12759_v2 = vld [vmem:[%s17291_s3 + $0x1a8] sm:$0xff] }
 0x554   :  { %7562 = vmatpush.bf16.msrb.mxu1 %v12759_v2 }
 0x555   :  { %v6934_v21 = vpop.f32.mrf.mxu2 }
 0x556   :  { %v6983_v30 = vadd.f32 %v6934_v21, %v6643_v49  ;;  %v12777_v21 = vld [vmem:[%s17291_s3 + $0x210] sm:$0xff] }
 0x557   :  { %7752 = vmatpush.bf16.msrb.mxu2 %v12777_v21 }
 0x558   :  { %v7163_v20 = vadd.f32 %v7114_v63, %v6983_v30  ;;  %7563 = vmatpush.bf16.msrb.mxu1 %v12758_v52 }
 0x55a   :  { %7183 = vst [vmem:[#allocation4 + $0x8] sm:$0xff] %v7163_v20  ;;  %v6645_v38 = vpop.f32.mrf.mxu1 }
 0x55b   :  { %v7117_v29 = vpop.f32.mrf.mxu3  ;;  %v6646_v31 = vadd.f32 %v6645_v38, %v16552_v3  ;;  %v6427_v14 = vpop.f32.mrf.mxu0  ;;  %7753 = vmatpush.bf16.msrb.mxu2 %v12776_v51 }
 0x55c   :  { %7564 = vmatpush.bf16.msrb.mxu1 %v12757_v44 }
 0x55d   :  { %7156 = vmatmul.bf16.gmra.mxu3 %v7044_v62  ;;  %v6937_v16 = vpop.f32.mrf.mxu2  ;;  %v12775_v62 = vld [vmem:[%s17291_s3 + $0x200] sm:$0xff] }
 0x55e   :  { %v6984_v7 = vadd.f32 %v6937_v16, %v6646_v31  ;;  %v12755_v31 = vld [vmem:[%s17291_s3 + $0x188] sm:$0xff] }
 0x55f   :  { %6976 = vmatmul.bf16.gmra.mxu2 %v6864_v6 }
 0x560   :  { %v7164_v0 = vadd.f32 %v7117_v29, %v6984_v7  ;;  %7565 = vmatpush.bf16.msrb.mxu1 %v12756_v23  ;;  %7754 = vmatpush.bf16.msrb.mxu2 %v12775_v62 }
 0x561   :  { %6684 = vmatmul.bf16.gmra.mxu1 %v6572_v19  ;;  %v7202_v59 = vld [vmem:[#allocation4] ss:$2 sm:$0xff] }
 0x562   :  { %7184 = vst [vmem:[#allocation4 + $0x10] sm:$0xff] %v7164_v0  ;;  %v6647_v3 = vpop.f32.mrf.mxu1 }
 0x563   :  { %v7119_v48 = vpop.f32.mrf.mxu3  ;;  %v6648_v56 = vadd.f32 %v6647_v3, %v16561_v27  ;;  %v7225_v27 = vadd.f32 %v16604_v33, %v7202_v59  ;;  %v6429_v39 = vpop.f32.mrf.mxu0 }
 0x564   :  { %7566 = vmatpush.bf16.msrb.mxu1 %v12755_v31 }
 0x565   :  { %v6939_v13 = vpop.f32.mrf.mxu2  ;;  %v7245_v47 = vmul.f32 0.2, %v7225_v27  ;;  %vm7235_vm8 = vcmp.ge.f32.partialorder %v7225_v27, 0.0 }
 0x566   :  { %v6985_v41 = vadd.f32 %v6939_v13, %v6648_v56 }
 0x567   :  { %v7255_v11 = vsel %vm7235_vm8, %v7225_v27, %v7245_v47 }
 0x568   :  { %v7165_v12 = vadd.f32 %v7119_v48, %v6985_v41  ;;  %7567 = vmatpush.bf16.msrb.mxu1 %v12754_v54 }
 0x56a   :  { %7185 = vst [vmem:[#allocation4 + $0x18] sm:$0xff] %v7165_v12 }
 0x56c   :  { %v6650_v8 = vpop.f32.mrf.mxu1  ;;  %v7122_v5 = vpop.f32.mrf.mxu3 }
 0x56d   :  { %v6651_v10 = vadd.f32 %v6650_v8, %v6422_v45 }
 0x56e   :  { %v6942_v24 = vpop.f32.mrf.mxu2 }
 0x56f   :  { %v6986_v17 = vadd.f32 %v6942_v24, %v6651_v10 }
 0x571   :  { %v7204_v50 = vld [vmem:[#allocation4 + $0x10] ss:$2 sm:$0xff]  ;;  %v7166_v37 = vadd.f32 %v7122_v5, %v6986_v17 }
 0x572   :  { %v7226_v42 = vadd.f32 %v16604_v33, %v7204_v50 }
 0x573   :  { %7186 = vst [vmem:[#allocation4 + $0x20] sm:$0xff] %v7166_v37 }
 0x574   :  { %v6652_v43 = vpop.f32.mrf.mxu1  ;;  %vm7236_vm9 = vcmp.ge.f32.partialorder %v7226_v42, 0.0  ;;  %v7246_v57 = vmul.f32 0.2, %v7226_v42  ;;  %v7124_v53 = vpop.f32.mrf.mxu3 }
 0x575   :  { %v6653_v25 = vadd.f32 %v6652_v43, %v6424_v28 }
 0x576   :  { %v7256_v32 = vsel %vm7236_vm9, %v7226_v42, %v7246_v57  ;;  %v6944_v46 = vpop.f32.mrf.mxu2  ;;  %v6432_v45 = vpop.f32.mrf.mxu0 }
 0x577   :  { %v13099_v55 = vpack.c.bf16 %v7256_v32, %v7255_v11  ;;  %v6987_v18 = vadd.f32 %v6944_v46, %v6653_v25 }
 0x579   :  { %13322 = vst [vmem:[#allocation3 + $0x8] sm:$0xff] %v13099_v55   ;;  %v7167_v63 = vadd.f32 %v7124_v53, %v6987_v18 }
 0x57b   :  { %7187 = vst [vmem:[#allocation4 + $0x28] sm:$0xff] %v7167_v63 }
 0x57e   :  { %v6655_v49 = vpop.f32.mrf.mxu1  ;;  %v6434_v4 = vpop.f32.mrf.mxu0 }
 0x57f   :  { %v6656_v35 = vadd.f32 %v6655_v49, %v6427_v14 }
 0x580   :  { %v7127_v58 = vpop.f32.mrf.mxu3  ;;  %v16617_v30 = vld [vmem:[#allocation3 + $0x8] sm:$0xf]  ;;  %v16619_v9 = vld [vmem:[#allocation3 + $0xc] sm:$0xf] }
 0x581   :  { %v7344_v40 = vunpack.c.l.b16 %v16617_v30  ;;  %v7345_v20 = vunpack.c.l.b16 %v16619_v9  ;;  %v12770_v37 = vld [vmem:[#allocation3 + $0x8] sm:$0xff] }
 0x582   :  { %v6947_v61 = vpop.f32.mrf.mxu2  ;;  %v7206_v19 = vld [vmem:[#allocation4 + $0x20] ss:$2 sm:$0xff]  ;;  %v7653_v25 = vshll.u32 %v12770_v37, 16 }
 0x583   :  { %v6988_v60 = vadd.f32 %v6947_v61, %v6656_v35  ;;  %v7354_v26 = vpack.c.b16 %v7345_v20, %v7344_v40  ;;  %v7227_v48 = vadd.f32 %v16604_v33, %v7206_v19 }
 0x584   :  { %v7655_v44 = vrot.slane %v7653_v25, 1 }
 0x585   :  { %v7168_v2 = vadd.f32 %v7127_v58, %v6988_v60  ;;  %7420 = vmatmul.bf16.vlgmr.msrb.gmra.mxu0 %v7354_v26  ;;  %v7247_v12 = vmul.f32 0.2, %v7227_v48  ;;  %vm7237_vm10 = vcmp.ge.f32.partialorder %v7227_v48, 0.0 }
 0x586   :  { %v6657_v38 = vpop.f32.mrf.mxu1  ;;  %v6437_v7 = vpop.f32.mrf.mxu0 }
 0x587   :  { %7188 = vst [vmem:[#allocation4 + $0x30] sm:$0xff] %v7168_v2  ;;  %v6658_v29 = vadd.f32 %v6657_v38, %v6429_v39  ;;  %v7257_v24 = vsel %vm7237_vm10, %v7227_v48, %v7247_v12  ;;  %v7289_v39 = vld [vmem:[#allocation3 + $0x4] sm:$0x8] }
 0x588   :  { %v7129_v34 = vpop.f32.mrf.mxu3  ;;  %v7447_v57 = vunpack.c.l.b16 %v7289_v39 }
 0x58a   :  { %v6949_v28 = vpop.f32.mrf.mxu2  ;;  %v7448_v46 = vpack.c.b16 %v7344_v40, %v7447_v57 }
 0x58b   :  { %v6989_v6 = vadd.f32 %v6949_v28, %v6658_v29 }
 0x58c   :  { %v7455_v61 = vshrl.u32 %v7448_v46, 16  ;;  %v7458_v60 = vshll.u32 %v7448_v46, 16 }
 0x58d   :  { %v7169_v16 = vadd.f32 %v7129_v34, %v6989_v6 }
 0x58e   :  { %v6660_v22 = vpop.f32.mrf.mxu1  ;;  %v6439_v59 = vpop.f32.mrf.mxu0  ;;  %v7457_v28 = vrot.slane %v7455_v61, 3  ;;  %v7460_v6 = vrot.slane %v7458_v60, 4 }
 0x58f   :  { %7189 = vst [vmem:[#allocation4 + $0x38] sm:$0xff] %v7169_v16  ;;  %v6661_v3 = vadd.f32 %v6660_v22, %v6432_v45 }
 0x590   :  { %v7132_v0 = vpop.f32.mrf.mxu3 }
 0x592   :  { %v6952_v36 = vpop.f32.mrf.mxu2 }
 0x593   :  { %v6990_v56 = vadd.f32 %v6952_v36, %v6661_v3  ;;  %v7461_v3 = vor.u32 %v7460_v6, %v7457_v28 }
 0x595   :  { %v7170_v13 = vadd.f32 %v7132_v0, %v6990_v56 }
 0x596   :  { %v7208_v41 = vld [vmem:[#allocation4 + $0x30] ss:$2 sm:$0xff]  ;;  %v6662_v14 = vpop.f32.mrf.mxu1  ;;  %v6442_v55 = vpop.f32.mrf.mxu0 }
 0x597   :  { %v7228_v52 = vadd.f32 %v16604_v33, %v7208_v41  ;;  %7190 = vst [vmem:[#allocation4 + $0x40] sm:$0xff] %v7170_v13  ;;  %v6663_v27 = vadd.f32 %v6662_v14, %v6434_v4  ;;  %v7651_v4 = vshrl.u32 %v12770_v37, 16 }
 0x598   :  { %v7134_v8 = vpop.f32.mrf.mxu3 }
 0x599   :  { %vm7238_vm11 = vcmp.ge.f32.partialorder %v7228_v52, 0.0  ;;  %v7248_v5 = vmul.f32 0.2, %v7228_v52  ;;  %v7656_v38 = vor.u32 %v7655_v44, %v7651_v4 }
 0x59a   :  { %v6954_v10 = vpop.f32.mrf.mxu2 }
 0x59b   :  { %v7258_v17 = vsel %vm7238_vm11, %v7228_v52, %v7248_v5  ;;  %v6991_v50 = vadd.f32 %v6954_v10, %v6663_v27 }
 0x59c   :  { %v13104_v47 = vpack.c.bf16 %v7258_v17, %v7257_v24 }
 0x59d   :  { %v7171_v42 = vadd.f32 %v7134_v8, %v6991_v50 }
 0x59e   :  { %13323 = vst [vmem:[#allocation3 + $0x10] sm:$0xff] %v13104_v47   ;;  %v6665_v43 = vpop.f32.mrf.mxu1 }
 0x59f   :  { %7191 = vst [vmem:[#allocation4 + $0x48] sm:$0xff] %v7171_v42  ;;  %v6666_v32 = vadd.f32 %v6665_v43, %v6437_v7  ;;  %v6444_v7 = vpop.f32.mrf.mxu0 }
 0x5a0   :  { %v7137_v11 = vpop.f32.mrf.mxu3 }
 0x5a2   :  { %v6957_v53 = vpop.f32.mrf.mxu2 }
 0x5a3   :  { %v6992_v18 = vadd.f32 %v6957_v53, %v6666_v32 }
 0x5a5   :  { %v7172_v45 = vadd.f32 %v7137_v11, %v6992_v18  ;;  %v16646_v63 = vld [vmem:[#allocation3 + $0x10] sm:$0xf]  ;;  %v16648_v1 = vld [vmem:[#allocation3 + $0x14] sm:$0xf] }
 0x5a6   :  { %v16650_v49 = vld [vmem:[#allocation3 + $0x10] sm:$0xff]  ;;  %v6667_v58 = vpop.f32.mrf.mxu1  ;;  %v7346_v21 = vunpack.c.l.b16 %v16646_v63  ;;  %v7347_v35 = vunpack.c.l.b16 %v16648_v1 }
 0x5a7   :  { %7192 = vst [vmem:[#allocation4 + $0x50] sm:$0xff] %v7172_v45  ;;  %v7658_v40 = vshll.u32 %v16650_v49, 16  ;;  %v6668_v23 = vadd.f32 %v6667_v58, %v6439_v59  ;;  %v7210_v48 = vld [vmem:[#allocation4 + $0x40] ss:$2 sm:$0xff]  ;;  %v6447_v8 = vpop.f32.mrf.mxu0 }
 0x5a8   :  { %v7139_v26 = vpop.f32.mrf.mxu3  ;;  %v7355_v51 = vpack.c.b16 %v7347_v35, %v7346_v21  ;;  %v7449_v2 = vpack.c.b16 %v7346_v21, %v7345_v20  ;;  %v7229_v12 = vadd.f32 %v16604_v33, %v7210_v48 }
 0x5a9   :  { %v16659_v34 = vrot.slane %v7658_v40, 1 }
 0x5aa   :  { %v6959_v62 = vpop.f32.mrf.mxu2  ;;  %7425 = vmatmul.bf16.gmra.mxu0 %v7355_v51  ;;  %v7463_v29 = vshrl.u32 %v7449_v2, 16  ;;  %v7466_v31 = vshll.u32 %v7449_v2, 16  ;;  %v7249_v10 = vmul.f32 0.2, %v7229_v12  ;;  %vm7239_vm12 = vcmp.ge.f32.partialorder %v7229_v12, 0.0 }
 0x5ab   :  { %v6993_v16 = vadd.f32 %v6959_v62, %v6668_v23  ;;  %v7661_v54 = vsel %vm3014_vm1, %v7656_v38, %v16659_v34  ;;  %v7662_v2 = vshrl.u32 %v16650_v49, 16 }
 0x5ac   :  { %v7465_v22 = vrot.slane %v7463_v29, 3  ;;  %v7468_v19 = vrot.slane %v7466_v31, 4  ;;  %7755 = vmatmul.bf16.vlgmr.msrb.gmra.mxu2 %v7661_v54  ;;  %v7259_v42 = vsel %vm7239_vm12, %v7229_v12, %v7249_v10 }
 0x5ad   :  { %v7173_v0 = vadd.f32 %v7139_v26, %v6993_v16  ;;  %v7664_v28 = vor.u32 %v7662_v2, %v16659_v34 }
 0x5ae   :  { %v6670_v20 = vpop.f32.mrf.mxu1  ;;  %v16663_v36 = vor.u32 %v7468_v19, %v7465_v22 }
 0x5af   :  { %7193 = vst [vmem:[#allocation4 + $0x58] sm:$0xff] %v7173_v0  ;;  %v6671_v41 = vadd.f32 %v6670_v20, %v6442_v55  ;;  %v6449_v25 = vpop.f32.mrf.mxu0 }
 0x5b0   :  { %v7142_v56 = vpop.f32.mrf.mxu3  ;;  %v7470_v13 = vsel %vm1308_vm0, %v7461_v3, %v16663_v36 }
 0x5b1   :  { %7568 = vmatmul.bf16.vlgmr.msrb.gmra.mxu1 %v7470_v13 }
 0x5b2   :  { %v6962_v14 = vpop.f32.mrf.mxu2 }
 0x5b3   :  { %v6994_v52 = vadd.f32 %v6962_v14, %v6671_v41 }
 0x5b5   :  { %v7174_v59 = vadd.f32 %v7142_v56, %v6994_v52 }
 0x5b6   :  { %v7212_v5 = vld [vmem:[#allocation4 + $0x50] ss:$2 sm:$0xff]  ;;  %v6672_v27 = vpop.f32.mrf.mxu1 }
 0x5b7   :  { %v7230_v24 = vadd.f32 %v16604_v33, %v7212_v5  ;;  %7194 = vst [vmem:[#allocation4 + $0x60] sm:$0xff] %v7174_v59  ;;  %v6673_v39 = vadd.f32 %v6672_v27, %v6444_v7  ;;  %v6452_v38 = vpop.f32.mrf.mxu0 }
 0x5b8   :  { %v7144_v17 = vpop.f32.mrf.mxu3 }
 0x5b9   :  { %vm7240_vm13 = vcmp.ge.f32.partialorder %v7230_v24, 0.0  ;;  %v7250_v50 = vmul.f32 0.2, %v7230_v24 }
 0x5ba   :  { %v6964_v47 = vpop.f32.mrf.mxu2 }
 0x5bb   :  { %v7260_v37 = vsel %vm7240_vm13, %v7230_v24, %v7250_v50  ;;  %v6995_v43 = vadd.f32 %v6964_v47, %v6673_v39 }
 0x5bc   :  { %v13109_v57 = vpack.c.bf16 %v7260_v37, %v7259_v42 }
 0x5bd   :  { %v7175_v11 = vadd.f32 %v7144_v17, %v6995_v43 }
 0x5be   :  { %13324 = vst [vmem:[#allocation3 + $0x18] sm:$0xff] %v13109_v57   ;;  %v6675_v32 = vpop.f32.mrf.mxu1  ;;  %v12798_v57 = vld [vmem:[%s17291_s3 + $0x2b8] sm:$0xff] }
 0x5bf   :  { %7285 = vst [vmem:[#allocation3 + $0x18] sm:$0xf] %v17448_v15  ;;  %v6676_v53 = vadd.f32 %v6675_v32, %v6447_v8  ;;  %v6454_v14 = vpop.f32.mrf.mxu0  ;;  %8003 = vmatpush.bf16.msrb.mxu3 %v12798_v57 }
 0x5c0   :  { %7286 = vst [vmem:[#allocation3 + $0x1c] sm:$0xf] %v17448_v15  ;;  %v7147_v55 = vpop.f32.mrf.mxu3 }
 0x5c1   :  { %7195 = vst [vmem:[#allocation4 + $0x68] sm:$0xff] %v7175_v11 }
 0x5c2   :  { %v6967_v46 = vpop.f32.mrf.mxu2 }
 0x5c3   :  { %v6996_v18 = vadd.f32 %v6967_v46, %v6676_v53  ;;  %v12797_v46 = vld [vmem:[%s17291_s3 + $0x2b0] sm:$0xff] }
 0x5c4   :  { %8004 = vmatpush.bf16.msrb.mxu3 %v12797_v46 }
 0x5c5   :  { %v7176_v45 = vadd.f32 %v7147_v55, %v6996_v18 }
 0x5c6   :  { %v16671_v44 = vld [vmem:[#allocation3 + $0x18] sm:$0xf]  ;;  %v6677_v58 = vpop.f32.mrf.mxu1 }
 0x5c7   :  { %v7348_v21 = vunpack.c.l.b16 %v16671_v44  ;;  %7196 = vst [vmem:[#allocation4 + $0x70] sm:$0xff] %v7176_v45  ;;  %v16674_v61 = vld [vmem:[#allocation3 + $0x18] sm:$0xff]  ;;  %v6678_v51 = vadd.f32 %v6677_v58, %v6449_v25  ;;  %v6457_v37 = vpop.f32.mrf.mxu0 }
 0x5c8   :  { %v16676_v60 = vld [vmem:[#allocation3 + $0x1c] sm:$0xf]  ;;  %v7149_v4 = vpop.f32.mrf.mxu3  ;;  %v7666_v23 = vshll.u32 %v16674_v61, 16  ;;  %v7670_v53 = vshrl.u32 %v16674_v61, 16  ;;  %v7604_v61 = vld [vmem:[#allocation3 + $0x30] sm:$0x1] }
 0x5c9   :  { %v7349_v40 = vunpack.c.l.b16 %v16676_v60  ;;  %v7450_v26 = vpack.c.b16 %v7348_v21, %v7347_v35  ;;  %v7214_v0 = vld [vmem:[#allocation4 + $0x60] ss:$2 sm:$0xff]  ;;  %8469 = vst [vmem:[#allocation3 + $0x30] sm:$0xf] %v17448_v15 }
 0x5ca   :  { %v6969_v62 = vpop.f32.mrf.mxu2  ;;  %v7668_v6 = vrot.slane %v7666_v23, 1  ;;  %v7231_v13 = vadd.f32 %v16604_v33, %v7214_v0 }
 0x5cb   :  { %v7356_v29 = vpack.c.b16 %v7349_v40, %v7348_v21  ;;  %v6997_v31 = vadd.f32 %v6969_v62, %v6678_v51  ;;  %v7472_v16 = vshrl.u32 %v7450_v26, 16  ;;  %v7475_v54 = vshll.u32 %v7450_v26, 16 }
 0x5cc   :  { %v7669_v35 = vsel %vm3014_vm1, %v7664_v28, %v7668_v6  ;;  %v7251_v8 = vmul.f32 0.2, %v7231_v13  ;;  %vm7241_vm14 = vcmp.ge.f32.partialorder %v7231_v13, 0.0  ;;  %v7672_v2 = vor.u32 %v7670_v53, %v7668_v6 }
 0x5cd   :  { %7430 = vmatmul.bf16.gmra.mxu0 %v7356_v29  ;;  %v7177_v7 = vadd.f32 %v7149_v4, %v6997_v31  ;;  %7760 = vmatmul.bf16.gmra.mxu2 %v7669_v35  ;;  %v7474_v49 = vrot.slane %v7472_v16, 3  ;;  %v7477_v19 = vrot.slane %v7475_v54, 4 }
 0x5ce   :  { %v6680_v22 = vpop.f32.mrf.mxu1  ;;  %v7261_v50 = vsel %vm7241_vm14, %v7231_v13, %v7251_v8 }
 0x5cf   :  { %7197 = vst [vmem:[#allocation4 + $0x78] sm:$0xff] %v7177_v7  ;;  %v16687_v3 = vor.u32 %v7477_v19, %v7474_v49  ;;  %v6681_v48 = vadd.f32 %v6680_v22, %v6452_v38  ;;  %v6459_v38 = vpop.f32.mrf.mxu0 }
 0x5d0   :  { %v7152_v20 = vpop.f32.mrf.mxu3 }
 0x5d1   :  { %v7479_v34 = vsel %vm1308_vm0, %v16663_v36, %v16687_v3 }
 0x5d2   :  { %v6972_v56 = vpop.f32.mrf.mxu2  ;;  %7573 = vmatmul.bf16.gmra.mxu1 %v7479_v34 }
 0x5d3   :  { %v6998_v41 = vadd.f32 %v6972_v56, %v6681_v48  ;;  %v12796_v56 = vld [vmem:[%s17291_s3 + $0x2a8] sm:$0xff] }
 0x5d4   :  { %8005 = vmatpush.bf16.msrb.mxu3 %v12796_v56 }
 0x5d5   :  { %v7178_v12 = vadd.f32 %v7152_v20, %v6998_v41 }
 0x5d6   :  { %v7216_v52 = vld [vmem:[#allocation4 + $0x70] ss:$2 sm:$0xff]  ;;  %v6682_v59 = vpop.f32.mrf.mxu1 }
 0x5d7   :  { %v7232_v5 = vadd.f32 %v16604_v33, %v7216_v52  ;;  %7198 = vst [vmem:[#allocation4 + $0x80] sm:$0xff] %v7178_v12  ;;  %v6683_v24 = vadd.f32 %v6682_v59, %v6454_v14 }
 0x5d8   :  { %v7154_v27 = vpop.f32.mrf.mxu3 }
 0x5d9   :  { %vm7242_vm15 = vcmp.ge.f32.partialorder %v7232_v5, 0.0  ;;  %v7252_v10 = vmul.f32 0.2, %v7232_v5 }
 0x5da   :  { %v6974_v17 = vpop.f32.mrf.mxu2 }
 0x5db   :  { %v7262_v36 = vsel %vm7242_vm15, %v7232_v5, %v7252_v10  ;;  %v6999_v39 = vadd.f32 %v6974_v17, %v6683_v24 }
 0x5dc   :  { %v13114_v47 = vpack.c.bf16 %v7262_v36, %v7261_v50 }
 0x5dd   :  { %v7179_v42 = vadd.f32 %v7154_v27, %v6999_v39 }
 0x5de   :  { %13325 = vst [vmem:[#allocation3 + $0x20] sm:$0xff] %v13114_v47   ;;  %v6685_v43 = vpop.f32.mrf.mxu1 }
 0x5df   :  { %7199 = vst [vmem:[#allocation4 + $0x88] sm:$0xff] %v7179_v42  ;;  %v6686_v11 = vadd.f32 %v6685_v43, %v6457_v37 }
 0x5e0   :  { %v7157_v32 = vpop.f32.mrf.mxu3 }
 0x5e2   :  { %v6977_v25 = vpop.f32.mrf.mxu2 }
 0x5e3   :  { %v7000_v55 = vadd.f32 %v6977_v25, %v6686_v11  ;;  %v7643_v11 = vunpack.c.l.b16 %v7604_v61 }
 0x5e5   :  { %v7180_v18 = vadd.f32 %v7157_v32, %v7000_v55  ;;  %v16701_v45 = vld [vmem:[#allocation3 + $0x20] sm:$0xf]  ;;  %v16703_v58 = vld [vmem:[#allocation3 + $0x24] sm:$0xf]  ;;  %v7649_v53 = vpack.c.b16 %v7643_v11, %v7643_v11  ;;  %v12805_v11 = vld [vmem:[%s17291_s3 + $0x2c8] sm:$0xff] }
 0x5e6   :  { %v12773_v21 = vld [vmem:[#allocation3 + $0x20] sm:$0xff]  ;;  %v6687_v4 = vpop.f32.mrf.mxu1  ;;  %v7350_v26 = vunpack.c.l.b16 %v16701_v45  ;;  %v7351_v51 = vunpack.c.l.b16 %v16703_v58  ;;  %v7218_v48 = vld [vmem:[#allocation4 + $0x80] ss:$2 sm:$0xff] }
 0x5e7   :  { %7200 = vst [vmem:[#allocation4 + $0x90] sm:$0xff] %v7180_v18  ;;  %v7674_v23 = vshll.u32 %v12773_v21, 16  ;;  %v6688_v31 = vadd.f32 %v6687_v4, %v6459_v38  ;;  %v7233_v34 = vadd.f32 %v16604_v33, %v7218_v48  ;;  %v7678_v17 = vshrl.u32 %v12773_v21, 16  ;;  %v16752_v48 = vld [vmem:[%s17293_s4 + $0x2] ss:$0 sm:$0xff] }
 0x5e8   :  { %v7357_v62 = vpack.c.b16 %v7351_v51, %v7350_v26  ;;  %v7451_v29 = vpack.c.b16 %v7350_v26, %v7349_v40  ;;  %v7159_v49 = vpop.f32.mrf.mxu3  ;;  %v7690_v21 = vshll.u32 %v7649_v53, 16 }
 0x5e9   :  { %v7676_v28 = vrot.slane %v7674_v23, 1  ;;  %v7253_v41 = vmul.f32 0.2, %v7233_v34  ;;  %vm7243_vm2 = vcmp.ge.f32.partialorder %v7233_v34, 0.0 }
 0x5ea   :  { %v6979_v16 = vpop.f32.mrf.mxu2  ;;  %7435 = vmatmul.bf16.gmra.mxu0 %v7357_v62  ;;  %v7481_v54 = vshrl.u32 %v7451_v29, 16  ;;  %v7484_v7 = vshll.u32 %v7451_v29, 16  ;;  %v7692_v23 = vrot.slane %v7690_v21, 1 }
 0x5eb   :  { %v7001_v35 = vadd.f32 %v6979_v16, %v6688_v31  ;;  %v7677_v22 = vsel %vm3014_vm1, %v7672_v2, %v7676_v28  ;;  %v7263_v52 = vsel %vm7243_vm2, %v7233_v34, %v7253_v41  ;;  %v7680_v47 = vor.u32 %v7678_v17, %v7676_v28  ;;  %v12794_v28 = vld [vmem:[%s17291_s3 + $0x298] sm:$0xff]  ;;  %v12793_v16 = vld [vmem:[%s17291_s3 + $0x290] sm:$0xff] }
 0x5ec   :  { %7765 = vmatmul.bf16.gmra.mxu2 %v7677_v22  ;;  %v7483_v6 = vrot.slane %v7481_v54, 3  ;;  %v7486_v19 = vrot.slane %v7484_v7, 4  ;;  %v12790_v54 = vld [vmem:[%s17291_s3 + $0x278] sm:$0xff]  ;;  %v12791_v22 = vld [vmem:[%s17291_s3 + $0x280] sm:$0xff] }
 0x5ed   :  { %v7181_v0 = vadd.f32 %v7159_v49, %v7001_v35  ;;  %v12811_v7 = vld [vmem:[%s17291_s3 + $0x2f8] sm:$0xff]  ;;  %8151 = vmatpush.bf16.msra.mxu0 %v12790_v54  ;;  %v12792_v35 = vld [vmem:[%s17291_s3 + $0x288] sm:$0xff] }
 0x5ee   :  { %v7487_v20 = vor.u32 %v7486_v19, %v7483_v6  ;;  %8338 = vmatpush.bf16.msra.mxu1 %v12811_v7 }
 0x5ef   :  { %7201 = vst [vmem:[#allocation4 + $0x98] sm:$0xff] %v7181_v0 }
 0x5f0   :  { %v7488_v40 = vsel %vm1308_vm0, %v16687_v3, %v7487_v20 }
 0x5f1   :  { %7578 = vmatmul.bf16.gmra.mxu1 %v7488_v40 }
 0x5f6   :  { %v7220_v13 = vld [vmem:[#allocation4 + $0x90] ss:$2 sm:$0xff] }
 0x5f7   :  { %v7234_v14 = vadd.f32 %v16604_v33, %v7220_v13  ;;  %v12795_v33 = vld [vmem:[%s17291_s3 + $0x2a0] sm:$0xff]  ;;  %v7791_v13 = vunpack.c.l.bf16 %v16617_v30  ;;  %v12809_v30 = vld [vmem:[%s17291_s3 + $0x2e8] sm:$0xff] }
 0x5f8   :  { %8006 = vmatpush.bf16.msrb.mxu3 %v12795_v33 }
 0x5f9   :  { %vm7244_vm3 = vcmp.ge.f32.partialorder %v7234_v14, 0.0  ;;  %v7254_v12 = vmul.f32 0.2, %v7234_v14 }
 0x5fb   :  { %v7264_v59 = vsel %vm7244_vm3, %v7234_v14, %v7254_v12  ;;  %v12810_v12 = vld [vmem:[%s17291_s3 + $0x2f0] sm:$0xff] }
 0x5fc   :  { %v13119_v8 = vpack.c.bf16 %v7264_v59, %v7263_v52  ;;  %8007 = vmatpush.bf16.msrb.mxu3 %v12794_v28  ;;  %8339 = vmatpush.bf16.msra.mxu1 %v12810_v12  ;;  %v7793_v28 = vunpack.c.l.bf16 %v16646_v63 }
 0x5fe   :  { %13326 = vst [vmem:[#allocation3 + $0x28] sm:$0xff] %v13119_v8   ;;  %v7792_v8 = vunpack.c.l.bf16 %v16619_v9  ;;  %v12808_v9 = vld [vmem:[%s17291_s3 + $0x2e0] sm:$0xff] }
 0x600   :  { %8008 = vmatpush.bf16.msrb.mxu3 %v12793_v16  ;;  %8340 = vmatpush.bf16.msra.mxu1 %v12809_v30 }
 0x602   :  { %v7421_v49 = vpop.f32.mrf.mxu0 }
 0x604   :  { %8009 = vmatpush.bf16.msrb.mxu3 %v12792_v35  ;;  %8341 = vmatpush.bf16.msra.mxu1 %v12808_v9 }
 0x605   :  { %v16718_v3 = vld [vmem:[#allocation3 + $0x28] sm:$0xf]  ;;  %v16720_v5 = vld [vmem:[#allocation3 + $0x2c] sm:$0xf] }
 0x606   :  { %v12774_v27 = vld [vmem:[#allocation3 + $0x28] sm:$0xff]  ;;  %v7352_v10 = vunpack.c.l.b16 %v16718_v3  ;;  %v7353_v24 = vunpack.c.l.b16 %v16720_v5 }
 0x607   :  { %v7682_v50 = vshll.u32 %v12774_v27, 16 }
 0x608   :  { %v7358_v36 = vpack.c.b16 %v7353_v24, %v7352_v10  ;;  %v7452_v39 = vpack.c.b16 %v7352_v10, %v7351_v51  ;;  %v7453_v46 = vpack.c.b16 %v7353_v24, %v7353_v24  ;;  %v7686_v51 = vshrl.u32 %v12774_v27, 16  ;;  %8010 = vmatpush.bf16.msrb.mxu3 %v12791_v22  ;;  %v12789_v10 = vld [vmem:[%s17291_s3 + $0x270] sm:$0xff] }
 0x609   :  { %v7684_v42 = vrot.slane %v7682_v50, 1  ;;  %8152 = vmatpush.bf16.msra.mxu0 %v12789_v10  ;;  %v7794_v22 = vunpack.c.l.bf16 %v16648_v1 }
 0x60a   :  { %7440 = vmatmul.bf16.gmra.mxu0 %v7358_v36  ;;  %v7490_v37 = vshrl.u32 %v7452_v39, 16  ;;  %v7493_v43 = vshll.u32 %v7452_v39, 16  ;;  %v7499_v4 = vshrl.u32 %v7453_v46, 16  ;;  %v7502_v26 = vshll.u32 %v7453_v46, 16  ;;  %v7423_v56 = vpop.f32.mrf.mxu0  ;;  %v12788_v39 = vld [vmem:[%s17291_s3 + $0x268] sm:$0xff] }
 0x60b   :  { %v7685_v57 = vsel %vm3014_vm1, %v7680_v47, %v7684_v42  ;;  %v7688_v2 = vor.u32 %v7686_v51, %v7684_v42  ;;  %v12807_v42 = vld [vmem:[%s17291_s3 + $0x2d8] sm:$0xff] }
 0x60c   :  { %7770 = vmatmul.bf16.gmra.mxu2 %v7685_v57  ;;  %v7492_v32 = vrot.slane %v7490_v37, 3  ;;  %v7495_v25 = vrot.slane %v7493_v43, 4  ;;  %v7501_v38 = vrot.slane %v7499_v4, 3  ;;  %v7504_v62 = vrot.slane %v7502_v26, 4  ;;  %v12787_v37 = vld [vmem:[%s17291_s3 + $0x260] sm:$0xff]  ;;  %8342 = vmatpush.bf16.msra.mxu1 %v12807_v42  ;;  %v12786_v43 = vld [vmem:[%s17291_s3 + $0x258] sm:$0xff] }
 0x60d   :  { %v7693_v29 = vsel %vm3014_vm1, %v7688_v2, %v7692_v23  ;;  %8153 = vmatpush.bf16.msra.mxu0 %v12788_v39  ;;  %v12806_v57 = vld [vmem:[%s17291_s3 + $0x2d0] sm:$0xff]  ;;  %v12804_v26 = vld [vmem:[%s17291_s3 + $0x2c0] sm:$0xff]  ;;  %v12784_v23 = vld [vmem:[%s17291_s3 + $0x248] sm:$0xff] }
 0x60e   :  { %v7496_v55 = vor.u32 %v7495_v25, %v7492_v32  ;;  %v7505_v61 = vor.u32 %v7504_v62, %v7501_v38  ;;  %v12783_v62 = vld [vmem:[%s17291_s3 + $0x240] sm:$0xff] }
 0x610   :  { %v7497_v18 = vsel %vm1308_vm0, %v7487_v20, %v7496_v55  ;;  %v7506_v31 = vsel %vm1308_vm0, %v7496_v55, %v7505_v61  ;;  %8343 = vmatpush.bf16.msra.mxu1 %v12806_v57  ;;  %v12785_v55 = vld [vmem:[%s17291_s3 + $0x250] sm:$0xff] }
 0x611   :  { %7583 = vmatmul.bf16.gmra.mxu1 %v7497_v18  ;;  %8154 = vmatpush.bf16.msra.mxu0 %v12787_v37 }
 0x614   :  { %8344 = vmatpush.bf16.msra.mxu1 %v12805_v11 }
 0x615   :  { %8155 = vmatpush.bf16.msra.mxu0 %v12786_v43 }
 0x618   :  { %8345 = vmatpush.bf16.msra.mxu1 %v12804_v26  ;;  %v7795_v26 = vunpack.c.l.bf16 %v16671_v44 }
 0x619   :  { %8156 = vmatpush.bf16.msra.mxu0 %v12785_v55 }
 0x61c   :  { %7775 = vmatmul.bf16.gmra.mxu2 %v7693_v29 }
 0x61d   :  { %8157 = vmatpush.bf16.msra.mxu0 %v12784_v23 }
 0x621   :  { %7588 = vmatmul.bf16.gmra.mxu1 %v7506_v31  ;;  %8158 = vmatpush.bf16.msra.mxu0 %v12783_v62 }
 0x627   :  { %v7426_v18 = vpop.f32.mrf.mxu0 }
 0x62e   :  { %v7569_v6 = vpop.f32.mrf.mxu1 }
 0x62f   :  { %v7570_v19 = vadd.f32 %v7569_v6, %v7421_v49  ;;  %v7756_v0 = vpop.f32.mrf.mxu2  ;;  %v7428_v61 = vpop.f32.mrf.mxu0 }
 0x631   :  { %v7781_v20 = vadd.f32 %v7756_v0, %v7570_v19 }
 0x633   :  { %v7806_v40 = vadd.f32 %v16752_v48, %v7781_v20 }
 0x635   :  { %v7816_v52 = vadd.f32 %v7806_v40, %v7791_v13 }
 0x636   :  { %v7571_v34 = vpop.f32.mrf.mxu1 }
 0x637   :  { %v7572_v41 = vadd.f32 %v7571_v34, %v7423_v56  ;;  %v7758_v14 = vpop.f32.mrf.mxu2  ;;  %v7836_v24 = vmul.f32 0.2, %v7816_v52  ;;  %vm7826_vm5 = vcmp.ge.f32.partialorder %v7816_v52, 0.0  ;;  %v7880_v56 = vld [vmem:[#allocation2 + $0x4] sm:$0x8] }
 0x638   :  { %v8038_v63 = vunpack.c.l.b16 %v7880_v56 }
 0x639   :  { %v7782_v59 = vadd.f32 %v7758_v14, %v7572_v41  ;;  %v7846_v33 = vsel %vm7826_vm5, %v7816_v52, %v7836_v24 }
 0x63b   :  { %v7807_v27 = vadd.f32 %v16752_v48, %v7782_v59 }
 0x63d   :  { %v7817_v17 = vadd.f32 %v7807_v27, %v7792_v8 }
 0x63f   :  { %vm7827_vm6 = vcmp.ge.f32.partialorder %v7817_v17, 0.0  ;;  %v7837_v50 = vmul.f32 0.2, %v7817_v17 }
 0x641   :  { %v7847_v36 = vsel %vm7827_vm6, %v7817_v17, %v7837_v50 }
 0x642   :  { %v13124_v47 = vpack.c.bf16 %v7847_v36, %v7846_v33 }
 0x644   :  { %13327 = vst [vmem:[#allocation2 + $0x8] sm:$0xff] %v13124_v47  }
 0x64a   :  { %v7431_v12 = vpop.f32.mrf.mxu0 }
 0x64b   :  { %v16788_v32 = vld [vmem:[#allocation2 + $0x8] sm:$0xf]  ;;  %v16790_v25 = vld [vmem:[#allocation2 + $0xc] sm:$0xf] }
 0x64c   :  { %v7935_v53 = vunpack.c.l.b16 %v16788_v32  ;;  %v7936_v46 = vunpack.c.l.b16 %v16790_v25  ;;  %v12799_v13 = vld [vmem:[#allocation2 + $0x8] sm:$0xff] }
 0x64d   :  { %v8244_v41 = vshll.u32 %v12799_v13, 16  ;;  %v8242_v33 = vshrl.u32 %v12799_v13, 16 }
 0x64e   :  { %v7945_v21 = vpack.c.b16 %v7936_v46, %v7935_v53  ;;  %v8039_v14 = vpack.c.b16 %v7935_v53, %v8038_v63 }
 0x64f   :  { %v7574_v4 = vpop.f32.mrf.mxu1  ;;  %v8246_v8 = vrot.slane %v8244_v41, 1 }
 0x650   :  { %8011 = vmatmul.bf16.vlgmr.msrb.gmra.mxu3 %v7945_v21  ;;  %v7575_v51 = vadd.f32 %v7574_v4, %v7426_v18  ;;  %v7761_v2 = vpop.f32.mrf.mxu2  ;;  %v8046_v24 = vshrl.u32 %v8039_v14, 16  ;;  %v8049_v17 = vshll.u32 %v8039_v14, 16 }
 0x651   :  { %v8247_v37 = vor.u32 %v8246_v8, %v8242_v33 }
 0x652   :  { %v7783_v38 = vadd.f32 %v7761_v2, %v7575_v51  ;;  %v8048_v55 = vrot.slane %v8046_v24, 3  ;;  %v8051_v53 = vrot.slane %v8049_v17, 4  ;;  %v7433_v2 = vpop.f32.mrf.mxu0 }
 0x654   :  { %v7808_v29 = vadd.f32 %v16752_v48, %v7783_v38 }
 0x656   :  { %v7818_v7 = vadd.f32 %v7808_v29, %v7793_v28 }
 0x657   :  { %v7576_v31 = vpop.f32.mrf.mxu1 }
 0x658   :  { %v7577_v16 = vadd.f32 %v7576_v31, %v7428_v61  ;;  %v7763_v54 = vpop.f32.mrf.mxu2  ;;  %v7838_v6 = vmul.f32 0.2, %v7818_v7  ;;  %vm7828_vm7 = vcmp.ge.f32.partialorder %v7818_v7, 0.0 }
 0x65a   :  { %v7784_v35 = vadd.f32 %v7763_v54, %v7577_v16  ;;  %v7848_v20 = vsel %vm7828_vm7, %v7818_v7, %v7838_v6  ;;  %v7796_v16 = vunpack.c.l.bf16 %v16676_v60 }
 0x65c   :  { %v7809_v49 = vadd.f32 %v16752_v48, %v7784_v35 }
 0x65e   :  { %v7819_v19 = vadd.f32 %v7809_v49, %v7794_v22 }
 0x660   :  { %vm7829_vm8 = vcmp.ge.f32.partialorder %v7819_v19, 0.0  ;;  %v7839_v0 = vmul.f32 0.2, %v7819_v19 }
 0x662   :  { %v7849_v40 = vsel %vm7829_vm8, %v7819_v19, %v7839_v0 }
 0x663   :  { %v13129_v34 = vpack.c.bf16 %v7849_v40, %v7848_v20 }
 0x665   :  { %13328 = vst [vmem:[#allocation2 + $0x10] sm:$0xff] %v13129_v34  }
 0x667   :  { %v7436_v19 = vpop.f32.mrf.mxu0 }
 0x66c   :  { %v16810_v52 = vld [vmem:[#allocation2 + $0x10] sm:$0xf]  ;;  %v16812_v1 = vld [vmem:[#allocation2 + $0x14] sm:$0xf] }
 0x66d   :  { %v16814_v59 = vld [vmem:[#allocation2 + $0x10] sm:$0xff]  ;;  %v7937_v10 = vunpack.c.l.b16 %v16810_v52  ;;  %v7938_v30 = vunpack.c.l.b16 %v16812_v1 }
 0x66e   :  { %v7579_v27 = vpop.f32.mrf.mxu1  ;;  %v8249_v36 = vshll.u32 %v16814_v59, 16  ;;  %v8253_v34 = vshrl.u32 %v16814_v59, 16 }
 0x66f   :  { %v7580_v50 = vadd.f32 %v7579_v27, %v7431_v12  ;;  %v7766_v9 = vpop.f32.mrf.mxu2  ;;  %v7946_v39 = vpack.c.b16 %v7938_v30, %v7937_v10  ;;  %v8040_v47 = vpack.c.b16 %v7937_v10, %v7936_v46  ;;  %v8052_v46 = vor.u32 %v8051_v53, %v8048_v55 }
 0x670   :  { %v8251_v43 = vrot.slane %v8249_v36, 1  ;;  %v7438_v36 = vpop.f32.mrf.mxu0  ;;  %v7798_v53 = vunpack.c.l.bf16 %v16703_v58 }
 0x671   :  { %v7785_v42 = vadd.f32 %v7766_v9, %v7580_v50  ;;  %8016 = vmatmul.bf16.gmra.mxu3 %v7946_v39  ;;  %v8054_v57 = vshrl.u32 %v8040_v47, 16  ;;  %v8057_v11 = vshll.u32 %v8040_v47, 16 }
 0x672   :  { %v8252_v18 = vsel %vm3014_vm1, %v8247_v37, %v8251_v43  ;;  %v8255_v8 = vor.u32 %v8253_v34, %v8251_v43 }
 0x673   :  { %v8056_v21 = vrot.slane %v8054_v57, 3  ;;  %v8059_v4 = vrot.slane %v8057_v11, 4  ;;  %8346 = vmatmul.bf16.vlgmr.msra.gmra.mxu1 %v8252_v18  ;;  %v7810_v51 = vadd.f32 %v16752_v48, %v7785_v42  ;;  %v7797_v42 = vunpack.c.l.bf16 %v16701_v45 }
 0x675   :  { %v8060_v38 = vor.u32 %v8059_v4, %v8056_v21  ;;  %v7820_v31 = vadd.f32 %v7810_v51, %v7795_v26 }
 0x676   :  { %v7581_v23 = vpop.f32.mrf.mxu1 }
 0x677   :  { %v7582_v62 = vadd.f32 %v7581_v23, %v7433_v2  ;;  %v7768_v29 = vpop.f32.mrf.mxu2  ;;  %v8061_v61 = vsel %vm1308_vm0, %v8052_v46, %v8060_v38  ;;  %v7840_v7 = vmul.f32 0.2, %v7820_v31  ;;  %vm7830_vm9 = vcmp.ge.f32.partialorder %v7820_v31, 0.0 }
 0x678   :  { %8159 = vmatmul.bf16.vlgmr.msra.gmra.mxu0 %v8061_v61 }
 0x679   :  { %v7786_v28 = vadd.f32 %v7768_v29, %v7582_v62  ;;  %v7850_v22 = vsel %vm7830_vm9, %v7820_v31, %v7840_v7 }
 0x67b   :  { %v7811_v54 = vadd.f32 %v16752_v48, %v7786_v28  ;;  %v7799_v28 = vunpack.c.l.bf16 %v16718_v3 }
 0x67d   :  { %v7821_v35 = vadd.f32 %v7811_v54, %v7796_v16 }
 0x67f   :  { %vm7831_vm10 = vcmp.ge.f32.partialorder %v7821_v35, 0.0  ;;  %v7841_v44 = vmul.f32 0.2, %v7821_v35 }
 0x681   :  { %v7851_v49 = vsel %vm7831_vm10, %v7821_v35, %v7841_v44 }
 0x682   :  { %v13134_v6 = vpack.c.bf16 %v7851_v49, %v7850_v22  ;;  %v7800_v22 = vunpack.c.l.bf16 %v16720_v5 }
 0x684   :  { %13329 = vst [vmem:[#allocation2 + $0x18] sm:$0xff] %v13134_v6  }
 0x685   :  { %7876 = vst [vmem:[#allocation2 + $0x18] sm:$0xf] %v17448_v15 }
 0x686   :  { %7877 = vst [vmem:[#allocation2 + $0x1c] sm:$0xf] %v17448_v15 }
 0x687   :  { %v7441_v21 = vpop.f32.mrf.mxu0 }
 0x68c   :  { %v16827_v0 = vld [vmem:[#allocation2 + $0x18] sm:$0xf] }
 0x68d   :  { %v16829_v60 = vld [vmem:[#allocation2 + $0x18] sm:$0xff]  ;;  %v7939_v20 = vunpack.c.l.b16 %v16827_v0 }
 0x68e   :  { %9157 = vst [vmem:[#allocation2 + $0x18] sm:$0xf] %v17448_v15  ;;  %v16833_v40 = vld [vmem:[#allocation2 + $0x1c] sm:$0xf]  ;;  %v7584_v56 = vpop.f32.mrf.mxu1  ;;  %v8257_v14 = vshll.u32 %v16829_v60, 16  ;;  %v8261_v44 = vshrl.u32 %v16829_v60, 16 }
 0x68f   :  { %v7940_v13 = vunpack.c.l.b16 %v16833_v40  ;;  %v7585_v63 = vadd.f32 %v7584_v56, %v7436_v19  ;;  %v7771_v41 = vpop.f32.mrf.mxu2  ;;  %v8041_v12 = vpack.c.b16 %v7939_v20, %v7938_v30  ;;  %v7443_v31 = vpop.f32.mrf.mxu0 }
 0x690   :  { %v8259_v24 = vrot.slane %v8257_v14, 1 }
 0x691   :  { %v7947_v27 = vpack.c.b16 %v7940_v13, %v7939_v20  ;;  %v7787_v10 = vadd.f32 %v7771_v41, %v7585_v63  ;;  %v8063_v17 = vshrl.u32 %v8041_v12, 16  ;;  %v8066_v50 = vshll.u32 %v8041_v12, 16 }
 0x692   :  { %v8260_v9 = vsel %vm3014_vm1, %v8255_v8, %v8259_v24  ;;  %v8263_v41 = vor.u32 %v8261_v44, %v8259_v24  ;;  %v12826_v44 = vld [vmem:[%s17294_s5 + $0x170] sm:$0xff] }
 0x693   :  { %8021 = vmatmul.bf16.gmra.mxu3 %v7947_v27  ;;  %v8065_v33 = vrot.slane %v8063_v17, 3  ;;  %v8068_v59 = vrot.slane %v8066_v50, 4  ;;  %8351 = vmatmul.bf16.gmra.mxu1 %v8260_v9  ;;  %v7812_v39 = vadd.f32 %v16752_v48, %v7787_v10 }
 0x695   :  { %v16842_v47 = vor.u32 %v8068_v59, %v8065_v33  ;;  %v7822_v11 = vadd.f32 %v7812_v39, %v7797_v42 }
 0x696   :  { %v7586_v30 = vpop.f32.mrf.mxu1 }
 0x697   :  { %v7587_v37 = vadd.f32 %v7586_v30, %v7438_v36  ;;  %v7773_v43 = vpop.f32.mrf.mxu2  ;;  %v8070_v57 = vsel %vm1308_vm0, %v8060_v38, %v16842_v47  ;;  %v7842_v4 = vmul.f32 0.2, %v7822_v11  ;;  %vm7832_vm11 = vcmp.ge.f32.partialorder %v7822_v11, 0.0 }
 0x698   :  { %8164 = vmatmul.bf16.gmra.mxu0 %v8070_v57 }
 0x699   :  { %v7788_v55 = vadd.f32 %v7773_v43, %v7587_v37  ;;  %v7852_v46 = vsel %vm7832_vm11, %v7822_v11, %v7842_v4 }
 0x69b   :  { %v7813_v18 = vadd.f32 %v16752_v48, %v7788_v55 }
 0x69d   :  { %v7823_v26 = vadd.f32 %v7813_v18, %v7798_v53  ;;  %v8195_v53 = vld [vmem:[#allocation2 + $0x30] sm:$0x1] }
 0x69e   :  { %v7589_v51 = vpop.f32.mrf.mxu1 }
 0x69f   :  { %vm7833_vm12 = vcmp.ge.f32.partialorder %v7823_v26, 0.0  ;;  %v7843_v2 = vmul.f32 0.2, %v7823_v26  ;;  %v7590_v45 = vadd.f32 %v7589_v51, %v7441_v21  ;;  %v7776_v23 = vpop.f32.mrf.mxu2  ;;  %v8234_v51 = vunpack.c.l.b16 %v8195_v53  ;;  %v12845_v53 = vld [vmem:[%s17294_s5 + $0x1e8] sm:$0xff] }
 0x6a1   :  { %v7853_v62 = vsel %vm7833_vm12, %v7823_v26, %v7843_v2  ;;  %v7789_v29 = vadd.f32 %v7776_v23, %v7590_v45 }
 0x6a2   :  { %v13139_v38 = vpack.c.bf16 %v7853_v62, %v7852_v46  ;;  %v8240_v46 = vpack.c.b16 %v8234_v51, %v8234_v51 }
 0x6a3   :  { %v7814_v61 = vadd.f32 %v16752_v48, %v7789_v29 }
 0x6a4   :  { %13330 = vst [vmem:[#allocation2 + $0x20] sm:$0xff] %v13139_v38   ;;  %v8281_v38 = vshll.u32 %v8240_v46, 16 }
 0x6a5   :  { %v7824_v7 = vadd.f32 %v7814_v61, %v7799_v28  ;;  %v12827_v28 = vld [vmem:[%s17294_s5 + $0x178] sm:$0xff] }
 0x6a6   :  { %v7591_v58 = vpop.f32.mrf.mxu1  ;;  %8594 = vmatpush.bf16.msra.mxu2 %v12827_v28  ;;  %v12841_v28 = vld [vmem:[%s17294_s5 + $0x1c8] sm:$0xff] }
 0x6a7   :  { %v7592_v16 = vadd.f32 %v7591_v58, %v7443_v31  ;;  %v7778_v54 = vpop.f32.mrf.mxu2  ;;  %v7844_v3 = vmul.f32 0.2, %v7824_v7  ;;  %vm7834_vm13 = vcmp.ge.f32.partialorder %v7824_v7, 0.0 }
 0x6a9   :  { %v7790_v35 = vadd.f32 %v7778_v54, %v7592_v16  ;;  %v7854_v10 = vsel %vm7834_vm13, %v7824_v7, %v7844_v3  ;;  %v8283_v54 = vrot.slane %v8281_v38, 1  ;;  %v12823_v3 = vld [vmem:[%s17294_s5 + $0x158] sm:$0xff] }
 0x6aa   :  { %8595 = vmatpush.bf16.msra.mxu2 %v12826_v44  ;;  %v12815_v38 = vld [vmem:[%s17294_s5 + $0x118] sm:$0xff] }
 0x6ab   :  { %v7815_v49 = vadd.f32 %v16752_v48, %v7790_v35  ;;  %v16854_v6 = vld [vmem:[#allocation2 + $0x20] sm:$0xf]  ;;  %v16856_v19 = vld [vmem:[#allocation2 + $0x24] sm:$0xf] }
 0x6ac   :  { %v12802_v20 = vld [vmem:[#allocation2 + $0x20] sm:$0xff]  ;;  %v7941_v56 = vunpack.c.l.b16 %v16854_v6  ;;  %v7942_v34 = vunpack.c.l.b16 %v16856_v19 }
 0x6ad   :  { %v7825_v63 = vadd.f32 %v7815_v49, %v7800_v22  ;;  %v8265_v14 = vshll.u32 %v12802_v20, 16  ;;  %v8269_v43 = vshrl.u32 %v12802_v20, 16  ;;  %v12825_v20 = vld [vmem:[%s17294_s5 + $0x168] sm:$0xff] }
 0x6ae   :  { %v7948_v12 = vpack.c.b16 %v7942_v34, %v7941_v56  ;;  %v8042_v5 = vpack.c.b16 %v7941_v56, %v7940_v13  ;;  %8596 = vmatpush.bf16.msra.mxu2 %v12825_v20  ;;  %v12832_v20 = vld [vmem:[%s17294_s5 + $0x180] sm:$0xff] }
 0x6af   :  { %vm7835_vm14 = vcmp.ge.f32.partialorder %v7825_v63, 0.0  ;;  %v7845_v48 = vmul.f32 0.2, %v7825_v63  ;;  %v8267_v60 = vrot.slane %v8265_v14, 1  ;;  %v12821_v14 = vld [vmem:[%s17294_s5 + $0x148] sm:$0xff] }
 0x6b0   :  { %8026 = vmatmul.bf16.gmra.mxu3 %v7948_v12  ;;  %v8072_v8 = vshrl.u32 %v8042_v5, 16  ;;  %v8075_v27 = vshll.u32 %v8042_v5, 16  ;;  %v12820_v12 = vld [vmem:[%s17294_s5 + $0x140] sm:$0xff]  ;;  %v12839_v5 = vld [vmem:[%s17294_s5 + $0x1b8] sm:$0xff] }
 0x6b1   :  { %v7855_v17 = vsel %vm7835_vm14, %v7825_v63, %v7845_v48  ;;  %v8268_v50 = vsel %vm3014_vm1, %v8263_v41, %v8267_v60  ;;  %v8271_v18 = vor.u32 %v8269_v43, %v8267_v60  ;;  %v12822_v63 = vld [vmem:[%s17294_s5 + $0x150] sm:$0xff]  ;;  %v12819_v41 = vld [vmem:[%s17294_s5 + $0x138] sm:$0xff]  ;;  %8929 = vmatpush.bf16.msrb.mxu0 %v12839_v5 }
 0x6b2   :  { %v13144_v9 = vpack.c.bf16 %v7855_v17, %v7854_v10  ;;  %8356 = vmatmul.bf16.gmra.mxu1 %v8268_v50  ;;  %v8074_v33 = vrot.slane %v8072_v8, 3  ;;  %v8077_v24 = vrot.slane %v8075_v27, 4  ;;  %8742 = vmatpush.bf16.msra.mxu3 %v12819_v41  ;;  %v12818_v48 = vld [vmem:[%s17294_s5 + $0x130] sm:$0xff]  ;;  %v12847_v60 = vld [vmem:[%s17294_s5 + $0x1f8] sm:$0xff]  ;;  %v12817_v27 = vld [vmem:[%s17294_s5 + $0x128] sm:$0xff] }
 0x6b3   :  { %v12838_v8 = vld [vmem:[%s17294_s5 + $0x1b0] sm:$0xff]  ;;  %9058 = vmatpush.bf16.msrb.mxu1 %v12847_v60 }
 0x6b4   :  { %13331 = vst [vmem:[#allocation2 + $0x28] sm:$0xff] %v13144_v9   ;;  %v8078_v59 = vor.u32 %v8077_v24, %v8074_v33  ;;  %v12846_v10 = vld [vmem:[%s17294_s5 + $0x1f0] sm:$0xff] }
 0x6b5   :  { %8930 = vmatpush.bf16.msrb.mxu0 %v12838_v8  ;;  %v8385_v8 = vunpack.c.l.bf16 %v16812_v1 }
 0x6b6   :  { %v8079_v36 = vsel %vm1308_vm0, %v16842_v47, %v8078_v59  ;;  %8743 = vmatpush.bf16.msra.mxu3 %v12818_v48 }
 0x6b7   :  { %8169 = vmatmul.bf16.gmra.mxu0 %v8079_v36  ;;  %9059 = vmatpush.bf16.msrb.mxu1 %v12846_v10 }
 0x6ba   :  { %8744 = vmatpush.bf16.msra.mxu3 %v12817_v27 }
 0x6bb   :  { %v16865_v13 = vld [vmem:[#allocation2 + $0x28] sm:$0xf]  ;;  %v16867_v39 = vld [vmem:[#allocation2 + $0x2c] sm:$0xf]  ;;  %9060 = vmatpush.bf16.msrb.mxu1 %v12845_v53 }
 0x6bc   :  { %v12803_v30 = vld [vmem:[#allocation2 + $0x28] sm:$0xff]  ;;  %v7943_v42 = vunpack.c.l.b16 %v16865_v13  ;;  %v7944_v37 = vunpack.c.l.b16 %v16867_v39 }
 0x6bd   :  { %v8273_v57 = vshll.u32 %v12803_v30, 16  ;;  %v8277_v58 = vshrl.u32 %v12803_v30, 16 }
 0x6be   :  { %v7949_v11 = vpack.c.b16 %v7944_v37, %v7943_v42  ;;  %v8043_v55 = vpack.c.b16 %v7943_v42, %v7942_v34  ;;  %v8044_v62 = vpack.c.b16 %v7944_v37, %v7944_v37  ;;  %v12824_v34 = vld [vmem:[%s17294_s5 + $0x160] sm:$0xff]  ;;  %v8382_v37 = vunpack.c.l.bf16 %v16788_v32 }
 0x6bf   :  { %v8275_v21 = vrot.slane %v8273_v57, 1  ;;  %8597 = vmatpush.bf16.msra.mxu2 %v12824_v34  ;;  %v8383_v32 = vunpack.c.l.bf16 %v16790_v25  ;;  %v12843_v25 = vld [vmem:[%s17294_s5 + $0x1d8] sm:$0xff]  ;;  %v12812_v34 = vld [vmem:[%s17294_s5 + $0x100] sm:$0xff] }
 0x6c0   :  { %8031 = vmatmul.bf16.gmra.mxu3 %v7949_v11  ;;  %v8081_v4 = vshrl.u32 %v8043_v55, 16  ;;  %v8084_v47 = vshll.u32 %v8043_v55, 16  ;;  %v8090_v61 = vshrl.u32 %v8044_v62, 16  ;;  %v8093_v31 = vshll.u32 %v8044_v62, 16  ;;  %v12837_v11 = vld [vmem:[%s17294_s5 + $0x1a8] sm:$0xff]  ;;  %v12816_v55 = vld [vmem:[%s17294_s5 + $0x120] sm:$0xff] }
 0x6c1   :  { %v8276_v26 = vsel %vm3014_vm1, %v8271_v18, %v8275_v21  ;;  %v8279_v16 = vor.u32 %v8277_v58, %v8275_v21  ;;  %8931 = vmatpush.bf16.msrb.mxu0 %v12837_v11  ;;  %8745 = vmatpush.bf16.msra.mxu3 %v12816_v55  ;;  %v12814_v58 = vld [vmem:[%s17294_s5 + $0x110] sm:$0xff] }
 0x6c2   :  { %8361 = vmatmul.bf16.gmra.mxu1 %v8276_v26  ;;  %v8083_v2 = vrot.slane %v8081_v4, 3  ;;  %v8086_v45 = vrot.slane %v8084_v47, 4  ;;  %v8092_v7 = vrot.slane %v8090_v61, 3  ;;  %v8095_v35 = vrot.slane %v8093_v31, 4  ;;  %v12844_v47 = vld [vmem:[%s17294_s5 + $0x1e0] sm:$0xff]  ;;  %v12842_v61 = vld [vmem:[%s17294_s5 + $0x1d0] sm:$0xff] }
 0x6c3   :  { %v8284_v22 = vsel %vm3014_vm1, %v8279_v16, %v8283_v54  ;;  %8598 = vmatpush.bf16.msra.mxu2 %v12823_v3  ;;  %9061 = vmatpush.bf16.msrb.mxu1 %v12844_v47  ;;  %v12834_v31 = vld [vmem:[%s17294_s5 + $0x190] sm:$0xff]  ;;  %v12833_v16 = vld [vmem:[%s17294_s5 + $0x188] sm:$0xff] }
 0x6c4   :  { %v8087_v23 = vor.u32 %v8086_v45, %v8083_v2  ;;  %v8096_v49 = vor.u32 %v8095_v35, %v8092_v7  ;;  %v12836_v2 = vld [vmem:[%s17294_s5 + $0x1a0] sm:$0xff]  ;;  %v12813_v7 = vld [vmem:[%s17294_s5 + $0x108] sm:$0xff] }
 0x6c5   :  { %8932 = vmatpush.bf16.msrb.mxu0 %v12836_v2  ;;  %8746 = vmatpush.bf16.msra.mxu3 %v12815_v38  ;;  %v12840_v35 = vld [vmem:[%s17294_s5 + $0x1c0] sm:$0xff] }
 0x6c6   :  { %v8088_v29 = vsel %vm1308_vm0, %v8078_v59, %v8087_v23  ;;  %v8097_v56 = vsel %vm1308_vm0, %v8087_v23, %v8096_v49  ;;  %v16923_v59 = vld [vmem:[%s17293_s4 + $0x3] ss:$0 sm:$0xff] }
 0x6c7   :  { %8174 = vmatmul.bf16.gmra.mxu0 %v8088_v29  ;;  %8599 = vmatpush.bf16.msra.mxu2 %v12822_v63  ;;  %v12835_v29 = vld [vmem:[%s17294_s5 + $0x198] sm:$0xff] }
 0x6c8   :  { %9062 = vmatpush.bf16.msrb.mxu1 %v12843_v25 }
 0x6c9   :  { %8933 = vmatpush.bf16.msrb.mxu0 %v12835_v29  ;;  %8747 = vmatpush.bf16.msra.mxu3 %v12814_v58 }
 0x6cb   :  { %8600 = vmatpush.bf16.msra.mxu2 %v12821_v14  ;;  %v8384_v14 = vunpack.c.l.bf16 %v16810_v52 }
 0x6cc   :  { %9063 = vmatpush.bf16.msrb.mxu1 %v12842_v61 }
 0x6cd   :  { %8934 = vmatpush.bf16.msrb.mxu0 %v12834_v31  ;;  %8748 = vmatpush.bf16.msra.mxu3 %v12813_v7 }
 0x6cf   :  { %8601 = vmatpush.bf16.msra.mxu2 %v12820_v12 }
 0x6d0   :  { %9064 = vmatpush.bf16.msrb.mxu1 %v12841_v28 }
 0x6d1   :  { %8935 = vmatpush.bf16.msrb.mxu0 %v12833_v16  ;;  %8749 = vmatpush.bf16.msra.mxu3 %v12812_v34 }
 0x6d2   :  { %8366 = vmatmul.bf16.gmra.mxu1 %v8284_v22 }
 0x6d3   :  { %v8012_v17 = vpop.f32.mrf.mxu3 }
 0x6d4   :  { %9065 = vmatpush.bf16.msrb.mxu1 %v12840_v35 }
 0x6d5   :  { %8936 = vmatpush.bf16.msrb.mxu0 %v12832_v20 }
 0x6d7   :  { %8179 = vmatmul.bf16.gmra.mxu0 %v8097_v56 }
 0x6db   :  { %v8014_v30 = vpop.f32.mrf.mxu3 }
 0x6f0   :  { %v8347_v50 = vpop.f32.mrf.mxu1 }
 0x6f4   :  { %v8017_v54 = vpop.f32.mrf.mxu3 }
 0x6f5   :  { %v8160_v9 = vpop.f32.mrf.mxu0 }
 0x6f6   :  { %v8161_v33 = vadd.f32 %v8160_v9, %v8012_v17 }
 0x6f8   :  { %v8372_v24 = vadd.f32 %v8347_v50, %v8161_v33  ;;  %v8349_v57 = vpop.f32.mrf.mxu1 }
 0x6fa   :  { %v8397_v36 = vadd.f32 %v16923_v59, %v8372_v24  ;;  %v13344_v24 = vld [vmem:[#allocation3 + $0x4] sm:$0x8] }
 0x6fc   :  { %v8407_v18 = vadd.f32 %v8397_v36, %v8382_v37  ;;  %v8019_v63 = vpop.f32.mrf.mxu3 }
 0x6fd   :  { %v8162_v42 = vpop.f32.mrf.mxu0 }
 0x6fe   :  { %v8163_v43 = vadd.f32 %v8162_v42, %v8014_v30  ;;  %v8427_v26 = vmul.f32 0.2, %v8407_v18  ;;  %vm8417_vm15 = vcmp.ge.f32.partialorder %v8407_v18, 0.0 }
 0x700   :  { %v8373_v21 = vadd.f32 %v8349_v57, %v8163_v43  ;;  %v8437_v23 = vsel %vm8417_vm15, %v8407_v18, %v8427_v26 }
 0x702   :  { %v8398_v4 = vadd.f32 %v16923_v59, %v8373_v21 }
 0x704   :  { %v8408_v51 = vadd.f32 %v8398_v4, %v8383_v32 }
 0x706   :  { %vm8418_vm2 = vcmp.ge.f32.partialorder %v8408_v51, 0.0  ;;  %v8428_v45 = vmul.f32 0.2, %v8408_v51 }
 0x708   :  { %v8438_v46 = vsel %vm8418_vm2, %v8408_v51, %v8428_v45 }
 0x709   :  { %v16947_v62 = vpack.c.bf16 %v8438_v46, %v8437_v23 }
 0x70b   :  { %13332 = vst [vmem:[#allocation3 + $0x8] sm:$0xff] %v16947_v62   ;;  %8602 = vmatmul.bf16.vlgmr.msra.gmra.mxu2 %v16947_v62  ;;  %v8835_v1 = vshll.u32 %v16947_v62, 16  ;;  %v8833_v47 = vshrl.u32 %v16947_v62, 16 }
 0x70d   :  { %v8837_v18 = vrot.slane %v8835_v1, 1 }
 0x70f   :  { %v8838_v61 = vor.u32 %v8837_v18, %v8833_v47 }
 0x710   :  { %v8352_v44 = vpop.f32.mrf.mxu1 }
 0x712   :  { %v13397_v36 = vld [vmem:[#allocation3 + $0x4] sm:$0xf0]   ;;  %v13367_v37 = vld [vmem:[#allocation3 + $0x8] sm:$0xf0] }
 0x713   :  { %v13345_v52 = vor.u32 %v13397_v36, %v13344_v24  ;;  %v13368_v43 = vld [vmem:[#allocation3 + $0x8] sm:$0xe] }
 0x714   :  { %v13369_v11 = vor.u32 %v13368_v43, %v13367_v37  ;;  %v8389_v43 = vunpack.c.l.bf16 %v16856_v19 }
 0x715   :  { %v8165_v22 = vpop.f32.mrf.mxu0  ;;  %v8637_v55 = vshrl.u32 %v13345_v52, 16  ;;  %v8640_v53 = vshll.u32 %v13345_v52, 16 }
 0x716   :  { %v8166_v49 = vadd.f32 %v8165_v22, %v8017_v54  ;;  %v8022_v42 = vpop.f32.mrf.mxu3  ;;  %v8994_v4 = vrot.slane %v13369_v11, 1 }
 0x717   :  { %v8639_v26 = vrot.slane %v8637_v55, 3  ;;  %v8642_v51 = vrot.slane %v8640_v53, 4 }
 0x718   :  { %v8374_v56 = vadd.f32 %v8352_v44, %v8166_v49  ;;  %v8354_v5 = vpop.f32.mrf.mxu1  ;;  %v8386_v49 = vunpack.c.l.bf16 %v16827_v0 }
 0x719   :  { %v8643_v35 = vor.u32 %v8642_v51, %v8639_v26 }
 0x71a   :  { %v8399_v3 = vadd.f32 %v16923_v59, %v8374_v56 }
 0x71c   :  { %v8409_v48 = vadd.f32 %v8399_v3, %v8384_v14 }
 0x71d   :  { %v8167_v41 = vpop.f32.mrf.mxu0 }
 0x71e   :  { %v8168_v12 = vadd.f32 %v8167_v41, %v8019_v63  ;;  %v8429_v10 = vmul.f32 0.2, %v8409_v48  ;;  %vm8419_vm3 = vcmp.ge.f32.partialorder %v8409_v48, 0.0  ;;  %v8024_v2 = vpop.f32.mrf.mxu3  ;;  %v8387_v63 = vunpack.c.l.bf16 %v16833_v40 }
 0x720   :  { %v8375_v60 = vadd.f32 %v8354_v5, %v8168_v12  ;;  %v8439_v9 = vsel %vm8419_vm3, %v8409_v48, %v8429_v10 }
 0x722   :  { %v8400_v27 = vadd.f32 %v16923_v59, %v8375_v60 }
 0x724   :  { %v8410_v17 = vadd.f32 %v8400_v27, %v8385_v8 }
 0x726   :  { %vm8420_vm5 = vcmp.ge.f32.partialorder %v8410_v17, 0.0  ;;  %v8430_v50 = vmul.f32 0.2, %v8410_v17 }
 0x728   :  { %v8440_v33 = vsel %vm8420_vm5, %v8410_v17, %v8430_v50 }
 0x729   :  { %v13154_v30 = vpack.c.bf16 %v8440_v33, %v8439_v9 }
 0x72b   :  { %13333 = vst [vmem:[#allocation3 + $0x10] sm:$0xff] %v13154_v30   ;;  %8607 = vmatmul.bf16.gmra.mxu2 %v13154_v30  ;;  %v8388_v30 = vunpack.c.l.bf16 %v16854_v6 }
 0x72f   :  { %v8357_v57 = vpop.f32.mrf.mxu1 }
 0x732   :  { %v16989_v21 = vld [vmem:[#allocation3 + $0x10] sm:$0xff] }
 0x733   :  { %v13399_v32 = vld [vmem:[#allocation3 + $0xc] sm:$0xff]   ;;  %v8995_v25 = vrot.slane %v16989_v21, 1  ;;  %v8840_v23 = vshll.u32 %v16989_v21, 16  ;;  %v8027_v3 = vpop.f32.mrf.mxu3  ;;  %v13398_v53 = vld [vmem:[#allocation3 + $0x14] sm:$0xf]  ;;  %v8844_v19 = vshrl.u32 %v16989_v21, 16 }
 0x734   :  { %v8170_v45 = vpop.f32.mrf.mxu0  ;;  %v8645_v46 = vshrl.u32 %v13399_v32, 16  ;;  %v8648_v29 = vshll.u32 %v13399_v32, 16 }
 0x735   :  { %v8171_v38 = vadd.f32 %v8170_v45, %v8022_v42  ;;  %v8996_v31 = vsel %vm7023_vm4, %v8994_v4, %v8995_v25  ;;  %v16997_v58 = vrot.slane %v8840_v23, 1 }
 0x736   :  { %v8647_v28 = vrot.slane %v8645_v46, 3  ;;  %v8650_v62 = vrot.slane %v8648_v29, 4  ;;  %9066 = vmatmul.bf16.vlgmr.msrb.gmra.mxu1 %v8996_v31 }
 0x737   :  { %v8376_v16 = vadd.f32 %v8357_v57, %v8171_v38  ;;  %v8359_v54 = vpop.f32.mrf.mxu1  ;;  %v8843_v7 = vsel %vm3014_vm1, %v8838_v61, %v16997_v58  ;;  %v8846_v38 = vor.u32 %v8844_v19, %v16997_v58  ;;  %v8786_v19 = vld [vmem:[#allocation3 + $0x30] sm:$0x1] }
 0x738   :  { %v17001_v44 = vor.u32 %v8650_v62, %v8647_v28  ;;  %8937 = vmatmul.bf16.vlgmr.msrb.gmra.mxu0 %v8843_v7 }
 0x739   :  { %v8401_v20 = vadd.f32 %v16923_v59, %v8376_v16 }
 0x73a   :  { %v8652_v22 = vsel %vm1308_vm0, %v8643_v35, %v17001_v44 }
 0x73b   :  { %8750 = vmatmul.bf16.vlgmr.msra.gmra.mxu3 %v8652_v22  ;;  %v8411_v41 = vadd.f32 %v8401_v20, %v8386_v49  ;;  %v8029_v9 = vpop.f32.mrf.mxu3 }
 0x73c   :  { %v8172_v56 = vpop.f32.mrf.mxu0 }
 0x73d   :  { %v8173_v34 = vadd.f32 %v8172_v56, %v8024_v2  ;;  %v8431_v48 = vmul.f32 0.2, %v8411_v41  ;;  %vm8421_vm6 = vcmp.ge.f32.partialorder %v8411_v41, 0.0 }
 0x73f   :  { %v8377_v14 = vadd.f32 %v8359_v54, %v8173_v34  ;;  %v8362_v12 = vpop.f32.mrf.mxu1  ;;  %v8441_v10 = vsel %vm8421_vm6, %v8411_v41, %v8431_v48  ;;  %v8390_v41 = vunpack.c.l.bf16 %v16865_v13 }
 0x741   :  { %v8402_v5 = vadd.f32 %v16923_v59, %v8377_v14 }
 0x743   :  { %v8412_v60 = vadd.f32 %v8402_v5, %v8387_v63  ;;  %v8032_v57 = vpop.f32.mrf.mxu3  ;;  %v8391_v5 = vunpack.c.l.bf16 %v16867_v39 }
 0x744   :  { %v8175_v8 = vpop.f32.mrf.mxu0 }
 0x745   :  { %vm8422_vm7 = vcmp.ge.f32.partialorder %v8412_v60, 0.0  ;;  %v8432_v27 = vmul.f32 0.2, %v8412_v60  ;;  %v8176_v0 = vadd.f32 %v8175_v8, %v8027_v3 }
 0x747   :  { %v8442_v17 = vsel %vm8422_vm7, %v8412_v60, %v8432_v27  ;;  %v8378_v50 = vadd.f32 %v8362_v12, %v8176_v0  ;;  %v8364_v24 = vpop.f32.mrf.mxu1 }
 0x748   :  { %v13159_v33 = vpack.c.bf16 %v8442_v17, %v8441_v10 }
 0x749   :  { %v8403_v40 = vadd.f32 %v16923_v59, %v8378_v50 }
 0x74a   :  { %13334 = vst [vmem:[#allocation3 + $0x18] sm:$0xff] %v13159_v33  }
 0x74b   :  { %8467 = vst [vmem:[#allocation3 + $0x18] sm:$0xf] %v17448_v15  ;;  %v8413_v52 = vadd.f32 %v8403_v40, %v8388_v30  ;;  %v8034_v34 = vpop.f32.mrf.mxu3 }
 0x74c   :  { %8468 = vst [vmem:[#allocation3 + $0x1c] sm:$0xf] %v17448_v15  ;;  %v8177_v36 = vpop.f32.mrf.mxu0 }
 0x74d   :  { %v8178_v42 = vadd.f32 %v8177_v36, %v8029_v9  ;;  %v8433_v18 = vmul.f32 0.2, %v8413_v52  ;;  %vm8423_vm8 = vcmp.ge.f32.partialorder %v8413_v52, 0.0 }
 0x74f   :  { %v8379_v37 = vadd.f32 %v8364_v24, %v8178_v42  ;;  %v8367_v51 = vpop.f32.mrf.mxu1  ;;  %v8443_v28 = vsel %vm8423_vm8, %v8413_v52, %v8433_v18 }
 0x751   :  { %v8404_v1 = vadd.f32 %v16923_v59, %v8379_v37 }
 0x752   :  { %v13401_v11 = vld [vmem:[#allocation3 + $0x14] sm:$0xf0]  }
 0x753   :  { %v12034_v55 = vld [vmem:[#allocation3 + $0x18] sm:$0xf]  ;;  %v8414_v32 = vadd.f32 %v8404_v1, %v8389_v43  ;;  %v12829_v47 = vld [vmem:[#allocation3 + $0x18] sm:$0xf0]  ;;  %v13355_v26 = vor.u32 %v13401_v11, %v13398_v53 }
 0x754   :  { %v13339_v4 = vld [vmem:[#allocation3 + $0x18] sm:$0xff]   ;;  %v8180_v6 = vpop.f32.mrf.mxu0  ;;  %v12035_v2 = vor.u32 %v12829_v47, %v12034_v55 }
 0x755   :  { %8612 = vmatmul.bf16.gmra.mxu2 %v13339_v4  ;;  %9576 = vst [vmem:[#allocation3 + $0x18] sm:$0xf] %v17448_v15  ;;  %vm8424_vm9 = vcmp.ge.f32.partialorder %v8414_v32, 0.0  ;;  %v8434_v45 = vmul.f32 0.2, %v8414_v32  ;;  %v8181_v23 = vadd.f32 %v8180_v6, %v8032_v57  ;;  %v8654_v46 = vshrl.u32 %v13355_v26, 16 }
 0x756   :  { %v8997_v29 = vrot.slane %v12035_v2, 1  ;;  %v8848_v61 = vshll.u32 %v12035_v2, 16  ;;  %v8657_v31 = vshll.u32 %v13355_v26, 16  ;;  %v8852_v27 = vshrl.u32 %v12035_v2, 16 }
 0x757   :  { %v8444_v62 = vsel %vm8424_vm9, %v8414_v32, %v8434_v45  ;;  %v8380_v16 = vadd.f32 %v8367_v51, %v8181_v23  ;;  %v8656_v54 = vrot.slane %v8654_v46, 3 }
 0x758   :  { %v13164_v7 = vpack.c.bf16 %v8444_v62, %v8443_v28  ;;  %v8998_v35 = vsel %vm7023_vm4, %v8995_v25, %v8997_v29  ;;  %v8850_v22 = vrot.slane %v8848_v61, 1  ;;  %v8659_v49 = vrot.slane %v8657_v31, 4  ;;  %v8369_v25 = vpop.f32.mrf.mxu1 }
 0x759   :  { %9071 = vmatmul.bf16.gmra.mxu1 %v8998_v35  ;;  %v8405_v58 = vadd.f32 %v16923_v59, %v8380_v16 }
 0x75a   :  { %13335 = vst [vmem:[#allocation3 + $0x20] sm:$0xff] %v13164_v7   ;;  %v8851_v20 = vsel %vm3014_vm1, %v8846_v38, %v8850_v22  ;;  %v8660_v56 = vor.u32 %v8659_v49, %v8656_v54  ;;  %v8854_v33 = vor.u32 %v8852_v27, %v8850_v22  ;;  %v12862_v27 = vld [vmem:[%s17291_s3 + $0x370] sm:$0xff] }
 0x75b   :  { %8942 = vmatmul.bf16.gmra.mxu0 %v8851_v20  ;;  %v8415_v14 = vadd.f32 %v8405_v58, %v8390_v41 }
 0x75c   :  { %v8182_v3 = vpop.f32.mrf.mxu0  ;;  %v8661_v63 = vsel %vm1308_vm0, %v17001_v44, %v8660_v56 }
 0x75d   :  { %v8183_v21 = vadd.f32 %v8182_v3, %v8034_v34  ;;  %8755 = vmatmul.bf16.gmra.mxu3 %v8661_v63  ;;  %v8435_v0 = vmul.f32 0.2, %v8415_v14  ;;  %vm8425_vm10 = vcmp.ge.f32.partialorder %v8415_v14, 0.0  ;;  %v12863_v63 = vld [vmem:[%s17291_s3 + $0x378] sm:$0xff] }
 0x75e   :  { %9262 = vmatpush.bf16.msrb.mxu2 %v12863_v63 }
 0x75f   :  { %v8381_v12 = vadd.f32 %v8369_v25, %v8183_v21  ;;  %v8445_v39 = vsel %vm8425_vm10, %v8415_v14, %v8435_v0 }
 0x761   :  { %v8406_v48 = vadd.f32 %v16923_v59, %v8381_v12  ;;  %v12830_v60 = vld [vmem:[#allocation3 + $0x20] sm:$0xff] }
 0x762   :  { %v13403_v8 = vld [vmem:[#allocation3 + $0x1c] sm:$0xff]   ;;  %v8856_v17 = vshll.u32 %v12830_v60, 16  ;;  %v8999_v44 = vrot.slane %v12830_v60, 1  ;;  %v8860_v47 = vshrl.u32 %v12830_v60, 16  ;;  %9263 = vmatpush.bf16.msrb.mxu2 %v12862_v27 }
 0x763   :  { %v8416_v10 = vadd.f32 %v8406_v48, %v8391_v5  ;;  %v8663_v50 = vshrl.u32 %v13403_v8, 16  ;;  %v8666_v13 = vshll.u32 %v13403_v8, 16 }
 0x764   :  { %v8858_v24 = vrot.slane %v8856_v17, 1  ;;  %v9000_v42 = vsel %vm7023_vm4, %v8997_v29, %v8999_v44  ;;  %v8825_v29 = vunpack.c.l.b16 %v8786_v19 }
 0x765   :  { %8617 = vmatmul.bf16.gmra.mxu2 %v13164_v7  ;;  %vm8426_vm11 = vcmp.ge.f32.partialorder %v8416_v10, 0.0  ;;  %v8436_v9 = vmul.f32 0.2, %v8416_v10  ;;  %v8665_v40 = vrot.slane %v8663_v50, 3  ;;  %v8668_v36 = vrot.slane %v8666_v13, 4 }
 0x766   :  { %v8859_v37 = vsel %vm3014_vm1, %v8854_v33, %v8858_v24  ;;  %v8862_v6 = vor.u32 %v8860_v47, %v8858_v24  ;;  %v8831_v61 = vpack.c.b16 %v8825_v29, %v8825_v29 }
 0x767   :  { %v8446_v30 = vsel %vm8426_vm11, %v8416_v10, %v8436_v9  ;;  %v8669_v52 = vor.u32 %v8668_v36, %v8665_v40 }
 0x768   :  { %v13169_v59 = vpack.c.bf16 %v8446_v30, %v8445_v39  ;;  %v8872_v62 = vshll.u32 %v8831_v61, 16  ;;  %v9003_v16 = vrot.slane %v8831_v61, 1 }
 0x769   :  { %9076 = vmatmul.bf16.gmra.mxu1 %v9000_v42  ;;  %v8670_v43 = vsel %vm1308_vm0, %v8660_v56, %v8669_v52 }
 0x76a   :  { %13336 = vst [vmem:[#allocation3 + $0x28] sm:$0xff] %v13169_v59   ;;  %v13190_v45 = vunpack.c.h.b16 %v13169_v59  ;;  %v8874_v49 = vrot.slane %v8872_v62, 1  ;;  %v12851_v62 = vld [vmem:[%s17291_s3 + $0x318] sm:$0xff] }
 0x76b   :  { %8947 = vmatmul.bf16.gmra.mxu0 %v8859_v37 }
 0x76c   :  { %v8635_v38 = vpack.c.b16 %v13190_v45, %v13190_v45 }
 0x76d   :  { %8760 = vmatmul.bf16.gmra.mxu3 %v8670_v43 }
 0x76e   :  { %v8681_v31 = vshrl.u32 %v8635_v38, 16  ;;  %v8684_v28 = vshll.u32 %v8635_v38, 16 }
 0x770   :  { %v8683_v7 = vrot.slane %v8681_v31, 3  ;;  %v8686_v35 = vrot.slane %v8684_v28, 4  ;;  %v12857_v28 = vld [vmem:[%s17291_s3 + $0x348] sm:$0xff] }
 0x771   :  { %v12831_v1 = vld [vmem:[#allocation3 + $0x28] sm:$0xff] }
 0x772   :  { %v13404_v57 = vld [vmem:[#allocation3 + $0x24] sm:$0xff]   ;;  %v8864_v11 = vshll.u32 %v12831_v1, 16  ;;  %v9001_v18 = vrot.slane %v12831_v1, 1  ;;  %v8868_v54 = vshrl.u32 %v12831_v1, 16  ;;  %v8687_v58 = vor.u32 %v8686_v35, %v8683_v7  ;;  %v12856_v35 = vld [vmem:[%s17291_s3 + $0x340] sm:$0xff] }
 0x773   :  { %v8672_v55 = vshrl.u32 %v13404_v57, 16  ;;  %v8675_v53 = vshll.u32 %v13404_v57, 16  ;;  %v12855_v57 = vld [vmem:[%s17291_s3 + $0x338] sm:$0xff] }
 0x774   :  { %v8866_v26 = vrot.slane %v8864_v11, 1  ;;  %v9002_v51 = vsel %vm7023_vm4, %v8999_v44, %v9001_v18  ;;  %v9004_v20 = vsel %vm7023_vm4, %v9001_v18, %v9003_v16  ;;  %v17046_v44 = vld [vmem:[%s17295_s6 + $0x1] ss:$0 sm:$0xff]  ;;  %9367 = vmatpush.bf16.msrb.mxu3 %v12855_v57 }
 0x775   :  { %8622 = vmatmul.bf16.gmra.mxu2 %v13169_v59  ;;  %v8674_v32 = vrot.slane %v8672_v55, 3  ;;  %v8677_v4 = vrot.slane %v8675_v53, 4  ;;  %v12861_v59 = vld [vmem:[%s17291_s3 + $0x368] sm:$0xff]  ;;  %v12860_v18 = vld [vmem:[%s17291_s3 + $0x360] sm:$0xff] }
 0x776   :  { %v8867_v23 = vsel %vm3014_vm1, %v8862_v6, %v8866_v26  ;;  %v8870_v22 = vor.u32 %v8868_v54, %v8866_v26  ;;  %9264 = vmatpush.bf16.msrb.mxu2 %v12861_v59  ;;  %v12859_v6 = vld [vmem:[%s17291_s3 + $0x358] sm:$0xff] }
 0x777   :  { %v8678_v2 = vor.u32 %v8677_v4, %v8674_v32  ;;  %v12854_v32 = vld [vmem:[%s17291_s3 + $0x330] sm:$0xff] }
 0x778   :  { %v8875_v56 = vsel %vm3014_vm1, %v8870_v22, %v8874_v49  ;;  %9368 = vmatpush.bf16.msrb.mxu3 %v12854_v32  ;;  %v12850_v22 = vld [vmem:[%s17291_s3 + $0x310] sm:$0xff] }
 0x779   :  { %9081 = vmatmul.bf16.gmra.mxu1 %v9002_v51  ;;  %v8679_v46 = vsel %vm1308_vm0, %v8669_v52, %v8678_v2  ;;  %v8688_v34 = vsel %vm1308_vm0, %v8678_v2, %v8687_v58  ;;  %v12853_v2 = vld [vmem:[%s17291_s3 + $0x328] sm:$0xff] }
 0x77a   :  { %9265 = vmatpush.bf16.msrb.mxu2 %v12860_v18  ;;  %v12849_v58 = vld [vmem:[%s17291_s3 + $0x308] sm:$0xff] }
 0x77b   :  { %8952 = vmatmul.bf16.gmra.mxu0 %v8867_v23  ;;  %v12858_v23 = vld [vmem:[%s17291_s3 + $0x350] sm:$0xff] }
 0x77c   :  { %9369 = vmatpush.bf16.msrb.mxu3 %v12853_v2 }
 0x77d   :  { %8765 = vmatmul.bf16.gmra.mxu3 %v8679_v46  ;;  %v12852_v46 = vld [vmem:[%s17291_s3 + $0x320] sm:$0xff] }
 0x77e   :  { %9266 = vmatpush.bf16.msrb.mxu2 %v12859_v6 }
 0x780   :  { %9370 = vmatpush.bf16.msrb.mxu3 %v12852_v46  ;;  %v17112_v46 = vld [vmem:[#allocation2 + $0x14] sm:$0x10] }
 0x781   :  { %9995 = vst [vmem:[#allocation2 + $0x18] sm:$0xf] %v17448_v15 }
 0x782   :  { %9267 = vmatpush.bf16.msrb.mxu2 %v12858_v23 }
 0x784   :  { %9371 = vmatpush.bf16.msrb.mxu3 %v12851_v62 }
 0x786   :  { %9268 = vmatpush.bf16.msrb.mxu2 %v12857_v28 }
 0x788   :  { %9372 = vmatpush.bf16.msrb.mxu3 %v12850_v22 }
 0x789   :  { %9086 = vmatmul.bf16.gmra.mxu1 %v9004_v20 }
 0x78a   :  { %9269 = vmatpush.bf16.msrb.mxu2 %v12856_v35 }
 0x78b   :  { %8957 = vmatmul.bf16.gmra.mxu0 %v8875_v56 }
 0x78c   :  { %9373 = vmatpush.bf16.msrb.mxu3 %v12849_v58 }
 0x78d   :  { %8770 = vmatmul.bf16.gmra.mxu3 %v8688_v34 }
 0x78e   :  { %v8603_v3 = vpop.f32.mrf.mxu2 }
 0x796   :  { %v8605_v48 = vpop.f32.mrf.mxu2 }
 0x7ae   :  { %v8608_v13 = vpop.f32.mrf.mxu2 }
 0x7b3   :  { %v9067_v14 = vpop.f32.mrf.mxu1 }
 0x7b5   :  { %v8938_v41 = vpop.f32.mrf.mxu0 }
 0x7b6   :  { %v8610_v42 = vpop.f32.mrf.mxu2 }
 0x7bb   :  { %v9069_v17 = vpop.f32.mrf.mxu1 }
 0x7bd   :  { %v8940_v0 = vpop.f32.mrf.mxu0 }
 0x7be   :  { %v8751_v21 = vpop.f32.mrf.mxu3 }
 0x7bf   :  { %v8752_v25 = vadd.f32 %v8751_v21, %v8603_v3  ;;  %v12848_v21 = vld [vmem:[%s17291_s3 + $0x300] sm:$0xff] }
 0x7c0   :  { %9374 = vmatpush.bf16.msrb.mxu3 %v12848_v21 }
 0x7c1   :  { %v8963_v12 = vadd.f32 %v8938_v41, %v8752_v25 }
 0x7c3   :  { %v9092_v5 = vadd.f32 %v9067_v14, %v8963_v12 }
 0x7c5   :  { %9102 = vst [vmem:[#allocation4] sm:$0xff] %v9092_v5 }
 0x7c6   :  { %v8753_v60 = vpop.f32.mrf.mxu3 }
 0x7c7   :  { %v8754_v8 = vadd.f32 %v8753_v60, %v8605_v48 }
 0x7c9   :  { %v8964_v10 = vadd.f32 %v8940_v0, %v8754_v8 }
 0x7cb   :  { %v9093_v50 = vadd.f32 %v9069_v17, %v8964_v10 }
 0x7cd   :  { %9103 = vst [vmem:[#allocation4 + $0x8] sm:$0xff] %v9093_v50 }
 0x7d4   :  { %v9112_v9 = vld [vmem:[#allocation4] ss:$2 sm:$0xff] }
 0x7d5   :  { %v9126_v33 = vadd.f32 %v17046_v44, %v9112_v9 }
 0x7d6   :  { %v9072_v24 = vpop.f32.mrf.mxu1 }
 0x7d7   :  { %vm9131_vm4 = vcmp.ge.f32.partialorder %v9126_v33, 0.0  ;;  %v9136_v40 = vmul.f32 0.2, %v9126_v33 }
 0x7d8   :  { %v8943_v36 = vpop.f32.mrf.mxu0  ;;  %v8613_v53 = vpop.f32.mrf.mxu2 }
 0x7d9   :  { %v9141_v39 = vsel %vm9131_vm4, %v9126_v33, %v9136_v40 }
 0x7da   :  { %v9146_v30 = vpack.c.bf16 %v9141_v39, %v9141_v39 }
 0x7dc   :  { %9151 = vst [vmem:[#allocation2 + $0x4] sm:$0xf] %v9146_v30  ;;  %v9158_v30 = vld [vmem:[#allocation2] sm:$0x8] }
 0x7de   :  { %v9074_v52 = vpop.f32.mrf.mxu1 }
 0x7e0   :  { %v8756_v37 = vpop.f32.mrf.mxu3  ;;  %v8945_v43 = vpop.f32.mrf.mxu0 }
 0x7e1   :  { %v8757_v1 = vadd.f32 %v8756_v37, %v8608_v13  ;;  %v8615_v29 = vpop.f32.mrf.mxu2 }
 0x7e3   :  { %v8965_v11 = vadd.f32 %v8943_v36, %v8757_v1  ;;  %v17093_v39 = vld [vmem:[#allocation2 + $0x4] sm:$0xf]  ;;  %v12874_v1 = vld [vmem:[%s17291_s3 + $0x3b8] sm:$0xff] }
 0x7e4   :  { %v9203_v37 = vunpack.c.l.b16 %v17093_v39  ;;  %9502 = vmatpush.bf16.msra.mxu2 %v12874_v1 }
 0x7e5   :  { %v9094_v55 = vadd.f32 %v9072_v24, %v8965_v11 }
 0x7e6   :  { %v9077_v51 = vpop.f32.mrf.mxu1 }
 0x7e7   :  { %9104 = vst [vmem:[#allocation4 + $0x10] sm:$0xff] %v9094_v55  ;;  %v12873_v55 = vld [vmem:[%s17291_s3 + $0x3b0] sm:$0xff] }
 0x7e8   :  { %v8758_v4 = vpop.f32.mrf.mxu3  ;;  %v8948_v47 = vpop.f32.mrf.mxu0  ;;  %9503 = vmatpush.bf16.msra.mxu2 %v12873_v55 }
 0x7e9   :  { %v8759_v26 = vadd.f32 %v8758_v4, %v8610_v42  ;;  %v8618_v56 = vpop.f32.mrf.mxu2 }
 0x7eb   :  { %v8966_v19 = vadd.f32 %v8945_v43, %v8759_v26  ;;  %v9286_v43 = vunpack.c.l.b16 %v9158_v30 }
 0x7ed   :  { %v9095_v45 = vadd.f32 %v9074_v52, %v8966_v19  ;;  %v9287_v32 = vpack.c.b16 %v9203_v37, %v9286_v43 }
 0x7ee   :  { %v9079_v54 = vpop.f32.mrf.mxu1 }
 0x7ef   :  { %9105 = vst [vmem:[#allocation4 + $0x18] sm:$0xff] %v9095_v45  ;;  %v9291_v19 = vshrl.u32 %v9287_v32, 16  ;;  %v9294_v23 = vshll.u32 %v9287_v32, 16 }
 0x7f0   :  { %v8761_v38 = vpop.f32.mrf.mxu3  ;;  %v8950_v31 = vpop.f32.mrf.mxu0 }
 0x7f1   :  { %v8762_v61 = vadd.f32 %v8761_v38, %v8613_v53  ;;  %v8620_v60 = vpop.f32.mrf.mxu2  ;;  %v9296_v35 = vrot.slane %v9294_v23, 4 }
 0x7f3   :  { %v8967_v16 = vadd.f32 %v8948_v47, %v8762_v61  ;;  %v12872_v47 = vld [vmem:[%s17291_s3 + $0x3a8] sm:$0xff] }
 0x7f4   :  { %9504 = vmatpush.bf16.msra.mxu2 %v12872_v47 }
 0x7f5   :  { %v9096_v7 = vadd.f32 %v9077_v51, %v8967_v16  ;;  %v9293_v16 = vrot.slane %v9291_v19, 3 }
 0x7f6   :  { %v9082_v41 = vpop.f32.mrf.mxu1  ;;  %v9114_v25 = vld [vmem:[#allocation4 + $0x10] ss:$2 sm:$0xff] }
 0x7f7   :  { %9106 = vst [vmem:[#allocation4 + $0x20] sm:$0xff] %v9096_v7  ;;  %v9127_v5 = vadd.f32 %v17046_v44, %v9114_v25  ;;  %v12870_v25 = vld [vmem:[%s17291_s3 + $0x398] sm:$0xff] }
 0x7f8   :  { %v8763_v49 = vpop.f32.mrf.mxu3  ;;  %v8953_v3 = vpop.f32.mrf.mxu0 }
 0x7f9   :  { %v8764_v20 = vadd.f32 %v8763_v49, %v8615_v29  ;;  %v9137_v10 = vmul.f32 0.2, %v9127_v5  ;;  %vm9132_vm12 = vcmp.ge.f32.partialorder %v9127_v5, 0.0  ;;  %v8623_v52 = vpop.f32.mrf.mxu2 }
 0x7fb   :  { %v8968_v34 = vadd.f32 %v8950_v31, %v8764_v20  ;;  %v9142_v24 = vsel %vm9132_vm12, %v9127_v5, %v9137_v10 }
 0x7fd   :  { %v9097_v63 = vadd.f32 %v9079_v54, %v8968_v34  ;;  %v12871_v54 = vld [vmem:[%s17291_s3 + $0x3a0] sm:$0xff] }
 0x7fe   :  { %v9084_v50 = vpop.f32.mrf.mxu1  ;;  %9505 = vmatpush.bf16.msra.mxu2 %v12871_v54 }
 0x7ff   :  { %9107 = vst [vmem:[#allocation4 + $0x28] sm:$0xff] %v9097_v63 }
 0x800   :  { %v8766_v14 = vpop.f32.mrf.mxu3  ;;  %v8955_v0 = vpop.f32.mrf.mxu0 }
 0x801   :  { %v8767_v12 = vadd.f32 %v8766_v14, %v8618_v56  ;;  %v8625_v29 = vpop.f32.mrf.mxu2 }
 0x802   :  { %9506 = vmatpush.bf16.msra.mxu2 %v12870_v25  ;;  %v12887_v25 = vld [vmem:[%s17291_s3 + $0x420] sm:$0xff] }
 0x803   :  { %v8969_v48 = vadd.f32 %v8953_v3, %v8767_v12  ;;  %v9297_v3 = vor.u32 %v9296_v35, %v9293_v16  ;;  %v12869_v12 = vld [vmem:[%s17291_s3 + $0x390] sm:$0xff]  ;;  %v12901_v16 = vld [vmem:[%s17291_s3 + $0x478] sm:$0xff] }
 0x804   :  { %9921 = vmatpush.bf16.msra.mxu1 %v12901_v16  ;;  %v12881_v35 = vld [vmem:[%s17291_s3 + $0x3f0] sm:$0xff] }
 0x805   :  { %v9098_v8 = vadd.f32 %v9082_v41, %v8969_v48 }
 0x806   :  { %v9116_v27 = vld [vmem:[#allocation4 + $0x20] ss:$2 sm:$0xff]  ;;  %v9087_v18 = vpop.f32.mrf.mxu1  ;;  %9507 = vmatpush.bf16.msra.mxu2 %v12869_v12 }
 0x807   :  { %v9128_v17 = vadd.f32 %v17046_v44, %v9116_v27  ;;  %9108 = vst [vmem:[#allocation4 + $0x30] sm:$0xff] %v9098_v8  ;;  %v12868_v27 = vld [vmem:[%s17291_s3 + $0x388] sm:$0xff] }
 0x808   :  { %v8768_v13 = vpop.f32.mrf.mxu3  ;;  %v8958_v57 = vpop.f32.mrf.mxu0 }
 0x809   :  { %vm9133_vm13 = vcmp.ge.f32.partialorder %v9128_v17, 0.0  ;;  %v9138_v9 = vmul.f32 0.2, %v9128_v17  ;;  %v8769_v33 = vadd.f32 %v8768_v13, %v8620_v60 }
 0x80a   :  { %9508 = vmatpush.bf16.msra.mxu2 %v12868_v27  ;;  %v12898_v27 = vld [vmem:[%s17291_s3 + $0x460] sm:$0xff] }
 0x80b   :  { %v9143_v40 = vsel %vm9133_vm13, %v9128_v17, %v9138_v9  ;;  %v8970_v36 = vadd.f32 %v8955_v0, %v8769_v33 }
 0x80c   :  { %v13198_v59 = vpack.c.bf16 %v9143_v40, %v9142_v24 }
 0x80d   :  { %v9099_v42 = vadd.f32 %v9084_v50, %v8970_v36  ;;  %v12867_v50 = vld [vmem:[%s17291_s3 + $0x380] sm:$0xff] }
 0x80e   :  { %13370 = vst [vmem:[#allocation2 + $0x8] sm:$0xff] %v13198_v59   ;;  %v9089_v20 = vpop.f32.mrf.mxu1  ;;  %9509 = vmatpush.bf16.msra.mxu2 %v12867_v50 }
 0x80f   :  { %9156 = vst [vmem:[#allocation2 + $0xc] sm:$0xf] %v17448_v15 }
 0x810   :  { %9109 = vst [vmem:[#allocation4 + $0x38] sm:$0xff] %v9099_v42  ;;  %v8771_v11 = vpop.f32.mrf.mxu3  ;;  %v8960_v62 = vpop.f32.mrf.mxu0 }
 0x811   :  { %v8772_v53 = vadd.f32 %v8771_v11, %v8623_v52 }
 0x813   :  { %v8971_v4 = vadd.f32 %v8958_v57, %v8772_v53 }
 0x815   :  { %v9100_v26 = vadd.f32 %v9087_v18, %v8971_v4  ;;  %v17106_v51 = vld [vmem:[#allocation2 + $0x8] sm:$0xf] }
 0x816   :  { %v9204_v6 = vunpack.c.l.b16 %v17106_v51  ;;  %v17109_v2 = vld [vmem:[#allocation2 + $0xc] sm:$0xf]  ;;  %v12864_v1 = vld [vmem:[#allocation2 + $0x4] sm:$0xff] }
 0x817   :  { %9110 = vst [vmem:[#allocation4 + $0x40] sm:$0xff] %v9100_v26  ;;  %v9205_v45 = vunpack.c.l.b16 %v17109_v2  ;;  %v9118_v41 = vld [vmem:[#allocation4 + $0x30] ss:$2 sm:$0xff]  ;;  %v9431_v11 = vshll.u32 %v12864_v1, 16  ;;  %v9429_v18 = vshrl.u32 %v12864_v1, 16  ;;  %v12876_v1 = vld [vmem:[%s17291_s3 + $0x3c8] sm:$0xff] }
 0x818   :  { %v8773_v38 = vpop.f32.mrf.mxu3  ;;  %v9208_v61 = vpack.c.b16 %v9204_v6, %v9203_v37  ;;  %v9129_v14 = vadd.f32 %v17046_v44, %v9118_v41 }
 0x819   :  { %v8774_v31 = vadd.f32 %v8773_v38, %v8625_v29  ;;  %v9288_v28 = vpack.c.b16 %v9205_v45, %v9204_v6  ;;  %v9433_v53 = vrot.slane %v9431_v11, 1 }
 0x81a   :  { %9270 = vmatmul.bf16.vlgmr.msrb.gmra.mxu2 %v9208_v61  ;;  %v9139_v48 = vmul.f32 0.2, %v9129_v14  ;;  %vm9134_vm14 = vcmp.ge.f32.partialorder %v9129_v14, 0.0 }
 0x81b   :  { %v8972_v7 = vadd.f32 %v8960_v62, %v8774_v31  ;;  %v9299_v22 = vshrl.u32 %v9288_v28, 16  ;;  %v9302_v49 = vshll.u32 %v9288_v28, 16  ;;  %v9434_v4 = vor.u32 %v9433_v53, %v9429_v18  ;;  %v12882_v62 = vld [vmem:[%s17291_s3 + $0x3f8] sm:$0xff]  ;;  %v12896_v53 = vld [vmem:[%s17291_s3 + $0x450] sm:$0xff]  ;;  %v12875_v18 = vld [vmem:[%s17291_s3 + $0x3c0] sm:$0xff] }
 0x81c   :  { %v9144_v0 = vsel %vm9134_vm14, %v9129_v14, %v9139_v48  ;;  %9786 = vmatpush.bf16.msra.mxu0 %v12882_v62  ;;  %13405 = vmatpush.bf16.msrb.mxu2 %v12882_v62  ;;  %v12899_v14 = vld [vmem:[%s17291_s3 + $0x468] sm:$0xff]  ;;  %v12886_v48 = vld [vmem:[%s17291_s3 + $0x418] sm:$0xff] }
 0x81d   :  { %v9101_v56 = vadd.f32 %v9089_v20, %v8972_v7  ;;  %v9301_v58 = vrot.slane %v9299_v22, 3  ;;  %v9304_v34 = vrot.slane %v9302_v49, 4  ;;  %v12890_v7 = vld [vmem:[%s17291_s3 + $0x438] sm:$0xff]  ;;  %v12889_v22 = vld [vmem:[%s17291_s3 + $0x430] sm:$0xff] }
 0x81e   :  { %9681 = vmatpush.bf16.msra.mxu3 %v12890_v7  ;;  %v9577_v7 = vld [vmem:[#allocation3] sm:$0x8] }
 0x81f   :  { %9111 = vst [vmem:[#allocation4 + $0x48] sm:$0xff] %v9101_v56  ;;  %v9305_v63 = vor.u32 %v9304_v34, %v9301_v58  ;;  %v12900_v34 = vld [vmem:[%s17291_s3 + $0x470] sm:$0xff] }
 0x820   :  { %9787 = vmatpush.bf16.msra.mxu0 %v12881_v35  ;;  %13406 = vmatpush.bf16.msrb.mxu2 %v12881_v35 }
 0x821   :  { %v9306_v21 = vsel %vm1308_vm0, %v9297_v3, %v9305_v63  ;;  %v12888_v3 = vld [vmem:[%s17291_s3 + $0x428] sm:$0xff]  ;;  %9922 = vmatpush.bf16.msra.mxu1 %v12900_v34 }
 0x822   :  { %9375 = vmatmul.bf16.vlgmr.msrb.gmra.mxu3 %v9306_v21  ;;  %v12880_v21 = vld [vmem:[%s17291_s3 + $0x3e8] sm:$0xff] }
 0x823   :  { %9682 = vmatpush.bf16.msra.mxu3 %v12889_v22 }
 0x824   :  { %9788 = vmatpush.bf16.msra.mxu0 %v12880_v21  ;;  %13407 = vmatpush.bf16.msrb.mxu2 %v12880_v21 }
 0x825   :  { %9923 = vmatpush.bf16.msra.mxu1 %v12899_v14 }
 0x826   :  { %v9120_v5 = vld [vmem:[#allocation4 + $0x40] ss:$2 sm:$0xff] }
 0x827   :  { %v9130_v60 = vadd.f32 %v17046_v44, %v9120_v5  ;;  %9683 = vmatpush.bf16.msra.mxu3 %v12888_v3 }
 0x829   :  { %vm9135_vm15 = vcmp.ge.f32.partialorder %v9130_v60, 0.0  ;;  %v9140_v8 = vmul.f32 0.2, %v9130_v60  ;;  %9924 = vmatpush.bf16.msra.mxu1 %v12898_v27 }
 0x82b   :  { %v9145_v10 = vsel %vm9135_vm15, %v9130_v60, %v9140_v8  ;;  %9684 = vmatpush.bf16.msra.mxu3 %v12887_v25  ;;  %v12879_v60 = vld [vmem:[%s17291_s3 + $0x3e0] sm:$0xff]  ;;  %v12885_v8 = vld [vmem:[%s17291_s3 + $0x410] sm:$0xff] }
 0x82c   :  { %v13203_v17 = vpack.c.bf16 %v9145_v10, %v9144_v0  ;;  %9789 = vmatpush.bf16.msra.mxu0 %v12879_v60  ;;  %13408 = vmatpush.bf16.msrb.mxu2 %v12879_v60 }
 0x82e   :  { %13371 = vst [vmem:[#allocation2 + $0x10] sm:$0xff] %v13203_v17   ;;  %v17200_v17 = vld [vmem:[%s17293_s4 + $0x4] ss:$0 sm:$0xff] }
 0x82f   :  { %9685 = vmatpush.bf16.msra.mxu3 %v12886_v48 }
 0x833   :  { %9686 = vmatpush.bf16.msra.mxu3 %v12885_v8 }
 0x835   :  { %v17133_v13 = vld [vmem:[#allocation2 + $0x10] sm:$0xf]  ;;  %v17135_v44 = vld [vmem:[#allocation2 + $0x14] sm:$0xf] }
 0x836   :  { %v9206_v9 = vunpack.c.l.b16 %v17133_v13  ;;  %v9207_v33 = vunpack.c.l.b16 %v17135_v44  ;;  %v12865_v57 = vld [vmem:[#allocation2 + $0xc] sm:$0xff]  ;;  %v12247_v26 = vld [vmem:[#allocation2 + $0x14] sm:$0xf]  ;;  %v9534_v25 = vunpack.c.l.bf16 %v17135_v44 }
 0x837   :  { %v9436_v55 = vshll.u32 %v12865_v57, 16  ;;  %v12248_v6 = vor.u32 %v17112_v46, %v12247_v26 }
 0x838   :  { %v9209_v24 = vpack.c.b16 %v9206_v9, %v9205_v45  ;;  %v9289_v40 = vpack.c.b16 %v9207_v33, %v9206_v9  ;;  %v9210_v43 = vpack.c.b16 %v9207_v33, %v9207_v33  ;;  %v9440_v45 = vshrl.u32 %v12865_v57, 16  ;;  %v12884_v9 = vld [vmem:[%s17291_s3 + $0x408] sm:$0xff]  ;;  %v12878_v33 = vld [vmem:[%s17291_s3 + $0x3d8] sm:$0xff] }
 0x839   :  { %v9438_v32 = vrot.slane %v9436_v55, 1  ;;  %v9444_v19 = vshll.u32 %v12248_v6, 16  ;;  %v9448_v61 = vshrl.u32 %v12248_v6, 16  ;;  %9687 = vmatpush.bf16.msra.mxu3 %v12884_v9  ;;  %9790 = vmatpush.bf16.msra.mxu0 %v12878_v33  ;;  %v12895_v6 = vld [vmem:[%s17291_s3 + $0x448] sm:$0xff] }
 0x83a   :  { %9275 = vmatmul.bf16.gmra.mxu2 %v9209_v24  ;;  %v9308_v36 = vshrl.u32 %v9289_v40, 16  ;;  %v9311_v30 = vshll.u32 %v9289_v40, 16  ;;  %v12897_v40 = vld [vmem:[%s17291_s3 + $0x458] sm:$0xff] }
 0x83b   :  { %v9439_v47 = vsel %vm3014_vm1, %v9434_v4, %v9438_v32  ;;  %v9442_v23 = vor.u32 %v9440_v45, %v9438_v32  ;;  %v9446_v29 = vrot.slane %v9444_v19, 1  ;;  %9925 = vmatpush.bf16.msra.mxu1 %v12897_v40  ;;  %13409 = vmatpush.bf16.msrb.mxu2 %v12878_v33 }
 0x83c   :  { %v9310_v59 = vrot.slane %v9308_v36, 3  ;;  %v9313_v42 = vrot.slane %v9311_v30, 4  ;;  %v9530_v36 = vunpack.c.l.bf16 %v17093_v39 }
 0x83d   :  { %v9447_v38 = vsel %vm3014_vm1, %v9442_v23, %v9446_v29  ;;  %v9450_v31 = vor.u32 %v9448_v61, %v9446_v29  ;;  %v9532_v23 = vunpack.c.l.bf16 %v17109_v2 }
 0x83e   :  { %v9314_v52 = vor.u32 %v9313_v42, %v9310_v59  ;;  %v12883_v59 = vld [vmem:[%s17291_s3 + $0x400] sm:$0xff]  ;;  %v12877_v42 = vld [vmem:[%s17291_s3 + $0x3d0] sm:$0xff] }
 0x83f   :  { %9688 = vmatpush.bf16.msra.mxu3 %v12883_v59  ;;  %9791 = vmatpush.bf16.msra.mxu0 %v12877_v42 }
 0x840   :  { %v9315_v37 = vsel %vm1308_vm0, %v9305_v63, %v9314_v52  ;;  %13410 = vmatpush.bf16.msrb.mxu2 %v12877_v42  ;;  %9926 = vmatpush.bf16.msra.mxu1 %v12896_v53 }
 0x841   :  { %9380 = vmatmul.bf16.gmra.mxu3 %v9315_v37 }
 0x843   :  { %13413 = vmatpush.bf16.msrb.mxu3 %v12901_v16  ;;  %9792 = vmatpush.bf16.msra.mxu0 %v12876_v1 }
 0x844   :  { %13411 = vmatpush.bf16.msrb.mxu2 %v12876_v1  ;;  %9927 = vmatpush.bf16.msra.mxu1 %v12895_v6 }
 0x847   :  { %13414 = vmatpush.bf16.msrb.mxu3 %v12900_v34  ;;  %9793 = vmatpush.bf16.msra.mxu0 %v12875_v18 }
 0x848   :  { %13412 = vmatpush.bf16.msrb.mxu2 %v12875_v18 }
 0x84a   :  { %9280 = vmatmul.bf16.gmra.mxu2 %v9210_v43 }
 0x84b   :  { %13415 = vmatpush.bf16.msrb.mxu3 %v12899_v14 }
 0x84f   :  { %13416 = vmatpush.bf16.msrb.mxu3 %v12898_v27 }
 0x851   :  { %9385 = vmatmul.bf16.gmra.mxu3 %v9314_v52 }
 0x853   :  { %13417 = vmatpush.bf16.msrb.mxu3 %v12897_v40 }
 0x857   :  { %13418 = vmatpush.bf16.msrb.mxu3 %v12896_v53 }
 0x85a   :  { %9510 = vmatmul.bf16.vlgmr.msra.gmra.mxu2 %v9439_v47  ;;  %v9531_v47 = vunpack.c.l.bf16 %v17106_v51  ;;  %v12894_v51 = vld [vmem:[%s17291_s3 + $0x440] sm:$0xff] }
 0x85b   :  { %9928 = vmatpush.bf16.msra.mxu1 %v12894_v51  ;;  %13419 = vmatpush.bf16.msrb.mxu3 %v12895_v6 }
 0x85f   :  { %13420 = vmatpush.bf16.msrb.mxu3 %v12894_v51 }
 0x86a   :  { %9515 = vmatmul.bf16.gmra.mxu2 %v9447_v38 }
 0x87a   :  { %9520 = vmatmul.bf16.gmra.mxu2 %v9450_v31 }
 0x89d   :  { %v9271_v28 = vpop.f32.mrf.mxu2 }
 0x8a5   :  { %v9376_v46 = vpop.f32.mrf.mxu3  ;;  %v9273_v54 = vpop.f32.mrf.mxu2 }
 0x8a6   :  { %v9377_v0 = vadd.f32 %v9376_v46, %v9271_v28 }
 0x8ad   :  { %v9378_v49 = vpop.f32.mrf.mxu3 }
 0x8ae   :  { %v9379_v37 = vadd.f32 %v9378_v49, %v9273_v54  ;;  %v9705_v49 = vunpack.c.l.b16 %v9577_v7 }
 0x8bd   :  { %v17158_v20 = vpop.f32.mrf.mxu2 }
 0x8c4   :  { %v17160_v56 = vpop.f32.mrf.mxu3 }
 0x8c5   :  { %v17162_v58 = vpop.f32.mrf.mxu2  ;;  %v9382_v4 = vadd.f32 %v17160_v56, %v17158_v20 }
 0x8cc   :  { %v17170_v63 = vpop.f32.mrf.mxu3 }
 0x8cd   :  { %v17172_v41 = vpop.f32.mrf.mxu2  ;;  %v9384_v31 = vadd.f32 %v17170_v63, %v17162_v58  ;;  %v9533_v58 = vunpack.c.l.bf16 %v17133_v13 }
 0x8d4   :  { %v17183_v12 = vpop.f32.mrf.mxu3 }
 0x8d5   :  { %v9283_v5 = vpop.f32.mrf.mxu2  ;;  %v9387_v56 = vadd.f32 %v17183_v12, %v17172_v41 }
 0x8dc   :  { %v9388_v10 = vpop.f32.mrf.mxu3 }
 0x8dd   :  { %v9511_v50 = vpop.f32.mrf.mxu2 }
 0x8de   :  { %v9525_v24 = vadd.f32 %v9511_v50, %v9377_v0 }
 0x8e0   :  { %v9540_v30 = vadd.f32 %v17200_v17, %v9525_v24 }
 0x8e2   :  { %v9545_v52 = vadd.f32 %v9540_v30, %v9530_v36 }
 0x8e4   :  { %vm9550_vm2 = vcmp.ge.f32.partialorder %v9545_v52, 0.0  ;;  %v9555_v43 = vmul.f32 0.2, %v9545_v52 }
 0x8e5   :  { %v9513_v39 = vpop.f32.mrf.mxu2 }
 0x8e6   :  { %v9560_v57 = vsel %vm9550_vm2, %v9545_v52, %v9555_v43  ;;  %v9526_v11 = vadd.f32 %v9513_v39, %v9379_v37 }
 0x8e7   :  { %v9565_v55 = vpack.c.bf16 %v9560_v57, %v9560_v57 }
 0x8e8   :  { %v9541_v32 = vadd.f32 %v17200_v17, %v9526_v11 }
 0x8e9   :  { %9570 = vst [vmem:[#allocation3 + $0x4] sm:$0xf] %v9565_v55 }
 0x8ea   :  { %v9546_v19 = vadd.f32 %v9541_v32, %v9531_v47 }
 0x8ec   :  { %v9556_v38 = vmul.f32 0.2, %v9546_v19  ;;  %vm9551_vm3 = vcmp.ge.f32.partialorder %v9546_v19, 0.0 }
 0x8ed   :  { %v9516_v26 = vpop.f32.mrf.mxu2 }
 0x8ee   :  { %v9527_v45 = vadd.f32 %v9516_v26, %v9382_v4  ;;  %v9561_v2 = vsel %vm9551_vm3, %v9546_v19, %v9556_v38 }
 0x8f0   :  { %v9542_v29 = vadd.f32 %v17200_v17, %v9527_v45  ;;  %v17242_v54 = vld [vmem:[#allocation3 + $0x4] sm:$0xf] }
 0x8f1   :  { %v9622_v22 = vunpack.c.l.b16 %v17242_v54 }
 0x8f2   :  { %v9547_v61 = vadd.f32 %v9542_v29, %v9532_v23 }
 0x8f3   :  { %v9706_v3 = vpack.c.b16 %v9622_v22, %v9705_v49 }
 0x8f4   :  { %vm9552_vm5 = vcmp.ge.f32.partialorder %v9547_v61, 0.0  ;;  %v9557_v28 = vmul.f32 0.2, %v9547_v61 }
 0x8f5   :  { %v9518_v62 = vpop.f32.mrf.mxu2  ;;  %v9710_v8 = vshrl.u32 %v9706_v3, 16  ;;  %v9713_v41 = vshll.u32 %v9706_v3, 16 }
 0x8f6   :  { %v9562_v16 = vsel %vm9552_vm5, %v9547_v61, %v9557_v28  ;;  %v9528_v46 = vadd.f32 %v9518_v62, %v9384_v31  ;;  %v12893_v28 = vld [vmem:[#allocation3 + $0x14] sm:$0x10] }
 0x8f7   :  { %v13208_v35 = vpack.c.bf16 %v9562_v16, %v9561_v2  ;;  %v9715_v9 = vrot.slane %v9713_v41, 4  ;;  %v9949_v41 = vunpack.c.l.bf16 %v17242_v54 }
 0x8f8   :  { %v9543_v20 = vadd.f32 %v17200_v17, %v9528_v46 }
 0x8f9   :  { %13372 = vst [vmem:[#allocation3 + $0x8] sm:$0xff] %v13208_v35  }
 0x8fa   :  { %9575 = vst [vmem:[#allocation3 + $0xc] sm:$0xf] %v17448_v15  ;;  %v9548_v63 = vadd.f32 %v9543_v20, %v9533_v58 }
 0x8fc   :  { %v9558_v12 = vmul.f32 0.2, %v9548_v63  ;;  %vm9553_vm6 = vcmp.ge.f32.partialorder %v9548_v63, 0.0 }
 0x8fd   :  { %v9521_v34 = vpop.f32.mrf.mxu2 }
 0x8fe   :  { %v9529_v21 = vadd.f32 %v9521_v34, %v9387_v56  ;;  %v9563_v33 = vsel %vm9553_vm6, %v9548_v63, %v9558_v12 }
 0x900   :  { %v9544_v14 = vadd.f32 %v17200_v17, %v9529_v21  ;;  %v17252_v5 = vld [vmem:[#allocation3 + $0x8] sm:$0xf]  ;;  %v9712_v17 = vrot.slane %v9710_v8, 3 }
 0x901   :  { %v9623_v48 = vunpack.c.l.b16 %v17252_v5  ;;  %v17255_v60 = vld [vmem:[#allocation3 + $0xc] sm:$0xf]  ;;  %v12891_v52 = vld [vmem:[#allocation3 + $0x4] sm:$0xff] }
 0x902   :  { %v9549_v13 = vadd.f32 %v9544_v14, %v9534_v25  ;;  %v9624_v27 = vunpack.c.l.b16 %v17255_v60  ;;  %v9716_v37 = vor.u32 %v9715_v9, %v9712_v17  ;;  %v9850_v1 = vshll.u32 %v12891_v52, 16  ;;  %v13430_v25 = vld [vmem:[%s17293_s4 + $0x5] ss:$0 sm:$0xff] }
 0x903   :  { %v9627_v0 = vpack.c.b16 %v9623_v48, %v9622_v22  ;;  %v9848_v4 = vshrl.u32 %v12891_v52, 16 }
 0x904   :  { %vm9554_vm7 = vcmp.ge.f32.partialorder %v9549_v13, 0.0  ;;  %v9559_v10 = vmul.f32 0.2, %v9549_v13  ;;  %v9707_v44 = vpack.c.b16 %v9624_v27, %v9623_v48  ;;  %v9852_v53 = vrot.slane %v9850_v1, 1 }
 0x905   :  { %v9523_v50 = vpop.f32.mrf.mxu2  ;;  %9689 = vmatmul.bf16.vlgmr.msra.gmra.mxu3 %v9627_v0 }
 0x906   :  { %v9564_v24 = vsel %vm9554_vm7, %v9549_v13, %v9559_v10  ;;  %v9718_v40 = vshrl.u32 %v9707_v44, 16  ;;  %v9721_v36 = vshll.u32 %v9707_v44, 16  ;;  %v9853_v19 = vor.u32 %v9852_v53, %v9848_v4 }
 0x907   :  { %v13213_v30 = vpack.c.bf16 %v9564_v24, %v9563_v33 }
 0x908   :  { %v9720_v59 = vrot.slane %v9718_v40, 3  ;;  %v9723_v42 = vrot.slane %v9721_v36, 4 }
 0x909   :  { %13373 = vst [vmem:[#allocation3 + $0x10] sm:$0xff] %v13213_v30  }
 0x90a   :  { %v9724_v43 = vor.u32 %v9723_v42, %v9720_v59  ;;  %v9950_v59 = vunpack.c.l.bf16 %v17252_v5 }
 0x90c   :  { %v9725_v39 = vsel %vm1308_vm0, %v9716_v37, %v9724_v43  ;;  %v9951_v37 = vunpack.c.l.bf16 %v17255_v60 }
 0x90d   :  { %9794 = vmatmul.bf16.vlgmr.msra.gmra.mxu0 %v9725_v39 }
 0x910   :  { %v17259_v57 = vld [vmem:[#allocation3 + $0x10] sm:$0xf]  ;;  %v17261_v11 = vld [vmem:[#allocation3 + $0x14] sm:$0xf] }
 0x911   :  { %v12892_v55 = vld [vmem:[#allocation3 + $0xc] sm:$0xff]  ;;  %v9625_v18 = vunpack.c.l.b16 %v17259_v57  ;;  %v9626_v32 = vunpack.c.l.b16 %v17261_v11  ;;  %v12404_v31 = vld [vmem:[#allocation3 + $0x14] sm:$0xf] }
 0x912   :  { %v9855_v47 = vshll.u32 %v12892_v55, 16  ;;  %v12405_v2 = vor.u32 %v12893_v28, %v12404_v31  ;;  %v9859_v7 = vshrl.u32 %v12892_v55, 16 }
 0x913   :  { %v9628_v26 = vpack.c.b16 %v9625_v18, %v9624_v27  ;;  %v9708_v6 = vpack.c.b16 %v9626_v32, %v9625_v18  ;;  %v9629_v49 = vpack.c.b16 %v9626_v32, %v9626_v32 }
 0x914   :  { %v9857_v45 = vrot.slane %v9855_v47, 1  ;;  %v9863_v46 = vshll.u32 %v12405_v2, 16  ;;  %v9867_v56 = vshrl.u32 %v12405_v2, 16 }
 0x915   :  { %9694 = vmatmul.bf16.gmra.mxu3 %v9628_v26  ;;  %v9727_v23 = vshrl.u32 %v9708_v6, 16  ;;  %v9730_v29 = vshll.u32 %v9708_v6, 16 }
 0x916   :  { %v9858_v38 = vsel %vm3014_vm1, %v9853_v19, %v9857_v45  ;;  %v9861_v35 = vor.u32 %v9859_v7, %v9857_v45  ;;  %v9865_v22 = vrot.slane %v9863_v46, 1 }
 0x917   :  { %v9729_v61 = vrot.slane %v9727_v23, 3  ;;  %v9732_v51 = vrot.slane %v9730_v29, 4  ;;  %9929 = vmatmul.bf16.vlgmr.msra.gmra.mxu1 %v9858_v38 }
 0x918   :  { %v9866_v20 = vsel %vm3014_vm1, %v9861_v35, %v9865_v22  ;;  %v9869_v58 = vor.u32 %v9867_v56, %v9865_v22 }
 0x919   :  { %v9733_v62 = vor.u32 %v9732_v51, %v9729_v61  ;;  %v9952_v51 = vunpack.c.l.bf16 %v17259_v57 }
 0x91b   :  { %9804 = vmatmul.bf16.vlgmr.msrb.gmra.mxu2 %v9733_v62  ;;  %v9734_v16 = vsel %vm1308_vm0, %v9724_v43, %v9733_v62 }
 0x91d   :  { %9799 = vmatmul.bf16.gmra.mxu0 %v9734_v16  ;;  %v9953_v16 = vunpack.c.l.bf16 %v17261_v11 }
 0x925   :  { %9699 = vmatmul.bf16.gmra.mxu3 %v9629_v49 }
 0x927   :  { %9934 = vmatmul.bf16.gmra.mxu1 %v9866_v20 }
 0x935   :  { %9939 = vmatmul.bf16.vlgmr.msrb.gmra.mxu3 %v9869_v58 }
 0x988   :  { %v9690_v34 = vpop.f32.mrf.mxu3 }
 0x98a   :  { %v9795_v3 = vpop.f32.mrf.mxu0 }
 0x98b   :  { %v9796_v21 = vadd.f32 %v9795_v3, %v9690_v34 }
 0x990   :  { %v9692_v63 = vpop.f32.mrf.mxu3 }
 0x992   :  { %v9797_v8 = vpop.f32.mrf.mxu0 }
 0x993   :  { %v9798_v0 = vadd.f32 %v9797_v8, %v9692_v63 }
 0x994   :  { %v9930_v14 = vpop.f32.mrf.mxu1 }
 0x995   :  { %v9944_v48 = vadd.f32 %v9930_v14, %v9796_v21 }
 0x997   :  { %v9959_v12 = vadd.f32 %v13430_v25, %v9944_v48 }
 0x998   :  { %v9695_v13 = vpop.f32.mrf.mxu3 }
 0x999   :  { %v9964_v27 = vadd.f32 %v9959_v12, %v9949_v41 }
 0x99a   :  { %v9800_v24 = vpop.f32.mrf.mxu0 }
 0x99b   :  { %vm9969_vm0 = vcmp.ge.f32.partialorder %v9964_v27, 0.0  ;;  %v9974_v10 = vmul.f32 0.2, %v9964_v27  ;;  %v9801_v30 = vadd.f32 %v9800_v24, %v9695_v13 }
 0x99c   :  { %v9932_v44 = vpop.f32.mrf.mxu1 }
 0x99d   :  { %v9979_v50 = vsel %vm9969_vm0, %v9964_v27, %v9974_v10  ;;  %v9945_v17 = vadd.f32 %v9932_v44, %v9798_v0 }
 0x99e   :  { %v9984_v9 = vpack.c.bf16 %v9979_v50, %v9979_v50  ;;  %v9805_v33 = vpop.f32.mrf.mxu2 }
 0x99f   :  { %v9960_v36 = vadd.f32 %v13430_v25, %v9945_v17 }
 0x9a0   :  { %9989 = vst [vmem:[#allocation2 + $0x4] sm:$0xf] %v9984_v9  ;;  %v9697_v40 = vpop.f32.mrf.mxu3 }
 0x9a1   :  { %v9965_v54 = vadd.f32 %v9960_v36, %v9950_v59 }
 0x9a2   :  { %v9802_v5 = vpop.f32.mrf.mxu0 }
 0x9a3   :  { %v9975_v18 = vmul.f32 0.2, %v9965_v54  ;;  %vm9970_vm1 = vcmp.ge.f32.partialorder %v9965_v54, 0.0  ;;  %v9803_v60 = vadd.f32 %v9802_v5, %v9697_v40 }
 0x9a4   :  { %v9935_v42 = vpop.f32.mrf.mxu1 }
 0x9a5   :  { %v9946_v52 = vadd.f32 %v9935_v42, %v9801_v30  ;;  %v9980_v47 = vsel %vm9970_vm1, %v9965_v54, %v9975_v18 }
 0x9a6   :  { %v9807_v43 = vpop.f32.mrf.mxu2 }
 0x9a7   :  { %v9996_v39 = vld [vmem:[#allocation2 + $0x4] sm:$0xf]  ;;  %v9961_v1 = vadd.f32 %v13430_v25, %v9946_v52 }
 0x9a8   :  { %v9998_v55 = vunpack.c.l.bf16 %v9996_v39  ;;  %v9700_v53 = vpop.f32.mrf.mxu3 }
 0x9a9   :  { %v9966_v32 = vadd.f32 %v9961_v1, %v9951_v37  ;;  %v9806_v61 = vadd.f32 %v9805_v33, %v9700_v53 }
 0x9aa   :  { %10000 = vst [vmem:[%s17296_s7] sm:$0xff] %v9998_v55 }
 0x9ab   :  { %vm9971_vm8 = vcmp.ge.f32.partialorder %v9966_v32, 0.0  ;;  %v9976_v4 = vmul.f32 0.2, %v9966_v32 }
 0x9ac   :  { %v9937_v19 = vpop.f32.mrf.mxu1 }
 0x9ad   :  { %v9981_v26 = vsel %vm9971_vm8, %v9966_v32, %v9976_v4  ;;  %v9947_v23 = vadd.f32 %v9937_v19, %v9803_v60 }
 0x9ae   :  { %v13218_v6 = vpack.c.bf16 %v9981_v26, %v9980_v47 }
 0x9af   :  { %v9962_v29 = vadd.f32 %v13430_v25, %v9947_v23 }
 0x9b0   :  { %13374 = vst [vmem:[#allocation2 + $0x8] sm:$0xff] %v13218_v6   ;;  %v9702_v45 = vpop.f32.mrf.mxu3 }
 0x9b1   :  { %9994 = vst [vmem:[#allocation2 + $0xc] sm:$0xf] %v17448_v15  ;;  %v9967_v62 = vadd.f32 %v9962_v29, %v9952_v51 }
 0x9b3   :  { %v9977_v7 = vmul.f32 0.2, %v9967_v62  ;;  %vm9972_vm9 = vcmp.ge.f32.partialorder %v9967_v62, 0.0 }
 0x9b5   :  { %v9982_v49 = vsel %vm9972_vm9, %v9967_v62, %v9977_v7 }
 0x9b7   :  { %v9997_v38 = vld [vmem:[#allocation2 + $0x8] sm:$0xf] }
 0x9b8   :  { %v9999_v31 = vunpack.c.l.bf16 %v9997_v38  ;;  %v9940_v28 = vpop.f32.mrf.mxu3 }
 0x9b9   :  { %v9948_v2 = vadd.f32 %v9940_v28, %v9806_v61 }
 0x9ba   :  { %10001 = vst [vmem:[%s17296_s7 + $0x8] sm:$0xff] %v9999_v31 }
 0x9bb   :  { %v9963_v46 = vadd.f32 %v13430_v25, %v9948_v2 }
 0x9bd   :  { %v9968_v35 = vadd.f32 %v9963_v46, %v9953_v16 }
 0x9bf   :  { %vm9973_vm10 = vcmp.ge.f32.partialorder %v9968_v35, 0.0  ;;  %v9978_v15 = vmul.f32 0.2, %v9968_v35 }
 0x9c0   :  { %v9942_v22 = vpop.f32.mrf.mxu3 }
 0x9c1   :  { %v9983_v20 = vsel %vm9973_vm10, %v9968_v35, %v9978_v15 }
 0x9c2   :  { %v13223_v57 = vpack.c.bf16 %v9983_v20, %v9982_v49 }
 0x9c4   :  { %13375 = vst [vmem:[#allocation2 + $0x10] sm:$0xff] %v13223_v57   ;;  %v13227_v56 = vunpack.c.l.bf16 %v13223_v57  ;;  %v13228_v58 = vunpack.c.h.bf16 %v13223_v57 }
 0x9c6   :  { %12439 = vst [vmem:[%s17296_s7 + $0x10] sm:$0xff] %v13227_v56 }
 0x9c7   :  { %12440 = vst [vmem:[%s17296_s7 + $0x18] sm:$0xff] %v13228_v58 }

</bundles_post_ra>
